<compile_context>
chip_gen: v7x
topology: tpu7x:2x2x1
jax: 0.10.0
libtpu: 0.0.40
codegen_flags: <defaults>
</compile_context>

<pallas_src>
import math
import functools

import numpy as np
import jax
import jax.numpy as jnp
from jax import lax
from jax.experimental import pallas as pl
from jax.experimental.pallas import tpu as pltpu

NEG_SLOPE = 0.01  # nn.LeakyReLU default

# conv geometry for the 'canonical'+'61obv'+'16ap' branch with 43x43 input
_H1, _H2, _H3 = 14, 6, 4          # spatial size after conv1 / conv2 / conv3
_C1, _C2, _C3 = 16, 32, 32        # channel counts after conv1 / conv2 / conv3
_K2, _K3 = 4, 3                   # conv2 / conv3 kernel sizes
_T2, _T3 = _K2 * _K2, _K3 * _K3   # taps per conv
_POS = _H3 * _H3                  # 16 spatial positions feeding the flatten


# ----------------------------------------------------------------------------
# Wrapper-side glue (runs once per call / offline)
# ----------------------------------------------------------------------------
def _conv1_patches(x, k, stride, pad):
    """im2col for conv1 only.  Rows = (b,oh,ow), feature order (C, KH, KW) matching
    torch weight.reshape(Cout, -1).  This is the only wrapper-side data expansion
    left (see TODO at top of file)."""
    B, C, H, W = x.shape
    OH = (H + 2 * pad - k) // stride + 1
    OW = (W + 2 * pad - k) // stride + 1
    xp = jnp.pad(x, ((0, 0), (0, 0), (pad, pad), (pad, pad)))
    cols = []
    for kh in range(k):
        for kw in range(k):
            cols.append(xp[:, :, kh:kh + stride * OH:stride, kw:kw + stride * OW:stride])
    cols = jnp.stack(cols, axis=0).reshape(k, k, B, C, OH, OW)
    cols = cols.transpose(2, 4, 5, 3, 0, 1)          # (B, OH, OW, C, KH, KW)
    return cols.reshape(B * OH * OW, C * k * k)


def _gather_bases(B):
    """Tiny per-output-row base source indices for conv2/conv3 in-kernel im2col.
    conv2 (b-major rows):  src = b*196 + 2*oh*14 + 2*ow     (tap offset 14*kh+kw)
    conv3 (s-major rows):  src = b*36  + oh*6 + ow          (tap offset 6*kh+kw)"""
    r2 = np.arange(B * _H2 * _H2)
    b2, rem2 = r2 // (_H2 * _H2), r2 % (_H2 * _H2)
    src2 = b2 * (_H1 * _H1) + (rem2 // _H2) * (2 * _H1) + (rem2 % _H2) * 2

    r3 = np.arange(B * _POS)
    s3, b3 = r3 // B, r3 % B
    src3 = b3 * (_H2 * _H2) + (s3 // _H3) * _H2 + (s3 % _H3)
    return (jnp.asarray(src2.reshape(-1, 1), jnp.int32),
            jnp.asarray(src3.reshape(-1, 1), jnp.int32))


def prepare_params(p, action_space, atoms):
    """Fold BN / biases / layout permutations / dueling mean-centering into
    kernel-ready arrays.  Batch-independent; done once, offline."""
    A = action_space
    hidden = p["fc_w"].shape[0]
    n_out = A * atoms
    out = {}

    # conv1 (no BN): plain GEMM weight + bias.
    cout1 = p["conv1_w"].shape[0]
    out["w1"] = p["conv1_w"].reshape(cout1, -1).T.astype(jnp.float32)   # (Cin*64, 16)
    out["b1"] = p["conv1_b"].reshape(1, cout1).astype(jnp.float32)

    # conv2 / conv3: single fused weight per conv, rows ordered (tap, ci) to match
    # the in-kernel patch assembly; BN scale folded into columns, conv bias folded
    # into the BN shift.
    def conv_fold(w, b, bn):
        gamma, beta, mean, var, eps = bn
        scale = gamma / jnp.sqrt(var + eps)
        co, ci, kh, kw = w.shape
        wt = jnp.transpose(w, (2, 3, 1, 0)).reshape(kh * kw * ci, co)   # ((kh,kw,ci), co)
        wt = (wt * scale[None, :]).astype(jnp.float32)
        shift = ((b - mean) * scale + beta).reshape(1, co).astype(jnp.float32)
        return wt, shift

    out["w2f"], out["s2"] = conv_fold(p["conv2_w"], p["conv2_b"], p["bn2"])   # (256, 32)
    out["w3f"], out["s3"] = conv_fold(p["conv3_w"], p["conv3_b"], p["bn3"])   # (288, 32)

    # fc: the in-kernel flatten produces feature order (s, c); torch .view(B,-1)
    # order is (c, s), so permute the fc weight rows once here.
    wfc = p["fc_w"].T.reshape(_C3, _POS, hidden).transpose(1, 0, 2).reshape(_C3 * _POS, hidden)
    out["wfc"] = wfc.astype(jnp.float32)
    out["bfc"] = p["fc_b"].reshape(1, hidden).astype(jnp.float32)

    # NoisyLinear hidden layers (eval path: mu weights), stored as (in, out).
    out["whv"] = p["hv_w"].T.astype(jnp.float32)
    out["bhv"] = p["hv_b"].reshape(1, hidden).astype(jnp.float32)
    out["wha"] = p["ha_w"].T.astype(jnp.float32)
    out["bha"] = p["ha_b"].reshape(1, hidden).astype(jnp.float32)

    # Value stream (shared over actions) and advantage stream with the
    # "minus per-atom action mean" folded into the weights/bias offline.
    out["wzv"] = p["zv_w"].T.astype(jnp.float32)                        # (hidden, atoms)
    out["bzv"] = p["zv_b"].reshape(1, atoms).astype(jnp.float32)
    center = np.eye(n_out, dtype=np.float32) - np.kron(
        np.ones((A, A), np.float32) / A, np.eye(atoms, dtype=np.float32))
    center = jnp.asarray(center)
    out["wzac"] = (p["za_w"].T @ center).astype(jnp.float32)            # (hidden, n_out)
    out["bzac"] = (p["za_b"] @ center).reshape(1, n_out).astype(jnp.float32)
    return out


# ----------------------------------------------------------------------------
# The single fused Pallas kernel (everything VMEM-resident, no grid)
# ----------------------------------------------------------------------------
def _dqn_fused_kernel(p1, w1, b1, src2, w2f, s2, src3, w3f, s3,
                      wfc, bfc, whv, bhv, wha, bha, wzv, bzv, wzac, bzac,
                      q_ref, pat2, pat3, flat, *, B, A, atoms):
    f32 = jnp.float32
    lrelu = lambda v: jnp.where(v > 0, v, NEG_SLOPE * v)
    dot = lambda a, b: jnp.dot(a, b, preferred_element_type=f32)

    n1 = B * _H1 * _H1            # conv1 output positions (rows of a1)
    n2 = B * _H2 * _H2            # conv2 output positions
    n3 = B * _POS                 # conv3 output positions

    # --- conv1: one im2col GEMM + bias + LeakyReLU  (B*196, Cin*64)@(Cin*64, 16) ---
    a1 = lrelu(dot(p1[...], w1[...]) + b1[...])

    # --- conv2: im2col built in-kernel from iota masks (no gather-matrix DMA).
    #     Each tap's gathered rows land in adjacent 16-lane blocks of a VMEM
    #     scratch, then ONE fused (BN-folded) weight GEMM. ---
    col1 = lax.broadcasted_iota(jnp.int32, (n2, n1), 1)
    d2 = col1 - src2[...]                               # (n2, n1): src-row delta
    for kh in range(_K2):
        for kw in range(_K2):
            t = kh * _K2 + kw
            m = jnp.where(d2 == _H1 * kh + kw, 1.0, 0.0).astype(f32)
            pat2[:, t * _C1:(t + 1) * _C1] = dot(m, a1)
    a2 = lrelu(dot(pat2[...], w2f[...]) + s2[...])       # (B*36, 32)

    # --- conv3: same scheme; output rows ordered (spatial-major, batch-minor) so
    #     the flatten below is plain static slicing. ---
    col2 = lax.broadcasted_iota(jnp.int32, (n3, n2), 1)
    d3 = col2 - src3[...]
    for kh in range(_K3):
        for kw in range(_K3):
            t = kh * _K3 + kw
            m = jnp.where(d3 == _H2 * kh + kw, 1.0, 0.0).astype(f32)
            pat3[:, t * _C2:(t + 1) * _C2] = dot(m, a2)
    a3 = lrelu(dot(pat3[...], w3f[...]) + s3[...])       # (B*16, 32), row = s*B + b
    # Dropout2d(0.2): identity in eval mode.

    # --- flatten (torch .view(B,-1); order handled by the offline fc-weight
    #     permutation): 16 static slice copies + one fc GEMM. ---
    for s in range(_POS):
        flat[:, s * _C3:(s + 1) * _C3] = a3[s * B:(s + 1) * B, :]
    h = lrelu(dot(flat[...], wfc[...]) + bfc[...])       # fc Dropout(0.2): identity (eval)

    # --- dueling noisy head (eval path: mu weights); F.dropout treated as identity ---
    hv = jnp.maximum(dot(h, whv[...]) + bhv[...], 0.0)
    ha = jnp.maximum(dot(h, wha[...]) + bha[...], 0.0)
    v = dot(hv, wzv[...]) + bzv[...]                      # (B, atoms), shared over actions
    ac = dot(ha, wzac[...]) + bzac[...]                   # (B, A*atoms), mean-centered

    # --- per-action softmax over atoms with a PER-ACTION max shift (robust) ---
    for a in range(A):
        la = v + ac[:, a * atoms:(a + 1) * atoms]
        la = la - jnp.max(la, axis=-1, keepdims=True)
        e = jnp.exp(la)
        inv = pl.reciprocal(jnp.sum(e, axis=-1, keepdims=True), approx=False)
        q_ref[:, a * atoms:(a + 1) * atoms] = e * inv


def _full_spec(shape):
    n = len(shape)
    return pl.BlockSpec(tuple(shape), lambda *_args, _n=n: (0,) * _n)  # whole array, VMEM


def dqn_forward(x, prep, action_space, atoms):
    """Mirrors DQN.forward(x, log=False) with eval-mode semantics."""
    B = x.shape[0]
    x = x.astype(jnp.float32)
    patches = _conv1_patches(x, k=8, stride=3, pad=2)     # (B*196, Cin*64)
    src2, src3 = _gather_bases(B)                         # ~0.4 KB of int32 tables
    n_out = action_space * atoms

    operands = (
        patches, prep["w1"], prep["b1"],
        src2, prep["w2f"], prep["s2"],
        src3, prep["w3f"], prep["s3"],
        prep["wfc"], prep["bfc"],
        prep["whv"], prep["bhv"], prep["wha"], prep["bha"],
        prep["wzv"], prep["bzv"], prep["wzac"], prep["bzac"],
    )
    kernel = functools.partial(_dqn_fused_kernel, B=B, A=action_space, atoms=atoms)
    q2d = pl.pallas_call(
        kernel,
        out_shape=jax.ShapeDtypeStruct((B, n_out), jnp.float32),
        in_specs=[_full_spec(op.shape) for op in operands],
        out_specs=_full_spec((B, n_out)),
        scratch_shapes=[
            pltpu.VMEM((B * _H2 * _H2, _T2 * _C1), jnp.float32),   # conv2 patches (72, 256)
            pltpu.VMEM((B * _POS, _T3 * _C2), jnp.float32),        # conv3 patches (32, 288)
            pltpu.VMEM((B, _POS * _C3), jnp.float32),              # flatten buffer (B, 512)
        ],
    )(*operands)
    return q2d.reshape(B, action_space, atoms)


# ----------------------------------------------------------------------------
# Pure-JAX reference (eval semantics) for numerical validation
# ----------------------------------------------------------------------------
def _reference_forward(x, p, action_space, atoms):
    with jax.default_matmul_precision("highest"):
        f32 = jnp.float32
        lrelu = lambda v: jnp.where(v > 0, v, NEG_SLOPE * v)

        def conv(h, w, b, stride, pad):
            y = jax.lax.conv_general_dilated(
                h, w, window_strides=(stride, stride),
                padding=[(pad, pad), (pad, pad)],
                dimension_numbers=("NCHW", "OIHW", "NCHW"),
                precision=jax.lax.Precision.HIGHEST)
            return y + b.reshape(1, -1, 1, 1)

        def bn(h, params):
            gamma, beta, mean, var, eps = params
            s = gamma / jnp.sqrt(var + eps)
            return h * s.reshape(1, -1, 1, 1) + (beta - mean * s).reshape(1, -1, 1, 1)

        x = x.astype(f32)
        h = lrelu(conv(x, p["conv1_w"], p["conv1_b"], 3, 2))
        h = lrelu(bn(conv(h, p["conv2_w"], p["conv2_b"], 2, 0), p["bn2"]))
        h = lrelu(bn(conv(h, p["conv3_w"], p["conv3_b"], 1, 0), p["bn3"]))
        feat = h.reshape(h.shape[0], -1)
        hfc = lrelu(feat @ p["fc_w"].T + p["fc_b"])
        hv = jnp.maximum(hfc @ p["hv_w"].T + p["hv_b"], 0.0)
        ha = jnp.maximum(hfc @ p["ha_w"].T + p["ha_b"], 0.0)
        v = (hv @ p["zv_w"].T + p["zv_b"]).reshape(-1, 1, atoms)
        a = (ha @ p["za_w"].T + p["za_b"]).reshape(-1, action_space, atoms)
        q = v + a - a.mean(axis=1, keepdims=True)
        return jax.nn.softmax(q, axis=-1)


# ----------------------------------------------------------------------------
# Deterministic parameter init (shapes per DQN.__init__, torch layouts; synthetic values)
# ----------------------------------------------------------------------------
def init_params(key, cin, hidden, action_space, atoms, conv_out=512):
    ks = jax.random.split(key, 16)

    def u(k, shape, fan_in):
        bound = 1.0 / math.sqrt(fan_in)
        return jax.random.uniform(k, shape, jnp.float32, -bound, bound)

    bn_default = lambda c: (jnp.ones((c,), jnp.float32), jnp.zeros((c,), jnp.float32),
                            jnp.zeros((c,), jnp.float32), jnp.ones((c,), jnp.float32), 1e-5)

    p = {}
    p["conv1_w"] = u(ks[0], (16, cin, 8, 8), cin * 64)
    p["conv1_b"] = u(ks[1], (16,), cin * 64)
    p["conv2_w"] = u(ks[2], (32, 16, 4, 4), 16 * 16)
    p["conv2_b"] = u(ks[3], (32,), 16 * 16)
    p["conv3_w"] = u(ks[4], (32, 32, 3, 3), 32 * 9)
    p["conv3_b"] = u(ks[5], (32,), 32 * 9)
    p["bn2"] = bn_default(32)
    p["bn3"] = bn_default(32)
    p["fc_w"] = u(ks[6], (hidden, conv_out), conv_out)
    p["fc_b"] = u(ks[7], (hidden,), conv_out)
    p["hv_w"] = u(ks[8], (hidden, hidden), hidden)
    p["hv_b"] = u(ks[9], (hidden,), hidden)
    p["ha_w"] = u(ks[10], (hidden, hidden), hidden)
    p["ha_b"] = u(ks[11], (hidden,), hidden)
    p["zv_w"] = u(ks[12], (atoms, hidden), hidden)
    p["zv_b"] = u(ks[13], (atoms,), hidden)
    p["za_w"] = u(ks[14], (action_space * atoms, hidden), hidden)
    p["za_b"] = u(ks[15], (action_space * atoms,), hidden)
    return p


if __name__ == "__main__":
    # args: history_length=4, OBSERVATION_DIMS=2 -> Cin=8; hidden_size=64;
    #       atoms=16; action_space=4; input spatial 43x43 -> conv_output_size=512.
    B, CIN, HW = 2, 8, 43
    HIDDEN, ATOMS, ACTIONS = 64, 16, 4

    key = jax.random.PRNGKey(0)
    k_x, k_p = jax.random.split(key)
    x = jax.random.normal(k_x, (B, CIN, HW, HW), jnp.float32)
    raw = init_params(k_p, CIN, HIDDEN, ACTIONS, ATOMS)
    prep = prepare_params(raw, ACTIONS, ATOMS)

    fwd = jax.jit(functools.partial(dqn_forward, action_space=ACTIONS, atoms=ATOMS))
    q = jax.block_until_ready(fwd(x, prep))

    assert q.shape == (B, ACTIONS, ATOMS), q.shape
    # probabilities over atoms must sum to 1 per (batch, action)
    sums = jnp.sum(q, axis=-1)
    assert jnp.allclose(sums, jnp.ones_like(sums), atol=1e-5), sums

    # numerical check against a pure-JAX eval-mode reference
    q_ref = _reference_forward(x, raw, ACTIONS, ATOMS)
    assert jnp.allclose(q, q_ref, atol=1e-3, rtol=1e-3), float(jnp.max(jnp.abs(q - q_ref)))

    print("KERNEL_OK")
</pallas_src>

<mosaic_0001>
module attributes {stable_mosaic.version = 11 : i64} {
  func.func @_dqn_fused_kernel(%arg0: memref<392x512xf32, #tpu.memory_space<vmem>>, %arg1: memref<512x16xf32, #tpu.memory_space<vmem>>, %arg2: memref<1x16xf32, #tpu.memory_space<vmem>>, %arg3: memref<72x1xi32, #tpu.memory_space<vmem>>, %arg4: memref<256x32xf32, #tpu.memory_space<vmem>>, %arg5: memref<1x32xf32, #tpu.memory_space<vmem>>, %arg6: memref<32x1xi32, #tpu.memory_space<vmem>>, %arg7: memref<288x32xf32, #tpu.memory_space<vmem>>, %arg8: memref<1x32xf32, #tpu.memory_space<vmem>>, %arg9: memref<512x64xf32, #tpu.memory_space<vmem>>, %arg10: memref<1x64xf32, #tpu.memory_space<vmem>>, %arg11: memref<64x64xf32, #tpu.memory_space<vmem>>, %arg12: memref<1x64xf32, #tpu.memory_space<vmem>>, %arg13: memref<64x64xf32, #tpu.memory_space<vmem>>, %arg14: memref<1x64xf32, #tpu.memory_space<vmem>>, %arg15: memref<64x16xf32, #tpu.memory_space<vmem>>, %arg16: memref<1x16xf32, #tpu.memory_space<vmem>>, %arg17: memref<64x64xf32, #tpu.memory_space<vmem>>, %arg18: memref<1x64xf32, #tpu.memory_space<vmem>>, %arg19: memref<2x64xf32, #tpu.memory_space<vmem>>, %arg20: memref<72x256xf32, #tpu.memory_space<vmem>>, %arg21: memref<32x288xf32, #tpu.memory_space<vmem>>, %arg22: memref<2x512xf32, #tpu.memory_space<vmem>>) attributes {dimension_semantics = [], scalar_prefetch = 0 : i64, scratch_operands = 3 : i64, tpu.core_type = #tpu.core_type<tc>} {
    %c0 = arith.constant 0 : index
    %c0_0 = arith.constant 0 : index
    %0 = vector.load %arg0[%c0, %c0_0] : memref<392x512xf32, #tpu.memory_space<vmem>>, vector<392x512xf32>
    %c0_1 = arith.constant 0 : index
    %c0_2 = arith.constant 0 : index
    %1 = vector.load %arg1[%c0_1, %c0_2] : memref<512x16xf32, #tpu.memory_space<vmem>>, vector<512x16xf32>
    %cst = arith.constant dense<0.000000e+00> : vector<392x16xf32>
    %2 = tpu.matmul %0, %1, %cst {dimension_numbers = #tpu.dot_dimension_numbers<[1], [0], [0], [1], [0, 0, 1, 1], [], []>} : vector<392x512xf32>, vector<512x16xf32>, vector<392x16xf32> -> vector<392x16xf32>
    %c0_3 = arith.constant 0 : index
    %c0_4 = arith.constant 0 : index
    %3 = vector.load %arg2[%c0_3, %c0_4] : memref<1x16xf32, #tpu.memory_space<vmem>>, vector<1x16xf32>
    %4 = vector.broadcast %3 : vector<1x16xf32> to vector<392x16xf32>
    %5 = arith.addf %2, %4 : vector<392x16xf32>
    %cst_5 = arith.constant 0.000000e+00 : f32
    %6 = vector.broadcast %cst_5 : f32 to vector<392x16xf32>
    %7 = arith.cmpf ogt, %5, %6 : vector<392x16xf32>
    %cst_6 = arith.constant 0.00999999977 : f32
    %8 = vector.broadcast %cst_6 : f32 to vector<392x16xf32>
    %9 = arith.mulf %8, %5 : vector<392x16xf32>
    %10 = arith.select %7, %5, %9 : vector<392x16xi1>, vector<392x16xf32>
    %11 = tpu.iota {dimensions = array<i32: 1>} : vector<72x392xi32>
    %c0_7 = arith.constant 0 : index
    %c0_8 = arith.constant 0 : index
    %12 = vector.load %arg3[%c0_7, %c0_8] : memref<72x1xi32, #tpu.memory_space<vmem>>, vector<72x1xi32>
    %13 = vector.broadcast %12 : vector<72x1xi32> to vector<72x392xi32>
    %14 = arith.subi %11, %13 : vector<72x392xi32>
    %c0_i32 = arith.constant 0 : i32
    %15 = vector.broadcast %c0_i32 : i32 to vector<72x392xi32>
    %16 = arith.cmpi eq, %14, %15 : vector<72x392xi32>
    %cst_9 = arith.constant 1.000000e+00 : f32
    %cst_10 = arith.constant 0.000000e+00 : f32
    %17 = vector.broadcast %cst_9 : f32 to vector<72x392xf32>
    %18 = vector.broadcast %cst_10 : f32 to vector<72x392xf32>
    %19 = arith.select %16, %17, %18 : vector<72x392xi1>, vector<72x392xf32>
    %cst_11 = arith.constant dense<0.000000e+00> : vector<72x16xf32>
    %20 = tpu.matmul %19, %10, %cst_11 {dimension_numbers = #tpu.dot_dimension_numbers<[1], [0], [0], [1], [0, 0, 1, 1], [], []>} : vector<72x392xf32>, vector<392x16xf32>, vector<72x16xf32> -> vector<72x16xf32>
    %c0_12 = arith.constant 0 : index
    %c0_13 = arith.constant 0 : index
    %21 = vector.load %arg20[%c0_12, %c0_13] : memref<72x256xf32, #tpu.memory_space<vmem>>, vector<72x16xf32>
    tpu.vector_store %arg20[%c0_12, %c0_13], %20 {strides = array<i32>} : memref<72x256xf32, #tpu.memory_space<vmem>>, vector<72x16xf32>,
    %c1_i32 = arith.constant 1 : i32
    %22 = vector.broadcast %c1_i32 : i32 to vector<72x392xi32>
    %23 = arith.cmpi eq, %14, %22 : vector<72x392xi32>
    %cst_14 = arith.constant 1.000000e+00 : f32
    %cst_15 = arith.constant 0.000000e+00 : f32
    %24 = vector.broadcast %cst_14 : f32 to vector<72x392xf32>
    %25 = vector.broadcast %cst_15 : f32 to vector<72x392xf32>
    %26 = arith.select %23, %24, %25 : vector<72x392xi1>, vector<72x392xf32>
    %cst_16 = arith.constant dense<0.000000e+00> : vector<72x16xf32>
    %27 = tpu.matmul %26, %10, %cst_16 {dimension_numbers = #tpu.dot_dimension_numbers<[1], [0], [0], [1], [0, 0, 1, 1], [], []>} : vector<72x392xf32>, vector<392x16xf32>, vector<72x16xf32> -> vector<72x16xf32>
    %c0_17 = arith.constant 0 : index
    %c16 = arith.constant 16 : index
    %28 = vector.load %arg20[%c0_17, %c16] : memref<72x256xf32, #tpu.memory_space<vmem>>, vector<72x16xf32>
    tpu.vector_store %arg20[%c0_17, %c16], %27 {strides = array<i32>} : memref<72x256xf32, #tpu.memory_space<vmem>>, vector<72x16xf32>,
    %c2_i32 = arith.constant 2 : i32
    %29 = vector.broadcast %c2_i32 : i32 to vector<72x392xi32>
    %30 = arith.cmpi eq, %14, %29 : vector<72x392xi32>
    %cst_18 = arith.constant 1.000000e+00 : f32
    %cst_19 = arith.constant 0.000000e+00 : f32
    %31 = vector.broadcast %cst_18 : f32 to vector<72x392xf32>
    %32 = vector.broadcast %cst_19 : f32 to vector<72x392xf32>
    %33 = arith.select %30, %31, %32 : vector<72x392xi1>, vector<72x392xf32>
    %cst_20 = arith.constant dense<0.000000e+00> : vector<72x16xf32>
    %34 = tpu.matmul %33, %10, %cst_20 {dimension_numbers = #tpu.dot_dimension_numbers<[1], [0], [0], [1], [0, 0, 1, 1], [], []>} : vector<72x392xf32>, vector<392x16xf32>, vector<72x16xf32> -> vector<72x16xf32>
    %c0_21 = arith.constant 0 : index
    %c32 = arith.constant 32 : index
    %35 = vector.load %arg20[%c0_21, %c32] : memref<72x256xf32, #tpu.memory_space<vmem>>, vector<72x16xf32>
    tpu.vector_store %arg20[%c0_21, %c32], %34 {strides = array<i32>} : memref<72x256xf32, #tpu.memory_space<vmem>>, vector<72x16xf32>,
    %c3_i32 = arith.constant 3 : i32
    %36 = vector.broadcast %c3_i32 : i32 to vector<72x392xi32>
    %37 = arith.cmpi eq, %14, %36 : vector<72x392xi32>
    %cst_22 = arith.constant 1.000000e+00 : f32
    %cst_23 = arith.constant 0.000000e+00 : f32
    %38 = vector.broadcast %cst_22 : f32 to vector<72x392xf32>
    %39 = vector.broadcast %cst_23 : f32 to vector<72x392xf32>
    %40 = arith.select %37, %38, %39 : vector<72x392xi1>, vector<72x392xf32>
    %cst_24 = arith.constant dense<0.000000e+00> : vector<72x16xf32>
    %41 = tpu.matmul %40, %10, %cst_24 {dimension_numbers = #tpu.dot_dimension_numbers<[1], [0], [0], [1], [0, 0, 1, 1], [], []>} : vector<72x392xf32>, vector<392x16xf32>, vector<72x16xf32> -> vector<72x16xf32>
    %c0_25 = arith.constant 0 : index
    %c48 = arith.constant 48 : index
    %42 = vector.load %arg20[%c0_25, %c48] : memref<72x256xf32, #tpu.memory_space<vmem>>, vector<72x16xf32>
    tpu.vector_store %arg20[%c0_25, %c48], %41 {strides = array<i32>} : memref<72x256xf32, #tpu.memory_space<vmem>>, vector<72x16xf32>,
    %c14_i32 = arith.constant 14 : i32
    %43 = vector.broadcast %c14_i32 : i32 to vector<72x392xi32>
    %44 = arith.cmpi eq, %14, %43 : vector<72x392xi32>
    %cst_26 = arith.constant 1.000000e+00 : f32
    %cst_27 = arith.constant 0.000000e+00 : f32
    %45 = vector.broadcast %cst_26 : f32 to vector<72x392xf32>
    %46 = vector.broadcast %cst_27 : f32 to vector<72x392xf32>
    %47 = arith.select %44, %45, %46 : vector<72x392xi1>, vector<72x392xf32>
    %cst_28 = arith.constant dense<0.000000e+00> : vector<72x16xf32>
    %48 = tpu.matmul %47, %10, %cst_28 {dimension_numbers = #tpu.dot_dimension_numbers<[1], [0], [0], [1], [0, 0, 1, 1], [], []>} : vector<72x392xf32>, vector<392x16xf32>, vector<72x16xf32> -> vector<72x16xf32>
    %c0_29 = arith.constant 0 : index
    %c64 = arith.constant 64 : index
    %49 = vector.load %arg20[%c0_29, %c64] : memref<72x256xf32, #tpu.memory_space<vmem>>, vector<72x16xf32>
    tpu.vector_store %arg20[%c0_29, %c64], %48 {strides = array<i32>} : memref<72x256xf32, #tpu.memory_space<vmem>>, vector<72x16xf32>,
    %c15_i32 = arith.constant 15 : i32
    %50 = vector.broadcast %c15_i32 : i32 to vector<72x392xi32>
    %51 = arith.cmpi eq, %14, %50 : vector<72x392xi32>
    %cst_30 = arith.constant 1.000000e+00 : f32
    %cst_31 = arith.constant 0.000000e+00 : f32
    %52 = vector.broadcast %cst_30 : f32 to vector<72x392xf32>
    %53 = vector.broadcast %cst_31 : f32 to vector<72x392xf32>
    %54 = arith.select %51, %52, %53 : vector<72x392xi1>, vector<72x392xf32>
    %cst_32 = arith.constant dense<0.000000e+00> : vector<72x16xf32>
    %55 = tpu.matmul %54, %10, %cst_32 {dimension_numbers = #tpu.dot_dimension_numbers<[1], [0], [0], [1], [0, 0, 1, 1], [], []>} : vector<72x392xf32>, vector<392x16xf32>, vector<72x16xf32> -> vector<72x16xf32>
    %c0_33 = arith.constant 0 : index
    %c80 = arith.constant 80 : index
    %56 = vector.load %arg20[%c0_33, %c80] : memref<72x256xf32, #tpu.memory_space<vmem>>, vector<72x16xf32>
    tpu.vector_store %arg20[%c0_33, %c80], %55 {strides = array<i32>} : memref<72x256xf32, #tpu.memory_space<vmem>>, vector<72x16xf32>,
    %c16_i32 = arith.constant 16 : i32
    %57 = vector.broadcast %c16_i32 : i32 to vector<72x392xi32>
    %58 = arith.cmpi eq, %14, %57 : vector<72x392xi32>
    %cst_34 = arith.constant 1.000000e+00 : f32
    %cst_35 = arith.constant 0.000000e+00 : f32
    %59 = vector.broadcast %cst_34 : f32 to vector<72x392xf32>
    %60 = vector.broadcast %cst_35 : f32 to vector<72x392xf32>
    %61 = arith.select %58, %59, %60 : vector<72x392xi1>, vector<72x392xf32>
    %cst_36 = arith.constant dense<0.000000e+00> : vector<72x16xf32>
    %62 = tpu.matmul %61, %10, %cst_36 {dimension_numbers = #tpu.dot_dimension_numbers<[1], [0], [0], [1], [0, 0, 1, 1], [], []>} : vector<72x392xf32>, vector<392x16xf32>, vector<72x16xf32> -> vector<72x16xf32>
    %c0_37 = arith.constant 0 : index
    %c96 = arith.constant 96 : index
    %63 = vector.load %arg20[%c0_37, %c96] : memref<72x256xf32, #tpu.memory_space<vmem>>, vector<72x16xf32>
    tpu.vector_store %arg20[%c0_37, %c96], %62 {strides = array<i32>} : memref<72x256xf32, #tpu.memory_space<vmem>>, vector<72x16xf32>,
    %c17_i32 = arith.constant 17 : i32
    %64 = vector.broadcast %c17_i32 : i32 to vector<72x392xi32>
    %65 = arith.cmpi eq, %14, %64 : vector<72x392xi32>
    %cst_38 = arith.constant 1.000000e+00 : f32
    %cst_39 = arith.constant 0.000000e+00 : f32
    %66 = vector.broadcast %cst_38 : f32 to vector<72x392xf32>
    %67 = vector.broadcast %cst_39 : f32 to vector<72x392xf32>
    %68 = arith.select %65, %66, %67 : vector<72x392xi1>, vector<72x392xf32>
    %cst_40 = arith.constant dense<0.000000e+00> : vector<72x16xf32>
    %69 = tpu.matmul %68, %10, %cst_40 {dimension_numbers = #tpu.dot_dimension_numbers<[1], [0], [0], [1], [0, 0, 1, 1], [], []>} : vector<72x392xf32>, vector<392x16xf32>, vector<72x16xf32> -> vector<72x16xf32>
    %c0_41 = arith.constant 0 : index
    %c112 = arith.constant 112 : index
    %70 = vector.load %arg20[%c0_41, %c112] : memref<72x256xf32, #tpu.memory_space<vmem>>, vector<72x16xf32>
    tpu.vector_store %arg20[%c0_41, %c112], %69 {strides = array<i32>} : memref<72x256xf32, #tpu.memory_space<vmem>>, vector<72x16xf32>,
    %c28_i32 = arith.constant 28 : i32
    %71 = vector.broadcast %c28_i32 : i32 to vector<72x392xi32>
    %72 = arith.cmpi eq, %14, %71 : vector<72x392xi32>
    %cst_42 = arith.constant 1.000000e+00 : f32
    %cst_43 = arith.constant 0.000000e+00 : f32
    %73 = vector.broadcast %cst_42 : f32 to vector<72x392xf32>
    %74 = vector.broadcast %cst_43 : f32 to vector<72x392xf32>
    %75 = arith.select %72, %73, %74 : vector<72x392xi1>, vector<72x392xf32>
    %cst_44 = arith.constant dense<0.000000e+00> : vector<72x16xf32>
    %76 = tpu.matmul %75, %10, %cst_44 {dimension_numbers = #tpu.dot_dimension_numbers<[1], [0], [0], [1], [0, 0, 1, 1], [], []>} : vector<72x392xf32>, vector<392x16xf32>, vector<72x16xf32> -> vector<72x16xf32>
    %c0_45 = arith.constant 0 : index
    %c128 = arith.constant 128 : index
    %77 = vector.load %arg20[%c0_45, %c128] : memref<72x256xf32, #tpu.memory_space<vmem>>, vector<72x16xf32>
    tpu.vector_store %arg20[%c0_45, %c128], %76 {strides = array<i32>} : memref<72x256xf32, #tpu.memory_space<vmem>>, vector<72x16xf32>,
    %c29_i32 = arith.constant 29 : i32
    %78 = vector.broadcast %c29_i32 : i32 to vector<72x392xi32>
    %79 = arith.cmpi eq, %14, %78 : vector<72x392xi32>
    %cst_46 = arith.constant 1.000000e+00 : f32
    %cst_47 = arith.constant 0.000000e+00 : f32
    %80 = vector.broadcast %cst_46 : f32 to vector<72x392xf32>
    %81 = vector.broadcast %cst_47 : f32 to vector<72x392xf32>
    %82 = arith.select %79, %80, %81 : vector<72x392xi1>, vector<72x392xf32>
    %cst_48 = arith.constant dense<0.000000e+00> : vector<72x16xf32>
    %83 = tpu.matmul %82, %10, %cst_48 {dimension_numbers = #tpu.dot_dimension_numbers<[1], [0], [0], [1], [0, 0, 1, 1], [], []>} : vector<72x392xf32>, vector<392x16xf32>, vector<72x16xf32> -> vector<72x16xf32>
    %c0_49 = arith.constant 0 : index
    %c144 = arith.constant 144 : index
    %84 = vector.load %arg20[%c0_49, %c144] : memref<72x256xf32, #tpu.memory_space<vmem>>, vector<72x16xf32>
    tpu.vector_store %arg20[%c0_49, %c144], %83 {strides = array<i32>} : memref<72x256xf32, #tpu.memory_space<vmem>>, vector<72x16xf32>,
    %c30_i32 = arith.constant 30 : i32
    %85 = vector.broadcast %c30_i32 : i32 to vector<72x392xi32>
    %86 = arith.cmpi eq, %14, %85 : vector<72x392xi32>
    %cst_50 = arith.constant 1.000000e+00 : f32
    %cst_51 = arith.constant 0.000000e+00 : f32
    %87 = vector.broadcast %cst_50 : f32 to vector<72x392xf32>
    %88 = vector.broadcast %cst_51 : f32 to vector<72x392xf32>
    %89 = arith.select %86, %87, %88 : vector<72x392xi1>, vector<72x392xf32>
    %cst_52 = arith.constant dense<0.000000e+00> : vector<72x16xf32>
    %90 = tpu.matmul %89, %10, %cst_52 {dimension_numbers = #tpu.dot_dimension_numbers<[1], [0], [0], [1], [0, 0, 1, 1], [], []>} : vector<72x392xf32>, vector<392x16xf32>, vector<72x16xf32> -> vector<72x16xf32>
    %c0_53 = arith.constant 0 : index
    %c160 = arith.constant 160 : index
    %91 = vector.load %arg20[%c0_53, %c160] : memref<72x256xf32, #tpu.memory_space<vmem>>, vector<72x16xf32>
    tpu.vector_store %arg20[%c0_53, %c160], %90 {strides = array<i32>} : memref<72x256xf32, #tpu.memory_space<vmem>>, vector<72x16xf32>,
    %c31_i32 = arith.constant 31 : i32
    %92 = vector.broadcast %c31_i32 : i32 to vector<72x392xi32>
    %93 = arith.cmpi eq, %14, %92 : vector<72x392xi32>
    %cst_54 = arith.constant 1.000000e+00 : f32
    %cst_55 = arith.constant 0.000000e+00 : f32
    %94 = vector.broadcast %cst_54 : f32 to vector<72x392xf32>
    %95 = vector.broadcast %cst_55 : f32 to vector<72x392xf32>
    %96 = arith.select %93, %94, %95 : vector<72x392xi1>, vector<72x392xf32>
    %cst_56 = arith.constant dense<0.000000e+00> : vector<72x16xf32>
    %97 = tpu.matmul %96, %10, %cst_56 {dimension_numbers = #tpu.dot_dimension_numbers<[1], [0], [0], [1], [0, 0, 1, 1], [], []>} : vector<72x392xf32>, vector<392x16xf32>, vector<72x16xf32> -> vector<72x16xf32>
    %c0_57 = arith.constant 0 : index
    %c176 = arith.constant 176 : index
    %98 = vector.load %arg20[%c0_57, %c176] : memref<72x256xf32, #tpu.memory_space<vmem>>, vector<72x16xf32>
    tpu.vector_store %arg20[%c0_57, %c176], %97 {strides = array<i32>} : memref<72x256xf32, #tpu.memory_space<vmem>>, vector<72x16xf32>,
    %c42_i32 = arith.constant 42 : i32
    %99 = vector.broadcast %c42_i32 : i32 to vector<72x392xi32>
    %100 = arith.cmpi eq, %14, %99 : vector<72x392xi32>
    %cst_58 = arith.constant 1.000000e+00 : f32
    %cst_59 = arith.constant 0.000000e+00 : f32
    %101 = vector.broadcast %cst_58 : f32 to vector<72x392xf32>
    %102 = vector.broadcast %cst_59 : f32 to vector<72x392xf32>
    %103 = arith.select %100, %101, %102 : vector<72x392xi1>, vector<72x392xf32>
    %cst_60 = arith.constant dense<0.000000e+00> : vector<72x16xf32>
    %104 = tpu.matmul %103, %10, %cst_60 {dimension_numbers = #tpu.dot_dimension_numbers<[1], [0], [0], [1], [0, 0, 1, 1], [], []>} : vector<72x392xf32>, vector<392x16xf32>, vector<72x16xf32> -> vector<72x16xf32>
    %c0_61 = arith.constant 0 : index
    %c192 = arith.constant 192 : index
    %105 = vector.load %arg20[%c0_61, %c192] : memref<72x256xf32, #tpu.memory_space<vmem>>, vector<72x16xf32>
    tpu.vector_store %arg20[%c0_61, %c192], %104 {strides = array<i32>} : memref<72x256xf32, #tpu.memory_space<vmem>>, vector<72x16xf32>,
    %c43_i32 = arith.constant 43 : i32
    %106 = vector.broadcast %c43_i32 : i32 to vector<72x392xi32>
    %107 = arith.cmpi eq, %14, %106 : vector<72x392xi32>
    %cst_62 = arith.constant 1.000000e+00 : f32
    %cst_63 = arith.constant 0.000000e+00 : f32
    %108 = vector.broadcast %cst_62 : f32 to vector<72x392xf32>
    %109 = vector.broadcast %cst_63 : f32 to vector<72x392xf32>
    %110 = arith.select %107, %108, %109 : vector<72x392xi1>, vector<72x392xf32>
    %cst_64 = arith.constant dense<0.000000e+00> : vector<72x16xf32>
    %111 = tpu.matmul %110, %10, %cst_64 {dimension_numbers = #tpu.dot_dimension_numbers<[1], [0], [0], [1], [0, 0, 1, 1], [], []>} : vector<72x392xf32>, vector<392x16xf32>, vector<72x16xf32> -> vector<72x16xf32>
    %c0_65 = arith.constant 0 : index
    %c208 = arith.constant 208 : index
    %112 = vector.load %arg20[%c0_65, %c208] : memref<72x256xf32, #tpu.memory_space<vmem>>, vector<72x16xf32>
    tpu.vector_store %arg20[%c0_65, %c208], %111 {strides = array<i32>} : memref<72x256xf32, #tpu.memory_space<vmem>>, vector<72x16xf32>,
    %c44_i32 = arith.constant 44 : i32
    %113 = vector.broadcast %c44_i32 : i32 to vector<72x392xi32>
    %114 = arith.cmpi eq, %14, %113 : vector<72x392xi32>
    %cst_66 = arith.constant 1.000000e+00 : f32
    %cst_67 = arith.constant 0.000000e+00 : f32
    %115 = vector.broadcast %cst_66 : f32 to vector<72x392xf32>
    %116 = vector.broadcast %cst_67 : f32 to vector<72x392xf32>
    %117 = arith.select %114, %115, %116 : vector<72x392xi1>, vector<72x392xf32>
    %cst_68 = arith.constant dense<0.000000e+00> : vector<72x16xf32>
    %118 = tpu.matmul %117, %10, %cst_68 {dimension_numbers = #tpu.dot_dimension_numbers<[1], [0], [0], [1], [0, 0, 1, 1], [], []>} : vector<72x392xf32>, vector<392x16xf32>, vector<72x16xf32> -> vector<72x16xf32>
    %c0_69 = arith.constant 0 : index
    %c224 = arith.constant 224 : index
    %119 = vector.load %arg20[%c0_69, %c224] : memref<72x256xf32, #tpu.memory_space<vmem>>, vector<72x16xf32>
    tpu.vector_store %arg20[%c0_69, %c224], %118 {strides = array<i32>} : memref<72x256xf32, #tpu.memory_space<vmem>>, vector<72x16xf32>,
    %c45_i32 = arith.constant 45 : i32
    %120 = vector.broadcast %c45_i32 : i32 to vector<72x392xi32>
    %121 = arith.cmpi eq, %14, %120 : vector<72x392xi32>
    %cst_70 = arith.constant 1.000000e+00 : f32
    %cst_71 = arith.constant 0.000000e+00 : f32
    %122 = vector.broadcast %cst_70 : f32 to vector<72x392xf32>
    %123 = vector.broadcast %cst_71 : f32 to vector<72x392xf32>
    %124 = arith.select %121, %122, %123 : vector<72x392xi1>, vector<72x392xf32>
    %cst_72 = arith.constant dense<0.000000e+00> : vector<72x16xf32>
    %125 = tpu.matmul %124, %10, %cst_72 {dimension_numbers = #tpu.dot_dimension_numbers<[1], [0], [0], [1], [0, 0, 1, 1], [], []>} : vector<72x392xf32>, vector<392x16xf32>, vector<72x16xf32> -> vector<72x16xf32>
    %c0_73 = arith.constant 0 : index
    %c240 = arith.constant 240 : index
    %126 = vector.load %arg20[%c0_73, %c240] : memref<72x256xf32, #tpu.memory_space<vmem>>, vector<72x16xf32>
    tpu.vector_store %arg20[%c0_73, %c240], %125 {strides = array<i32>} : memref<72x256xf32, #tpu.memory_space<vmem>>, vector<72x16xf32>,
    %c0_74 = arith.constant 0 : index
    %c0_75 = arith.constant 0 : index
    %127 = vector.load %arg20[%c0_74, %c0_75] : memref<72x256xf32, #tpu.memory_space<vmem>>, vector<72x256xf32>
    %c0_76 = arith.constant 0 : index
    %c0_77 = arith.constant 0 : index
    %128 = vector.load %arg4[%c0_76, %c0_77] : memref<256x32xf32, #tpu.memory_space<vmem>>, vector<256x32xf32>
    %cst_78 = arith.constant dense<0.000000e+00> : vector<72x32xf32>
    %129 = tpu.matmul %127, %128, %cst_78 {dimension_numbers = #tpu.dot_dimension_numbers<[1], [0], [0], [1], [0, 0, 1, 1], [], []>} : vector<72x256xf32>, vector<256x32xf32>, vector<72x32xf32> -> vector<72x32xf32>
    %c0_79 = arith.constant 0 : index
    %c0_80 = arith.constant 0 : index
    %130 = vector.load %arg5[%c0_79, %c0_80] : memref<1x32xf32, #tpu.memory_space<vmem>>, vector<1x32xf32>
    %131 = vector.broadcast %130 : vector<1x32xf32> to vector<72x32xf32>
    %132 = arith.addf %129, %131 : vector<72x32xf32>
    %cst_81 = arith.constant 0.000000e+00 : f32
    %133 = vector.broadcast %cst_81 : f32 to vector<72x32xf32>
    %134 = arith.cmpf ogt, %132, %133 : vector<72x32xf32>
    %cst_82 = arith.constant 0.00999999977 : f32
    %135 = vector.broadcast %cst_82 : f32 to vector<72x32xf32>
    %136 = arith.mulf %135, %132 : vector<72x32xf32>
    %137 = arith.select %134, %132, %136 : vector<72x32xi1>, vector<72x32xf32>
    %138 = tpu.iota {dimensions = array<i32: 1>} : vector<32x72xi32>
    %c0_83 = arith.constant 0 : index
    %c0_84 = arith.constant 0 : index
    %139 = vector.load %arg6[%c0_83, %c0_84] : memref<32x1xi32, #tpu.memory_space<vmem>>, vector<32x1xi32>
    %140 = vector.broadcast %139 : vector<32x1xi32> to vector<32x72xi32>
    %141 = arith.subi %138, %140 : vector<32x72xi32>
    %c0_i32_85 = arith.constant 0 : i32
    %142 = vector.broadcast %c0_i32_85 : i32 to vector<32x72xi32>
    %143 = arith.cmpi eq, %141, %142 : vector<32x72xi32>
    %cst_86 = arith.constant 1.000000e+00 : f32
    %cst_87 = arith.constant 0.000000e+00 : f32
    %144 = vector.broadcast %cst_86 : f32 to vector<32x72xf32>
    %145 = vector.broadcast %cst_87 : f32 to vector<32x72xf32>
    %146 = arith.select %143, %144, %145 : vector<32x72xi1>, vector<32x72xf32>
    %cst_88 = arith.constant dense<0.000000e+00> : vector<32x32xf32>
    %147 = tpu.matmul %146, %137, %cst_88 {dimension_numbers = #tpu.dot_dimension_numbers<[1], [0], [0], [1], [0, 0, 1, 1], [], []>} : vector<32x72xf32>, vector<72x32xf32>, vector<32x32xf32> -> vector<32x32xf32>
    %c0_89 = arith.constant 0 : index
    %c0_90 = arith.constant 0 : index
    %148 = vector.load %arg21[%c0_89, %c0_90] : memref<32x288xf32, #tpu.memory_space<vmem>>, vector<32x32xf32>
    tpu.vector_store %arg21[%c0_89, %c0_90], %147 {strides = array<i32>} : memref<32x288xf32, #tpu.memory_space<vmem>>, vector<32x32xf32>,
    %c1_i32_91 = arith.constant 1 : i32
    %149 = vector.broadcast %c1_i32_91 : i32 to vector<32x72xi32>
    %150 = arith.cmpi eq, %141, %149 : vector<32x72xi32>
    %cst_92 = arith.constant 1.000000e+00 : f32
    %cst_93 = arith.constant 0.000000e+00 : f32
    %151 = vector.broadcast %cst_92 : f32 to vector<32x72xf32>
    %152 = vector.broadcast %cst_93 : f32 to vector<32x72xf32>
    %153 = arith.select %150, %151, %152 : vector<32x72xi1>, vector<32x72xf32>
    %cst_94 = arith.constant dense<0.000000e+00> : vector<32x32xf32>
    %154 = tpu.matmul %153, %137, %cst_94 {dimension_numbers = #tpu.dot_dimension_numbers<[1], [0], [0], [1], [0, 0, 1, 1], [], []>} : vector<32x72xf32>, vector<72x32xf32>, vector<32x32xf32> -> vector<32x32xf32>
    %c0_95 = arith.constant 0 : index
    %c32_96 = arith.constant 32 : index
    %155 = vector.load %arg21[%c0_95, %c32_96] : memref<32x288xf32, #tpu.memory_space<vmem>>, vector<32x32xf32>
    tpu.vector_store %arg21[%c0_95, %c32_96], %154 {strides = array<i32>} : memref<32x288xf32, #tpu.memory_space<vmem>>, vector<32x32xf32>,
    %c2_i32_97 = arith.constant 2 : i32
    %156 = vector.broadcast %c2_i32_97 : i32 to vector<32x72xi32>
    %157 = arith.cmpi eq, %141, %156 : vector<32x72xi32>
    %cst_98 = arith.constant 1.000000e+00 : f32
    %cst_99 = arith.constant 0.000000e+00 : f32
    %158 = vector.broadcast %cst_98 : f32 to vector<32x72xf32>
    %159 = vector.broadcast %cst_99 : f32 to vector<32x72xf32>
    %160 = arith.select %157, %158, %159 : vector<32x72xi1>, vector<32x72xf32>
    %cst_100 = arith.constant dense<0.000000e+00> : vector<32x32xf32>
    %161 = tpu.matmul %160, %137, %cst_100 {dimension_numbers = #tpu.dot_dimension_numbers<[1], [0], [0], [1], [0, 0, 1, 1], [], []>} : vector<32x72xf32>, vector<72x32xf32>, vector<32x32xf32> -> vector<32x32xf32>
    %c0_101 = arith.constant 0 : index
    %c64_102 = arith.constant 64 : index
    %162 = vector.load %arg21[%c0_101, %c64_102] : memref<32x288xf32, #tpu.memory_space<vmem>>, vector<32x32xf32>
    tpu.vector_store %arg21[%c0_101, %c64_102], %161 {strides = array<i32>} : memref<32x288xf32, #tpu.memory_space<vmem>>, vector<32x32xf32>,
    %c6_i32 = arith.constant 6 : i32
    %163 = vector.broadcast %c6_i32 : i32 to vector<32x72xi32>
    %164 = arith.cmpi eq, %141, %163 : vector<32x72xi32>
    %cst_103 = arith.constant 1.000000e+00 : f32
    %cst_104 = arith.constant 0.000000e+00 : f32
    %165 = vector.broadcast %cst_103 : f32 to vector<32x72xf32>
    %166 = vector.broadcast %cst_104 : f32 to vector<32x72xf32>
    %167 = arith.select %164, %165, %166 : vector<32x72xi1>, vector<32x72xf32>
    %cst_105 = arith.constant dense<0.000000e+00> : vector<32x32xf32>
    %168 = tpu.matmul %167, %137, %cst_105 {dimension_numbers = #tpu.dot_dimension_numbers<[1], [0], [0], [1], [0, 0, 1, 1], [], []>} : vector<32x72xf32>, vector<72x32xf32>, vector<32x32xf32> -> vector<32x32xf32>
    %c0_106 = arith.constant 0 : index
    %c96_107 = arith.constant 96 : index
    %169 = vector.load %arg21[%c0_106, %c96_107] : memref<32x288xf32, #tpu.memory_space<vmem>>, vector<32x32xf32>
    tpu.vector_store %arg21[%c0_106, %c96_107], %168 {strides = array<i32>} : memref<32x288xf32, #tpu.memory_space<vmem>>, vector<32x32xf32>,
    %c7_i32 = arith.constant 7 : i32
    %170 = vector.broadcast %c7_i32 : i32 to vector<32x72xi32>
    %171 = arith.cmpi eq, %141, %170 : vector<32x72xi32>
    %cst_108 = arith.constant 1.000000e+00 : f32
    %cst_109 = arith.constant 0.000000e+00 : f32
    %172 = vector.broadcast %cst_108 : f32 to vector<32x72xf32>
    %173 = vector.broadcast %cst_109 : f32 to vector<32x72xf32>
    %174 = arith.select %171, %172, %173 : vector<32x72xi1>, vector<32x72xf32>
    %cst_110 = arith.constant dense<0.000000e+00> : vector<32x32xf32>
    %175 = tpu.matmul %174, %137, %cst_110 {dimension_numbers = #tpu.dot_dimension_numbers<[1], [0], [0], [1], [0, 0, 1, 1], [], []>} : vector<32x72xf32>, vector<72x32xf32>, vector<32x32xf32> -> vector<32x32xf32>
    %c0_111 = arith.constant 0 : index
    %c128_112 = arith.constant 128 : index
    %176 = vector.load %arg21[%c0_111, %c128_112] : memref<32x288xf32, #tpu.memory_space<vmem>>, vector<32x32xf32>
    tpu.vector_store %arg21[%c0_111, %c128_112], %175 {strides = array<i32>} : memref<32x288xf32, #tpu.memory_space<vmem>>, vector<32x32xf32>,
    %c8_i32 = arith.constant 8 : i32
    %177 = vector.broadcast %c8_i32 : i32 to vector<32x72xi32>
    %178 = arith.cmpi eq, %141, %177 : vector<32x72xi32>
    %cst_113 = arith.constant 1.000000e+00 : f32
    %cst_114 = arith.constant 0.000000e+00 : f32
    %179 = vector.broadcast %cst_113 : f32 to vector<32x72xf32>
    %180 = vector.broadcast %cst_114 : f32 to vector<32x72xf32>
    %181 = arith.select %178, %179, %180 : vector<32x72xi1>, vector<32x72xf32>
    %cst_115 = arith.constant dense<0.000000e+00> : vector<32x32xf32>
    %182 = tpu.matmul %181, %137, %cst_115 {dimension_numbers = #tpu.dot_dimension_numbers<[1], [0], [0], [1], [0, 0, 1, 1], [], []>} : vector<32x72xf32>, vector<72x32xf32>, vector<32x32xf32> -> vector<32x32xf32>
    %c0_116 = arith.constant 0 : index
    %c160_117 = arith.constant 160 : index
    %183 = vector.load %arg21[%c0_116, %c160_117] : memref<32x288xf32, #tpu.memory_space<vmem>>, vector<32x32xf32>
    tpu.vector_store %arg21[%c0_116, %c160_117], %182 {strides = array<i32>} : memref<32x288xf32, #tpu.memory_space<vmem>>, vector<32x32xf32>,
    %c12_i32 = arith.constant 12 : i32
    %184 = vector.broadcast %c12_i32 : i32 to vector<32x72xi32>
    %185 = arith.cmpi eq, %141, %184 : vector<32x72xi32>
    %cst_118 = arith.constant 1.000000e+00 : f32
    %cst_119 = arith.constant 0.000000e+00 : f32
    %186 = vector.broadcast %cst_118 : f32 to vector<32x72xf32>
    %187 = vector.broadcast %cst_119 : f32 to vector<32x72xf32>
    %188 = arith.select %185, %186, %187 : vector<32x72xi1>, vector<32x72xf32>
    %cst_120 = arith.constant dense<0.000000e+00> : vector<32x32xf32>
    %189 = tpu.matmul %188, %137, %cst_120 {dimension_numbers = #tpu.dot_dimension_numbers<[1], [0], [0], [1], [0, 0, 1, 1], [], []>} : vector<32x72xf32>, vector<72x32xf32>, vector<32x32xf32> -> vector<32x32xf32>
    %c0_121 = arith.constant 0 : index
    %c192_122 = arith.constant 192 : index
    %190 = vector.load %arg21[%c0_121, %c192_122] : memref<32x288xf32, #tpu.memory_space<vmem>>, vector<32x32xf32>
    tpu.vector_store %arg21[%c0_121, %c192_122], %189 {strides = array<i32>} : memref<32x288xf32, #tpu.memory_space<vmem>>, vector<32x32xf32>,
    %c13_i32 = arith.constant 13 : i32
    %191 = vector.broadcast %c13_i32 : i32 to vector<32x72xi32>
    %192 = arith.cmpi eq, %141, %191 : vector<32x72xi32>
    %cst_123 = arith.constant 1.000000e+00 : f32
    %cst_124 = arith.constant 0.000000e+00 : f32
    %193 = vector.broadcast %cst_123 : f32 to vector<32x72xf32>
    %194 = vector.broadcast %cst_124 : f32 to vector<32x72xf32>
    %195 = arith.select %192, %193, %194 : vector<32x72xi1>, vector<32x72xf32>
    %cst_125 = arith.constant dense<0.000000e+00> : vector<32x32xf32>
    %196 = tpu.matmul %195, %137, %cst_125 {dimension_numbers = #tpu.dot_dimension_numbers<[1], [0], [0], [1], [0, 0, 1, 1], [], []>} : vector<32x72xf32>, vector<72x32xf32>, vector<32x32xf32> -> vector<32x32xf32>
    %c0_126 = arith.constant 0 : index
    %c224_127 = arith.constant 224 : index
    %197 = vector.load %arg21[%c0_126, %c224_127] : memref<32x288xf32, #tpu.memory_space<vmem>>, vector<32x32xf32>
    tpu.vector_store %arg21[%c0_126, %c224_127], %196 {strides = array<i32>} : memref<32x288xf32, #tpu.memory_space<vmem>>, vector<32x32xf32>,
    %c14_i32_128 = arith.constant 14 : i32
    %198 = vector.broadcast %c14_i32_128 : i32 to vector<32x72xi32>
    %199 = arith.cmpi eq, %141, %198 : vector<32x72xi32>
    %cst_129 = arith.constant 1.000000e+00 : f32
    %cst_130 = arith.constant 0.000000e+00 : f32
    %200 = vector.broadcast %cst_129 : f32 to vector<32x72xf32>
    %201 = vector.broadcast %cst_130 : f32 to vector<32x72xf32>
    %202 = arith.select %199, %200, %201 : vector<32x72xi1>, vector<32x72xf32>
    %cst_131 = arith.constant dense<0.000000e+00> : vector<32x32xf32>
    %203 = tpu.matmul %202, %137, %cst_131 {dimension_numbers = #tpu.dot_dimension_numbers<[1], [0], [0], [1], [0, 0, 1, 1], [], []>} : vector<32x72xf32>, vector<72x32xf32>, vector<32x32xf32> -> vector<32x32xf32>
    %c0_132 = arith.constant 0 : index
    %c256 = arith.constant 256 : index
    %204 = vector.load %arg21[%c0_132, %c256] : memref<32x288xf32, #tpu.memory_space<vmem>>, vector<32x32xf32>
    tpu.vector_store %arg21[%c0_132, %c256], %203 {strides = array<i32>} : memref<32x288xf32, #tpu.memory_space<vmem>>, vector<32x32xf32>,
    %c0_133 = arith.constant 0 : index
    %c0_134 = arith.constant 0 : index
    %205 = vector.load %arg21[%c0_133, %c0_134] : memref<32x288xf32, #tpu.memory_space<vmem>>, vector<32x288xf32>
    %c0_135 = arith.constant 0 : index
    %c0_136 = arith.constant 0 : index
    %206 = vector.load %arg7[%c0_135, %c0_136] : memref<288x32xf32, #tpu.memory_space<vmem>>, vector<288x32xf32>
    %cst_137 = arith.constant dense<0.000000e+00> : vector<32x32xf32>
    %207 = tpu.matmul %205, %206, %cst_137 {dimension_numbers = #tpu.dot_dimension_numbers<[1], [0], [0], [1], [0, 0, 1, 1], [], []>} : vector<32x288xf32>, vector<288x32xf32>, vector<32x32xf32> -> vector<32x32xf32>
    %c0_138 = arith.constant 0 : index
    %c0_139 = arith.constant 0 : index
    %208 = vector.load %arg8[%c0_138, %c0_139] : memref<1x32xf32, #tpu.memory_space<vmem>>, vector<1x32xf32>
    %209 = vector.broadcast %208 : vector<1x32xf32> to vector<32x32xf32>
    %210 = arith.addf %207, %209 : vector<32x32xf32>
    %cst_140 = arith.constant 0.000000e+00 : f32
    %211 = vector.broadcast %cst_140 : f32 to vector<32x32xf32>
    %212 = arith.cmpf ogt, %210, %211 : vector<32x32xf32>
    %cst_141 = arith.constant 0.00999999977 : f32
    %213 = vector.broadcast %cst_141 : f32 to vector<32x32xf32>
    %214 = arith.mulf %213, %210 : vector<32x32xf32>
    %215 = arith.select %212, %210, %214 : vector<32x32xi1>, vector<32x32xf32>
    %216 = vector.extract_strided_slice %215 {offsets = [0, 0], sizes = [2, 32], strides = [1, 1]} : vector<32x32xf32> to vector<2x32xf32>
    %c0_142 = arith.constant 0 : index
    %c0_143 = arith.constant 0 : index
    %217 = vector.load %arg22[%c0_142, %c0_143] : memref<2x512xf32, #tpu.memory_space<vmem>>, vector<2x32xf32>
    tpu.vector_store %arg22[%c0_142, %c0_143], %216 {strides = array<i32>} : memref<2x512xf32, #tpu.memory_space<vmem>>, vector<2x32xf32>,
    %218 = vector.extract_strided_slice %215 {offsets = [2, 0], sizes = [2, 32], strides = [1, 1]} : vector<32x32xf32> to vector<2x32xf32>
    %c0_144 = arith.constant 0 : index
    %c32_145 = arith.constant 32 : index
    %219 = vector.load %arg22[%c0_144, %c32_145] : memref<2x512xf32, #tpu.memory_space<vmem>>, vector<2x32xf32>
    tpu.vector_store %arg22[%c0_144, %c32_145], %218 {strides = array<i32>} : memref<2x512xf32, #tpu.memory_space<vmem>>, vector<2x32xf32>,
    %220 = vector.extract_strided_slice %215 {offsets = [4, 0], sizes = [2, 32], strides = [1, 1]} : vector<32x32xf32> to vector<2x32xf32>
    %c0_146 = arith.constant 0 : index
    %c64_147 = arith.constant 64 : index
    %221 = vector.load %arg22[%c0_146, %c64_147] : memref<2x512xf32, #tpu.memory_space<vmem>>, vector<2x32xf32>
    tpu.vector_store %arg22[%c0_146, %c64_147], %220 {strides = array<i32>} : memref<2x512xf32, #tpu.memory_space<vmem>>, vector<2x32xf32>,
    %222 = vector.extract_strided_slice %215 {offsets = [6, 0], sizes = [2, 32], strides = [1, 1]} : vector<32x32xf32> to vector<2x32xf32>
    %c0_148 = arith.constant 0 : index
    %c96_149 = arith.constant 96 : index
    %223 = vector.load %arg22[%c0_148, %c96_149] : memref<2x512xf32, #tpu.memory_space<vmem>>, vector<2x32xf32>
    tpu.vector_store %arg22[%c0_148, %c96_149], %222 {strides = array<i32>} : memref<2x512xf32, #tpu.memory_space<vmem>>, vector<2x32xf32>,
    %224 = vector.extract_strided_slice %215 {offsets = [8, 0], sizes = [2, 32], strides = [1, 1]} : vector<32x32xf32> to vector<2x32xf32>
    %c0_150 = arith.constant 0 : index
    %c128_151 = arith.constant 128 : index
    %225 = vector.load %arg22[%c0_150, %c128_151] : memref<2x512xf32, #tpu.memory_space<vmem>>, vector<2x32xf32>
    tpu.vector_store %arg22[%c0_150, %c128_151], %224 {strides = array<i32>} : memref<2x512xf32, #tpu.memory_space<vmem>>, vector<2x32xf32>,
    %226 = vector.extract_strided_slice %215 {offsets = [10, 0], sizes = [2, 32], strides = [1, 1]} : vector<32x32xf32> to vector<2x32xf32>
    %c0_152 = arith.constant 0 : index
    %c160_153 = arith.constant 160 : index
    %227 = vector.load %arg22[%c0_152, %c160_153] : memref<2x512xf32, #tpu.memory_space<vmem>>, vector<2x32xf32>
    tpu.vector_store %arg22[%c0_152, %c160_153], %226 {strides = array<i32>} : memref<2x512xf32, #tpu.memory_space<vmem>>, vector<2x32xf32>,
    %228 = vector.extract_strided_slice %215 {offsets = [12, 0], sizes = [2, 32], strides = [1, 1]} : vector<32x32xf32> to vector<2x32xf32>
    %c0_154 = arith.constant 0 : index
    %c192_155 = arith.constant 192 : index
    %229 = vector.load %arg22[%c0_154, %c192_155] : memref<2x512xf32, #tpu.memory_space<vmem>>, vector<2x32xf32>
    tpu.vector_store %arg22[%c0_154, %c192_155], %228 {strides = array<i32>} : memref<2x512xf32, #tpu.memory_space<vmem>>, vector<2x32xf32>,
    %230 = vector.extract_strided_slice %215 {offsets = [14, 0], sizes = [2, 32], strides = [1, 1]} : vector<32x32xf32> to vector<2x32xf32>
    %c0_156 = arith.constant 0 : index
    %c224_157 = arith.constant 224 : index
    %231 = vector.load %arg22[%c0_156, %c224_157] : memref<2x512xf32, #tpu.memory_space<vmem>>, vector<2x32xf32>
    tpu.vector_store %arg22[%c0_156, %c224_157], %230 {strides = array<i32>} : memref<2x512xf32, #tpu.memory_space<vmem>>, vector<2x32xf32>,
    %232 = vector.extract_strided_slice %215 {offsets = [16, 0], sizes = [2, 32], strides = [1, 1]} : vector<32x32xf32> to vector<2x32xf32>
    %c0_158 = arith.constant 0 : index
    %c256_159 = arith.constant 256 : index
    %233 = vector.load %arg22[%c0_158, %c256_159] : memref<2x512xf32, #tpu.memory_space<vmem>>, vector<2x32xf32>
    tpu.vector_store %arg22[%c0_158, %c256_159], %232 {strides = array<i32>} : memref<2x512xf32, #tpu.memory_space<vmem>>, vector<2x32xf32>,
    %234 = vector.extract_strided_slice %215 {offsets = [18, 0], sizes = [2, 32], strides = [1, 1]} : vector<32x32xf32> to vector<2x32xf32>
    %c0_160 = arith.constant 0 : index
    %c288 = arith.constant 288 : index
    %235 = vector.load %arg22[%c0_160, %c288] : memref<2x512xf32, #tpu.memory_space<vmem>>, vector<2x32xf32>
    tpu.vector_store %arg22[%c0_160, %c288], %234 {strides = array<i32>} : memref<2x512xf32, #tpu.memory_space<vmem>>, vector<2x32xf32>,
    %236 = vector.extract_strided_slice %215 {offsets = [20, 0], sizes = [2, 32], strides = [1, 1]} : vector<32x32xf32> to vector<2x32xf32>
    %c0_161 = arith.constant 0 : index
    %c320 = arith.constant 320 : index
    %237 = vector.load %arg22[%c0_161, %c320] : memref<2x512xf32, #tpu.memory_space<vmem>>, vector<2x32xf32>
    tpu.vector_store %arg22[%c0_161, %c320], %236 {strides = array<i32>} : memref<2x512xf32, #tpu.memory_space<vmem>>, vector<2x32xf32>,
    %238 = vector.extract_strided_slice %215 {offsets = [22, 0], sizes = [2, 32], strides = [1, 1]} : vector<32x32xf32> to vector<2x32xf32>
    %c0_162 = arith.constant 0 : index
    %c352 = arith.constant 352 : index
    %239 = vector.load %arg22[%c0_162, %c352] : memref<2x512xf32, #tpu.memory_space<vmem>>, vector<2x32xf32>
    tpu.vector_store %arg22[%c0_162, %c352], %238 {strides = array<i32>} : memref<2x512xf32, #tpu.memory_space<vmem>>, vector<2x32xf32>,
    %240 = vector.extract_strided_slice %215 {offsets = [24, 0], sizes = [2, 32], strides = [1, 1]} : vector<32x32xf32> to vector<2x32xf32>
    %c0_163 = arith.constant 0 : index
    %c384 = arith.constant 384 : index
    %241 = vector.load %arg22[%c0_163, %c384] : memref<2x512xf32, #tpu.memory_space<vmem>>, vector<2x32xf32>
    tpu.vector_store %arg22[%c0_163, %c384], %240 {strides = array<i32>} : memref<2x512xf32, #tpu.memory_space<vmem>>, vector<2x32xf32>,
    %242 = vector.extract_strided_slice %215 {offsets = [26, 0], sizes = [2, 32], strides = [1, 1]} : vector<32x32xf32> to vector<2x32xf32>
    %c0_164 = arith.constant 0 : index
    %c416 = arith.constant 416 : index
    %243 = vector.load %arg22[%c0_164, %c416] : memref<2x512xf32, #tpu.memory_space<vmem>>, vector<2x32xf32>
    tpu.vector_store %arg22[%c0_164, %c416], %242 {strides = array<i32>} : memref<2x512xf32, #tpu.memory_space<vmem>>, vector<2x32xf32>,
    %244 = vector.extract_strided_slice %215 {offsets = [28, 0], sizes = [2, 32], strides = [1, 1]} : vector<32x32xf32> to vector<2x32xf32>
    %c0_165 = arith.constant 0 : index
    %c448 = arith.constant 448 : index
    %245 = vector.load %arg22[%c0_165, %c448] : memref<2x512xf32, #tpu.memory_space<vmem>>, vector<2x32xf32>
    tpu.vector_store %arg22[%c0_165, %c448], %244 {strides = array<i32>} : memref<2x512xf32, #tpu.memory_space<vmem>>, vector<2x32xf32>,
    %246 = vector.extract_strided_slice %215 {offsets = [30, 0], sizes = [2, 32], strides = [1, 1]} : vector<32x32xf32> to vector<2x32xf32>
    %c0_166 = arith.constant 0 : index
    %c480 = arith.constant 480 : index
    %247 = vector.load %arg22[%c0_166, %c480] : memref<2x512xf32, #tpu.memory_space<vmem>>, vector<2x32xf32>
    tpu.vector_store %arg22[%c0_166, %c480], %246 {strides = array<i32>} : memref<2x512xf32, #tpu.memory_space<vmem>>, vector<2x32xf32>,
    %c0_167 = arith.constant 0 : index
    %c0_168 = arith.constant 0 : index
    %248 = vector.load %arg22[%c0_167, %c0_168] : memref<2x512xf32, #tpu.memory_space<vmem>>, vector<2x512xf32>
    %c0_169 = arith.constant 0 : index
    %c0_170 = arith.constant 0 : index
    %249 = vector.load %arg9[%c0_169, %c0_170] : memref<512x64xf32, #tpu.memory_space<vmem>>, vector<512x64xf32>
    %cst_171 = arith.constant dense<0.000000e+00> : vector<2x64xf32>
    %250 = tpu.matmul %248, %249, %cst_171 {dimension_numbers = #tpu.dot_dimension_numbers<[1], [0], [0], [1], [0, 0, 1, 1], [], []>} : vector<2x512xf32>, vector<512x64xf32>, vector<2x64xf32> -> vector<2x64xf32>
    %c0_172 = arith.constant 0 : index
    %c0_173 = arith.constant 0 : index
    %251 = vector.load %arg10[%c0_172, %c0_173] : memref<1x64xf32, #tpu.memory_space<vmem>>, vector<1x64xf32>
    %252 = vector.broadcast %251 : vector<1x64xf32> to vector<2x64xf32>
    %253 = arith.addf %250, %252 : vector<2x64xf32>
    %cst_174 = arith.constant 0.000000e+00 : f32
    %254 = vector.broadcast %cst_174 : f32 to vector<2x64xf32>
    %255 = arith.cmpf ogt, %253, %254 : vector<2x64xf32>
    %cst_175 = arith.constant 0.00999999977 : f32
    %256 = vector.broadcast %cst_175 : f32 to vector<2x64xf32>
    %257 = arith.mulf %256, %253 : vector<2x64xf32>
    %258 = arith.select %255, %253, %257 : vector<2x64xi1>, vector<2x64xf32>
    %c0_176 = arith.constant 0 : index
    %c0_177 = arith.constant 0 : index
    %259 = vector.load %arg11[%c0_176, %c0_177] : memref<64x64xf32, #tpu.memory_space<vmem>>, vector<64x64xf32>
    %cst_178 = arith.constant dense<0.000000e+00> : vector<2x64xf32>
    %260 = tpu.matmul %258, %259, %cst_178 {dimension_numbers = #tpu.dot_dimension_numbers<[1], [0], [0], [1], [0, 0, 1, 1], [], []>} : vector<2x64xf32>, vector<64x64xf32>, vector<2x64xf32> -> vector<2x64xf32>
    %c0_179 = arith.constant 0 : index
    %c0_180 = arith.constant 0 : index
    %261 = vector.load %arg12[%c0_179, %c0_180] : memref<1x64xf32, #tpu.memory_space<vmem>>, vector<1x64xf32>
    %262 = vector.broadcast %261 : vector<1x64xf32> to vector<2x64xf32>
    %263 = arith.addf %260, %262 : vector<2x64xf32>
    %cst_181 = arith.constant 0.000000e+00 : f32
    %264 = vector.broadcast %cst_181 : f32 to vector<2x64xf32>
    %265 = arith.maximumf %263, %264 : vector<2x64xf32>
    %c0_182 = arith.constant 0 : index
    %c0_183 = arith.constant 0 : index
    %266 = vector.load %arg13[%c0_182, %c0_183] : memref<64x64xf32, #tpu.memory_space<vmem>>, vector<64x64xf32>
    %cst_184 = arith.constant dense<0.000000e+00> : vector<2x64xf32>
    %267 = tpu.matmul %258, %266, %cst_184 {dimension_numbers = #tpu.dot_dimension_numbers<[1], [0], [0], [1], [0, 0, 1, 1], [], []>} : vector<2x64xf32>, vector<64x64xf32>, vector<2x64xf32> -> vector<2x64xf32>
    %c0_185 = arith.constant 0 : index
    %c0_186 = arith.constant 0 : index
    %268 = vector.load %arg14[%c0_185, %c0_186] : memref<1x64xf32, #tpu.memory_space<vmem>>, vector<1x64xf32>
    %269 = vector.broadcast %268 : vector<1x64xf32> to vector<2x64xf32>
    %270 = arith.addf %267, %269 : vector<2x64xf32>
    %cst_187 = arith.constant 0.000000e+00 : f32
    %271 = vector.broadcast %cst_187 : f32 to vector<2x64xf32>
    %272 = arith.maximumf %270, %271 : vector<2x64xf32>
    %c0_188 = arith.constant 0 : index
    %c0_189 = arith.constant 0 : index
    %273 = vector.load %arg15[%c0_188, %c0_189] : memref<64x16xf32, #tpu.memory_space<vmem>>, vector<64x16xf32>
    %cst_190 = arith.constant dense<0.000000e+00> : vector<2x16xf32>
    %274 = tpu.matmul %265, %273, %cst_190 {dimension_numbers = #tpu.dot_dimension_numbers<[1], [0], [0], [1], [0, 0, 1, 1], [], []>} : vector<2x64xf32>, vector<64x16xf32>, vector<2x16xf32> -> vector<2x16xf32>
    %c0_191 = arith.constant 0 : index
    %c0_192 = arith.constant 0 : index
    %275 = vector.load %arg16[%c0_191, %c0_192] : memref<1x16xf32, #tpu.memory_space<vmem>>, vector<1x16xf32>
    %276 = vector.broadcast %275 : vector<1x16xf32> to vector<2x16xf32>
    %277 = arith.addf %274, %276 : vector<2x16xf32>
    %c0_193 = arith.constant 0 : index
    %c0_194 = arith.constant 0 : index
    %278 = vector.load %arg17[%c0_193, %c0_194] : memref<64x64xf32, #tpu.memory_space<vmem>>, vector<64x64xf32>
    %cst_195 = arith.constant dense<0.000000e+00> : vector<2x64xf32>
    %279 = tpu.matmul %272, %278, %cst_195 {dimension_numbers = #tpu.dot_dimension_numbers<[1], [0], [0], [1], [0, 0, 1, 1], [], []>} : vector<2x64xf32>, vector<64x64xf32>, vector<2x64xf32> -> vector<2x64xf32>
    %c0_196 = arith.constant 0 : index
    %c0_197 = arith.constant 0 : index
    %280 = vector.load %arg18[%c0_196, %c0_197] : memref<1x64xf32, #tpu.memory_space<vmem>>, vector<1x64xf32>
    %281 = vector.broadcast %280 : vector<1x64xf32> to vector<2x64xf32>
    %282 = arith.addf %279, %281 : vector<2x64xf32>
    %283 = vector.extract_strided_slice %282 {offsets = [0, 0], sizes = [2, 16], strides = [1, 1]} : vector<2x64xf32> to vector<2x16xf32>
    %284 = arith.addf %277, %283 : vector<2x16xf32>
    %cst_198 = arith.constant dense<0xFF800000> : vector<2xf32>
    %285 = vector.multi_reduction <maximumf>, %284, %cst_198 [1] : vector<2x16xf32> to vector<2xf32>
    %286 = vector.shape_cast %285 : vector<2xf32> to vector<2x1xf32>
    %287 = vector.broadcast %286 : vector<2x1xf32> to vector<2x16xf32>
    %288 = arith.subf %284, %287 : vector<2x16xf32>
    %289 = math.exp %288 : vector<2x16xf32>
    %cst_199 = arith.constant dense<0.000000e+00> : vector<2xf32>
    %290 = vector.multi_reduction <add>, %289, %cst_199 [1] : vector<2x16xf32> to vector<2xf32>
    %291 = vector.shape_cast %290 : vector<2xf32> to vector<2x1xf32>
    %292 = tpu.reciprocal %291 : vector<2x1xf32> -> vector<2x1xf32>
    %293 = vector.broadcast %292 : vector<2x1xf32> to vector<2x16xf32>
    %294 = arith.mulf %289, %293 : vector<2x16xf32>
    %c0_200 = arith.constant 0 : index
    %c0_201 = arith.constant 0 : index
    %295 = vector.load %arg19[%c0_200, %c0_201] : memref<2x64xf32, #tpu.memory_space<vmem>>, vector<2x16xf32>
    tpu.vector_store %arg19[%c0_200, %c0_201], %294 {strides = array<i32>} : memref<2x64xf32, #tpu.memory_space<vmem>>, vector<2x16xf32>,
    %296 = vector.extract_strided_slice %282 {offsets = [0, 16], sizes = [2, 16], strides = [1, 1]} : vector<2x64xf32> to vector<2x16xf32>
    %297 = arith.addf %277, %296 : vector<2x16xf32>
    %cst_202 = arith.constant dense<0xFF800000> : vector<2xf32>
    %298 = vector.multi_reduction <maximumf>, %297, %cst_202 [1] : vector<2x16xf32> to vector<2xf32>
    %299 = vector.shape_cast %298 : vector<2xf32> to vector<2x1xf32>
    %300 = vector.broadcast %299 : vector<2x1xf32> to vector<2x16xf32>
    %301 = arith.subf %297, %300 : vector<2x16xf32>
    %302 = math.exp %301 : vector<2x16xf32>
    %cst_203 = arith.constant dense<0.000000e+00> : vector<2xf32>
    %303 = vector.multi_reduction <add>, %302, %cst_203 [1] : vector<2x16xf32> to vector<2xf32>
    %304 = vector.shape_cast %303 : vector<2xf32> to vector<2x1xf32>
    %305 = tpu.reciprocal %304 : vector<2x1xf32> -> vector<2x1xf32>
    %306 = vector.broadcast %305 : vector<2x1xf32> to vector<2x16xf32>
    %307 = arith.mulf %302, %306 : vector<2x16xf32>
    %c0_204 = arith.constant 0 : index
    %c16_205 = arith.constant 16 : index
    %308 = vector.load %arg19[%c0_204, %c16_205] : memref<2x64xf32, #tpu.memory_space<vmem>>, vector<2x16xf32>
    tpu.vector_store %arg19[%c0_204, %c16_205], %307 {strides = array<i32>} : memref<2x64xf32, #tpu.memory_space<vmem>>, vector<2x16xf32>,
    %309 = vector.extract_strided_slice %282 {offsets = [0, 32], sizes = [2, 16], strides = [1, 1]} : vector<2x64xf32> to vector<2x16xf32>
    %310 = arith.addf %277, %309 : vector<2x16xf32>
    %cst_206 = arith.constant dense<0xFF800000> : vector<2xf32>
    %311 = vector.multi_reduction <maximumf>, %310, %cst_206 [1] : vector<2x16xf32> to vector<2xf32>
    %312 = vector.shape_cast %311 : vector<2xf32> to vector<2x1xf32>
    %313 = vector.broadcast %312 : vector<2x1xf32> to vector<2x16xf32>
    %314 = arith.subf %310, %313 : vector<2x16xf32>
    %315 = math.exp %314 : vector<2x16xf32>
    %cst_207 = arith.constant dense<0.000000e+00> : vector<2xf32>
    %316 = vector.multi_reduction <add>, %315, %cst_207 [1] : vector<2x16xf32> to vector<2xf32>
    %317 = vector.shape_cast %316 : vector<2xf32> to vector<2x1xf32>
    %318 = tpu.reciprocal %317 : vector<2x1xf32> -> vector<2x1xf32>
    %319 = vector.broadcast %318 : vector<2x1xf32> to vector<2x16xf32>
    %320 = arith.mulf %315, %319 : vector<2x16xf32>
    %c0_208 = arith.constant 0 : index
    %c32_209 = arith.constant 32 : index
    %321 = vector.load %arg19[%c0_208, %c32_209] : memref<2x64xf32, #tpu.memory_space<vmem>>, vector<2x16xf32>
    tpu.vector_store %arg19[%c0_208, %c32_209], %320 {strides = array<i32>} : memref<2x64xf32, #tpu.memory_space<vmem>>, vector<2x16xf32>,
    %322 = vector.extract_strided_slice %282 {offsets = [0, 48], sizes = [2, 16], strides = [1, 1]} : vector<2x64xf32> to vector<2x16xf32>
    %323 = arith.addf %277, %322 : vector<2x16xf32>
    %cst_210 = arith.constant dense<0xFF800000> : vector<2xf32>
    %324 = vector.multi_reduction <maximumf>, %323, %cst_210 [1] : vector<2x16xf32> to vector<2xf32>
    %325 = vector.shape_cast %324 : vector<2xf32> to vector<2x1xf32>
    %326 = vector.broadcast %325 : vector<2x1xf32> to vector<2x16xf32>
    %327 = arith.subf %323, %326 : vector<2x16xf32>
    %328 = math.exp %327 : vector<2x16xf32>
    %cst_211 = arith.constant dense<0.000000e+00> : vector<2xf32>
    %329 = vector.multi_reduction <add>, %328, %cst_211 [1] : vector<2x16xf32> to vector<2xf32>
    %330 = vector.shape_cast %329 : vector<2xf32> to vector<2x1xf32>
    %331 = tpu.reciprocal %330 : vector<2x1xf32> -> vector<2x1xf32>
    %332 = vector.broadcast %331 : vector<2x1xf32> to vector<2x16xf32>
    %333 = arith.mulf %328, %332 : vector<2x16xf32>
    %c0_212 = arith.constant 0 : index
    %c48_213 = arith.constant 48 : index
    %334 = vector.load %arg19[%c0_212, %c48_213] : memref<2x64xf32, #tpu.memory_space<vmem>>, vector<2x16xf32>
    tpu.vector_store %arg19[%c0_212, %c48_213], %333 {strides = array<i32>} : memref<2x64xf32, #tpu.memory_space<vmem>>, vector<2x16xf32>,
    return
  }
}

</mosaic_0001>

<bundles_post_ra>
// kernel: dqn_forward.1
= control target key start
LH: loop header
LB: loop body
LE: loop exit
PB: predicated region body
PF: predicated region fallthrough
CT: control target
= control target key end

     0   :  { %v17754_v0 = vmov 0.0|0.0   ;;  %s12995_s30 = smov 32   ;;  %s12996_s21 = smov 48   ;;  %s17729_s1 = inlined_call_operand.vmem [shape: f32[512,16], index: 1, kind: input, shape index: {}]   ;;  %s17730_s0 = inlined_call_operand.vmem [shape: f32[392,512], index: 0, kind: input, shape index: {}]   ;;  %s17731_s3 = inlined_call_operand.vmem [shape: s32[72,1], index: 3, kind: input, shape index: {}]   ;;  %s17732_s2 = inlined_call_operand.vmem [shape: f32[1,16], index: 2, kind: input, shape index: {}]   ;;  %s17733_s4 = inlined_call_operand.vmem [shape: f32[256,32], index: 4, kind: input, shape index: {}]   ;;  %s17734_s6 = inlined_call_operand.vmem [shape: s32[32,1], index: 6, kind: input, shape index: {}]   ;;  %s17735_s5 = inlined_call_operand.vmem [shape: f32[1,32], index: 5, kind: input, shape index: {}]   ;;  %s17736_s7 = inlined_call_operand.vmem [shape: f32[288,32], index: 7, kind: input, shape index: {}]   ;;  %s17737_s8 = inlined_call_operand.vmem [shape: f32[1,32], index: 8, kind: input, shape index: {}]   ;;  %s17738_s9 = inlined_call_operand.vmem [shape: f32[512,64], index: 9, kind: input, shape index: {}]   ;;  %s17739_s11 = inlined_call_operand.vmem [shape: f32[64,64], index: 11, kind: input, shape index: {}]   ;;  %s17740_s13 = inlined_call_operand.vmem [shape: f32[64,64], index: 13, kind: input, shape index: {}]   ;;  %s17741_s10 = inlined_call_operand.vmem [shape: f32[1,64], index: 10, kind: input, shape index: {}]   ;;  %s17742_s15 = inlined_call_operand.vmem [shape: f32[64,16], index: 15, kind: input, shape index: {}]   ;;  %s17743_s17 = inlined_call_operand.vmem [shape: f32[64,64], index: 17, kind: input, shape index: {}]   ;;  %s17744_s12 = inlined_call_operand.vmem [shape: f32[1,64], index: 12, kind: input, shape index: {}]   ;;  %s17745_s14 = inlined_call_operand.vmem [shape: f32[1,64], index: 14, kind: input, shape index: {}]   ;;  %s17746_s16 = inlined_call_operand.vmem [shape: f32[1,16], index: 16, kind: input, shape index: {}]   ;;  %s17747_s18 = inlined_call_operand.vmem [shape: f32[1,64], index: 18, kind: input, shape index: {}]   ;;  %s17748_s19 = inlined_call_operand.vmem [shape: f32[2,64], index: 19, kind: output, shape index: {}]  }
   0x1   :  { %17816 = sst [smem:[#allocation79_spill]] %s17729_s1  ;;  %11490 = vmatprep.subr.bf16.mxu0 %v17754_v0  ;;  %s12999_s23 = smov 96  }
   0x2   :  { %17817 = sst [smem:[#allocation80_spill]] %s17730_s0  ;;  %s17820_s20 = sld [smem:[#allocation79_spill]] }
   0x3   :  { %17818 = sst [smem:[#allocation81_spill]] %s17731_s3  ;;  %s17821_s22 = sld [smem:[#allocation80_spill]] }
   0x4   :  { %17819 = sst [smem:[#allocation82_spill]] %s17732_s2  ;;  %s17822_s1 = sld [smem:[#allocation81_spill]] }
   0x5   :  { %s17823_s28 = sld [smem:[#allocation82_spill]]  ;;  %s12997_s0 = smov 64  }
   0x6   :  { %s12998_s3 = smov 80   ;;  %s13000_s24 = smov 112  }
   0x8   :  { %v258_v1 = vld [vmem:[%s17820_s20] sm:$0xff]  ;;  %v259_v2 = vld [vmem:[%s17820_s20 + $0x8] sm:$0xff]  ;;  %v260_v3 = vld [vmem:[%s17820_s20 + $0x10] sm:$0xff] }
   0x9   :  { %v11491_v4 = vpack.c.bf16 %v259_v2, %v258_v1  ;;  %v261_v5 = vld [vmem:[%s17820_s20 + $0x18] sm:$0xff]  ;;  %v262_v7 = vld [vmem:[%s17820_s20 + $0x20] sm:$0xff]  ;;  %v263_v8 = vld [vmem:[%s17820_s20 + $0x28] sm:$0xff] }
   0xa   :  { %v11494_v6 = vpack.c.bf16 %v261_v5, %v260_v3  ;;  %v11497_v9 = vpack.c.bf16 %v263_v8, %v262_v7  ;;  %v264_v10 = vld [vmem:[%s17820_s20 + $0x30] sm:$0xff]  ;;  %v265_v11 = vld [vmem:[%s17820_s20 + $0x38] sm:$0xff]  ;;  %v63_v12 = vld [vmem:[%s17821_s22 + $0x8] sm:$0xff] }
   0xb   :  { %11492 = vmatpush1.bf16.msra.mxu0 %v11491_v4  ;;  %v11500_v13 = vpack.c.bf16 %v265_v11, %v264_v10  ;;  %393 = vmatprep.mubr.f32.mxu0 %v63_v12  ;;  %v266_v14 = vld [vmem:[%s17820_s20 + $0x40] sm:$0xff]  ;;  %v267_v15 = vld [vmem:[%s17820_s20 + $0x48] sm:$0xff]  ;;  %v268_v17 = vld [vmem:[%s17820_s20 + $0x50] sm:$0xff] }
   0xc   :  { %11493 = vmatprep.subr.bf16.mxu0 %v17754_v0  ;;  %v11503_v16 = vpack.c.bf16 %v267_v15, %v266_v14  ;;  %v269_v18 = vld [vmem:[%s17820_s20 + $0x58] sm:$0xff]  ;;  %v270_v20 = vld [vmem:[%s17820_s20 + $0x60] sm:$0xff]  ;;  %v271_v21 = vld [vmem:[%s17820_s20 + $0x68] sm:$0xff] }
   0xd   :  { %v11506_v19 = vpack.c.bf16 %v269_v18, %v268_v17  ;;  %v11509_v22 = vpack.c.bf16 %v271_v21, %v270_v20  ;;  %v272_v23 = vld [vmem:[%s17820_s20 + $0x70] sm:$0xff]  ;;  %v273_v24 = vld [vmem:[%s17820_s20 + $0x78] sm:$0xff]  ;;  %v274_v26 = vld [vmem:[%s17820_s20 + $0x80] sm:$0xff] }
   0xe   :  { %v11512_v25 = vpack.c.bf16 %v273_v24, %v272_v23  ;;  %v275_v27 = vld [vmem:[%s17820_s20 + $0x88] sm:$0xff]  ;;  %v276_v29 = vld [vmem:[%s17820_s20 + $0x90] sm:$0xff]  ;;  %v277_v30 = vld [vmem:[%s17820_s20 + $0x98] sm:$0xff] }
   0xf   :  { %11495 = vmatpush1.bf16.msra.mxu0 %v11494_v6  ;;  %v11515_v28 = vpack.c.bf16 %v275_v27, %v274_v26  ;;  %v11518_v31 = vpack.c.bf16 %v277_v30, %v276_v29  ;;  %v278_v32 = vld [vmem:[%s17820_s20 + $0xa0] sm:$0xff]  ;;  %v279_v33 = vld [vmem:[%s17820_s20 + $0xa8] sm:$0xff]  ;;  %v280_v35 = vld [vmem:[%s17820_s20 + $0xb0] sm:$0xff] }
  0x10   :  { %11496 = vmatprep.subr.bf16.mxu0 %v17754_v0  ;;  %v11521_v34 = vpack.c.bf16 %v279_v33, %v278_v32  ;;  %v281_v36 = vld [vmem:[%s17820_s20 + $0xb8] sm:$0xff]  ;;  %v282_v38 = vld [vmem:[%s17820_s20 + $0xc0] sm:$0xff]  ;;  %v283_v39 = vld [vmem:[%s17820_s20 + $0xc8] sm:$0xff] }
  0x11   :  { %v11524_v37 = vpack.c.bf16 %v281_v36, %v280_v35  ;;  %v11527_v40 = vpack.c.bf16 %v283_v39, %v282_v38  ;;  %v284_v41 = vld [vmem:[%s17820_s20 + $0xd0] sm:$0xff]  ;;  %v285_v42 = vld [vmem:[%s17820_s20 + $0xd8] sm:$0xff]  ;;  %v286_v44 = vld [vmem:[%s17820_s20 + $0xe0] sm:$0xff] }
  0x12   :  { %v11530_v43 = vpack.c.bf16 %v285_v42, %v284_v41  ;;  %v287_v45 = vld [vmem:[%s17820_s20 + $0xe8] sm:$0xff]  ;;  %v288_v47 = vld [vmem:[%s17820_s20 + $0xf0] sm:$0xff]  ;;  %v289_v48 = vld [vmem:[%s17820_s20 + $0xf8] sm:$0xff] }
  0x13   :  { %11498 = vmatpush1.bf16.msra.mxu0 %v11497_v9  ;;  %v11533_v46 = vpack.c.bf16 %v287_v45, %v286_v44  ;;  %v11536_v49 = vpack.c.bf16 %v289_v48, %v288_v47  ;;  %v290_v50 = vld [vmem:[%s17820_s20 + $0x100] sm:$0xff]  ;;  %v291_v51 = vld [vmem:[%s17820_s20 + $0x108] sm:$0xff]  ;;  %v292_v55 = vld [vmem:[%s17820_s20 + $0x110] sm:$0xff] }
  0x14   :  { %11499 = vmatprep.subr.bf16.mxu0 %v17754_v0  ;;  %v62_v52 = vld [vmem:[%s17821_s22] sm:$0xff]  ;;  %v11539_v53 = vpack.c.bf16 %v291_v51, %v290_v50  ;;  %v67_v54 = vld [vmem:[%s17821_s22 + $0x28] sm:$0xff]  ;;  %v293_v56 = vld [vmem:[%s17820_s20 + $0x118] sm:$0xff] }
  0x15   :  { %v66_v57 = vld [vmem:[%s17821_s22 + $0x20] sm:$0xff]  ;;  %v11542_v58 = vpack.c.bf16 %v293_v56, %v292_v55  ;;  %v71_v59 = vld [vmem:[%s17821_s22 + $0x48] sm:$0xff]  ;;  %v296_v2 = vld [vmem:[%s17820_s20 + $0x130] sm:$0xff] }
  0x16   :  { %v294_v60 = vld [vmem:[%s17820_s20 + $0x120] sm:$0xff]  ;;  %v295_v61 = vld [vmem:[%s17820_s20 + $0x128] sm:$0xff]  ;;  %v297_v3 = vld [vmem:[%s17820_s20 + $0x138] sm:$0xff] }
  0x17   :  { %11501 = vmatpush1.bf16.msra.mxu0 %v11500_v13  ;;  %v70_v62 = vld [vmem:[%s17821_s22 + $0x40] sm:$0xff]  ;;  %v11545_v63 = vpack.c.bf16 %v295_v61, %v294_v60  ;;  %v75_v1 = vld [vmem:[%s17821_s22 + $0x68] sm:$0xff]  ;;  %v11548_v5 = vpack.c.bf16 %v297_v3, %v296_v2  ;;  %v300_v12 = vld [vmem:[%s17820_s20 + $0x150] sm:$0xff] }
  0x18   :  { %11502 = vmatprep.subr.bf16.mxu0 %v17754_v0  ;;  %v74_v4 = vld [vmem:[%s17821_s22 + $0x60] sm:$0xff]  ;;  %v79_v6 = vld [vmem:[%s17821_s22 + $0x88] sm:$0xff]  ;;  %v301_v13 = vld [vmem:[%s17820_s20 + $0x158] sm:$0xff] }
  0x19   :  { %v298_v7 = vld [vmem:[%s17820_s20 + $0x140] sm:$0xff]  ;;  %v299_v8 = vld [vmem:[%s17820_s20 + $0x148] sm:$0xff]  ;;  %v11554_v15 = vpack.c.bf16 %v301_v13, %v300_v12  ;;  %v305_v23 = vld [vmem:[%s17820_s20 + $0x178] sm:$0xff] }
  0x1a   :  { %v78_v9 = vld [vmem:[%s17821_s22 + $0x80] sm:$0xff]  ;;  %v11551_v10 = vpack.c.bf16 %v299_v8, %v298_v7  ;;  %v83_v11 = vld [vmem:[%s17821_s22 + $0xa8] sm:$0xff]  ;;  %v308_v32 = vld [vmem:[%s17820_s20 + $0x190] sm:$0xff] }
  0x1b   :  { %11504 = vmatpush1.bf16.msra.mxu0 %v11503_v16  ;;  %v82_v14 = vld [vmem:[%s17821_s22 + $0xa0] sm:$0xff]  ;;  %v87_v16 = vld [vmem:[%s17821_s22 + $0xc8] sm:$0xff]  ;;  %v309_v33 = vld [vmem:[%s17820_s20 + $0x198] sm:$0xff] }
  0x1c   :  { %11505 = vmatprep.subr.bf16.mxu0 %v17754_v0  ;;  %v302_v17 = vld [vmem:[%s17820_s20 + $0x160] sm:$0xff]  ;;  %v303_v18 = vld [vmem:[%s17820_s20 + $0x168] sm:$0xff]  ;;  %v11566_v35 = vpack.c.bf16 %v309_v33, %v308_v32  ;;  %v312_v42 = vld [vmem:[%s17820_s20 + $0x1b0] sm:$0xff] }
  0x1d   :  { %v11557_v20 = vpack.c.bf16 %v303_v18, %v302_v17  ;;  %v91_v21 = vld [vmem:[%s17821_s22 + $0xe8] sm:$0xff]  ;;  %v90_v24 = vld [vmem:[%s17821_s22 + $0xe0] sm:$0xff]  ;;  %v320_v2 = vld [vmem:[%s17820_s20 + $0x1f0] sm:$0xff] }
  0x1e   :  { %v95_v26 = vld [vmem:[%s17821_s22 + $0x108] sm:$0xff]  ;;  %v306_v27 = vld [vmem:[%s17820_s20 + $0x180] sm:$0xff]  ;;  %v321_v3 = vld [vmem:[%s17820_s20 + $0x1f8] sm:$0xff] }
  0x1f   :  { %11507 = vmatpush1.bf16.msra.mxu0 %v11506_v19  ;;  %v86_v19 = vld [vmem:[%s17821_s22 + $0xc0] sm:$0xff]  ;;  %v103_v36 = vld [vmem:[%s17821_s22 + $0x148] sm:$0xff] }
  0x20   :  { %11508 = vmatprep.subr.bf16.mxu0 %v17754_v0  ;;  %v94_v29 = vld [vmem:[%s17821_s22 + $0x100] sm:$0xff]  ;;  %v311_v38 = vld [vmem:[%s17820_s20 + $0x1a8] sm:$0xff] }
  0x21   :  { %v102_v39 = vld [vmem:[%s17821_s22 + $0x140] sm:$0xff]  ;;  %v107_v41 = vld [vmem:[%s17821_s22 + $0x168] sm:$0xff] }
  0x22   :  { %v106_v44 = vld [vmem:[%s17821_s22 + $0x160] sm:$0xff]  ;;  %v315_v48 = vld [vmem:[%s17820_s20 + $0x1c8] sm:$0xff] }
  0x23   :  { %11510 = vmatpush1.bf16.msra.mxu0 %v11509_v22  ;;  %v304_v22 = vld [vmem:[%s17820_s20 + $0x170] sm:$0xff]  ;;  %v314_v47 = vld [vmem:[%s17820_s20 + $0x1c0] sm:$0xff]  ;;  %v115_v51 = vld [vmem:[%s17821_s22 + $0x1a8] sm:$0xff] }
  0x24   :  { %11511 = vmatprep.subr.bf16.mxu0 %v17754_v0  ;;  %v11575_v50 = vpack.c.bf16 %v315_v48, %v314_v47  ;;  %v119_v56 = vld [vmem:[%s17821_s22 + $0x1c8] sm:$0xff]  ;;  %v134_v8 = vld [vmem:[%s17821_s22 + $0x240] sm:$0xff] }
  0x25   :  { %v123_v61 = vld [vmem:[%s17821_s22 + $0x1e8] sm:$0xff]  ;;  %v142_v12 = vld [vmem:[%s17821_s22 + $0x280] sm:$0xff] }
  0x26   :  { %v135_v7 = vld [vmem:[%s17821_s22 + $0x248] sm:$0xff]  ;;  %v154_v18 = vld [vmem:[%s17821_s22 + $0x2e0] sm:$0xff] }
  0x27   :  { %11513 = vmatpush1.bf16.msra.mxu0 %v11512_v25  ;;  %v11560_v25 = vpack.c.bf16 %v305_v23, %v304_v22  ;;  %v147_v13 = vld [vmem:[%s17821_s22 + $0x2a8] sm:$0xff]  ;;  %v162_v22 = vld [vmem:[%s17821_s22 + $0x320] sm:$0xff] }
  0x28   :  { %11514 = vmatprep.subr.bf16.mxu0 %v17754_v0  ;;  %v155_v17 = vld [vmem:[%s17821_s22 + $0x2e8] sm:$0xff]  ;;  %v182_v32 = vld [vmem:[%s17821_s22 + $0x3c0] sm:$0xff] }
  0x29   :  { %v167_v23 = vld [vmem:[%s17821_s22 + $0x348] sm:$0xff]  ;;  %v214_v48 = vld [vmem:[%s17821_s22 + $0x4c0] sm:$0xff] }
  0x2a   :  { %v187_v33 = vld [vmem:[%s17821_s22 + $0x3e8] sm:$0xff] }
  0x2b   :  { %11516 = vmatpush1.bf16.msra.mxu0 %v11515_v28  ;;  %v307_v28 = vld [vmem:[%s17820_s20 + $0x188] sm:$0xff] }
  0x2c   :  { %11517 = vmatprep.subr.bf16.mxu0 %v17754_v0  ;;  %v11563_v30 = vpack.c.bf16 %v307_v28, %v306_v27  ;;  %v175_v27 = vld [vmem:[%s17821_s22 + $0x388] sm:$0xff]  ;;  %v174_v28 = vld [vmem:[%s17821_s22 + $0x380] sm:$0xff] }
  0x2d   :  { %v215_v47 = vld [vmem:[%s17821_s22 + $0x4c8] sm:$0xff] }
  0x2f   :  { %11519 = vmatpush1.bf16.msra.mxu0 %v11518_v31  ;;  %v99_v31 = vld [vmem:[%s17821_s22 + $0x128] sm:$0xff] }
  0x30   :  { %11520 = vmatprep.subr.bf16.mxu0 %v17754_v0 }
  0x33   :  { %11522 = vmatpush1.bf16.msra.mxu0 %v11521_v34  ;;  %v98_v34 = vld [vmem:[%s17821_s22 + $0x120] sm:$0xff] }
  0x34   :  { %11523 = vmatprep.subr.bf16.mxu0 %v17754_v0 }
  0x37   :  { %11525 = vmatpush1.bf16.msra.mxu0 %v11524_v37  ;;  %v310_v37 = vld [vmem:[%s17820_s20 + $0x1a0] sm:$0xff] }
  0x38   :  { %11526 = vmatprep.subr.bf16.mxu0 %v17754_v0 }
  0x3b   :  { %11528 = vmatpush1.bf16.msra.mxu0 %v11527_v40  ;;  %v11569_v40 = vpack.c.bf16 %v311_v38, %v310_v37  ;;  %v195_v37 = vld [vmem:[%s17821_s22 + $0x428] sm:$0xff]  ;;  %v194_v38 = vld [vmem:[%s17821_s22 + $0x420] sm:$0xff] }
  0x3c   :  { %11529 = vmatprep.subr.bf16.mxu0 %v17754_v0 }
  0x3f   :  { %11531 = vmatpush1.bf16.msra.mxu0 %v11530_v43  ;;  %v313_v43 = vld [vmem:[%s17820_s20 + $0x1b8] sm:$0xff] }
  0x40   :  { %11532 = vmatprep.subr.bf16.mxu0 %v17754_v0  ;;  %v11572_v45 = vpack.c.bf16 %v313_v43, %v312_v42  ;;  %v202_v42 = vld [vmem:[%s17821_s22 + $0x460] sm:$0xff]  ;;  %v207_v43 = vld [vmem:[%s17821_s22 + $0x488] sm:$0xff] }
  0x43   :  { %11534 = vmatpush1.bf16.msra.mxu0 %v11533_v46  ;;  %v111_v46 = vld [vmem:[%s17821_s22 + $0x188] sm:$0xff] }
  0x44   :  { %11535 = vmatprep.subr.bf16.mxu0 %v17754_v0 }
  0x47   :  { %11537 = vmatpush1.bf16.msra.mxu0 %v11536_v49  ;;  %v110_v49 = vld [vmem:[%s17821_s22 + $0x180] sm:$0xff] }
  0x48   :  { %11538 = vmatprep.subr.bf16.mxu0 %v17754_v0 }
  0x4a   :  { %394 = vmatmul.mubr.f32.vlgmr.msra.gmra.mrb[0].mxu0 %v62_v52  ;;  %v316_v52 = vld [vmem:[%s17820_s20 + $0x1d0] sm:$0xff] }
  0x4b   :  { %398 = vmatprep.mubr.f32.mxu0 %v67_v54  ;;  %11540 = vmatpush1.bf16.msra.mxu0 %v11539_v53  ;;  %v317_v53 = vld [vmem:[%s17820_s20 + $0x1d8] sm:$0xff]  ;;  %v114_v54 = vld [vmem:[%s17821_s22 + $0x1a0] sm:$0xff] }
  0x4c   :  { %11541 = vmatprep.subr.bf16.mxu0 %v17754_v0  ;;  %v11578_v55 = vpack.c.bf16 %v317_v53, %v316_v52  ;;  %v222_v52 = vld [vmem:[%s17821_s22 + $0x500] sm:$0xff]  ;;  %v227_v53 = vld [vmem:[%s17821_s22 + $0x528] sm:$0xff] }
  0x4e   :  { %399 = vmatmul.mubr.f32.gmra.mrb[2].mxu0 %v66_v57  ;;  %v318_v57 = vld [vmem:[%s17820_s20 + $0x1e0] sm:$0xff] }
  0x4f   :  { %403 = vmatprep.mubr.f32.mxu0 %v71_v59  ;;  %11543 = vmatpush1.bf16.msra.mxu0 %v11542_v58  ;;  %v319_v58 = vld [vmem:[%s17820_s20 + $0x1e8] sm:$0xff]  ;;  %v118_v59 = vld [vmem:[%s17821_s22 + $0x1c0] sm:$0xff] }
  0x50   :  { %11544 = vmatprep.subr.bf16.mxu0 %v17754_v0  ;;  %v11581_v60 = vpack.c.bf16 %v319_v58, %v318_v57  ;;  %v235_v57 = vld [vmem:[%s17821_s22 + $0x568] sm:$0xff]  ;;  %v234_v58 = vld [vmem:[%s17821_s22 + $0x560] sm:$0xff] }
  0x52   :  { %404 = vmatmul.mubr.f32.gmra.mrb[4].mxu0 %v70_v62  ;;  %v122_v62 = vld [vmem:[%s17821_s22 + $0x1e0] sm:$0xff] }
  0x53   :  { %408 = vmatprep.mubr.f32.mxu0 %v75_v1  ;;  %11546 = vmatpush1.bf16.msra.mxu0 %v11545_v63  ;;  %v127_v63 = vld [vmem:[%s17821_s22 + $0x208] sm:$0xff]  ;;  %v126_v1 = vld [vmem:[%s17821_s22 + $0x200] sm:$0xff] }
  0x54   :  { %11547 = vmatprep.subr.bf16.mxu0 %v17754_v0 }
  0x56   :  { %409 = vmatmul.mubr.f32.gmra.mrb[6].mxu0 %v74_v4  ;;  %v131_v4 = vld [vmem:[%s17821_s22 + $0x228] sm:$0xff] }
  0x57   :  { %413 = vmatprep.mubr.f32.mxu0 %v79_v6  ;;  %11549 = vmatpush1.bf16.msra.mxu0 %v11548_v5  ;;  %v11584_v5 = vpack.c.bf16 %v321_v3, %v320_v2  ;;  %v130_v6 = vld [vmem:[%s17821_s22 + $0x220] sm:$0xff]  ;;  %v251_v2 = vld [vmem:[%s17821_s22 + $0x5e8] sm:$0xff] }
  0x58   :  { %11550 = vmatprep.subr.bf16.mxu0 %v17754_v0  ;;  %v250_v3 = vld [vmem:[%s17821_s22 + $0x5e0] sm:$0xff] }
  0x5a   :  { %414 = vmatmul.mubr.f32.gmra.mrb[8].mxu0 %v78_v9  ;;  %v139_v9 = vld [vmem:[%s17821_s22 + $0x268] sm:$0xff] }
  0x5b   :  { %418 = vmatprep.mubr.f32.mxu0 %v83_v11  ;;  %11552 = vmatpush1.bf16.msra.mxu0 %v11551_v10  ;;  %v138_v10 = vld [vmem:[%s17821_s22 + $0x260] sm:$0xff]  ;;  %v143_v11 = vld [vmem:[%s17821_s22 + $0x288] sm:$0xff] }
  0x5c   :  { %11553 = vmatprep.subr.bf16.mxu0 %v17754_v0 }
  0x5e   :  { %419 = vmatmul.mubr.f32.gmra.mrb[10].mxu0 %v82_v14  ;;  %v146_v14 = vld [vmem:[%s17821_s22 + $0x2a0] sm:$0xff] }
  0x5f   :  { %423 = vmatprep.mubr.f32.mxu0 %v87_v16  ;;  %11555 = vmatpush1.bf16.msra.mxu0 %v11554_v15  ;;  %v151_v15 = vld [vmem:[%s17821_s22 + $0x2c8] sm:$0xff]  ;;  %v150_v16 = vld [vmem:[%s17821_s22 + $0x2c0] sm:$0xff] }
  0x60   :  { %11556 = vmatprep.subr.bf16.mxu0 %v17754_v0 }
  0x62   :  { %424 = vmatmul.mubr.f32.gmra.mrb[12].mxu0 %v86_v19  ;;  %v159_v19 = vld [vmem:[%s17821_s22 + $0x308] sm:$0xff] }
  0x63   :  { %428 = vmatprep.mubr.f32.mxu0 %v91_v21  ;;  %11558 = vmatpush1.bf16.msra.mxu0 %v11557_v20  ;;  %v158_v20 = vld [vmem:[%s17821_s22 + $0x300] sm:$0xff]  ;;  %v163_v21 = vld [vmem:[%s17821_s22 + $0x328] sm:$0xff] }
  0x64   :  { %11559 = vmatprep.subr.bf16.mxu0 %v17754_v0 }
  0x66   :  { %429 = vmatmul.mubr.f32.gmra.mrb[14].mxu0 %v90_v24  ;;  %v166_v24 = vld [vmem:[%s17821_s22 + $0x340] sm:$0xff] }
  0x67   :  { %433 = vmatprep.mubr.f32.mxu0 %v95_v26  ;;  %11561 = vmatpush1.bf16.msra.mxu0 %v11560_v25  ;;  %v171_v25 = vld [vmem:[%s17821_s22 + $0x368] sm:$0xff]  ;;  %v170_v26 = vld [vmem:[%s17821_s22 + $0x360] sm:$0xff] }
  0x68   :  { %11562 = vmatprep.subr.bf16.mxu0 %v17754_v0 }
  0x6a   :  { %434 = vmatmul.mubr.f32.gmra.mrb[16].mxu0 %v94_v29  ;;  %v179_v29 = vld [vmem:[%s17821_s22 + $0x3a8] sm:$0xff] }
  0x6b   :  { %438 = vmatprep.mubr.f32.mxu0 %v99_v31  ;;  %11564 = vmatpush1.bf16.msra.mxu0 %v11563_v30  ;;  %v178_v30 = vld [vmem:[%s17821_s22 + $0x3a0] sm:$0xff]  ;;  %v183_v31 = vld [vmem:[%s17821_s22 + $0x3c8] sm:$0xff] }
  0x6c   :  { %11565 = vmatprep.subr.bf16.mxu0 %v17754_v0 }
  0x6e   :  { %439 = vmatmul.mubr.f32.gmra.mrb[18].mxu0 %v98_v34  ;;  %v186_v34 = vld [vmem:[%s17821_s22 + $0x3e0] sm:$0xff] }
  0x6f   :  { %443 = vmatprep.mubr.f32.mxu0 %v103_v36  ;;  %11567 = vmatpush1.bf16.msra.mxu0 %v11566_v35  ;;  %v191_v35 = vld [vmem:[%s17821_s22 + $0x408] sm:$0xff]  ;;  %v190_v36 = vld [vmem:[%s17821_s22 + $0x400] sm:$0xff] }
  0x70   :  { %11568 = vmatprep.subr.bf16.mxu0 %v17754_v0 }
  0x72   :  { %444 = vmatmul.mubr.f32.gmra.mrb[20].mxu0 %v102_v39  ;;  %v199_v39 = vld [vmem:[%s17821_s22 + $0x448] sm:$0xff] }
  0x73   :  { %448 = vmatprep.mubr.f32.mxu0 %v107_v41  ;;  %11570 = vmatpush1.bf16.msra.mxu0 %v11569_v40  ;;  %v198_v40 = vld [vmem:[%s17821_s22 + $0x440] sm:$0xff]  ;;  %v203_v41 = vld [vmem:[%s17821_s22 + $0x468] sm:$0xff] }
  0x74   :  { %11571 = vmatprep.subr.bf16.mxu0 %v17754_v0 }
  0x76   :  { %449 = vmatmul.mubr.f32.gmra.mrb[22].mxu0 %v106_v44  ;;  %v206_v44 = vld [vmem:[%s17821_s22 + $0x480] sm:$0xff] }
  0x77   :  { %453 = vmatprep.mubr.f32.mxu0 %v111_v46  ;;  %11573 = vmatpush1.bf16.msra.mxu0 %v11572_v45  ;;  %v211_v45 = vld [vmem:[%s17821_s22 + $0x4a8] sm:$0xff]  ;;  %v210_v46 = vld [vmem:[%s17821_s22 + $0x4a0] sm:$0xff] }
  0x78   :  { %11574 = vmatprep.subr.bf16.mxu0 %v17754_v0 }
  0x7a   :  { %454 = vmatmul.mubr.f32.gmra.mrb[24].mxu0 %v110_v49  ;;  %v219_v49 = vld [vmem:[%s17821_s22 + $0x4e8] sm:$0xff] }
  0x7b   :  { %458 = vmatprep.mubr.f32.mxu0 %v115_v51  ;;  %11576 = vmatpush1.bf16.msra.mxu0 %v11575_v50  ;;  %v218_v50 = vld [vmem:[%s17821_s22 + $0x4e0] sm:$0xff]  ;;  %v223_v51 = vld [vmem:[%s17821_s22 + $0x508] sm:$0xff] }
  0x7c   :  { %11577 = vmatprep.subr.bf16.mxu0 %v17754_v0 }
  0x7e   :  { %459 = vmatmul.mubr.f32.gmra.mrb[26].mxu0 %v114_v54  ;;  %v226_v54 = vld [vmem:[%s17821_s22 + $0x520] sm:$0xff] }
  0x7f   :  { %463 = vmatprep.mubr.f32.mxu0 %v119_v56  ;;  %11579 = vmatpush1.bf16.msra.mxu0 %v11578_v55  ;;  %v231_v55 = vld [vmem:[%s17821_s22 + $0x548] sm:$0xff]  ;;  %v230_v56 = vld [vmem:[%s17821_s22 + $0x540] sm:$0xff] }
  0x80   :  { %11580 = vmatprep.subr.bf16.mxu0 %v17754_v0 }
  0x82   :  { %464 = vmatmul.mubr.f32.gmra.mrb[28].mxu0 %v118_v59  ;;  %v239_v59 = vld [vmem:[%s17821_s22 + $0x588] sm:$0xff] }
  0x83   :  { %468 = vmatprep.mubr.f32.mxu0 %v123_v61  ;;  %11582 = vmatpush1.bf16.msra.mxu0 %v11581_v60  ;;  %v238_v60 = vld [vmem:[%s17821_s22 + $0x580] sm:$0xff]  ;;  %v243_v61 = vld [vmem:[%s17821_s22 + $0x5a8] sm:$0xff] }
  0x84   :  { %11583 = vmatprep.subr.bf16.mxu0 %v17754_v0 }
  0x86   :  { %469 = vmatmul.mubr.f32.gmra.mrb[30].mxu0 %v122_v62  ;;  %v242_v62 = vld [vmem:[%s17821_s22 + $0x5a0] sm:$0xff] }
  0x87   :  { %473 = vmatprep.mubr.f32.mxu0 %v127_v63  ;;  %11585 = vmatpush1.bf16.msra.mxu0 %v11584_v5  ;;  %v247_v63 = vld [vmem:[%s17821_s22 + $0x5c8] sm:$0xff]  ;;  %v254_v5 = vld [vmem:[%s17821_s22 + $0x600] sm:$0xff] }
  0x8a   :  { %474 = vmatmul.mubr.f32.gmra.mrb[32].mxu0 %v126_v1  ;;  %v246_v1 = vld [vmem:[%s17821_s22 + $0x5c0] sm:$0xff] }
  0x8b   :  { %478 = vmatprep.mubr.f32.mxu0 %v131_v4  ;;  %v255_v4 = vld [vmem:[%s17821_s22 + $0x608] sm:$0xff] }
  0x8e   :  { %479 = vmatmul.mubr.f32.gmra.mrb[34].mxu0 %v130_v6  ;;  %v65_v6 = vld [vmem:[%s17821_s22 + $0x18] sm:$0xff] }
  0x8f   :  { %483 = vmatprep.mubr.f32.mxu0 %v135_v7  ;;  %v64_v7 = vld [vmem:[%s17821_s22 + $0x10] sm:$0xff] }
  0x92   :  { %484 = vmatmul.mubr.f32.gmra.mrb[36].mxu0 %v134_v8  ;;  %v69_v8 = vld [vmem:[%s17821_s22 + $0x38] sm:$0xff] }
  0x93   :  { %488 = vmatprep.mubr.f32.mxu0 %v139_v9  ;;  %v68_v9 = vld [vmem:[%s17821_s22 + $0x30] sm:$0xff] }
  0x96   :  { %489 = vmatmul.mubr.f32.gmra.mrb[38].mxu0 %v138_v10  ;;  %v73_v10 = vld [vmem:[%s17821_s22 + $0x58] sm:$0xff] }
  0x97   :  { %493 = vmatprep.mubr.f32.mxu0 %v143_v11  ;;  %v72_v11 = vld [vmem:[%s17821_s22 + $0x50] sm:$0xff] }
  0x9a   :  { %494 = vmatmul.mubr.f32.gmra.mrb[40].mxu0 %v142_v12  ;;  %v77_v12 = vld [vmem:[%s17821_s22 + $0x78] sm:$0xff] }
  0x9b   :  { %498 = vmatprep.mubr.f32.mxu0 %v147_v13  ;;  %v76_v13 = vld [vmem:[%s17821_s22 + $0x70] sm:$0xff] }
  0x9e   :  { %499 = vmatmul.mubr.f32.gmra.mrb[42].mxu0 %v146_v14  ;;  %v81_v14 = vld [vmem:[%s17821_s22 + $0x98] sm:$0xff] }
  0x9f   :  { %503 = vmatprep.mubr.f32.mxu0 %v151_v15  ;;  %v80_v15 = vld [vmem:[%s17821_s22 + $0x90] sm:$0xff] }
  0xa2   :  { %504 = vmatmul.mubr.f32.gmra.mrb[44].mxu0 %v150_v16  ;;  %v85_v16 = vld [vmem:[%s17821_s22 + $0xb8] sm:$0xff] }
  0xa3   :  { %508 = vmatprep.mubr.f32.mxu0 %v155_v17  ;;  %v84_v17 = vld [vmem:[%s17821_s22 + $0xb0] sm:$0xff] }
  0xa6   :  { %509 = vmatmul.mubr.f32.gmra.mrb[46].mxu0 %v154_v18  ;;  %v89_v18 = vld [vmem:[%s17821_s22 + $0xd8] sm:$0xff] }
  0xa7   :  { %513 = vmatprep.mubr.f32.mxu0 %v159_v19  ;;  %v88_v19 = vld [vmem:[%s17821_s22 + $0xd0] sm:$0xff] }
  0xaa   :  { %514 = vmatmul.mubr.f32.gmra.mrb[48].mxu0 %v158_v20  ;;  %v93_v20 = vld [vmem:[%s17821_s22 + $0xf8] sm:$0xff] }
  0xab   :  { %518 = vmatprep.mubr.f32.mxu0 %v163_v21  ;;  %v92_v21 = vld [vmem:[%s17821_s22 + $0xf0] sm:$0xff] }
  0xae   :  { %519 = vmatmul.mubr.f32.gmra.mrb[50].mxu0 %v162_v22  ;;  %v97_v22 = vld [vmem:[%s17821_s22 + $0x118] sm:$0xff] }
  0xaf   :  { %523 = vmatprep.mubr.f32.mxu0 %v167_v23  ;;  %v96_v23 = vld [vmem:[%s17821_s22 + $0x110] sm:$0xff] }
  0xb2   :  { %524 = vmatmul.mubr.f32.gmra.mrb[52].mxu0 %v166_v24  ;;  %v101_v24 = vld [vmem:[%s17821_s22 + $0x138] sm:$0xff] }
  0xb3   :  { %528 = vmatprep.mubr.f32.mxu0 %v171_v25  ;;  %v100_v25 = vld [vmem:[%s17821_s22 + $0x130] sm:$0xff] }
  0xb6   :  { %529 = vmatmul.mubr.f32.gmra.mrb[54].mxu0 %v170_v26  ;;  %v105_v26 = vld [vmem:[%s17821_s22 + $0x158] sm:$0xff] }
  0xb7   :  { %533 = vmatprep.mubr.f32.mxu0 %v175_v27  ;;  %v104_v27 = vld [vmem:[%s17821_s22 + $0x150] sm:$0xff] }
  0xba   :  { %534 = vmatmul.mubr.f32.gmra.mrb[56].mxu0 %v174_v28  ;;  %v109_v28 = vld [vmem:[%s17821_s22 + $0x178] sm:$0xff] }
  0xbb   :  { %538 = vmatprep.mubr.f32.mxu0 %v179_v29  ;;  %v108_v29 = vld [vmem:[%s17821_s22 + $0x170] sm:$0xff] }
  0xbe   :  { %539 = vmatmul.mubr.f32.gmra.mrb[58].mxu0 %v178_v30  ;;  %v113_v30 = vld [vmem:[%s17821_s22 + $0x198] sm:$0xff] }
  0xbf   :  { %543 = vmatprep.mubr.f32.mxu0 %v183_v31  ;;  %v112_v31 = vld [vmem:[%s17821_s22 + $0x190] sm:$0xff] }
  0xc2   :  { %544 = vmatmul.mubr.f32.gmra.mrb[60].mxu0 %v182_v32  ;;  %v117_v32 = vld [vmem:[%s17821_s22 + $0x1b8] sm:$0xff] }
  0xc3   :  { %548 = vmatprep.mubr.f32.mxu0 %v187_v33  ;;  %v116_v33 = vld [vmem:[%s17821_s22 + $0x1b0] sm:$0xff] }
  0xc6   :  { %549 = vmatmul.mubr.f32.gmra.mrb[62].mxu0 %v186_v34  ;;  %v121_v34 = vld [vmem:[%s17821_s22 + $0x1d8] sm:$0xff] }
  0xc7   :  { %553 = vmatprep.mubr.f32.mxu0 %v191_v35  ;;  %v120_v35 = vld [vmem:[%s17821_s22 + $0x1d0] sm:$0xff] }
  0xca   :  { %554 = vmatmul.mubr.f32.gmra.mrb[64].mxu0 %v190_v36  ;;  %v125_v36 = vld [vmem:[%s17821_s22 + $0x1f8] sm:$0xff] }
  0xcb   :  { %558 = vmatprep.mubr.f32.mxu0 %v195_v37  ;;  %v124_v37 = vld [vmem:[%s17821_s22 + $0x1f0] sm:$0xff] }
  0xce   :  { %559 = vmatmul.mubr.f32.gmra.mrb[66].mxu0 %v194_v38  ;;  %v129_v38 = vld [vmem:[%s17821_s22 + $0x218] sm:$0xff] }
  0xcf   :  { %563 = vmatprep.mubr.f32.mxu0 %v199_v39  ;;  %v128_v39 = vld [vmem:[%s17821_s22 + $0x210] sm:$0xff] }
  0xd2   :  { %564 = vmatmul.mubr.f32.gmra.mrb[68].mxu0 %v198_v40  ;;  %v133_v40 = vld [vmem:[%s17821_s22 + $0x238] sm:$0xff] }
  0xd3   :  { %568 = vmatprep.mubr.f32.mxu0 %v203_v41  ;;  %v132_v41 = vld [vmem:[%s17821_s22 + $0x230] sm:$0xff] }
  0xd6   :  { %569 = vmatmul.mubr.f32.gmra.mrb[70].mxu0 %v202_v42  ;;  %v137_v42 = vld [vmem:[%s17821_s22 + $0x258] sm:$0xff] }
  0xd7   :  { %573 = vmatprep.mubr.f32.mxu0 %v207_v43  ;;  %v136_v43 = vld [vmem:[%s17821_s22 + $0x250] sm:$0xff] }
  0xda   :  { %574 = vmatmul.mubr.f32.gmra.mrb[72].mxu0 %v206_v44  ;;  %v141_v44 = vld [vmem:[%s17821_s22 + $0x278] sm:$0xff] }
  0xdb   :  { %578 = vmatprep.mubr.f32.mxu0 %v211_v45  ;;  %v140_v45 = vld [vmem:[%s17821_s22 + $0x270] sm:$0xff] }
  0xde   :  { %579 = vmatmul.mubr.f32.gmra.mrb[74].mxu0 %v210_v46  ;;  %v145_v46 = vld [vmem:[%s17821_s22 + $0x298] sm:$0xff] }
  0xdf   :  { %583 = vmatprep.mubr.f32.mxu0 %v215_v47  ;;  %v144_v47 = vld [vmem:[%s17821_s22 + $0x290] sm:$0xff] }
  0xe2   :  { %584 = vmatmul.mubr.f32.gmra.mrb[76].mxu0 %v214_v48  ;;  %v149_v48 = vld [vmem:[%s17821_s22 + $0x2b8] sm:$0xff] }
  0xe3   :  { %588 = vmatprep.mubr.f32.mxu0 %v219_v49  ;;  %v148_v49 = vld [vmem:[%s17821_s22 + $0x2b0] sm:$0xff] }
  0xe6   :  { %589 = vmatmul.mubr.f32.gmra.mrb[78].mxu0 %v218_v50  ;;  %v153_v50 = vld [vmem:[%s17821_s22 + $0x2d8] sm:$0xff] }
  0xe7   :  { %593 = vmatprep.mubr.f32.mxu0 %v223_v51  ;;  %v152_v51 = vld [vmem:[%s17821_s22 + $0x2d0] sm:$0xff] }
  0xea   :  { %594 = vmatmul.mubr.f32.gmra.mrb[80].mxu0 %v222_v52  ;;  %v157_v52 = vld [vmem:[%s17821_s22 + $0x2f8] sm:$0xff] }
  0xeb   :  { %598 = vmatprep.mubr.f32.mxu0 %v227_v53  ;;  %v12991_v53 = vmov 0  }
  0xec   :  { %12970 = vset.pattern.permute.xlu0 %v12991_v53  ;;  %12971 = vset.pattern.permute.xlu1 %v12991_v53 }
  0xee   :  { %599 = vmatmul.mubr.f32.gmra.mrb[82].mxu0 %v226_v54  ;;  %v1101_v54 = vld [vmem:[%s17822_s1] sm:$0xff] }
  0xef   :  { %603 = vmatprep.mubr.f32.mxu0 %v231_v55  ;;  %1111 = vperm.xlu0 %12970, %v1101_v54   ;;  %v156_v55 = vld [vmem:[%s17821_s22 + $0x2f0] sm:$0xff] }
  0xf2   :  { %604 = vmatmul.mubr.f32.gmra.mrb[84].mxu0 %v230_v56  ;;  %v161_v56 = vld [vmem:[%s17821_s22 + $0x318] sm:$0xff] }
  0xf3   :  { %608 = vmatprep.mubr.f32.mxu0 %v235_v57  ;;  %v1102_v57 = vld [vmem:[%s17822_s1 + $0x8] sm:$0xff] }
  0xf4   :  { %1114 = vperm.xlu0 %12970, %v1102_v57  }
  0xf6   :  { %609 = vmatmul.mubr.f32.gmra.mrb[86].mxu0 %v234_v58  ;;  %v160_v58 = vld [vmem:[%s17821_s22 + $0x310] sm:$0xff] }
  0xf7   :  { %613 = vmatprep.mubr.f32.mxu0 %v239_v59  ;;  %v165_v59 = vld [vmem:[%s17821_s22 + $0x338] sm:$0xff] }
  0xfa   :  { %614 = vmatmul.mubr.f32.gmra.mrb[88].mxu0 %v238_v60  ;;  %v1103_v60 = vld [vmem:[%s17822_s1 + $0x10] sm:$0xff] }
  0xfb   :  { %618 = vmatprep.mubr.f32.mxu0 %v243_v61  ;;  %1117 = vperm.xlu1 %12971, %v1103_v60   ;;  %v164_v61 = vld [vmem:[%s17821_s22 + $0x330] sm:$0xff] }
  0xfe   :  { %619 = vmatmul.mubr.f32.gmra.mrb[90].mxu0 %v242_v62  ;;  %v169_v62 = vld [vmem:[%s17821_s22 + $0x358] sm:$0xff] }
  0xff   :  { %623 = vmatprep.mubr.f32.mxu0 %v247_v63  ;;  %v1104_v63 = vld [vmem:[%s17822_s1 + $0x18] sm:$0xff] }
 0x100   :  { %1120 = vperm.xlu1 %12971, %v1104_v63  }
 0x102   :  { %624 = vmatmul.mubr.f32.gmra.mrb[92].mxu0 %v246_v1  ;;  %v168_v1 = vld [vmem:[%s17821_s22 + $0x350] sm:$0xff] }
 0x103   :  { %628 = vmatprep.mubr.f32.mxu0 %v251_v2  ;;  %v173_v2 = vld [vmem:[%s17821_s22 + $0x378] sm:$0xff] }
 0x106   :  { %629 = vmatmul.mubr.f32.gmra.mrb[94].mxu0 %v250_v3  ;;  %v1105_v3 = vld [vmem:[%s17822_s1 + $0x20] sm:$0xff] }
 0x107   :  { %633 = vmatprep.mubr.f32.mxu0 %v255_v4  ;;  %1123 = vperm.xlu0 %12970, %v1105_v3   ;;  %v172_v4 = vld [vmem:[%s17821_s22 + $0x370] sm:$0xff] }
 0x10a   :  { %634 = vmatmul.mubr.f32.gmra.mrb[96].mxu0 %v254_v5  ;;  %v177_v5 = vld [vmem:[%s17821_s22 + $0x398] sm:$0xff] }
 0x10b   :  { %703 = vmatprep.mubr.f32.mxu0 %v65_v6  ;;  %v1106_v6 = vld [vmem:[%s17822_s1 + $0x28] sm:$0xff] }
 0x10c   :  { %1126 = vperm.xlu1 %12971, %v1106_v6  }
 0x10e   :  { %704 = vmatmul.mubr.f32.vlgmr.msra.gmra.mrb[0].mxu0 %v64_v7  ;;  %v176_v7 = vld [vmem:[%s17821_s22 + $0x390] sm:$0xff] }
 0x10f   :  { %708 = vmatprep.mubr.f32.mxu0 %v69_v8  ;;  %v181_v8 = vld [vmem:[%s17821_s22 + $0x3b8] sm:$0xff] }
 0x112   :  { %709 = vmatmul.mubr.f32.gmra.mrb[2].mxu0 %v68_v9  ;;  %v1107_v9 = vld [vmem:[%s17822_s1 + $0x30] sm:$0xff] }
 0x113   :  { %713 = vmatprep.mubr.f32.mxu0 %v73_v10  ;;  %1129 = vperm.xlu0 %12970, %v1107_v9   ;;  %v180_v10 = vld [vmem:[%s17821_s22 + $0x3b0] sm:$0xff] }
 0x116   :  { %714 = vmatmul.mubr.f32.gmra.mrb[4].mxu0 %v72_v11  ;;  %v185_v11 = vld [vmem:[%s17821_s22 + $0x3d8] sm:$0xff] }
 0x117   :  { %718 = vmatprep.mubr.f32.mxu0 %v77_v12  ;;  %v1108_v12 = vld [vmem:[%s17822_s1 + $0x38] sm:$0xff] }
 0x118   :  { %1132 = vperm.xlu1 %12971, %v1108_v12  }
 0x11a   :  { %719 = vmatmul.mubr.f32.gmra.mrb[6].mxu0 %v76_v13  ;;  %v1109_v13 = vld [vmem:[%s17822_s1 + $0x40] sm:$0xff]  ;;  %s12994_s1 = smov 16  }
 0x11b   :  { %723 = vmatprep.mubr.f32.mxu0 %v81_v14  ;;  %1135 = vperm.xlu0 %12970, %v1109_v13   ;;  %v184_v14 = vld [vmem:[%s17821_s22 + $0x3d0] sm:$0xff] }
 0x11e   :  { %724 = vmatmul.mubr.f32.gmra.mrb[8].mxu0 %v80_v15  ;;  %v189_v15 = vld [vmem:[%s17821_s22 + $0x3f8] sm:$0xff] }
 0x11f   :  { %728 = vmatprep.mubr.f32.mxu0 %v85_v16  ;;  %v188_v16 = vld [vmem:[%s17821_s22 + $0x3f0] sm:$0xff] }
 0x122   :  { %729 = vmatmul.mubr.f32.gmra.mrb[10].mxu0 %v84_v17  ;;  %v193_v17 = vld [vmem:[%s17821_s22 + $0x418] sm:$0xff] }
 0x123   :  { %733 = vmatprep.mubr.f32.mxu0 %v89_v18  ;;  %v192_v18 = vld [vmem:[%s17821_s22 + $0x410] sm:$0xff] }
 0x126   :  { %734 = vmatmul.mubr.f32.gmra.mrb[12].mxu0 %v88_v19  ;;  %v197_v19 = vld [vmem:[%s17821_s22 + $0x438] sm:$0xff] }
 0x127   :  { %738 = vmatprep.mubr.f32.mxu0 %v93_v20  ;;  %v196_v20 = vld [vmem:[%s17821_s22 + $0x430] sm:$0xff] }
 0x12a   :  { %739 = vmatmul.mubr.f32.gmra.mrb[14].mxu0 %v92_v21  ;;  %v201_v21 = vld [vmem:[%s17821_s22 + $0x458] sm:$0xff] }
 0x12b   :  { %743 = vmatprep.mubr.f32.mxu0 %v97_v22  ;;  %v200_v22 = vld [vmem:[%s17821_s22 + $0x450] sm:$0xff] }
 0x12e   :  { %744 = vmatmul.mubr.f32.gmra.mrb[16].mxu0 %v96_v23  ;;  %v205_v23 = vld [vmem:[%s17821_s22 + $0x478] sm:$0xff] }
 0x12f   :  { %748 = vmatprep.mubr.f32.mxu0 %v101_v24  ;;  %v204_v24 = vld [vmem:[%s17821_s22 + $0x470] sm:$0xff] }
 0x132   :  { %749 = vmatmul.mubr.f32.gmra.mrb[18].mxu0 %v100_v25  ;;  %v209_v25 = vld [vmem:[%s17821_s22 + $0x498] sm:$0xff] }
 0x133   :  { %753 = vmatprep.mubr.f32.mxu0 %v105_v26  ;;  %v208_v26 = vld [vmem:[%s17821_s22 + $0x490] sm:$0xff] }
 0x136   :  { %754 = vmatmul.mubr.f32.gmra.mrb[20].mxu0 %v104_v27  ;;  %v213_v27 = vld [vmem:[%s17821_s22 + $0x4b8] sm:$0xff] }
 0x137   :  { %758 = vmatprep.mubr.f32.mxu0 %v109_v28  ;;  %v212_v28 = vld [vmem:[%s17821_s22 + $0x4b0] sm:$0xff] }
 0x13a   :  { %759 = vmatmul.mubr.f32.gmra.mrb[22].mxu0 %v108_v29  ;;  %v217_v29 = vld [vmem:[%s17821_s22 + $0x4d8] sm:$0xff] }
 0x13b   :  { %763 = vmatprep.mubr.f32.mxu0 %v113_v30  ;;  %v216_v30 = vld [vmem:[%s17821_s22 + $0x4d0] sm:$0xff] }
 0x13e   :  { %764 = vmatmul.mubr.f32.gmra.mrb[24].mxu0 %v112_v31  ;;  %v221_v31 = vld [vmem:[%s17821_s22 + $0x4f8] sm:$0xff] }
 0x13f   :  { %768 = vmatprep.mubr.f32.mxu0 %v117_v32  ;;  %v220_v32 = vld [vmem:[%s17821_s22 + $0x4f0] sm:$0xff] }
 0x142   :  { %769 = vmatmul.mubr.f32.gmra.mrb[26].mxu0 %v116_v33  ;;  %v225_v33 = vld [vmem:[%s17821_s22 + $0x518] sm:$0xff] }
 0x143   :  { %773 = vmatprep.mubr.f32.mxu0 %v121_v34  ;;  %v224_v34 = vld [vmem:[%s17821_s22 + $0x510] sm:$0xff] }
 0x146   :  { %774 = vmatmul.mubr.f32.gmra.mrb[28].mxu0 %v120_v35  ;;  %v229_v35 = vld [vmem:[%s17821_s22 + $0x538] sm:$0xff] }
 0x147   :  { %778 = vmatprep.mubr.f32.mxu0 %v125_v36  ;;  %v228_v36 = vld [vmem:[%s17821_s22 + $0x530] sm:$0xff] }
 0x14a   :  { %779 = vmatmul.mubr.f32.gmra.mrb[30].mxu0 %v124_v37  ;;  %v233_v37 = vld [vmem:[%s17821_s22 + $0x558] sm:$0xff] }
 0x14b   :  { %783 = vmatprep.mubr.f32.mxu0 %v129_v38  ;;  %v232_v38 = vld [vmem:[%s17821_s22 + $0x550] sm:$0xff] }
 0x14e   :  { %784 = vmatmul.mubr.f32.gmra.mrb[32].mxu0 %v128_v39  ;;  %v237_v39 = vld [vmem:[%s17821_s22 + $0x578] sm:$0xff] }
 0x14f   :  { %788 = vmatprep.mubr.f32.mxu0 %v133_v40  ;;  %v236_v40 = vld [vmem:[%s17821_s22 + $0x570] sm:$0xff] }
 0x152   :  { %789 = vmatmul.mubr.f32.gmra.mrb[34].mxu0 %v132_v41  ;;  %v241_v41 = vld [vmem:[%s17821_s22 + $0x598] sm:$0xff] }
 0x153   :  { %793 = vmatprep.mubr.f32.mxu0 %v137_v42  ;;  %v240_v42 = vld [vmem:[%s17821_s22 + $0x590] sm:$0xff] }
 0x156   :  { %794 = vmatmul.mubr.f32.gmra.mrb[36].mxu0 %v136_v43  ;;  %v245_v43 = vld [vmem:[%s17821_s22 + $0x5b8] sm:$0xff] }
 0x157   :  { %798 = vmatprep.mubr.f32.mxu0 %v141_v44  ;;  %v244_v44 = vld [vmem:[%s17821_s22 + $0x5b0] sm:$0xff] }
 0x15a   :  { %799 = vmatmul.mubr.f32.gmra.mrb[38].mxu0 %v140_v45  ;;  %v249_v45 = vld [vmem:[%s17821_s22 + $0x5d8] sm:$0xff] }
 0x15b   :  { %803 = vmatprep.mubr.f32.mxu0 %v145_v46  ;;  %v248_v46 = vld [vmem:[%s17821_s22 + $0x5d0] sm:$0xff] }
 0x15e   :  { %804 = vmatmul.mubr.f32.gmra.mrb[40].mxu0 %v144_v47  ;;  %v253_v47 = vld [vmem:[%s17821_s22 + $0x5f8] sm:$0xff] }
 0x15f   :  { %808 = vmatprep.mubr.f32.mxu0 %v149_v48  ;;  %v252_v48 = vld [vmem:[%s17821_s22 + $0x5f0] sm:$0xff] }
 0x162   :  { %809 = vmatmul.mubr.f32.gmra.mrb[42].mxu0 %v148_v49  ;;  %v257_v49 = vld [vmem:[%s17821_s22 + $0x618] sm:$0xff] }
 0x163   :  { %813 = vmatprep.mubr.f32.mxu0 %v153_v50  ;;  %v256_v50 = vld [vmem:[%s17821_s22 + $0x610] sm:$0xff] }
 0x166   :  { %814 = vmatmul.mubr.f32.gmra.mrb[44].mxu0 %v152_v51  ;;  %v13945_v51 = vld [vmem:[%s17823_s28] ss:$0 sm:$0xff] }
 0x167   :  { %818 = vmatprep.mubr.f32.mxu0 %v157_v52  ;;  %v17753_v52 = vlaneseq }
 0x169   :  { %v13948_v54 = vand.u32 127, %v17753_v52 }
 0x16a   :  { %819 = vmatmul.mubr.f32.gmra.mrb[46].mxu0 %v156_v55 }
 0x16b   :  { %823 = vmatprep.mubr.f32.mxu0 %v161_v56  ;;  %17824 = vst [vmem:[#allocation5_spill] sm:$0xff] %v13948_v54  ;;  %v13952_v57 = vadd.s32 128, %v13948_v54 }
 0x16e   :  { %824 = vmatmul.mubr.f32.gmra.mrb[48].mxu0 %v160_v58  ;;  %v13954_v58 = vpop.permute.xlu0 %1111 }
 0x16f   :  { %828 = vmatprep.mubr.f32.mxu0 %v165_v59  ;;  %v13958_v60 = vsub.s32 %v13952_v57, %v13954_v58 }
 0x171   :  { %vm1174_vm1 = vcmp.eq.s32.totalorder %v13958_v60, 0  ;;  %vm3329_vm2 = vcmp.eq.s32.totalorder %v13958_v60, 16 }
 0x172   :  { %829 = vmatmul.mubr.f32.gmra.mrb[50].mxu0 %v164_v61 }
 0x173   :  { %833 = vmatprep.mubr.f32.mxu0 %v169_v62 }
 0x176   :  { %834 = vmatmul.mubr.f32.gmra.mrb[52].mxu0 %v168_v1 }
 0x177   :  { %838 = vmatprep.mubr.f32.mxu0 %v173_v2  ;;  %v17814_v2 = vmov 1.0  }
 0x178   :  { %9279 = vmatprep.mubr.msk.f32.mxu1 %vm1174_vm1, %v17814_v2 }
 0x17a   :  { %839 = vmatmul.mubr.f32.gmra.mrb[54].mxu0 %v172_v4 }
 0x17b   :  { %843 = vmatprep.mubr.f32.mxu0 %v177_v5 }
 0x17e   :  { %844 = vmatmul.mubr.f32.gmra.mrb[56].mxu0 %v176_v7 }
 0x17f   :  { %848 = vmatprep.mubr.f32.mxu0 %v181_v8 }
 0x182   :  { %849 = vmatmul.mubr.f32.gmra.mrb[58].mxu0 %v180_v10 }
 0x183   :  { %853 = vmatprep.mubr.f32.mxu0 %v185_v11 }
 0x186   :  { %854 = vmatmul.mubr.f32.gmra.mrb[60].mxu0 %v184_v14 }
 0x187   :  { %858 = vmatprep.mubr.f32.mxu0 %v189_v15 }
 0x18a   :  { %859 = vmatmul.mubr.f32.gmra.mrb[62].mxu0 %v188_v16 }
 0x18b   :  { %863 = vmatprep.mubr.f32.mxu0 %v193_v17 }
 0x18e   :  { %864 = vmatmul.mubr.f32.gmra.mrb[64].mxu0 %v192_v18 }
 0x18f   :  { %868 = vmatprep.mubr.f32.mxu0 %v197_v19 }
 0x192   :  { %869 = vmatmul.mubr.f32.gmra.mrb[66].mxu0 %v196_v20 }
 0x193   :  { %873 = vmatprep.mubr.f32.mxu0 %v201_v21 }
 0x196   :  { %874 = vmatmul.mubr.f32.gmra.mrb[68].mxu0 %v200_v22 }
 0x197   :  { %878 = vmatprep.mubr.f32.mxu0 %v205_v23 }
 0x19a   :  { %879 = vmatmul.mubr.f32.gmra.mrb[70].mxu0 %v204_v24 }
 0x19b   :  { %883 = vmatprep.mubr.f32.mxu0 %v209_v25 }
 0x19e   :  { %884 = vmatmul.mubr.f32.gmra.mrb[72].mxu0 %v208_v26 }
 0x19f   :  { %888 = vmatprep.mubr.f32.mxu0 %v213_v27 }
 0x1a2   :  { %889 = vmatmul.mubr.f32.gmra.mrb[74].mxu0 %v212_v28 }
 0x1a3   :  { %893 = vmatprep.mubr.f32.mxu0 %v217_v29 }
 0x1a6   :  { %894 = vmatmul.mubr.f32.gmra.mrb[76].mxu0 %v216_v30 }
 0x1a7   :  { %898 = vmatprep.mubr.f32.mxu0 %v221_v31 }
 0x1aa   :  { %899 = vmatmul.mubr.f32.gmra.mrb[78].mxu0 %v220_v32 }
 0x1ab   :  { %903 = vmatprep.mubr.f32.mxu0 %v225_v33 }
 0x1ae   :  { %904 = vmatmul.mubr.f32.gmra.mrb[80].mxu0 %v224_v34 }
 0x1af   :  { %908 = vmatprep.mubr.f32.mxu0 %v229_v35 }
 0x1b2   :  { %909 = vmatmul.mubr.f32.gmra.mrb[82].mxu0 %v228_v36 }
 0x1b3   :  { %913 = vmatprep.mubr.f32.mxu0 %v233_v37 }
 0x1b6   :  { %914 = vmatmul.mubr.f32.gmra.mrb[84].mxu0 %v232_v38 }
 0x1b7   :  { %918 = vmatprep.mubr.f32.mxu0 %v237_v39 }
 0x1ba   :  { %919 = vmatmul.mubr.f32.gmra.mrb[86].mxu0 %v236_v40 }
 0x1bb   :  { %923 = vmatprep.mubr.f32.mxu0 %v241_v41 }
 0x1be   :  { %924 = vmatmul.mubr.f32.gmra.mrb[88].mxu0 %v240_v42 }
 0x1bf   :  { %928 = vmatprep.mubr.f32.mxu0 %v245_v43 }
 0x1c2   :  { %929 = vmatmul.mubr.f32.gmra.mrb[90].mxu0 %v244_v44 }
 0x1c3   :  { %933 = vmatprep.mubr.f32.mxu0 %v249_v45 }
 0x1c6   :  { %934 = vmatmul.mubr.f32.gmra.mrb[92].mxu0 %v248_v46 }
 0x1c7   :  { %938 = vmatprep.mubr.f32.mxu0 %v253_v47 }
 0x1ca   :  { %939 = vmatmul.mubr.f32.gmra.mrb[94].mxu0 %v252_v48 }
 0x1cb   :  { %943 = vmatprep.mubr.f32.mxu0 %v257_v49 }
 0x1ce   :  { %944 = vmatmul.mubr.f32.gmra.mrb[96].mxu0 %v256_v50 }
 0x1cf   :  { %9495 = vmatprep.mubr.msk.f32.mxu0 %vm3329_vm2, %v17814_v2 }
 0x1e1   :  { %v705_v53 = vpop.f32.mrb[0].mxu0 }
 0x1e2   :  { %v12810_v55 = vadd.f32 %v13945_v51, %v705_v53  ;;  %v707_v56 = vpop.f32.mrb[1].mxu0 }
 0x1e4   :  { %v998_v61 = vmul.f32 0.01, %v12810_v55  ;;  %vm949_vm0 = vcmp.gt.f32.partialorder %v12810_v55, 0.0 }
 0x1e5   :  { %v710_v59 = vpop.f32.mrb[2].mxu0 }
 0x1e6   :  { %v12811_v62 = vadd.f32 %v13945_v51, %v710_v59  ;;  %v712_v63 = vpop.f32.mrb[3].mxu0  ;;  %v1047_v4 = vsel %vm949_vm0, %v12810_v55, %v998_v61 }
 0x1e8   :  { %vm950_vm3 = vcmp.gt.f32.partialorder %v12811_v62, 0.0  ;;  %v999_v1 = vmul.f32 0.01, %v12811_v62 }
 0x1e9   :  { %v715_v3 = vpop.f32.mrb[4].mxu0 }
 0x1ea   :  { %v1048_v5 = vsel %vm950_vm3, %v12811_v62, %v999_v1  ;;  %v12812_v6 = vadd.f32 %v13945_v51, %v715_v3  ;;  %v717_v7 = vpop.f32.mrb[5].mxu0 }
 0x1eb   :  { %v13966_v8 = vpack.c.bf16 %v1048_v5, %v1047_v4 }
 0x1ec   :  { %v1000_v10 = vmul.f32 0.01, %v12812_v6  ;;  %vm951_vm4 = vcmp.gt.f32.partialorder %v12812_v6, 0.0 }
 0x1ed   :  { %v720_v9 = vpop.f32.mrb[6].mxu0 }
 0x1ee   :  { %v12813_v11 = vadd.f32 %v13945_v51, %v720_v9  ;;  %v722_v12 = vpop.f32.mrb[7].mxu0  ;;  %v1049_v15 = vsel %vm951_vm4, %v12812_v6, %v1000_v10 }
 0x1f0   :  { %vm952_vm5 = vcmp.gt.f32.partialorder %v12813_v11, 0.0  ;;  %v1001_v13 = vmul.f32 0.01, %v12813_v11 }
 0x1f1   :  { %v725_v14 = vpop.f32.mrb[8].mxu0 }
 0x1f2   :  { %v1050_v16 = vsel %vm952_vm5, %v12813_v11, %v1001_v13  ;;  %v12814_v17 = vadd.f32 %v13945_v51, %v725_v14  ;;  %v727_v18 = vpop.f32.mrb[9].mxu0 }
 0x1f3   :  { %v13970_v19 = vpack.c.bf16 %v1050_v16, %v1049_v15 }
 0x1f4   :  { %v1002_v21 = vmul.f32 0.01, %v12814_v17  ;;  %vm953_vm6 = vcmp.gt.f32.partialorder %v12814_v17, 0.0 }
 0x1f5   :  { %v730_v20 = vpop.f32.mrb[10].mxu0 }
 0x1f6   :  { %v12815_v22 = vadd.f32 %v13945_v51, %v730_v20  ;;  %v732_v23 = vpop.f32.mrb[11].mxu0  ;;  %v1051_v26 = vsel %vm953_vm6, %v12814_v17, %v1002_v21 }
 0x1f8   :  { %vm954_vm7 = vcmp.gt.f32.partialorder %v12815_v22, 0.0  ;;  %v1003_v24 = vmul.f32 0.01, %v12815_v22 }
 0x1f9   :  { %v735_v25 = vpop.f32.mrb[12].mxu0 }
 0x1fa   :  { %v1052_v27 = vsel %vm954_vm7, %v12815_v22, %v1003_v24  ;;  %v12816_v28 = vadd.f32 %v13945_v51, %v735_v25  ;;  %v737_v29 = vpop.f32.mrb[13].mxu0 }
 0x1fb   :  { %v13974_v30 = vpack.c.bf16 %v1052_v27, %v1051_v26 }
 0x1fc   :  { %v1004_v32 = vmul.f32 0.01, %v12816_v28  ;;  %vm955_vm8 = vcmp.gt.f32.partialorder %v12816_v28, 0.0 }
 0x1fd   :  { %v740_v31 = vpop.f32.mrb[14].mxu0 }
 0x1fe   :  { %v12817_v33 = vadd.f32 %v13945_v51, %v740_v31  ;;  %v742_v34 = vpop.f32.mrb[15].mxu0  ;;  %v1053_v37 = vsel %vm955_vm8, %v12816_v28, %v1004_v32 }
 0x200   :  { %vm956_vm9 = vcmp.gt.f32.partialorder %v12817_v33, 0.0  ;;  %v1005_v35 = vmul.f32 0.01, %v12817_v33 }
 0x201   :  { %v745_v36 = vpop.f32.mrb[16].mxu0 }
 0x202   :  { %v1054_v38 = vsel %vm956_vm9, %v12817_v33, %v1005_v35  ;;  %v12818_v39 = vadd.f32 %v13945_v51, %v745_v36  ;;  %v747_v40 = vpop.f32.mrb[17].mxu0 }
 0x203   :  { %v13978_v41 = vpack.c.bf16 %v1054_v38, %v1053_v37 }
 0x204   :  { %v1006_v43 = vmul.f32 0.01, %v12818_v39  ;;  %vm957_vm10 = vcmp.gt.f32.partialorder %v12818_v39, 0.0 }
 0x205   :  { %v750_v42 = vpop.f32.mrb[18].mxu0 }
 0x206   :  { %v12819_v44 = vadd.f32 %v13945_v51, %v750_v42  ;;  %v752_v45 = vpop.f32.mrb[19].mxu0  ;;  %v1055_v48 = vsel %vm957_vm10, %v12818_v39, %v1006_v43 }
 0x208   :  { %vm958_vm11 = vcmp.gt.f32.partialorder %v12819_v44, 0.0  ;;  %v1007_v46 = vmul.f32 0.01, %v12819_v44 }
 0x209   :  { %v755_v47 = vpop.f32.mrb[20].mxu0 }
 0x20a   :  { %v1056_v49 = vsel %vm958_vm11, %v12819_v44, %v1007_v46  ;;  %v12820_v50 = vadd.f32 %v13945_v51, %v755_v47  ;;  %v757_v53 = vpop.f32.mrb[21].mxu0 }
 0x20b   :  { %v13982_v55 = vpack.c.bf16 %v1056_v49, %v1055_v48 }
 0x20c   :  { %v1008_v59 = vmul.f32 0.01, %v12820_v50  ;;  %vm959_vm12 = vcmp.gt.f32.partialorder %v12820_v50, 0.0 }
 0x20d   :  { %v760_v56 = vpop.f32.mrb[22].mxu0 }
 0x20e   :  { %v12821_v61 = vadd.f32 %v13945_v51, %v760_v56  ;;  %v762_v62 = vpop.f32.mrb[23].mxu0  ;;  %v1057_v3 = vsel %vm959_vm12, %v12820_v50, %v1008_v59 }
 0x210   :  { %vm960_vm13 = vcmp.gt.f32.partialorder %v12821_v61, 0.0  ;;  %v1009_v63 = vmul.f32 0.01, %v12821_v61 }
 0x211   :  { %v765_v1 = vpop.f32.mrb[24].mxu0 }
 0x212   :  { %v1058_v4 = vsel %vm960_vm13, %v12821_v61, %v1009_v63  ;;  %v12822_v5 = vadd.f32 %v13945_v51, %v765_v1  ;;  %v767_v6 = vpop.f32.mrb[25].mxu0 }
 0x213   :  { %v13986_v7 = vpack.c.bf16 %v1058_v4, %v1057_v3 }
 0x214   :  { %v1010_v10 = vmul.f32 0.01, %v12822_v5  ;;  %vm961_vm14 = vcmp.gt.f32.partialorder %v12822_v5, 0.0 }
 0x215   :  { %v770_v9 = vpop.f32.mrb[26].mxu0 }
 0x216   :  { %v12823_v11 = vadd.f32 %v13945_v51, %v770_v9  ;;  %v772_v12 = vpop.f32.mrb[27].mxu0  ;;  %v1059_v15 = vsel %vm961_vm14, %v12822_v5, %v1010_v10 }
 0x218   :  { %vm962_vm15 = vcmp.gt.f32.partialorder %v12823_v11, 0.0  ;;  %v1011_v13 = vmul.f32 0.01, %v12823_v11 }
 0x219   :  { %v775_v14 = vpop.f32.mrb[28].mxu0 }
 0x21a   :  { %v1060_v16 = vsel %vm962_vm15, %v12823_v11, %v1011_v13  ;;  %v12824_v17 = vadd.f32 %v13945_v51, %v775_v14  ;;  %v777_v18 = vpop.f32.mrb[29].mxu0 }
 0x21b   :  { %v13990_v20 = vpack.c.bf16 %v1060_v16, %v1059_v15 }
 0x21c   :  { %v1012_v22 = vmul.f32 0.01, %v12824_v17  ;;  %vm963_vm0 = vcmp.gt.f32.partialorder %v12824_v17, 0.0 }
 0x21d   :  { %v780_v21 = vpop.f32.mrb[30].mxu0 }
 0x21e   :  { %v12825_v23 = vadd.f32 %v13945_v51, %v780_v21  ;;  %v782_v24 = vpop.f32.mrb[31].mxu0  ;;  %v1061_v27 = vsel %vm963_vm0, %v12824_v17, %v1012_v22 }
 0x220   :  { %vm964_vm1 = vcmp.gt.f32.partialorder %v12825_v23, 0.0  ;;  %v1013_v25 = vmul.f32 0.01, %v12825_v23 }
 0x221   :  { %v785_v26 = vpop.f32.mrb[32].mxu0 }
 0x222   :  { %v1062_v28 = vsel %vm964_vm1, %v12825_v23, %v1013_v25  ;;  %v12826_v29 = vadd.f32 %v13945_v51, %v785_v26  ;;  %v787_v31 = vpop.f32.mrb[33].mxu0 }
 0x223   :  { %v13994_v32 = vpack.c.bf16 %v1062_v28, %v1061_v27 }
 0x224   :  { %v1014_v34 = vmul.f32 0.01, %v12826_v29  ;;  %vm965_vm2 = vcmp.gt.f32.partialorder %v12826_v29, 0.0 }
 0x225   :  { %v790_v33 = vpop.f32.mrb[34].mxu0 }
 0x226   :  { %v12827_v35 = vadd.f32 %v13945_v51, %v790_v33  ;;  %v792_v36 = vpop.f32.mrb[35].mxu0  ;;  %v1063_v39 = vsel %vm965_vm2, %v12826_v29, %v1014_v34 }
 0x228   :  { %vm966_vm3 = vcmp.gt.f32.partialorder %v12827_v35, 0.0  ;;  %v1015_v37 = vmul.f32 0.01, %v12827_v35 }
 0x229   :  { %v795_v38 = vpop.f32.mrb[36].mxu0 }
 0x22a   :  { %v1064_v40 = vsel %vm966_vm3, %v12827_v35, %v1015_v37  ;;  %v12828_v42 = vadd.f32 %v13945_v51, %v795_v38  ;;  %v797_v43 = vpop.f32.mrb[37].mxu0 }
 0x22b   :  { %v13998_v44 = vpack.c.bf16 %v1064_v40, %v1063_v39 }
 0x22c   :  { %v1016_v46 = vmul.f32 0.01, %v12828_v42  ;;  %vm967_vm4 = vcmp.gt.f32.partialorder %v12828_v42, 0.0 }
 0x22d   :  { %v800_v45 = vpop.f32.mrb[38].mxu0  ;;  %11587 = vmatprep.subr.bf16.mxu1 %v13998_v44  ;;  %11923 = vmatprep.subr.bf16.mxu0 %v13998_v44 }
 0x22e   :  { %v12829_v47 = vadd.f32 %v13945_v51, %v800_v45  ;;  %v802_v48 = vpop.f32.mrb[39].mxu0  ;;  %11589 = vmatpush3.bf16.msra.mxu1 %v13966_v8  ;;  %11925 = vmatpush3.bf16.msra.mxu0 %v13966_v8  ;;  %v1065_v53 = vsel %vm967_vm4, %v12828_v42, %v1016_v46 }
 0x230   :  { %vm968_vm5 = vcmp.gt.f32.partialorder %v12829_v47, 0.0  ;;  %v1017_v49 = vmul.f32 0.01, %v12829_v47 }
 0x231   :  { %v805_v50 = vpop.f32.mrb[40].mxu0 }
 0x232   :  { %v1066_v56 = vsel %vm968_vm5, %v12829_v47, %v1017_v49  ;;  %v12830_v59 = vadd.f32 %v13945_v51, %v805_v50  ;;  %v807_v61 = vpop.f32.mrb[41].mxu0 }
 0x233   :  { %v14006_v62 = vpack.c.bf16 %v1066_v56, %v1065_v53 }
 0x234   :  { %v1018_v1 = vmul.f32 0.01, %v12830_v59  ;;  %vm969_vm6 = vcmp.gt.f32.partialorder %v12830_v59, 0.0 }
 0x235   :  { %v810_v63 = vpop.f32.mrb[42].mxu0  ;;  %11591 = vmatprep.subr.bf16.mxu1 %v14006_v62  ;;  %11927 = vmatprep.subr.bf16.mxu0 %v14006_v62 }
 0x236   :  { %v12831_v3 = vadd.f32 %v13945_v51, %v810_v63  ;;  %v812_v4 = vpop.f32.mrb[43].mxu0  ;;  %11593 = vmatpush3.bf16.msra.mxu1 %v13970_v19  ;;  %11929 = vmatpush3.bf16.msra.mxu0 %v13970_v19  ;;  %v1067_v9 = vsel %vm969_vm6, %v12830_v59, %v1018_v1 }
 0x238   :  { %vm970_vm7 = vcmp.gt.f32.partialorder %v12831_v3, 0.0  ;;  %v1019_v5 = vmul.f32 0.01, %v12831_v3 }
 0x239   :  { %v815_v6 = vpop.f32.mrb[44].mxu0 }
 0x23a   :  { %v1068_v10 = vsel %vm970_vm7, %v12831_v3, %v1019_v5  ;;  %v12832_v11 = vadd.f32 %v13945_v51, %v815_v6  ;;  %v817_v12 = vpop.f32.mrb[45].mxu0 }
 0x23b   :  { %v14014_v13 = vpack.c.bf16 %v1068_v10, %v1067_v9 }
 0x23c   :  { %v1020_v15 = vmul.f32 0.01, %v12832_v11  ;;  %vm971_vm8 = vcmp.gt.f32.partialorder %v12832_v11, 0.0 }
 0x23d   :  { %v820_v14 = vpop.f32.mrb[46].mxu0  ;;  %11595 = vmatprep.subr.bf16.mxu1 %v14014_v13  ;;  %11931 = vmatprep.subr.bf16.mxu0 %v14014_v13 }
 0x23e   :  { %v12833_v16 = vadd.f32 %v13945_v51, %v820_v14  ;;  %v822_v17 = vpop.f32.mrb[47].mxu0  ;;  %11597 = vmatpush3.bf16.msra.mxu1 %v13974_v30  ;;  %11933 = vmatpush3.bf16.msra.mxu0 %v13974_v30  ;;  %v1069_v22 = vsel %vm971_vm8, %v12832_v11, %v1020_v15 }
 0x240   :  { %vm972_vm9 = vcmp.gt.f32.partialorder %v12833_v16, 0.0  ;;  %v1021_v18 = vmul.f32 0.01, %v12833_v16 }
 0x241   :  { %v825_v21 = vpop.f32.mrb[48].mxu0 }
 0x242   :  { %v1070_v23 = vsel %vm972_vm9, %v12833_v16, %v1021_v18  ;;  %v12834_v24 = vadd.f32 %v13945_v51, %v825_v21  ;;  %v827_v25 = vpop.f32.mrb[49].mxu0  ;;  %v14053_v18 = vpop.permute.xlu0 %1114 }
 0x243   :  { %v14022_v26 = vpack.c.bf16 %v1070_v23, %v1069_v22 }
 0x244   :  { %v1022_v28 = vmul.f32 0.01, %v12834_v24  ;;  %vm973_vm10 = vcmp.gt.f32.partialorder %v12834_v24, 0.0 }
 0x245   :  { %v830_v27 = vpop.f32.mrb[50].mxu0  ;;  %11599 = vmatprep.subr.bf16.mxu1 %v14022_v26  ;;  %11935 = vmatprep.subr.bf16.mxu0 %v14022_v26 }
 0x246   :  { %v12835_v29 = vadd.f32 %v13945_v51, %v830_v27  ;;  %v832_v31 = vpop.f32.mrb[51].mxu0  ;;  %11601 = vmatpush3.bf16.msra.mxu1 %v13978_v41  ;;  %11937 = vmatpush3.bf16.msra.mxu0 %v13978_v41  ;;  %v1071_v35 = vsel %vm973_vm10, %v12834_v24, %v1022_v28  ;;  %v14058_v27 = vsub.s32 %v13948_v54, %v13954_v58  ;;  %v14060_v28 = vpop.permute.xlu1 %1117 }
 0x247   :  { %v14066_v31 = vsub.s32 %v13952_v57, %v14053_v18 }
 0x248   :  { %vm974_vm11 = vcmp.gt.f32.partialorder %v12835_v29, 0.0  ;;  %v1023_v33 = vmul.f32 0.01, %v12835_v29  ;;  %vm1173_vm2 = vcmp.eq.s32.totalorder %v14058_v27, 0  ;;  %vm3328_vm3 = vcmp.eq.s32.totalorder %v14058_v27, 16 }
 0x249   :  { %v835_v34 = vpop.f32.mrb[52].mxu0  ;;  %vm1178_vm5 = vcmp.eq.s32.totalorder %v14066_v31, 0  ;;  %vm3333_vm7 = vcmp.eq.s32.totalorder %v14066_v31, 16 }
 0x24a   :  { %v1072_v36 = vsel %vm974_vm11, %v12835_v29, %v1023_v33  ;;  %v12836_v37 = vadd.f32 %v13945_v51, %v835_v34  ;;  %v837_v38 = vpop.f32.mrb[53].mxu0  ;;  %v14072_v34 = vsub.s32 %v13948_v54, %v14053_v18 }
 0x24b   :  { %v14030_v39 = vpack.c.bf16 %v1072_v36, %v1071_v35 }
 0x24c   :  { %v1024_v42 = vmul.f32 0.01, %v12836_v37  ;;  %vm975_vm12 = vcmp.gt.f32.partialorder %v12836_v37, 0.0  ;;  %vm1177_vm8 = vcmp.eq.s32.totalorder %v14072_v34, 0  ;;  %vm3332_vm9 = vcmp.eq.s32.totalorder %v14072_v34, 16 }
 0x24d   :  { %v840_v40 = vpop.f32.mrb[54].mxu0  ;;  %11603 = vmatprep.subr.bf16.mxu1 %v14030_v39  ;;  %11939 = vmatprep.subr.bf16.mxu0 %v14030_v39 }
 0x24e   :  { %v12837_v43 = vadd.f32 %v13945_v51, %v840_v40  ;;  %v842_v45 = vpop.f32.mrb[55].mxu0  ;;  %11605 = vmatpush3.bf16.msra.mxu1 %v13982_v55  ;;  %11941 = vmatpush3.bf16.msra.mxu0 %v13982_v55  ;;  %v1073_v48 = vsel %vm975_vm12, %v12836_v37, %v1024_v42  ;;  %v14084_v40 = vsub.s32 %v13952_v57, %v14060_v28  ;;  %v14087_v42 = vpop.permute.xlu1 %1120 }
 0x24f   :  { %v14093_v45 = vsub.s32 %v13948_v54, %v14060_v28 }
 0x250   :  { %vm976_vm13 = vcmp.gt.f32.partialorder %v12837_v43, 0.0  ;;  %v1025_v46 = vmul.f32 0.01, %v12837_v43  ;;  %vm1182_vm10 = vcmp.eq.s32.totalorder %v14084_v40, 0  ;;  %vm3337_vm11 = vcmp.eq.s32.totalorder %v14084_v40, 16 }
 0x251   :  { %v845_v47 = vpop.f32.mrb[56].mxu0  ;;  %vm1181_vm12 = vcmp.eq.s32.totalorder %v14093_v45, 0 }
 0x252   :  { %v1074_v49 = vsel %vm976_vm13, %v12837_v43, %v1025_v46  ;;  %v12838_v50 = vadd.f32 %v13945_v51, %v845_v47  ;;  %v847_v53 = vpop.f32.mrb[57].mxu0  ;;  %vm3336_vm13 = vcmp.eq.s32.totalorder %v14093_v45, 16 }
 0x253   :  { %v14038_v56 = vpack.c.bf16 %v1074_v49, %v1073_v48  ;;  %v14110_v53 = vsub.s32 %v13952_v57, %v14087_v42 }
 0x254   :  { %v1026_v61 = vmul.f32 0.01, %v12838_v50  ;;  %vm977_vm14 = vcmp.gt.f32.partialorder %v12838_v50, 0.0 }
 0x255   :  { %v850_v59 = vpop.f32.mrb[58].mxu0  ;;  %11607 = vmatprep.subr.bf16.mxu1 %v14038_v56  ;;  %11943 = vmatprep.subr.bf16.mxu0 %v14038_v56 }
 0x256   :  { %v12839_v63 = vadd.f32 %v13945_v51, %v850_v59  ;;  %v852_v1 = vpop.f32.mrb[59].mxu0  ;;  %11609 = vmatpush3.bf16.msra.mxu1 %v13986_v7  ;;  %11945 = vmatpush3.bf16.msra.mxu0 %v13986_v7  ;;  %v1075_v5 = vsel %vm977_vm14, %v12838_v50, %v1026_v61  ;;  %v14117_v61 = vsub.s32 %v13948_v54, %v14087_v42 }
 0x258   :  { %vm978_vm15 = vcmp.gt.f32.partialorder %v12839_v63, 0.0  ;;  %v1027_v3 = vmul.f32 0.01, %v12839_v63  ;;  %17826 = vst [vmem:[#allocation7_spill] sm:$0xff] %v14117_v61 }
 0x259   :  { %v855_v4 = vpop.f32.mrb[60].mxu0 }
 0x25a   :  { %v1076_v6 = vsel %vm978_vm15, %v12839_v63, %v1027_v3  ;;  %v12840_v9 = vadd.f32 %v13945_v51, %v855_v4  ;;  %v857_v10 = vpop.f32.mrb[61].mxu0  ;;  %v14120_v63 = vpop.permute.xlu0 %1123  ;;  %vm1186_vm15 = vcmp.eq.s32.totalorder %v14110_v53, 0 }
 0x25b   :  { %v14046_v11 = vpack.c.bf16 %v1076_v6, %v1075_v5  ;;  %v14135_v6 = vsub.s32 %v13952_v57, %v14120_v63 }
 0x25c   :  { %v1028_v14 = vmul.f32 0.01, %v12840_v9  ;;  %vm979_vm0 = vcmp.gt.f32.partialorder %v12840_v9, 0.0 }
 0x25d   :  { %v860_v12 = vpop.f32.mrb[62].mxu0  ;;  %11611 = vmatprep.subr.bf16.mxu1 %v14046_v11  ;;  %11947 = vmatprep.subr.bf16.mxu0 %v14046_v11 }
 0x25e   :  { %v12841_v15 = vadd.f32 %v13945_v51, %v860_v12  ;;  %v862_v16 = vpop.f32.mrb[63].mxu0  ;;  %11613 = vmatpush3.bf16.msra.mxu1 %v13990_v20  ;;  %11949 = vmatpush3.bf16.msra.mxu0 %v13990_v20  ;;  %v1077_v22 = vsel %vm979_vm0, %v12840_v9, %v1028_v14  ;;  %v14139_v9 = vpop.permute.xlu1 %1126  ;;  %v14145_v12 = vsub.s32 %v13948_v54, %v14120_v63 }
 0x260   :  { %vm980_vm1 = vcmp.gt.f32.partialorder %v12841_v15, 0.0  ;;  %v1029_v17 = vmul.f32 0.01, %v12841_v15  ;;  %17827 = vst [vmem:[#allocation8_spill] sm:$0xff] %v14145_v12 }
 0x261   :  { %v865_v21 = vpop.f32.mrb[64].mxu0 }
 0x262   :  { %v1078_v23 = vsel %vm980_vm1, %v12841_v15, %v1029_v17  ;;  %v12842_v24 = vadd.f32 %v13945_v51, %v865_v21  ;;  %v867_v25 = vpop.f32.mrb[65].mxu0  ;;  %vm3341_vm1 = vcmp.eq.s32.totalorder %v14110_v53, 16 }
 0x263   :  { %v14062_v29 = vpack.c.bf16 %v1078_v23, %v1077_v22  ;;  %v14163_v22 = vsub.s32 %v13952_v57, %v14139_v9  ;;  %v14173_v25 = vpop.permute.xlu0 %1129 }
 0x264   :  { %v1030_v35 = vmul.f32 0.01, %v12842_v24  ;;  %vm981_vm4 = vcmp.gt.f32.partialorder %v12842_v24, 0.0 }
 0x265   :  { %v870_v33 = vpop.f32.mrb[66].mxu0  ;;  %11615 = vmatprep.subr.bf16.mxu1 %v14062_v29  ;;  %11951 = vmatprep.subr.bf16.mxu0 %v14062_v29 }
 0x266   :  { %v12843_v36 = vadd.f32 %v13945_v51, %v870_v33  ;;  %v872_v37 = vpop.f32.mrb[67].mxu0  ;;  %11617 = vmatpush3.bf16.msra.mxu1 %v13994_v32  ;;  %11953 = vmatpush3.bf16.msra.mxu0 %v13994_v32  ;;  %v1079_v46 = vsel %vm981_vm4, %v12842_v24, %v1030_v35  ;;  %vm1190_vm4 = vcmp.eq.s32.totalorder %v14135_v6, 0  ;;  %v14170_v24 = vsub.s32 %v13948_v54, %v14139_v9 }
 0x267   :  { %11979 = vmatprep.subr.bf16.mxu0 %v13998_v44  ;;  %11618 = vmatprep.subr.bf16.mxu1 %v17754_v0 }
 0x268   :  { %vm982_vm6 = vcmp.gt.f32.partialorder %v12843_v36, 0.0  ;;  %v1031_v38 = vmul.f32 0.01, %v12843_v36  ;;  %17829 = vst [vmem:[#allocation10_spill] sm:$0xff] %v14170_v24 }
 0x269   :  { %v875_v43 = vpop.f32.mrb[68].mxu0  ;;  %9280 = vmatmul.mubr.msk.f32.vlgmr.msra.gmra.mrb[0].mxu1 %vm1173_vm2, %v17814_v2  ;;  %9496 = vmatmul.mubr.msk.f32.vlgmr.msra.gmra.mrb[98].mxu0 %vm3328_vm3, %v17814_v2  ;;  %vm1185_vm2 = vcmp.eq.s32.totalorder %v14117_v61, 0  ;;  %vm3340_vm3 = vcmp.eq.s32.totalorder %v14117_v61, 16 }
 0x26a   :  { %v1080_v47 = vsel %vm982_vm6, %v12843_v36, %v1031_v38  ;;  %v12844_v48 = vadd.f32 %v13945_v51, %v875_v43  ;;  %v877_v49 = vpop.f32.mrb[69].mxu0  ;;  %11981 = vmatpush3.bf16.msra.mxu0 %v13966_v8  ;;  %9281 = vmatprep.mubr.msk.f32.mxu1 %vm1178_vm5, %v17814_v2  ;;  %vm3345_vm5 = vcmp.eq.s32.totalorder %v14135_v6, 16  ;;  %vm1189_vm6 = vcmp.eq.s32.totalorder %v14145_v12, 0  ;;  %v14192_v43 = vpop.permute.xlu1 %1132 }
 0x26b   :  { %v14102_v50 = vpack.c.bf16 %v1080_v47, %v1079_v46  ;;  %11983 = vmatprep.subr.bf16.mxu0 %v14006_v62  ;;  %9497 = vmatprep.mubr.msk.f32.mxu0 %vm3333_vm7, %v17814_v2  ;;  %vm3344_vm7 = vcmp.eq.s32.totalorder %v14145_v12, 16  ;;  %v14188_v38 = vsub.s32 %v13952_v57, %v14173_v25  ;;  %v14198_v47 = vsub.s32 %v13948_v54, %v14173_v25 }
 0x26c   :  { %v1032_v1 = vmul.f32 0.01, %v12844_v48  ;;  %vm983_vm14 = vcmp.gt.f32.partialorder %v12844_v48, 0.0 }
 0x26d   :  { %17825 = vst [vmem:[#allocation6_spill] sm:$0xff] %v14102_v50  ;;  %v880_v59 = vpop.f32.mrb[70].mxu0  ;;  %9282 = vmatmul.mubr.msk.f32.gmra.mrb[2].mxu1 %vm1177_vm8, %v17814_v2  ;;  %9498 = vmatmul.mubr.msk.f32.gmra.mrb[100].mxu0 %vm3332_vm9, %v17814_v2  ;;  %vm1194_vm9 = vcmp.eq.s32.totalorder %v14163_v22, 0  ;;  %17830 = vst [vmem:[#allocation11_spill] sm:$0xff] %v14188_v38 }
 0x26e   :  { %v12845_v3 = vadd.f32 %v13945_v51, %v880_v59  ;;  %11620 = vmatpush1.bf16.msra.mxu1 %v14102_v50  ;;  %v882_v4 = vpop.f32.mrb[71].mxu0  ;;  %11985 = vmatpush3.bf16.msra.mxu0 %v13970_v19  ;;  %v1081_v14 = vsel %vm983_vm14, %v12844_v48, %v1032_v1  ;;  %17831 = vst [vmem:[#allocation12_spill] sm:$0xff] %v14198_v47  ;;  %vm1198_vm14 = vcmp.eq.s32.totalorder %v14188_v38, 0 }
 0x26f   :  { %11987 = vmatprep.subr.bf16.mxu0 %v14014_v13  ;;  %9283 = vmatprep.mubr.msk.f32.mxu1 %vm1182_vm10, %v17814_v2  ;;  %v14216_v4 = vsub.s32 %v13952_v57, %v14192_v43 }
 0x270   :  { %vm984_vm0 = vcmp.gt.f32.partialorder %v12845_v3, 0.0  ;;  %v1033_v5 = vmul.f32 0.01, %v12845_v3  ;;  %9499 = vmatprep.mubr.msk.f32.mxu0 %vm3337_vm11, %v17814_v2  ;;  %11621 = vmatprep.subr.bf16.mxu1 %v17754_v0  ;;  %vm3349_vm11 = vcmp.eq.s32.totalorder %v14163_v22, 16 }
 0x271   :  { %v885_v10 = vpop.f32.mrb[72].mxu0  ;;  %9284 = vmatmul.mubr.msk.f32.gmra.mrb[4].mxu1 %vm1181_vm12, %v17814_v2  ;;  %9500 = vmatmul.mubr.msk.f32.gmra.mrb[102].mxu0 %vm3336_vm13, %v17814_v2  ;;  %vm1193_vm12 = vcmp.eq.s32.totalorder %v14170_v24, 0  ;;  %vm3348_vm13 = vcmp.eq.s32.totalorder %v14170_v24, 16 }
 0x272   :  { %v1082_v15 = vsel %vm984_vm0, %v12845_v3, %v1033_v5  ;;  %v12846_v16 = vadd.f32 %v13945_v51, %v885_v10  ;;  %v887_v17 = vpop.f32.mrb[73].mxu0  ;;  %11989 = vmatpush3.bf16.msra.mxu0 %v13974_v30  ;;  %9285 = vmatprep.mubr.msk.f32.mxu1 %vm1186_vm15, %v17814_v2  ;;  %v14219_v5 = vpop.permute.xlu0 %1135  ;;  %v14222_v10 = vadd.s32 384, %v13948_v54  ;;  %vm3353_vm15 = vcmp.eq.s32.totalorder %v14188_v38, 16 }
 0x273   :  { %v14155_v21 = vpack.c.bf16 %v1082_v15, %v1081_v14  ;;  %11991 = vmatprep.subr.bf16.mxu0 %v14022_v26  ;;  %9501 = vmatprep.mubr.msk.f32.mxu0 %vm3341_vm1, %v17814_v2  ;;  %v14230_v15 = vsub.s32 %v13948_v54, %v14192_v43  ;;  %vm1197_vm0 = vcmp.eq.s32.totalorder %v14198_v47, 0  ;;  %vm3352_vm1 = vcmp.eq.s32.totalorder %v14198_v47, 16 }
 0x274   :  { %v1034_v33 = vmul.f32 0.01, %v12846_v16  ;;  %vm985_vm8 = vcmp.gt.f32.partialorder %v12846_v16, 0.0 }
 0x275   :  { %17828 = vst [vmem:[#allocation9_spill] sm:$0xff] %v14155_v21  ;;  %v890_v23 = vpop.f32.mrb[74].mxu0  ;;  %9286 = vmatmul.mubr.msk.f32.gmra.mrb[6].mxu1 %vm1185_vm2, %v17814_v2  ;;  %9502 = vmatmul.mubr.msk.f32.gmra.mrb[104].mxu0 %vm3340_vm3, %v17814_v2  ;;  %vm1202_vm3 = vcmp.eq.s32.totalorder %v14216_v4, 0 }
 0x276   :  { %v12847_v35 = vadd.f32 %v13945_v51, %v890_v23  ;;  %11623 = vmatpush1.bf16.msra.mxu1 %v14155_v21  ;;  %v892_v36 = vpop.f32.mrb[75].mxu0  ;;  %11993 = vmatpush3.bf16.msra.mxu0 %v13978_v41  ;;  %v1083_v48 = vsel %vm985_vm8, %v12846_v16, %v1034_v33  ;;  %v14244_v33 = vsub.s32 %v13952_v57, %v14219_v5 }
 0x277   :  { %11995 = vmatprep.subr.bf16.mxu0 %v14030_v39  ;;  %9287 = vmatprep.mubr.msk.f32.mxu1 %vm1190_vm4, %v17814_v2  ;;  %v14252_v36 = vsub.s32 %v14222_v10, %v13954_v58 }
 0x278   :  { %vm986_vm10 = vcmp.gt.f32.partialorder %v12847_v35, 0.0  ;;  %v1035_v37 = vmul.f32 0.01, %v12847_v35  ;;  %9503 = vmatprep.mubr.msk.f32.mxu0 %vm3345_vm5, %v17814_v2  ;;  %11624 = vmatprep.subr.bf16.mxu1 %v17754_v0  ;;  %vm3357_vm5 = vcmp.eq.s32.totalorder %v14216_v4, 16  ;;  %vm1206_vm8 = vcmp.eq.s32.totalorder %v14244_v33, 0 }
 0x279   :  { %v895_v46 = vpop.f32.mrb[76].mxu0  ;;  %9288 = vmatmul.mubr.msk.f32.gmra.mrb[8].mxu1 %vm1189_vm6, %v17814_v2  ;;  %9504 = vmatmul.mubr.msk.f32.gmra.mrb[106].mxu0 %vm3344_vm7, %v17814_v2  ;;  %17833 = vst [vmem:[#allocation14_spill] sm:$0xff] %v14252_v36  ;;  %vm1201_vm6 = vcmp.eq.s32.totalorder %v14230_v15, 0  ;;  %vm3356_vm7 = vcmp.eq.s32.totalorder %v14230_v15, 16 }
 0x27a   :  { %v1084_v49 = vsel %vm986_vm10, %v12847_v35, %v1035_v37  ;;  %v12848_v59 = vadd.f32 %v13945_v51, %v895_v46  ;;  %v897_v1 = vpop.f32.mrb[77].mxu0  ;;  %11997 = vmatpush3.bf16.msra.mxu0 %v13982_v55  ;;  %9289 = vmatprep.mubr.msk.f32.mxu1 %vm1194_vm9, %v17814_v2  ;;  %vm3361_vm9 = vcmp.eq.s32.totalorder %v14244_v33, 16  ;;  %vm1176_vm10 = vcmp.eq.s32.totalorder %v14252_v36, 0 }
 0x27b   :  { %v14208_v3 = vpack.c.bf16 %v1084_v49, %v1083_v48  ;;  %11999 = vmatprep.subr.bf16.mxu0 %v14038_v56  ;;  %9505 = vmatprep.mubr.msk.f32.mxu0 %vm3349_vm11, %v17814_v2 }
 0x27c   :  { %v1036_v16 = vmul.f32 0.01, %v12848_v59  ;;  %vm987_vm2 = vcmp.gt.f32.partialorder %v12848_v59, 0.0 }
 0x27d   :  { %17832 = vst [vmem:[#allocation13_spill] sm:$0xff] %v14208_v3  ;;  %v900_v14 = vpop.f32.mrb[78].mxu0  ;;  %9290 = vmatmul.mubr.msk.f32.gmra.mrb[10].mxu1 %vm1193_vm12, %v17814_v2  ;;  %9506 = vmatmul.mubr.msk.f32.gmra.mrb[108].mxu0 %vm3348_vm13, %v17814_v2  ;;  %vm1245_vm12 = vcmask 64512  }
 0x27e   :  { %v12849_v17 = vadd.f32 %v13945_v51, %v900_v14  ;;  %11626 = vmatpush1.bf16.msra.mxu1 %v14208_v3  ;;  %v902_v23 = vpop.f32.mrb[79].mxu0  ;;  %12001 = vmatpush3.bf16.msra.mxu0 %v13986_v7  ;;  %v1085_v57 = vsel %vm987_vm2, %v12848_v59, %v1036_v16  ;;  %v14270_v59 = vsub.s32 %v13948_v54, %v14219_v5  ;;  %vm3698_vm2 = vcmp.eq.s32.totalorder %v14066_v31, 17 }
 0x27f   :  { %12003 = vmatprep.subr.bf16.mxu0 %v14046_v11  ;;  %9291 = vmatprep.mubr.msk.f32.mxu1 %vm1198_vm14, %v17814_v2 }
 0x280   :  { %vm988_vm4 = vcmp.gt.f32.partialorder %v12849_v17, 0.0  ;;  %v1037_v35 = vmul.f32 0.01, %v12849_v17  ;;  %9507 = vmatprep.mubr.msk.f32.mxu0 %vm3353_vm15, %v17814_v2  ;;  %11627 = vmatprep.subr.bf16.mxu1 %v17754_v0  ;;  %vm1205_vm14 = vcmp.eq.s32.totalorder %v14270_v59, 0  ;;  %vm3360_vm15 = vcmp.eq.s32.totalorder %v14270_v59, 16 }
 0x281   :  { %v905_v37 = vpop.f32.mrb[80].mxu0  ;;  %9292 = vmatmul.mubr.msk.f32.gmra.mrb[12].mxu1 %vm1197_vm0, %v17814_v2  ;;  %9508 = vmatmul.mubr.msk.f32.gmra.mrb[110].mxu0 %vm3352_vm1, %v17814_v2  ;;  %vm3694_vm0 = vcmp.eq.s32.totalorder %v13958_v60, 17  ;;  %vm3693_vm1 = vcmp.eq.s32.totalorder %v14058_v27, 17 }
 0x282   :  { %v1086_v46 = vsel %vm988_vm4, %v12849_v17, %v1037_v35  ;;  %v12850_v48 = vadd.f32 %v13945_v51, %v905_v37  ;;  %v907_v49 = vpop.f32.mrb[81].mxu0  ;;  %12005 = vmatpush3.bf16.msra.mxu0 %v13990_v20  ;;  %9293 = vmatprep.mubr.msk.f32.mxu1 %vm1202_vm3, %v17814_v2 }
 0x283   :  { %v14263_v1 = vpack.c.bf16 %v1086_v46, %v1085_v57  ;;  %12007 = vmatprep.subr.bf16.mxu0 %v14062_v29  ;;  %9509 = vmatprep.mubr.msk.f32.mxu0 %vm3357_vm5, %v17814_v2  ;;  %v17758_v57 = vmov 0.0   ;;  %vm3697_vm5 = vcmp.eq.s32.totalorder %v14072_v34, 17 }
 0x284   :  { %v1038_v16 = vmul.f32 0.01, %v12850_v48  ;;  %vm989_vm11 = vcmp.gt.f32.partialorder %v12850_v48, 0.0  ;;  %v1212_v46 = vsel %vm1176_vm10, 1.0, %v17758_v57 }
 0x285   :  { %17834 = vst [vmem:[#allocation15_spill] sm:$0xff] %v14263_v1  ;;  %v910_v14 = vpop.f32.mrb[82].mxu0  ;;  %9294 = vmatmul.mubr.msk.f32.gmra.mrb[14].mxu1 %vm1201_vm6, %v17814_v2  ;;  %9510 = vmatmul.mubr.msk.f32.gmra.mrb[112].mxu0 %vm3356_vm7, %v17814_v2  ;;  %vm3702_vm6 = vcmp.eq.s32.totalorder %v14084_v40, 17  ;;  %vm3701_vm7 = vcmp.eq.s32.totalorder %v14093_v45, 17 }
 0x286   :  { %v12851_v17 = vadd.f32 %v13945_v51, %v910_v14  ;;  %11629 = vmatpush1.bf16.msra.mxu1 %v14263_v1  ;;  %v912_v23 = vpop.f32.mrb[83].mxu0  ;;  %9295 = vmatprep.mubr.msk.f32.mxu1 %vm1206_vm8, %v17814_v2  ;;  %v1087_v49 = vsel %vm989_vm11, %v12850_v48, %v1038_v16  ;;  %vm3706_vm8 = vcmp.eq.s32.totalorder %v14110_v53, 17  ;;  %vm3705_vm11 = vcmp.eq.s32.totalorder %v14117_v61, 17 }
 0x287   :  { %9511 = vmatprep.mubr.msk.f32.mxu0 %vm3361_vm9, %v17814_v2  ;;  %12009 = vmatpush3.bf16.msra.mxu0 %v13994_v32 }
 0x288   :  { %vm990_vm13 = vcmp.gt.f32.partialorder %v12851_v17, 0.0  ;;  %v1039_v35 = vmul.f32 0.01, %v12851_v17  ;;  %12035 = vmatprep.subr.bf16.mxu0 %v13998_v44  ;;  %11630 = vmatprep.subr.bf16.mxu1 %v17754_v0 }
 0x289   :  { %v915_v37 = vpop.f32.mrb[84].mxu0  ;;  %9296 = vmatmul.mubr.msk.f32.gmra.mrb[16].mxu1 %vm1205_vm14, %v17814_v2  ;;  %9512 = vmatmul.mubr.msk.f32.gmra.mrb[114].mxu0 %vm3360_vm15, %v17814_v2  ;;  %vm3709_vm14 = vcmp.eq.s32.totalorder %v14145_v12, 17  ;;  %vm3714_vm15 = vcmp.eq.s32.totalorder %v14163_v22, 17 }
 0x28a   :  { %v1088_v14 = vsel %vm990_vm13, %v12851_v17, %v1039_v35  ;;  %v12852_v23 = vadd.f32 %v13945_v51, %v915_v37  ;;  %v917_v52 = vpop.f32.mrb[85].mxu0  ;;  %9297 = vmatprep.mubr.msk.f32.mxu1 %vm1245_vm12, %v1212_v46  ;;  %9531 = vmatprep.mubr.msk.f32.mxu0 %vm3694_vm0, %v17814_v2  ;;  %v17836_v17 = vmov 0.0|0.0   ;;  %vm3710_vm13 = vcmp.eq.s32.totalorder %v14135_v6, 17 }
 0x28b   :  { %v14293_v0 = vpack.c.bf16 %v1088_v14, %v1087_v49 }
 0x28c   :  { %v1040_v48 = vmul.f32 0.01, %v12852_v23  ;;  %vm991_vm3 = vcmp.gt.f32.partialorder %v12852_v23, 0.0 }
 0x28d   :  { %17835 = vst [vmem:[#allocation16_spill] sm:$0xff] %v14293_v0  ;;  %v920_v36 = vpop.f32.mrb[86].mxu0  ;;  %11632 = vmatpush1.bf16.msra.mxu1 %v14293_v0  ;;  %9532 = vmatmul.mubr.msk.f32.vlgmr.msra.gmra.mrb[116].mxu0 %vm3693_vm1, %v17814_v2 }
 0x28e   :  { %v12853_v16 = vadd.f32 %v13945_v51, %v920_v36  ;;  %12037 = vmatpush3.bf16.msra.mxu0 %v13966_v8  ;;  %v922_v52 = vpop.f32.mrb[87].mxu0  ;;  %9533 = vmatprep.mubr.msk.f32.mxu0 %vm3698_vm2, %v17814_v2  ;;  %v1089_v36 = vsel %vm991_vm3, %v12852_v23, %v1040_v48  ;;  %vm3713_vm2 = vcmp.eq.s32.totalorder %v14170_v24, 17  ;;  %vm3718_vm3 = vcmp.eq.s32.totalorder %v14188_v38, 17 }
 0x28f   :  { %12039 = vmatprep.subr.bf16.mxu0 %v14006_v62  ;;  %11633 = vmatprep.subr.bf16.mxu1 %v17836_v17 }
 0x290   :  { %vm992_vm4 = vcmp.gt.f32.partialorder %v12853_v16, 0.0  ;;  %v1041_v35 = vmul.f32 0.01, %v12853_v16 }
 0x291   :  { %v925_v37 = vpop.f32.mrb[88].mxu0  ;;  %9534 = vmatmul.mubr.msk.f32.gmra.mrb[118].mxu0 %vm3697_vm5, %v17814_v2 }
 0x292   :  { %v1090_v46 = vsel %vm992_vm4, %v12853_v16, %v1041_v35  ;;  %v12854_v49 = vadd.f32 %v13945_v51, %v925_v37  ;;  %12041 = vmatpush3.bf16.msra.mxu0 %v13970_v19  ;;  %v927_v14 = vpop.f32.mrb[89].mxu0  ;;  %9535 = vmatprep.mubr.msk.f32.mxu0 %vm3702_vm6, %v17814_v2  ;;  %vm3717_vm4 = vcmp.eq.s32.totalorder %v14198_v47, 17  ;;  %vm3722_vm6 = vcmp.eq.s32.totalorder %v14216_v4, 17 }
 0x293   :  { %v14310_v52 = vpack.c.bf16 %v1090_v46, %v1089_v36  ;;  %12043 = vmatprep.subr.bf16.mxu0 %v14014_v13 }
 0x294   :  { %v1042_v23 = vmul.f32 0.01, %v12854_v49  ;;  %vm993_vm9 = vcmp.gt.f32.partialorder %v12854_v49, 0.0 }
 0x295   :  { %17837 = vst [vmem:[#allocation17_spill] sm:$0xff] %v14310_v52  ;;  %v930_v57 = vpop.f32.mrb[90].mxu0  ;;  %11635 = vmatpush1.bf16.msra.mxu1 %v14310_v52  ;;  %9536 = vmatmul.mubr.msk.f32.gmra.mrb[120].mxu0 %vm3701_vm7, %v17814_v2  ;;  %vm3721_vm7 = vcmp.eq.s32.totalorder %v14230_v15, 17 }
 0x296   :  { %v12855_v48 = vadd.f32 %v13945_v51, %v930_v57  ;;  %12045 = vmatpush3.bf16.msra.mxu0 %v13974_v30  ;;  %v932_v16 = vpop.f32.mrb[91].mxu0  ;;  %9537 = vmatprep.mubr.msk.f32.mxu0 %vm3706_vm8, %v17814_v2  ;;  %v1091_v57 = vsel %vm993_vm9, %v12854_v49, %v1042_v23 }
 0x297   :  { %12047 = vmatprep.subr.bf16.mxu0 %v14022_v26  ;;  %11636 = vmatprep.subr.bf16.mxu1 %v17836_v17 }
 0x298   :  { %vm994_vm10 = vcmp.gt.f32.partialorder %v12855_v48, 0.0  ;;  %v1043_v35 = vmul.f32 0.01, %v12855_v48 }
 0x299   :  { %v935_v37 = vpop.f32.mrb[92].mxu0  ;;  %9538 = vmatmul.mubr.msk.f32.gmra.mrb[122].mxu0 %vm3705_vm11, %v17814_v2 }
 0x29a   :  { %v1092_v36 = vsel %vm994_vm10, %v12855_v48, %v1043_v35  ;;  %v12856_v46 = vadd.f32 %v13945_v51, %v935_v37  ;;  %12049 = vmatpush3.bf16.msra.mxu0 %v13978_v41  ;;  %v937_v14 = vpop.f32.mrb[93].mxu0  ;;  %9539 = vmatprep.mubr.msk.f32.mxu0 %vm3710_vm13, %v17814_v2  ;;  %v14342_v37 = vadd.s32 256, %v13948_v54  ;;  %v14356_v54 = vsub.s32 %v14222_v10, %v14053_v18 }
 0x29b   :  { %v14328_v16 = vpack.c.bf16 %v1092_v36, %v1091_v57  ;;  %12051 = vmatprep.subr.bf16.mxu0 %v14030_v39  ;;  %v12989_v36 = vld [vmem:[%s17823_s28] ss:$0 sm:$0xff]  ;;  %vm3726_vm10 = vcmp.eq.s32.totalorder %v14244_v33, 17  ;;  %vm3725_vm13 = vcmp.eq.s32.totalorder %v14270_v59, 17 }
 0x29c   :  { %v1044_v49 = vmul.f32 0.01, %v12856_v46  ;;  %vm995_vm0 = vcmp.gt.f32.partialorder %v12856_v46, 0.0  ;;  %17840 = vst [vmem:[#allocation20_spill] sm:$0xff] %v14356_v54  ;;  %vm1180_vm8 = vcmp.eq.s32.totalorder %v14356_v54, 0 }
 0x29d   :  { %17838 = vst [vmem:[#allocation18_spill] sm:$0xff] %v14328_v16  ;;  %v940_v52 = vpop.f32.mrb[94].mxu0  ;;  %11638 = vmatpush1.bf16.msra.mxu1 %v14328_v16  ;;  %9540 = vmatmul.mubr.msk.f32.gmra.mrb[124].mxu0 %vm3709_vm14, %v17814_v2 }
 0x29e   :  { %v12857_v23 = vadd.f32 %v13945_v51, %v940_v52  ;;  %12053 = vmatpush3.bf16.msra.mxu0 %v13982_v55  ;;  %v942_v48 = vpop.f32.mrb[95].mxu0  ;;  %9541 = vmatprep.mubr.msk.f32.mxu0 %vm3714_vm15, %v17814_v2  ;;  %v1093_v51 = vsel %vm995_vm0, %v12856_v46, %v1044_v49  ;;  %v14361_v49 = vsub.s32 %v14342_v37, %v13954_v58  ;;  %vm4059_vm15 = vcmp.eq.s32.totalorder %v13958_v60, 28 }
 0x29f   :  { %12055 = vmatprep.subr.bf16.mxu0 %v14038_v56  ;;  %11639 = vmatprep.subr.bf16.mxu1 %v17836_v17  ;;  %vm4058_vm0 = vcmp.eq.s32.totalorder %v14058_v27, 28 }
 0x2a0   :  { %vm996_vm1 = vcmp.gt.f32.partialorder %v12857_v23, 0.0  ;;  %v1045_v35 = vmul.f32 0.01, %v12857_v23  ;;  %17841 = vst [vmem:[#allocation21_spill] sm:$0xff] %v14361_v49  ;;  %vm1175_vm9 = vcmp.eq.s32.totalorder %v14361_v49, 0 }
 0x2a1   :  { %v945_v57 = vpop.f32.mrb[96].mxu0  ;;  %9542 = vmatmul.mubr.msk.f32.gmra.mrb[126].mxu0 %vm3713_vm2, %v17814_v2 }
 0x2a2   :  { %v1094_v52 = vsel %vm996_vm1, %v12857_v23, %v1045_v35  ;;  %v12858_v14 = vadd.f32 %v12989_v36, %v945_v57  ;;  %12057 = vmatpush3.bf16.msra.mxu0 %v13986_v7  ;;  %v947_v48 = vpop.f32.mrb[97].mxu0  ;;  %9543 = vmatprep.mubr.msk.f32.mxu0 %vm3718_vm3, %v17814_v2  ;;  %v14370_v23 = vsub.s32 %v14222_v10, %v14060_v28  ;;  %v17843_v35 = vmov 0.0  }
 0x2a3   :  { %v14351_v16 = vpack.c.bf16 %v1094_v52, %v1093_v51  ;;  %12059 = vmatprep.subr.bf16.mxu0 %v14046_v11  ;;  %v14380_v57 = vsub.s32 %v14342_v37, %v14053_v18  ;;  %v1216_v51 = vsel %vm1180_vm8, 1.0, %v17843_v35  ;;  %v14394_v18 = vsub.s32 %v14222_v10, %v14087_v42 }
 0x2a4   :  { %v1046_v46 = vmul.f32 0.01, %v12858_v14  ;;  %vm997_vm5 = vcmp.gt.f32.partialorder %v12858_v14, 0.0  ;;  %17842 = vst [vmem:[#allocation22_spill] sm:$0xff] %v14370_v23  ;;  %vm1184_vm11 = vcmp.eq.s32.totalorder %v14370_v23, 0  ;;  %v14404_v52 = vsub.s32 %v14342_v37, %v14060_v28 }
 0x2a5   :  { %17839 = vst [vmem:[#allocation19_spill] sm:$0xff] %v14351_v16  ;;  %11641 = vmatpush1.bf16.msra.mxu1 %v14351_v16  ;;  %9544 = vmatmul.mubr.msk.f32.gmra.mrb[128].mxu0 %vm3717_vm4, %v17814_v2  ;;  %17845 = vst [vmem:[#allocation24_spill] sm:$0xff] %v14380_v57  ;;  %vm1179_vm14 = vcmp.eq.s32.totalorder %v14380_v57, 0  ;;  %v1220_v36 = vsel %vm1184_vm11, 1.0, %v17843_v35  ;;  %vm1188_vm1 = vcmp.eq.s32.totalorder %v14394_v18, 0  ;;  %v14422_v28 = vsub.s32 %v14342_v37, %v14087_v42 }
 0x2a6   :  { %12061 = vmatpush3.bf16.msra.mxu0 %v13990_v20  ;;  %9545 = vmatprep.mubr.msk.f32.mxu0 %vm3722_vm6, %v17814_v2  ;;  %v14374_v58 = vsel %vm997_vm5, %v12858_v14, %v1046_v46  ;;  %17846 = vst [vmem:[#allocation25_spill] sm:$0xff] %v14404_v52  ;;  %v14414_v14 = vsub.s32 %v14222_v10, %v14120_v63  ;;  %vm1183_vm2 = vcmp.eq.s32.totalorder %v14404_v52, 0  ;;  %vm4063_vm3 = vcmp.eq.s32.totalorder %v14066_v31, 28 }
 0x2a7   :  { %12063 = vmatprep.subr.bf16.mxu0 %v14062_v29  ;;  %1415 = vmatprep.subr.mxu1 %v17843_v35  ;;  %17844 = vst [vmem:[#allocation23_spill] sm:$0xff] %v14374_v58  ;;  %17847 = vst [vmem:[#allocation26_spill] sm:$0xff] %v14422_v28  ;;  %v1224_v48 = vsel %vm1188_vm1, 1.0, %v17843_v35  ;;  %v14433_v46 = vsub.s32 %v14222_v10, %v14139_v9  ;;  %vm4062_vm4 = vcmp.eq.s32.totalorder %v14072_v34, 28  ;;  %vm1187_vm6 = vcmp.eq.s32.totalorder %v14422_v28, 0 }
 0x2a8   :  { %vm1192_vm5 = vcmp.eq.s32.totalorder %v14414_v14, 0  ;;  %v14443_v42 = vsub.s32 %v14342_v37, %v14120_v63  ;;  %vm4066_vm8 = vcmp.eq.s32.totalorder %v14093_v45, 28  ;;  %v14464_v63 = vsub.s32 %v14342_v37, %v14139_v9 }
 0x2a9   :  { %1416 = vmatpush1.msra.mxu1 %v14374_v58  ;;  %9546 = vmatmul.mubr.msk.f32.gmra.mrb[130].mxu0 %vm3721_vm7, %v17814_v2  ;;  %vm4067_vm7 = vcmp.eq.s32.totalorder %v14084_v40, 28  ;;  %vm4071_vm11 = vcmp.eq.s32.totalorder %v14110_v53, 28  ;;  %v14485_v9 = vsub.s32 %v14342_v37, %v14173_v25  ;;  %vm4074_vm1 = vcmp.eq.s32.totalorder %v14145_v12, 28 }
 0x2aa   :  { %12065 = vmatpush3.bf16.msra.mxu0 %v13994_v32  ;;  %9298 = vmatmul.mubr.msk.f32.vlgmr.msra.gmra.mrb[18].mxu1 %vm1175_vm9, %v17814_v2  ;;  %17848 = vst [vmem:[#allocation27_spill] sm:$0xff] %v14443_v42  ;;  %vm1196_vm9 = vcmp.eq.s32.totalorder %v14433_v46, 0  ;;  %17850 = vst [vmem:[#allocation29_spill] sm:$0xff] %v14464_v63 }
 0x2ab   :  { %11643 = vmatprep.subr.bf16.mxu1 %v13998_v44  ;;  %9547 = vmatprep.mubr.msk.f32.mxu0 %vm3726_vm10, %v17814_v2  ;;  %vm1191_vm10 = vcmp.eq.s32.totalorder %v14443_v42, 0  ;;  %17851 = vst [vmem:[#allocation30_spill] sm:$0xff] %v14485_v9 }
 0x2ac   :  { %12091 = vmatprep.subr.bf16.mxu0 %v13998_v44  ;;  %9299 = vmatprep.mubr.msk.f32.mxu1 %vm1245_vm12, %v1216_v51  ;;  %v1228_v51 = vsel %vm1192_vm5, 1.0, %v17843_v35  ;;  %vm4078_vm5 = vcmp.eq.s32.totalorder %v14170_v24, 28 }
 0x2ad   :  { %11645 = vmatpush3.bf16.msra.mxu1 %v13966_v8  ;;  %9548 = vmatmul.mubr.msk.f32.gmra.mrb[132].mxu0 %vm3725_vm13, %v17814_v2  ;;  %vm4070_vm13 = vcmp.eq.s32.totalorder %v14117_v61, 28 }
 0x2ae   :  { %11647 = vmatprep.subr.bf16.mxu1 %v14006_v62  ;;  %9300 = vmatmul.mubr.msk.f32.gmra.mrb[20].mxu1 %vm1179_vm14, %v17814_v2 }
 0x2af   :  { %9567 = vmatprep.mubr.msk.f32.mxu0 %vm4059_vm15, %v17814_v2  ;;  %9301 = vmatprep.mubr.msk.f32.mxu1 %vm1245_vm12, %v1220_v36  ;;  %v14454_v36 = vsub.s32 %v14222_v10, %v14173_v25  ;;  %vm1195_vm15 = vcmp.eq.s32.totalorder %v14464_v63, 0  ;;  %v14506_v25 = vsub.s32 %v14342_v37, %v14192_v43 }
 0x2b1   :  { %11649 = vmatpush3.bf16.msra.mxu1 %v13970_v19  ;;  %9568 = vmatmul.mubr.msk.f32.vlgmr.msra.gmra.mrb[134].mxu0 %vm4058_vm0, %v17814_v2  ;;  %17849 = vst [vmem:[#allocation28_spill] sm:$0xff] %v14454_v36  ;;  %vm1200_vm14 = vcmp.eq.s32.totalorder %v14454_v36, 0  ;;  %vm4075_vm0 = vcmp.eq.s32.totalorder %v14135_v6, 28  ;;  %v14496_v36 = vsub.s32 %v14222_v10, %v14219_v5  ;;  %17853 = vst [vmem:[#allocation32_spill] sm:$0xff] %v14506_v25 }
 0x2b2   :  { %11651 = vmatprep.subr.bf16.mxu1 %v14014_v13  ;;  %12093 = vmatpush3.bf16.msra.mxu0 %v13966_v8 }
 0x2b3   :  { %9302 = vmatmul.mubr.msk.f32.gmra.mrb[22].mxu1 %vm1183_vm2, %v17814_v2  ;;  %9569 = vmatprep.mubr.msk.f32.mxu0 %vm4063_vm3, %v17814_v2  ;;  %17852 = vst [vmem:[#allocation31_spill] sm:$0xff] %v14496_v36  ;;  %vm1199_vm3 = vcmp.eq.s32.totalorder %v14485_v9, 0 }
 0x2b4   :  { %12095 = vmatprep.subr.bf16.mxu0 %v14006_v62  ;;  %9303 = vmatprep.mubr.msk.f32.mxu1 %vm1245_vm12, %v1224_v48  ;;  %v1232_v48 = vsel %vm1196_vm9, 1.0, %v17843_v35  ;;  %vm4082_vm9 = vcmp.eq.s32.totalorder %v14198_v47, 28 }
 0x2b5   :  { %11653 = vmatpush3.bf16.msra.mxu1 %v13974_v30  ;;  %9570 = vmatmul.mubr.msk.f32.gmra.mrb[136].mxu0 %vm4062_vm4, %v17814_v2  ;;  %vm4079_vm4 = vcmp.eq.s32.totalorder %v14163_v22, 28 }
 0x2b6   :  { %11655 = vmatprep.subr.bf16.mxu1 %v14022_v26  ;;  %12097 = vmatpush3.bf16.msra.mxu0 %v13970_v19 }
 0x2b7   :  { %9304 = vmatmul.mubr.msk.f32.gmra.mrb[24].mxu1 %vm1187_vm6, %v17814_v2  ;;  %9571 = vmatprep.mubr.msk.f32.mxu0 %vm4067_vm7, %v17814_v2  ;;  %vm1208_vm6 = vcmp.eq.s32.totalorder %v14496_v36, 0  ;;  %vm1203_vm7 = vcmp.eq.s32.totalorder %v14506_v25, 0 }
 0x2b8   :  { %12099 = vmatprep.subr.bf16.mxu0 %v14014_v13  ;;  %9305 = vmatprep.mubr.msk.f32.mxu1 %vm1245_vm12, %v1228_v51  ;;  %v14475_v51 = vsub.s32 %v14222_v10, %v14192_v43  ;;  %v14523_v43 = vsub.s32 %v14342_v37, %v14219_v5  ;;  %v17855_v5 = vld [vmem:[#allocation17_spill] sm:$0xff]  ;;  %v17856_v37 = vld [vmem:[#allocation18_spill] sm:$0xff] }
 0x2b9   :  { %11657 = vmatpush3.bf16.msra.mxu1 %v13978_v41  ;;  %9572 = vmatmul.mubr.msk.f32.gmra.mrb[138].mxu0 %vm4066_vm8, %v17814_v2  ;;  %vm4083_vm8 = vcmp.eq.s32.totalorder %v14188_v38, 28 }
 0x2ba   :  { %11659 = vmatprep.subr.bf16.mxu1 %v14030_v39  ;;  %12101 = vmatpush3.bf16.msra.mxu0 %v13974_v30  ;;  %vm1204_vm2 = vcmp.eq.s32.totalorder %v14475_v51, 0  ;;  %17854 = vst [vmem:[#allocation33_spill] sm:$0xff] %v14523_v43 }
 0x2bb   :  { %9306 = vmatmul.mubr.msk.f32.gmra.mrb[26].mxu1 %vm1191_vm10, %v17814_v2  ;;  %9573 = vmatprep.mubr.msk.f32.mxu0 %vm4071_vm11, %v17814_v2  ;;  %v1240_v10 = vsel %vm1204_vm2, 1.0, %v17843_v35  ;;  %vm4087_vm10 = vcmp.eq.s32.totalorder %v14216_v4, 28  ;;  %vm1207_vm11 = vcmp.eq.s32.totalorder %v14523_v43, 0  ;;  %vm4090_vm2 = vcmp.eq.s32.totalorder %v14270_v59, 28 }
 0x2bc   :  { %12103 = vmatprep.subr.bf16.mxu0 %v14022_v26  ;;  %9307 = vmatprep.mubr.msk.f32.mxu1 %vm1245_vm12, %v1232_v48  ;;  %v1236_v48 = vsel %vm1200_vm14, 1.0, %v17843_v35  ;;  %vm4086_vm14 = vcmp.eq.s32.totalorder %v14230_v15, 28 }
 0x2bd   :  { %11661 = vmatpush3.bf16.msra.mxu1 %v13982_v55  ;;  %9574 = vmatmul.mubr.msk.f32.gmra.mrb[140].mxu0 %vm4070_vm13, %v17814_v2  ;;  %vm1504_vm13 = vcmp.eq.s32.totalorder %v13958_v60, 1 }
 0x2be   :  { %11663 = vmatprep.subr.bf16.mxu1 %v14038_v56  ;;  %12105 = vmatpush3.bf16.msra.mxu0 %v13978_v41 }
 0x2bf   :  { %9308 = vmatmul.mubr.msk.f32.gmra.mrb[28].mxu1 %vm1195_vm15, %v17814_v2  ;;  %9575 = vmatprep.mubr.msk.f32.mxu0 %vm4075_vm0, %v17814_v2  ;;  %vm4091_vm15 = vcmp.eq.s32.totalorder %v14244_v33, 28  ;;  %vm1503_vm0 = vcmp.eq.s32.totalorder %v14058_v27, 1 }
 0x2c0   :  { %12107 = vmatprep.subr.bf16.mxu0 %v14030_v39  ;;  %9309 = vmatprep.mubr.msk.f32.mxu1 %vm1245_vm12, %v1236_v48  ;;  %v1244_v48 = vsel %vm1208_vm6, 1.0, %v17843_v35  ;;  %vm4386_vm6 = vcmp.eq.s32.totalorder %v14058_v27, 29 }
 0x2c1   :  { %11665 = vmatpush3.bf16.msra.mxu1 %v13986_v7  ;;  %9576 = vmatmul.mubr.msk.f32.gmra.mrb[142].mxu0 %vm4074_vm1, %v17814_v2  ;;  %vm1508_vm1 = vcmp.eq.s32.totalorder %v14066_v31, 1 }
 0x2c2   :  { %11667 = vmatprep.subr.bf16.mxu1 %v14046_v11  ;;  %12109 = vmatpush3.bf16.msra.mxu0 %v13982_v55 }
 0x2c3   :  { %9310 = vmatmul.mubr.msk.f32.gmra.mrb[30].mxu1 %vm1199_vm3, %v17814_v2  ;;  %9577 = vmatprep.mubr.msk.f32.mxu0 %vm4079_vm4, %v17814_v2  ;;  %vm4387_vm3 = vcmp.eq.s32.totalorder %v13958_v60, 29  ;;  %vm1507_vm4 = vcmp.eq.s32.totalorder %v14072_v34, 1 }
 0x2c4   :  { %12111 = vmatprep.subr.bf16.mxu0 %v14038_v56  ;;  %9311 = vmatprep.mubr.msk.f32.mxu1 %vm1245_vm12, %v1240_v10  ;;  %v17857_v10 = vld [vmem:[#allocation14_spill] sm:$0xff] }
 0x2c5   :  { %11669 = vmatpush3.bf16.msra.mxu1 %v13990_v20  ;;  %9578 = vmatmul.mubr.msk.f32.gmra.mrb[144].mxu0 %vm4078_vm5, %v17814_v2  ;;  %vm1512_vm5 = vcmp.eq.s32.totalorder %v14084_v40, 1 }
 0x2c6   :  { %11671 = vmatprep.subr.bf16.mxu1 %v14062_v29  ;;  %12113 = vmatpush3.bf16.msra.mxu0 %v13986_v7 }
 0x2c7   :  { %9312 = vmatmul.mubr.msk.f32.gmra.mrb[32].mxu1 %vm1203_vm7, %v17814_v2  ;;  %9579 = vmatprep.mubr.msk.f32.mxu0 %vm4083_vm8, %v17814_v2  ;;  %vm4391_vm7 = vcmp.eq.s32.totalorder %v14066_v31, 29  ;;  %vm1511_vm8 = vcmp.eq.s32.totalorder %v14093_v45, 1 }
 0x2c8   :  { %12115 = vmatprep.subr.bf16.mxu0 %v14046_v11  ;;  %9313 = vmatprep.mubr.msk.f32.mxu1 %vm1245_vm12, %v1244_v48 }
 0x2c9   :  { %11673 = vmatpush3.bf16.msra.mxu1 %v13994_v32  ;;  %9580 = vmatmul.mubr.msk.f32.gmra.mrb[146].mxu0 %vm4082_vm9, %v17814_v2  ;;  %vm1516_vm9 = vcmp.eq.s32.totalorder %v14110_v53, 1 }
 0x2ca   :  { %12117 = vmatpush3.bf16.msra.mxu0 %v13990_v20  ;;  %9581 = vmatprep.mubr.msk.f32.mxu0 %vm4087_vm10, %v17814_v2  ;;  %vm4390_vm10 = vcmp.eq.s32.totalorder %v14072_v34, 29 }
 0x2cb   :  { %9314 = vmatmul.mubr.msk.f32.gmra.mrb[34].mxu1 %vm1207_vm11, %v17814_v2  ;;  %12119 = vmatprep.subr.bf16.mxu0 %v14062_v29  ;;  %vm4395_vm11 = vcmp.eq.s32.totalorder %v14084_v40, 29 }
 0x2cc   :  { %9315 = vmatprep.mubr.msk.f32.mxu1 %vm1504_vm13, %v17814_v2  ;;  %11674 = vmatprep.subr.bf16.mxu1 %v17836_v17  ;;  %vm1515_vm13 = vcmp.eq.s32.totalorder %v14117_v61, 1 }
 0x2cd   :  { %9582 = vmatmul.mubr.msk.f32.gmra.mrb[148].mxu0 %vm4086_vm14, %v17814_v2  ;;  %vm1520_vm14 = vcmp.eq.s32.totalorder %v14135_v6, 1 }
 0x2ce   :  { %12121 = vmatpush3.bf16.msra.mxu0 %v13994_v32  ;;  %9583 = vmatprep.mubr.msk.f32.mxu0 %vm4091_vm15, %v17814_v2  ;;  %vm4394_vm15 = vcmp.eq.s32.totalorder %v14093_v45, 29 }
 0x2cf   :  { %9316 = vmatmul.mubr.msk.f32.vlgmr.msra.gmra.mrb[36].mxu1 %vm1503_vm0, %v17814_v2  ;;  %12147 = vmatprep.subr.bf16.mxu0 %v13998_v44  ;;  %vm4399_vm0 = vcmp.eq.s32.totalorder %v14110_v53, 29 }
 0x2d0   :  { %11676 = vmatpush1.bf16.msra.mxu1 %v14102_v50  ;;  %9317 = vmatprep.mubr.msk.f32.mxu1 %vm1508_vm1, %v17814_v2  ;;  %vm1519_vm1 = vcmp.eq.s32.totalorder %v14145_v12, 1 }
 0x2d1   :  { %11677 = vmatprep.subr.bf16.mxu1 %v17836_v17  ;;  %9584 = vmatmul.mubr.msk.f32.gmra.mrb[150].mxu0 %vm4090_vm2, %v17814_v2  ;;  %vm1524_vm2 = vcmp.eq.s32.totalorder %v14163_v22, 1 }
 0x2d2   :  { %9603 = vmatprep.mubr.msk.f32.mxu0 %vm4387_vm3, %v17814_v2  ;;  %vm4398_vm3 = vcmp.eq.s32.totalorder %v14117_v61, 29 }
 0x2d3   :  { %9318 = vmatmul.mubr.msk.f32.gmra.mrb[38].mxu1 %vm1507_vm4, %v17814_v2  ;;  %vm4403_vm4 = vcmp.eq.s32.totalorder %v14135_v6, 29 }
 0x2d4   :  { %11679 = vmatpush1.bf16.msra.mxu1 %v14155_v21  ;;  %9319 = vmatprep.mubr.msk.f32.mxu1 %vm1512_vm5, %v17814_v2  ;;  %vm1523_vm5 = vcmp.eq.s32.totalorder %v14170_v24, 1 }
 0x2d5   :  { %11680 = vmatprep.subr.bf16.mxu1 %v17836_v17  ;;  %9604 = vmatmul.mubr.msk.f32.vlgmr.msra.gmra.mrb[152].mxu0 %vm4386_vm6, %v17814_v2  ;;  %vm1528_vm6 = vcmp.eq.s32.totalorder %v14188_v38, 1 }
 0x2d6   :  { %12149 = vmatpush3.bf16.msra.mxu0 %v13966_v8  ;;  %9605 = vmatprep.mubr.msk.f32.mxu0 %vm4391_vm7, %v17814_v2  ;;  %vm4402_vm7 = vcmp.eq.s32.totalorder %v14145_v12, 29 }
 0x2d7   :  { %9320 = vmatmul.mubr.msk.f32.gmra.mrb[40].mxu1 %vm1511_vm8, %v17814_v2  ;;  %12151 = vmatprep.subr.bf16.mxu0 %v14006_v62  ;;  %vm4407_vm8 = vcmp.eq.s32.totalorder %v14163_v22, 29 }
 0x2d8   :  { %11682 = vmatpush1.bf16.msra.mxu1 %v14208_v3  ;;  %9321 = vmatprep.mubr.msk.f32.mxu1 %vm1516_vm9, %v17814_v2  ;;  %vm1527_vm9 = vcmp.eq.s32.totalorder %v14198_v47, 1 }
 0x2d9   :  { %11683 = vmatprep.subr.bf16.mxu1 %v17836_v17  ;;  %9606 = vmatmul.mubr.msk.f32.gmra.mrb[154].mxu0 %vm4390_vm10, %v17814_v2  ;;  %vm1532_vm10 = vcmp.eq.s32.totalorder %v14216_v4, 1 }
 0x2da   :  { %12153 = vmatpush3.bf16.msra.mxu0 %v13970_v19  ;;  %9607 = vmatprep.mubr.msk.f32.mxu0 %vm4395_vm11, %v17814_v2  ;;  %vm4406_vm11 = vcmp.eq.s32.totalorder %v14170_v24, 29 }
 0x2db   :  { %9322 = vmatmul.mubr.msk.f32.gmra.mrb[42].mxu1 %vm1515_vm13, %v17814_v2  ;;  %12155 = vmatprep.subr.bf16.mxu0 %v14014_v13  ;;  %vm4411_vm13 = vcmp.eq.s32.totalorder %v14188_v38, 29 }
 0x2dc   :  { %11685 = vmatpush1.bf16.msra.mxu1 %v14263_v1  ;;  %9323 = vmatprep.mubr.msk.f32.mxu1 %vm1520_vm14, %v17814_v2  ;;  %vm1531_vm14 = vcmp.eq.s32.totalorder %v14230_v15, 1 }
 0x2dd   :  { %11686 = vmatprep.subr.bf16.mxu1 %v17836_v17  ;;  %9608 = vmatmul.mubr.msk.f32.gmra.mrb[156].mxu0 %vm4394_vm15, %v17814_v2  ;;  %vm1536_vm15 = vcmp.eq.s32.totalorder %v14244_v33, 1 }
 0x2de   :  { %12157 = vmatpush3.bf16.msra.mxu0 %v13974_v30  ;;  %9609 = vmatprep.mubr.msk.f32.mxu0 %vm4399_vm0, %v17814_v2  ;;  %vm4410_vm0 = vcmp.eq.s32.totalorder %v14198_v47, 29 }
 0x2df   :  { %9324 = vmatmul.mubr.msk.f32.gmra.mrb[44].mxu1 %vm1519_vm1, %v17814_v2  ;;  %12159 = vmatprep.subr.bf16.mxu0 %v14022_v26  ;;  %vm1506_vm1 = vcmp.eq.s32.totalorder %v17857_v10, 1 }
 0x2e0   :  { %11688 = vmatpush1.bf16.msra.mxu1 %v14293_v0  ;;  %9325 = vmatprep.mubr.msk.f32.mxu1 %vm1524_vm2, %v17814_v2  ;;  %vm4415_vm2 = vcmp.eq.s32.totalorder %v14216_v4, 29  ;;  %v1542_v48 = vsel %vm1506_vm1, 1.0, %v17843_v35  ;;  %vm4754_vm1 = vcmp.eq.s32.totalorder %v14072_v34, 30 }
 0x2e1   :  { %11689 = vmatprep.subr.bf16.mxu1 %v17836_v17  ;;  %9610 = vmatmul.mubr.msk.f32.gmra.mrb[158].mxu0 %vm4398_vm3, %v17814_v2  ;;  %vm1535_vm3 = vcmp.eq.s32.totalorder %v14270_v59, 1 }
 0x2e2   :  { %12161 = vmatpush3.bf16.msra.mxu0 %v13978_v41  ;;  %9611 = vmatprep.mubr.msk.f32.mxu0 %vm4403_vm4, %v17814_v2  ;;  %vm4414_vm4 = vcmp.eq.s32.totalorder %v14230_v15, 29 }
 0x2e3   :  { %9326 = vmatmul.mubr.msk.f32.gmra.mrb[46].mxu1 %vm1523_vm5, %v17814_v2  ;;  %12163 = vmatprep.subr.bf16.mxu0 %v14030_v39  ;;  %vm1510_vm5 = vcmp.eq.s32.totalorder %v14356_v54, 1 }
 0x2e4   :  { %11691 = vmatpush1.bf16.msra.mxu1 %v17855_v5  ;;  %9327 = vmatprep.mubr.msk.f32.mxu1 %vm1528_vm6, %v17814_v2  ;;  %vm4419_vm6 = vcmp.eq.s32.totalorder %v14244_v33, 29 }
 0x2e5   :  { %11692 = vmatprep.subr.bf16.mxu1 %v17836_v17  ;;  %9612 = vmatmul.mubr.msk.f32.gmra.mrb[160].mxu0 %vm4402_vm7, %v17814_v2  ;;  %vm1505_vm7 = vcmp.eq.s32.totalorder %v14361_v49, 1 }
 0x2e6   :  { %12165 = vmatpush3.bf16.msra.mxu0 %v13982_v55  ;;  %9613 = vmatprep.mubr.msk.f32.mxu0 %vm4407_vm8, %v17814_v2  ;;  %vm4418_vm8 = vcmp.eq.s32.totalorder %v14270_v59, 29 }
 0x2e7   :  { %9328 = vmatmul.mubr.msk.f32.gmra.mrb[48].mxu1 %vm1527_vm9, %v17814_v2  ;;  %12167 = vmatprep.subr.bf16.mxu0 %v14038_v56  ;;  %vm1514_vm9 = vcmp.eq.s32.totalorder %v14370_v23, 1 }
 0x2e8   :  { %11694 = vmatpush1.bf16.msra.mxu1 %v17856_v37  ;;  %9329 = vmatprep.mubr.msk.f32.mxu1 %vm1532_vm10, %v17814_v2  ;;  %vm4751_vm10 = vcmp.eq.s32.totalorder %v13958_v60, 30  ;;  %v1550_v49 = vsel %vm1514_vm9, 1.0, %v17843_v35  ;;  %vm4762_vm9 = vcmp.eq.s32.totalorder %v14117_v61, 30 }
 0x2e9   :  { %11695 = vmatprep.subr.bf16.mxu1 %v17836_v17  ;;  %9614 = vmatmul.mubr.msk.f32.gmra.mrb[162].mxu0 %vm4406_vm11, %v17814_v2  ;;  %vm1509_vm11 = vcmp.eq.s32.totalorder %v14380_v57, 1 }
 0x2ea   :  { %12169 = vmatpush3.bf16.msra.mxu0 %v13986_v7  ;;  %9615 = vmatprep.mubr.msk.f32.mxu0 %vm4411_vm13, %v17814_v2  ;;  %vm4750_vm13 = vcmp.eq.s32.totalorder %v14058_v27, 30 }
 0x2eb   :  { %9330 = vmatmul.mubr.msk.f32.gmra.mrb[50].mxu1 %vm1531_vm14, %v17814_v2  ;;  %12171 = vmatprep.subr.bf16.mxu0 %v14046_v11  ;;  %vm1518_vm14 = vcmp.eq.s32.totalorder %v14394_v18, 1 }
 0x2ec   :  { %11697 = vmatpush1.bf16.msra.mxu1 %v14351_v16  ;;  %9331 = vmatprep.mubr.msk.f32.mxu1 %vm1536_vm15, %v17814_v2  ;;  %vm4755_vm15 = vcmp.eq.s32.totalorder %v14066_v31, 30 }
 0x2ed   :  { %1744 = vmatprep.subr.mxu1 %v17843_v35  ;;  %9616 = vmatmul.mubr.msk.f32.gmra.mrb[164].mxu0 %vm4410_vm0, %v17814_v2  ;;  %vm1513_vm0 = vcmp.eq.s32.totalorder %v14404_v52, 1 }
 0x2ee   :  { %12173 = vmatpush3.bf16.msra.mxu0 %v13990_v20  ;;  %9617 = vmatprep.mubr.msk.f32.mxu0 %vm4415_vm2, %v17814_v2  ;;  %vm1522_vm2 = vcmp.eq.s32.totalorder %v14414_v14, 1 }
 0x2ef   :  { %9332 = vmatmul.mubr.msk.f32.gmra.mrb[52].mxu1 %vm1535_vm3, %v17814_v2  ;;  %12175 = vmatprep.subr.bf16.mxu0 %v14062_v29  ;;  %vm4759_vm3 = vcmp.eq.s32.totalorder %v14084_v40, 30 }
 0x2f0   :  { %1745 = vmatpush1.msra.mxu1 %v14374_v58  ;;  %9333 = vmatprep.mubr.msk.f32.mxu1 %vm1245_vm12, %v1542_v48  ;;  %v1546_v48 = vsel %vm1510_vm5, 1.0, %v17843_v35  ;;  %vm4758_vm5 = vcmp.eq.s32.totalorder %v14093_v45, 30 }
 0x2f1   :  { %11699 = vmatprep.subr.bf16.mxu1 %v13998_v44  ;;  %9618 = vmatmul.mubr.msk.f32.gmra.mrb[166].mxu0 %vm4414_vm4, %v17814_v2  ;;  %vm1517_vm4 = vcmp.eq.s32.totalorder %v14422_v28, 1 }
 0x2f2   :  { %12177 = vmatpush3.bf16.msra.mxu0 %v13994_v32  ;;  %9619 = vmatprep.mubr.msk.f32.mxu0 %vm4419_vm6, %v17814_v2  ;;  %vm1526_vm6 = vcmp.eq.s32.totalorder %v14433_v46, 1 }
 0x2f3   :  { %9334 = vmatmul.mubr.msk.f32.vlgmr.msra.gmra.mrb[54].mxu1 %vm1505_vm7, %v17814_v2  ;;  %12203 = vmatprep.subr.bf16.mxu0 %v13998_v44  ;;  %vm4763_vm7 = vcmp.eq.s32.totalorder %v14110_v53, 30 }
 0x2f4   :  { %11701 = vmatpush3.bf16.msra.mxu1 %v13966_v8  ;;  %9335 = vmatprep.mubr.msk.f32.mxu1 %vm1245_vm12, %v1546_v48  ;;  %v1558_v48 = vsel %vm1522_vm2, 1.0, %v17843_v35  ;;  %vm4770_vm2 = vcmp.eq.s32.totalorder %v14170_v24, 30 }
 0x2f5   :  { %11703 = vmatprep.subr.bf16.mxu1 %v14006_v62  ;;  %9620 = vmatmul.mubr.msk.f32.gmra.mrb[168].mxu0 %vm4418_vm8, %v17814_v2  ;;  %vm1521_vm8 = vcmp.eq.s32.totalorder %v14443_v42, 1 }
 0x2f6   :  { %9639 = vmatprep.mubr.msk.f32.mxu0 %vm4751_vm10, %v17814_v2 }
 0x2f7   :  { %9336 = vmatmul.mubr.msk.f32.gmra.mrb[56].mxu1 %vm1509_vm11, %v17814_v2  ;;  %vm4767_vm11 = vcmp.eq.s32.totalorder %v14135_v6, 30 }
 0x2f8   :  { %11705 = vmatpush3.bf16.msra.mxu1 %v13970_v19  ;;  %9337 = vmatprep.mubr.msk.f32.mxu1 %vm1245_vm12, %v1550_v49  ;;  %v1554_v49 = vsel %vm1518_vm14, 1.0, %v17843_v35  ;;  %vm4766_vm14 = vcmp.eq.s32.totalorder %v14145_v12, 30 }
 0x2f9   :  { %11707 = vmatprep.subr.bf16.mxu1 %v14014_v13  ;;  %9640 = vmatmul.mubr.msk.f32.vlgmr.msra.gmra.mrb[170].mxu0 %vm4750_vm13, %v17814_v2  ;;  %vm1525_vm13 = vcmp.eq.s32.totalorder %v14464_v63, 1 }
 0x2fa   :  { %12205 = vmatpush3.bf16.msra.mxu0 %v13966_v8  ;;  %9641 = vmatprep.mubr.msk.f32.mxu0 %vm4755_vm15, %v17814_v2  ;;  %vm1534_vm15 = vcmp.eq.s32.totalorder %v14475_v51, 1 }
 0x2fb   :  { %9338 = vmatmul.mubr.msk.f32.gmra.mrb[58].mxu1 %vm1513_vm0, %v17814_v2  ;;  %12207 = vmatprep.subr.bf16.mxu0 %v14006_v62  ;;  %vm4771_vm0 = vcmp.eq.s32.totalorder %v14163_v22, 30 }
 0x2fc   :  { %11709 = vmatpush3.bf16.msra.mxu1 %v13974_v30  ;;  %9339 = vmatprep.mubr.msk.f32.mxu1 %vm1245_vm12, %v1554_v49  ;;  %v1562_v49 = vsel %vm1526_vm6, 1.0, %v17843_v35  ;;  %vm4774_vm6 = vcmp.eq.s32.totalorder %v14198_v47, 30 }
 0x2fd   :  { %11711 = vmatprep.subr.bf16.mxu1 %v14022_v26  ;;  %9642 = vmatmul.mubr.msk.f32.gmra.mrb[172].mxu0 %vm4754_vm1, %v17814_v2  ;;  %vm1529_vm1 = vcmp.eq.s32.totalorder %v14485_v9, 1 }
 0x2fe   :  { %12209 = vmatpush3.bf16.msra.mxu0 %v13970_v19  ;;  %9643 = vmatprep.mubr.msk.f32.mxu0 %vm4759_vm3, %v17814_v2  ;;  %vm1538_vm3 = vcmp.eq.s32.totalorder %v14496_v36, 1 }
 0x2ff   :  { %9340 = vmatmul.mubr.msk.f32.gmra.mrb[60].mxu1 %vm1517_vm4, %v17814_v2  ;;  %12211 = vmatprep.subr.bf16.mxu0 %v14014_v13  ;;  %vm4775_vm4 = vcmp.eq.s32.totalorder %v14188_v38, 30 }
 0x300   :  { %11713 = vmatpush3.bf16.msra.mxu1 %v13978_v41  ;;  %9341 = vmatprep.mubr.msk.f32.mxu1 %vm1245_vm12, %v1558_v48  ;;  %v17858_v48 = vld [vmem:[#allocation28_spill] sm:$0xff] }
 0x301   :  { %11715 = vmatprep.subr.bf16.mxu1 %v14030_v39  ;;  %9644 = vmatmul.mubr.msk.f32.gmra.mrb[174].mxu0 %vm4758_vm5, %v17814_v2  ;;  %vm1530_vm10 = vcmp.eq.s32.totalorder %v17858_v48, 1  ;;  %vm1533_vm5 = vcmp.eq.s32.totalorder %v14506_v25, 1 }
 0x302   :  { %12213 = vmatpush3.bf16.msra.mxu0 %v13974_v30  ;;  %9645 = vmatprep.mubr.msk.f32.mxu0 %vm4763_vm7, %v17814_v2  ;;  %vm4779_vm7 = vcmp.eq.s32.totalorder %v14216_v4, 30 }
 0x303   :  { %9342 = vmatmul.mubr.msk.f32.gmra.mrb[62].mxu1 %vm1521_vm8, %v17814_v2  ;;  %12215 = vmatprep.subr.bf16.mxu0 %v14022_v26  ;;  %vm1537_vm8 = vcmp.eq.s32.totalorder %v14523_v43, 1 }
 0x304   :  { %11717 = vmatpush3.bf16.msra.mxu1 %v13982_v55  ;;  %9343 = vmatprep.mubr.msk.f32.mxu1 %vm1245_vm12, %v1562_v49  ;;  %v1566_v49 = vsel %vm1530_vm10, 1.0, %v17843_v35  ;;  %vm4778_vm10 = vcmp.eq.s32.totalorder %v14230_v15, 30 }
 0x305   :  { %11719 = vmatprep.subr.bf16.mxu1 %v14038_v56  ;;  %9646 = vmatmul.mubr.msk.f32.gmra.mrb[176].mxu0 %vm4762_vm9, %v17814_v2  ;;  %vm1869_vm9 = vcmp.eq.s32.totalorder %v13958_v60, 2 }
 0x306   :  { %12217 = vmatpush3.bf16.msra.mxu0 %v13978_v41  ;;  %9647 = vmatprep.mubr.msk.f32.mxu0 %vm4767_vm11, %v17814_v2  ;;  %vm4783_vm11 = vcmp.eq.s32.totalorder %v14244_v33, 30 }
 0x307   :  { %9344 = vmatmul.mubr.msk.f32.gmra.mrb[64].mxu1 %vm1525_vm13, %v17814_v2  ;;  %12219 = vmatprep.subr.bf16.mxu0 %v14030_v39  ;;  %vm1868_vm13 = vcmp.eq.s32.totalorder %v14058_v27, 2 }
 0x308   :  { %11721 = vmatpush3.bf16.msra.mxu1 %v13986_v7  ;;  %9345 = vmatprep.mubr.msk.f32.mxu1 %vm1245_vm12, %v1566_v49  ;;  %v1570_v49 = vsel %vm1534_vm15, 1.0, %v17843_v35  ;;  %vm4782_vm15 = vcmp.eq.s32.totalorder %v14270_v59, 30 }
 0x309   :  { %11723 = vmatprep.subr.bf16.mxu1 %v14046_v11  ;;  %9648 = vmatmul.mubr.msk.f32.gmra.mrb[178].mxu0 %vm4766_vm14, %v17814_v2  ;;  %vm1873_vm14 = vcmp.eq.s32.totalorder %v14066_v31, 2 }
 0x30a   :  { %12221 = vmatpush3.bf16.msra.mxu0 %v13982_v55  ;;  %9649 = vmatprep.mubr.msk.f32.mxu0 %vm4771_vm0, %v17814_v2  ;;  %vm5115_vm0 = vcmp.eq.s32.totalorder %v13958_v60, 31 }
 0x30b   :  { %9346 = vmatmul.mubr.msk.f32.gmra.mrb[66].mxu1 %vm1529_vm1, %v17814_v2  ;;  %12223 = vmatprep.subr.bf16.mxu0 %v14038_v56  ;;  %vm1872_vm1 = vcmp.eq.s32.totalorder %v14072_v34, 2 }
 0x30c   :  { %11725 = vmatpush3.bf16.msra.mxu1 %v13990_v20  ;;  %9347 = vmatprep.mubr.msk.f32.mxu1 %vm1245_vm12, %v1570_v49  ;;  %v1574_v49 = vsel %vm1538_vm3, 1.0, %v17843_v35  ;;  %vm5114_vm3 = vcmp.eq.s32.totalorder %v14058_v27, 31 }
 0x30d   :  { %11727 = vmatprep.subr.bf16.mxu1 %v14062_v29  ;;  %9650 = vmatmul.mubr.msk.f32.gmra.mrb[180].mxu0 %vm4770_vm2, %v17814_v2  ;;  %vm1877_vm2 = vcmp.eq.s32.totalorder %v14084_v40, 2 }
 0x30e   :  { %12225 = vmatpush3.bf16.msra.mxu0 %v13986_v7  ;;  %9651 = vmatprep.mubr.msk.f32.mxu0 %vm4775_vm4, %v17814_v2  ;;  %vm5119_vm4 = vcmp.eq.s32.totalorder %v14066_v31, 31 }
 0x30f   :  { %9348 = vmatmul.mubr.msk.f32.gmra.mrb[68].mxu1 %vm1533_vm5, %v17814_v2  ;;  %12227 = vmatprep.subr.bf16.mxu0 %v14046_v11  ;;  %vm1876_vm5 = vcmp.eq.s32.totalorder %v14093_v45, 2 }
 0x310   :  { %11729 = vmatpush3.bf16.msra.mxu1 %v13994_v32  ;;  %9349 = vmatprep.mubr.msk.f32.mxu1 %vm1245_vm12, %v1574_v49 }
 0x311   :  { %9652 = vmatmul.mubr.msk.f32.gmra.mrb[182].mxu0 %vm4774_vm6, %v17814_v2  ;;  %11730 = vmatprep.subr.bf16.mxu1 %v17836_v17  ;;  %vm1881_vm6 = vcmp.eq.s32.totalorder %v14110_v53, 2 }
 0x312   :  { %12229 = vmatpush3.bf16.msra.mxu0 %v13990_v20  ;;  %9653 = vmatprep.mubr.msk.f32.mxu0 %vm4779_vm7, %v17814_v2  ;;  %vm5118_vm7 = vcmp.eq.s32.totalorder %v14072_v34, 31 }
 0x313   :  { %9350 = vmatmul.mubr.msk.f32.gmra.mrb[70].mxu1 %vm1537_vm8, %v17814_v2  ;;  %12231 = vmatprep.subr.bf16.mxu0 %v14062_v29  ;;  %vm5123_vm8 = vcmp.eq.s32.totalorder %v14084_v40, 31 }
 0x314   :  { %9351 = vmatprep.mubr.msk.f32.mxu1 %vm1869_vm9, %v17814_v2  ;;  %vm1880_vm9 = vcmp.eq.s32.totalorder %v14117_v61, 2 }
 0x315   :  { %9654 = vmatmul.mubr.msk.f32.gmra.mrb[184].mxu0 %vm4778_vm10, %v17814_v2  ;;  %vm1885_vm10 = vcmp.eq.s32.totalorder %v14135_v6, 2 }
 0x316   :  { %12233 = vmatpush3.bf16.msra.mxu0 %v13994_v32  ;;  %9655 = vmatprep.mubr.msk.f32.mxu0 %vm4783_vm11, %v17814_v2  ;;  %vm5122_vm11 = vcmp.eq.s32.totalorder %v14093_v45, 31 }
 0x317   :  { %9352 = vmatmul.mubr.msk.f32.vlgmr.msra.gmra.mrb[72].mxu1 %vm1868_vm13, %v17814_v2  ;;  %12259 = vmatprep.subr.bf16.mxu0 %v13998_v44  ;;  %vm5127_vm13 = vcmp.eq.s32.totalorder %v14110_v53, 31 }
 0x318   :  { %11732 = vmatpush1.bf16.msra.mxu1 %v14102_v50  ;;  %9353 = vmatprep.mubr.msk.f32.mxu1 %vm1873_vm14, %v17814_v2  ;;  %vm1884_vm14 = vcmp.eq.s32.totalorder %v14145_v12, 2 }
 0x319   :  { %11733 = vmatprep.subr.bf16.mxu1 %v17836_v17  ;;  %9656 = vmatmul.mubr.msk.f32.gmra.mrb[186].mxu0 %vm4782_vm15, %v17814_v2  ;;  %vm1889_vm15 = vcmp.eq.s32.totalorder %v14163_v22, 2 }
 0x31a   :  { %9675 = vmatprep.mubr.msk.f32.mxu0 %vm5115_vm0, %v17814_v2  ;;  %vm5126_vm0 = vcmp.eq.s32.totalorder %v14117_v61, 31 }
 0x31b   :  { %9354 = vmatmul.mubr.msk.f32.gmra.mrb[74].mxu1 %vm1872_vm1, %v17814_v2  ;;  %vm5131_vm1 = vcmp.eq.s32.totalorder %v14135_v6, 31 }
 0x31c   :  { %11735 = vmatpush1.bf16.msra.mxu1 %v14155_v21  ;;  %9355 = vmatprep.mubr.msk.f32.mxu1 %vm1877_vm2, %v17814_v2  ;;  %vm1888_vm2 = vcmp.eq.s32.totalorder %v14170_v24, 2 }
 0x31d   :  { %11736 = vmatprep.subr.bf16.mxu1 %v17836_v17  ;;  %9676 = vmatmul.mubr.msk.f32.vlgmr.msra.gmra.mrb[188].mxu0 %vm5114_vm3, %v17814_v2  ;;  %vm1893_vm3 = vcmp.eq.s32.totalorder %v14188_v38, 2 }
 0x31e   :  { %12261 = vmatpush3.bf16.msra.mxu0 %v13966_v8  ;;  %9677 = vmatprep.mubr.msk.f32.mxu0 %vm5119_vm4, %v17814_v2  ;;  %vm5130_vm4 = vcmp.eq.s32.totalorder %v14145_v12, 31 }
 0x31f   :  { %9356 = vmatmul.mubr.msk.f32.gmra.mrb[76].mxu1 %vm1876_vm5, %v17814_v2  ;;  %12263 = vmatprep.subr.bf16.mxu0 %v14006_v62  ;;  %vm5135_vm5 = vcmp.eq.s32.totalorder %v14163_v22, 31 }
 0x320   :  { %11738 = vmatpush1.bf16.msra.mxu1 %v14208_v3  ;;  %9357 = vmatprep.mubr.msk.f32.mxu1 %vm1881_vm6, %v17814_v2  ;;  %vm1892_vm6 = vcmp.eq.s32.totalorder %v14198_v47, 2 }
 0x321   :  { %11739 = vmatprep.subr.bf16.mxu1 %v17836_v17  ;;  %9678 = vmatmul.mubr.msk.f32.gmra.mrb[190].mxu0 %vm5118_vm7, %v17814_v2  ;;  %vm1897_vm7 = vcmp.eq.s32.totalorder %v14216_v4, 2 }
 0x322   :  { %12265 = vmatpush3.bf16.msra.mxu0 %v13970_v19  ;;  %9679 = vmatprep.mubr.msk.f32.mxu0 %vm5123_vm8, %v17814_v2  ;;  %vm5134_vm8 = vcmp.eq.s32.totalorder %v14170_v24, 31 }
 0x323   :  { %9358 = vmatmul.mubr.msk.f32.gmra.mrb[78].mxu1 %vm1880_vm9, %v17814_v2  ;;  %12267 = vmatprep.subr.bf16.mxu0 %v14014_v13  ;;  %vm5139_vm9 = vcmp.eq.s32.totalorder %v14188_v38, 31 }
 0x324   :  { %11741 = vmatpush1.bf16.msra.mxu1 %v14263_v1  ;;  %9359 = vmatprep.mubr.msk.f32.mxu1 %vm1885_vm10, %v17814_v2  ;;  %vm1896_vm10 = vcmp.eq.s32.totalorder %v14230_v15, 2 }
 0x325   :  { %11742 = vmatprep.subr.bf16.mxu1 %v17836_v17  ;;  %9680 = vmatmul.mubr.msk.f32.gmra.mrb[192].mxu0 %vm5122_vm11, %v17814_v2  ;;  %vm1901_vm11 = vcmp.eq.s32.totalorder %v14244_v33, 2 }
 0x326   :  { %12269 = vmatpush3.bf16.msra.mxu0 %v13974_v30  ;;  %9681 = vmatprep.mubr.msk.f32.mxu0 %vm5127_vm13, %v17814_v2  ;;  %vm5138_vm13 = vcmp.eq.s32.totalorder %v14198_v47, 31 }
 0x327   :  { %9360 = vmatmul.mubr.msk.f32.gmra.mrb[80].mxu1 %vm1884_vm14, %v17814_v2  ;;  %12271 = vmatprep.subr.bf16.mxu0 %v14022_v26  ;;  %vm1871_vm14 = vcmp.eq.s32.totalorder %v17857_v10, 2  ;;  %v17859_v10 = vld [vmem:[#allocation21_spill] sm:$0xff] }
 0x328   :  { %11744 = vmatpush1.bf16.msra.mxu1 %v14293_v0  ;;  %9361 = vmatprep.mubr.msk.f32.mxu1 %vm1889_vm15, %v17814_v2  ;;  %vm5143_vm15 = vcmp.eq.s32.totalorder %v14216_v4, 31  ;;  %v1907_v49 = vsel %vm1871_vm14, 1.0, %v17843_v35  ;;  %vm5482_vm14 = vcmp.eq.s32.totalorder %v14072_v34, 42 }
 0x329   :  { %11745 = vmatprep.subr.bf16.mxu1 %v17836_v17  ;;  %9682 = vmatmul.mubr.msk.f32.gmra.mrb[194].mxu0 %vm5126_vm0, %v17814_v2  ;;  %vm1900_vm0 = vcmp.eq.s32.totalorder %v14270_v59, 2 }
 0x32a   :  { %12273 = vmatpush3.bf16.msra.mxu0 %v13978_v41  ;;  %9683 = vmatprep.mubr.msk.f32.mxu0 %vm5131_vm1, %v17814_v2  ;;  %vm5142_vm1 = vcmp.eq.s32.totalorder %v14230_v15, 31 }
 0x32b   :  { %9362 = vmatmul.mubr.msk.f32.gmra.mrb[82].mxu1 %vm1888_vm2, %v17814_v2  ;;  %12275 = vmatprep.subr.bf16.mxu0 %v14030_v39  ;;  %vm1875_vm2 = vcmp.eq.s32.totalorder %v14356_v54, 2 }
 0x32c   :  { %11747 = vmatpush1.bf16.msra.mxu1 %v17855_v5  ;;  %9363 = vmatprep.mubr.msk.f32.mxu1 %vm1893_vm3, %v17814_v2  ;;  %vm5147_vm3 = vcmp.eq.s32.totalorder %v14244_v33, 31 }
 0x32d   :  { %11748 = vmatprep.subr.bf16.mxu1 %v17836_v17  ;;  %9684 = vmatmul.mubr.msk.f32.gmra.mrb[196].mxu0 %vm5130_vm4, %v17814_v2  ;;  %vm1870_vm4 = vcmp.eq.s32.totalorder %v17859_v10, 2 }
 0x32e   :  { %12277 = vmatpush3.bf16.msra.mxu0 %v13982_v55  ;;  %9685 = vmatprep.mubr.msk.f32.mxu0 %vm5135_vm5, %v17814_v2  ;;  %vm5146_vm5 = vcmp.eq.s32.totalorder %v14270_v59, 31 }
 0x32f   :  { %9364 = vmatmul.mubr.msk.f32.gmra.mrb[84].mxu1 %vm1892_vm6, %v17814_v2  ;;  %12279 = vmatprep.subr.bf16.mxu0 %v14038_v56  ;;  %vm1879_vm6 = vcmp.eq.s32.totalorder %v14370_v23, 2 }
 0x330   :  { %11750 = vmatpush1.bf16.msra.mxu1 %v17856_v37  ;;  %9365 = vmatprep.mubr.msk.f32.mxu1 %vm1897_vm7, %v17814_v2  ;;  %vm5479_vm7 = vcmp.eq.s32.totalorder %v13958_v60, 42  ;;  %v1915_v23 = vsel %vm1879_vm6, 1.0, %v17843_v35  ;;  %vm5490_vm6 = vcmp.eq.s32.totalorder %v14117_v61, 42 }
 0x331   :  { %11751 = vmatprep.subr.bf16.mxu1 %v17836_v17  ;;  %9686 = vmatmul.mubr.msk.f32.gmra.mrb[198].mxu0 %vm5134_vm8, %v17814_v2  ;;  %vm1874_vm8 = vcmp.eq.s32.totalorder %v14380_v57, 2 }
 0x332   :  { %12281 = vmatpush3.bf16.msra.mxu0 %v13986_v7  ;;  %9687 = vmatprep.mubr.msk.f32.mxu0 %vm5139_vm9, %v17814_v2  ;;  %vm5478_vm9 = vcmp.eq.s32.totalorder %v14058_v27, 42 }
 0x333   :  { %9366 = vmatmul.mubr.msk.f32.gmra.mrb[86].mxu1 %vm1896_vm10, %v17814_v2  ;;  %12283 = vmatprep.subr.bf16.mxu0 %v14046_v11  ;;  %vm1883_vm10 = vcmp.eq.s32.totalorder %v14394_v18, 2 }
 0x334   :  { %11753 = vmatpush1.bf16.msra.mxu1 %v14351_v16  ;;  %9367 = vmatprep.mubr.msk.f32.mxu1 %vm1901_vm11, %v17814_v2  ;;  %vm5483_vm11 = vcmp.eq.s32.totalorder %v14066_v31, 42 }
 0x335   :  { %2109 = vmatprep.subr.mxu1 %v17843_v35  ;;  %9688 = vmatmul.mubr.msk.f32.gmra.mrb[200].mxu0 %vm5138_vm13, %v17814_v2  ;;  %vm1878_vm13 = vcmp.eq.s32.totalorder %v14404_v52, 2 }
 0x336   :  { %12285 = vmatpush3.bf16.msra.mxu0 %v13990_v20  ;;  %9689 = vmatprep.mubr.msk.f32.mxu0 %vm5143_vm15, %v17814_v2  ;;  %vm1887_vm15 = vcmp.eq.s32.totalorder %v14414_v14, 2 }
 0x337   :  { %9368 = vmatmul.mubr.msk.f32.gmra.mrb[88].mxu1 %vm1900_vm0, %v17814_v2  ;;  %12287 = vmatprep.subr.bf16.mxu0 %v14062_v29  ;;  %vm5487_vm0 = vcmp.eq.s32.totalorder %v14084_v40, 42 }
 0x338   :  { %2110 = vmatpush1.msra.mxu1 %v14374_v58  ;;  %9369 = vmatprep.mubr.msk.f32.mxu1 %vm1245_vm12, %v1907_v49  ;;  %v1911_v49 = vsel %vm1875_vm2, 1.0, %v17843_v35  ;;  %vm5486_vm2 = vcmp.eq.s32.totalorder %v14093_v45, 42 }
 0x339   :  { %11755 = vmatprep.subr.bf16.mxu1 %v13998_v44  ;;  %9690 = vmatmul.mubr.msk.f32.gmra.mrb[202].mxu0 %vm5142_vm1, %v17814_v2  ;;  %vm1882_vm1 = vcmp.eq.s32.totalorder %v14422_v28, 2 }
 0x33a   :  { %12289 = vmatpush3.bf16.msra.mxu0 %v13994_v32  ;;  %9691 = vmatprep.mubr.msk.f32.mxu0 %vm5147_vm3, %v17814_v2  ;;  %vm1891_vm3 = vcmp.eq.s32.totalorder %v14433_v46, 2 }
 0x33b   :  { %9370 = vmatmul.mubr.msk.f32.vlgmr.msra.gmra.mrb[90].mxu1 %vm1870_vm4, %v17814_v2  ;;  %12315 = vmatprep.subr.bf16.mxu0 %v13998_v44  ;;  %vm5491_vm4 = vcmp.eq.s32.totalorder %v14110_v53, 42 }
 0x33c   :  { %11757 = vmatpush3.bf16.msra.mxu1 %v13966_v8  ;;  %9371 = vmatprep.mubr.msk.f32.mxu1 %vm1245_vm12, %v1911_v49  ;;  %v9938_v54 = vpop.f32.mrb[0].mxu1  ;;  %v10292_v58 = vpop.f32.mrb[98].mxu0 }
 0x33d   :  { %11759 = vmatprep.subr.bf16.mxu1 %v14006_v62  ;;  %9692 = vmatmul.mubr.msk.f32.gmra.mrb[204].mxu0 %vm5146_vm5, %v17814_v2  ;;  %v9939_v10 = vpop.f32.mrb[1].mxu1  ;;  %v10293_v16 = vpop.f32.mrb[99].mxu0  ;;  %vm1886_vm5 = vcmp.eq.s32.totalorder %v14443_v42, 2 }
 0x33e   :  { %9711 = vmatprep.mubr.msk.f32.mxu0 %vm5479_vm7, %v17814_v2  ;;  %v14891_v37 = vadd.f32 %v9939_v10, %v9938_v54  ;;  %v14893_v49 = vadd.f32 %v10293_v16, %v10292_v58  ;;  %v1919_v10 = vsel %vm1883_vm10, 1.0, %v17843_v35  ;;  %vm1895_vm7 = vcmp.eq.s32.totalorder %v17858_v48, 2 }
 0x33f   :  { %9372 = vmatmul.mubr.msk.f32.gmra.mrb[92].mxu1 %vm1874_vm8, %v17814_v2  ;;  %vm5495_vm8 = vcmp.eq.s32.totalorder %v14135_v6, 42  ;;  %vm5494_vm10 = vcmp.eq.s32.totalorder %v14145_v12, 42 }
 0x340   :  { %17860 = vst [vmem:[#allocation28_spill] sm:$0xff] %v14893_v49  ;;  %11761 = vmatpush3.bf16.msra.mxu1 %v13970_v19  ;;  %9373 = vmatprep.mubr.msk.f32.mxu1 %vm1245_vm12, %v1915_v23  ;;  %v9941_v5 = vpop.f32.mrb[2].mxu1  ;;  %v10295_v57 = vpop.f32.mrb[100].mxu0 }
 0x341   :  { %11763 = vmatprep.subr.bf16.mxu1 %v14014_v13  ;;  %9712 = vmatmul.mubr.msk.f32.vlgmr.msra.gmra.mrb[206].mxu0 %vm5478_vm9, %v17814_v2  ;;  %v9942_v54 = vpop.f32.mrb[3].mxu1  ;;  %v10296_v16 = vpop.f32.mrb[101].mxu0  ;;  %vm1890_vm9 = vcmp.eq.s32.totalorder %v14464_v63, 2 }
 0x342   :  { %12317 = vmatpush3.bf16.msra.mxu0 %v13966_v8  ;;  %9713 = vmatprep.mubr.msk.f32.mxu0 %vm5483_vm11, %v17814_v2  ;;  %v14907_v23 = vadd.f32 %v9942_v54, %v9941_v5  ;;  %v14909_v58 = vadd.f32 %v10296_v16, %v10295_v57  ;;  %vm1899_vm11 = vcmp.eq.s32.totalorder %v14475_v51, 2 }
 0x343   :  { %9374 = vmatmul.mubr.msk.f32.gmra.mrb[94].mxu1 %vm1878_vm13, %v17814_v2  ;;  %12319 = vmatprep.subr.bf16.mxu0 %v14006_v62  ;;  %vm5499_vm13 = vcmp.eq.s32.totalorder %v14163_v22, 42 }
 0x344   :  { %17861 = vst [vmem:[#allocation34_spill] sm:$0xff] %v14909_v58  ;;  %11765 = vmatpush3.bf16.msra.mxu1 %v13974_v30  ;;  %9375 = vmatprep.mubr.msk.f32.mxu1 %vm1245_vm12, %v1919_v10  ;;  %v9944_v49 = vpop.f32.mrb[4].mxu1  ;;  %v10298_v52 = vpop.f32.mrb[102].mxu0  ;;  %v1923_v10 = vsel %vm1887_vm15, 1.0, %v17843_v35  ;;  %vm5498_vm15 = vcmp.eq.s32.totalorder %v14170_v24, 42 }
 0x345   :  { %11767 = vmatprep.subr.bf16.mxu1 %v14022_v26  ;;  %9714 = vmatmul.mubr.msk.f32.gmra.mrb[208].mxu0 %vm5482_vm14, %v17814_v2  ;;  %v9945_v57 = vpop.f32.mrb[5].mxu1  ;;  %v10299_v5 = vpop.f32.mrb[103].mxu0  ;;  %vm1894_vm14 = vcmp.eq.s32.totalorder %v14485_v9, 2 }
 0x346   :  { %12321 = vmatpush3.bf16.msra.mxu0 %v13970_v19  ;;  %9715 = vmatprep.mubr.msk.f32.mxu0 %vm5487_vm0, %v17814_v2  ;;  %v14924_v54 = vadd.f32 %v9945_v57, %v9944_v49  ;;  %v14926_v16 = vadd.f32 %v10299_v5, %v10298_v52  ;;  %vm1903_vm0 = vcmp.eq.s32.totalorder %v14496_v36, 2 }
 0x347   :  { %9376 = vmatmul.mubr.msk.f32.gmra.mrb[96].mxu1 %vm1882_vm1, %v17814_v2  ;;  %12323 = vmatprep.subr.bf16.mxu0 %v14014_v13  ;;  %vm5503_vm1 = vcmp.eq.s32.totalorder %v14188_v38, 42 }
 0x348   :  { %17862 = vst [vmem:[#allocation35_spill] sm:$0xff] %v14926_v16  ;;  %11769 = vmatpush3.bf16.msra.mxu1 %v13978_v41  ;;  %9377 = vmatprep.mubr.msk.f32.mxu1 %vm1245_vm12, %v1923_v10  ;;  %v9947_v58 = vpop.f32.mrb[6].mxu1  ;;  %v10301_v28 = vpop.f32.mrb[104].mxu0  ;;  %v1927_v10 = vsel %vm1891_vm3, 1.0, %v17843_v35  ;;  %vm5502_vm3 = vcmp.eq.s32.totalorder %v14198_v47, 42 }
 0x349   :  { %11771 = vmatprep.subr.bf16.mxu1 %v14030_v39  ;;  %9716 = vmatmul.mubr.msk.f32.gmra.mrb[210].mxu0 %vm5486_vm2, %v17814_v2  ;;  %v9948_v52 = vpop.f32.mrb[7].mxu1  ;;  %v10302_v49 = vpop.f32.mrb[105].mxu0  ;;  %vm1898_vm2 = vcmp.eq.s32.totalorder %v14506_v25, 2 }
 0x34a   :  { %12325 = vmatpush3.bf16.msra.mxu0 %v13974_v30  ;;  %9717 = vmatprep.mubr.msk.f32.mxu0 %vm5491_vm4, %v17814_v2  ;;  %v14941_v57 = vadd.f32 %v9948_v52, %v9947_v58  ;;  %v14943_v5 = vadd.f32 %v10302_v49, %v10301_v28  ;;  %vm5507_vm4 = vcmp.eq.s32.totalorder %v14216_v4, 42 }
 0x34b   :  { %9378 = vmatmul.mubr.msk.f32.gmra.mrb[98].mxu1 %vm1886_vm5, %v17814_v2  ;;  %12327 = vmatprep.subr.bf16.mxu0 %v14022_v26  ;;  %vm1902_vm5 = vcmp.eq.s32.totalorder %v14523_v43, 2 }
 0x34c   :  { %17863 = vst [vmem:[#allocation36_spill] sm:$0xff] %v14943_v5  ;;  %11773 = vmatpush3.bf16.msra.mxu1 %v13982_v55  ;;  %9379 = vmatprep.mubr.msk.f32.mxu1 %vm1245_vm12, %v1927_v10  ;;  %v9950_v16 = vpop.f32.mrb[8].mxu1  ;;  %v10304_v42 = vpop.f32.mrb[106].mxu0  ;;  %v1931_v10 = vsel %vm1895_vm7, 1.0, %v17843_v35  ;;  %vm5506_vm7 = vcmp.eq.s32.totalorder %v14230_v15, 42 }
 0x34d   :  { %11775 = vmatprep.subr.bf16.mxu1 %v14038_v56  ;;  %9718 = vmatmul.mubr.msk.f32.gmra.mrb[212].mxu0 %vm5490_vm6, %v17814_v2  ;;  %v9951_v28 = vpop.f32.mrb[9].mxu1  ;;  %v10305_v58 = vpop.f32.mrb[107].mxu0  ;;  %vm2234_vm6 = vcmp.eq.s32.totalorder %v13958_v60, 3 }
 0x34e   :  { %12329 = vmatpush3.bf16.msra.mxu0 %v13978_v41  ;;  %9719 = vmatprep.mubr.msk.f32.mxu0 %vm5495_vm8, %v17814_v2  ;;  %v14958_v52 = vadd.f32 %v9951_v28, %v9950_v16  ;;  %v14960_v49 = vadd.f32 %v10305_v58, %v10304_v42  ;;  %vm5511_vm8 = vcmp.eq.s32.totalorder %v14244_v33, 42 }
 0x34f   :  { %9380 = vmatmul.mubr.msk.f32.gmra.mrb[100].mxu1 %vm1890_vm9, %v17814_v2  ;;  %12331 = vmatprep.subr.bf16.mxu0 %v14030_v39  ;;  %vm2233_vm9 = vcmp.eq.s32.totalorder %v14058_v27, 3 }
 0x350   :  { %17864 = vst [vmem:[#allocation37_spill] sm:$0xff] %v14960_v49  ;;  %11777 = vmatpush3.bf16.msra.mxu1 %v13986_v7  ;;  %9381 = vmatprep.mubr.msk.f32.mxu1 %vm1245_vm12, %v1931_v10  ;;  %v9953_v5 = vpop.f32.mrb[10].mxu1  ;;  %v10307_v63 = vpop.f32.mrb[108].mxu0  ;;  %v1935_v10 = vsel %vm1899_vm11, 1.0, %v17843_v35  ;;  %vm5510_vm11 = vcmp.eq.s32.totalorder %v14270_v59, 42 }
 0x351   :  { %11779 = vmatprep.subr.bf16.mxu1 %v14046_v11  ;;  %9720 = vmatmul.mubr.msk.f32.gmra.mrb[214].mxu0 %vm5494_vm10, %v17814_v2  ;;  %v9954_v42 = vpop.f32.mrb[11].mxu1  ;;  %v10308_v16 = vpop.f32.mrb[109].mxu0  ;;  %vm2238_vm10 = vcmp.eq.s32.totalorder %v14066_v31, 3 }
 0x352   :  { %12333 = vmatpush3.bf16.msra.mxu0 %v13982_v55  ;;  %9721 = vmatprep.mubr.msk.f32.mxu0 %vm5499_vm13, %v17814_v2  ;;  %v14975_v28 = vadd.f32 %v9954_v42, %v9953_v5  ;;  %v14977_v58 = vadd.f32 %v10308_v16, %v10307_v63  ;;  %vm5843_vm13 = vcmp.eq.s32.totalorder %v13958_v60, 43 }
 0x353   :  { %9382 = vmatmul.mubr.msk.f32.gmra.mrb[102].mxu1 %vm1894_vm14, %v17814_v2  ;;  %12335 = vmatprep.subr.bf16.mxu0 %v14038_v56  ;;  %vm2237_vm14 = vcmp.eq.s32.totalorder %v14072_v34, 3 }
 0x354   :  { %17865 = vst [vmem:[#allocation38_spill] sm:$0xff] %v14977_v58  ;;  %11781 = vmatpush3.bf16.msra.mxu1 %v13990_v20  ;;  %9383 = vmatprep.mubr.msk.f32.mxu1 %vm1245_vm12, %v1935_v10  ;;  %v9956_v49 = vpop.f32.mrb[12].mxu1  ;;  %v10310_v9 = vpop.f32.mrb[110].mxu0  ;;  %v1939_v10 = vsel %vm1903_vm0, 1.0, %v17843_v35  ;;  %vm5842_vm0 = vcmp.eq.s32.totalorder %v14058_v27, 43 }
 0x355   :  { %11783 = vmatprep.subr.bf16.mxu1 %v14062_v29  ;;  %9722 = vmatmul.mubr.msk.f32.gmra.mrb[216].mxu0 %vm5498_vm15, %v17814_v2  ;;  %v9957_v63 = vpop.f32.mrb[13].mxu1  ;;  %v10311_v5 = vpop.f32.mrb[111].mxu0  ;;  %vm2242_vm15 = vcmp.eq.s32.totalorder %v14084_v40, 3 }
 0x356   :  { %12337 = vmatpush3.bf16.msra.mxu0 %v13986_v7  ;;  %9723 = vmatprep.mubr.msk.f32.mxu0 %vm5503_vm1, %v17814_v2  ;;  %v14992_v42 = vadd.f32 %v9957_v63, %v9956_v49  ;;  %v14994_v16 = vadd.f32 %v10311_v5, %v10310_v9  ;;  %vm5847_vm1 = vcmp.eq.s32.totalorder %v14066_v31, 43 }
 0x357   :  { %9384 = vmatmul.mubr.msk.f32.gmra.mrb[104].mxu1 %vm1898_vm2, %v17814_v2  ;;  %12339 = vmatprep.subr.bf16.mxu0 %v14046_v11  ;;  %vm2241_vm2 = vcmp.eq.s32.totalorder %v14093_v45, 3 }
 0x358   :  { %17866 = vst [vmem:[#allocation39_spill] sm:$0xff] %v14994_v16  ;;  %11785 = vmatpush3.bf16.msra.mxu1 %v13994_v32  ;;  %9385 = vmatprep.mubr.msk.f32.mxu1 %vm1245_vm12, %v1939_v10  ;;  %v9959_v58 = vpop.f32.mrb[14].mxu1  ;;  %v10313_v25 = vpop.f32.mrb[112].mxu0 }
 0x359   :  { %9724 = vmatmul.mubr.msk.f32.gmra.mrb[218].mxu0 %vm5502_vm3, %v17814_v2  ;;  %v9960_v9 = vpop.f32.mrb[15].mxu1  ;;  %v10314_v49 = vpop.f32.mrb[113].mxu0  ;;  %11786 = vmatprep.subr.bf16.mxu1 %v17836_v17  ;;  %vm2246_vm3 = vcmp.eq.s32.totalorder %v14110_v53, 3 }
 0x35a   :  { %12341 = vmatpush3.bf16.msra.mxu0 %v13990_v20  ;;  %9725 = vmatprep.mubr.msk.f32.mxu0 %vm5507_vm4, %v17814_v2  ;;  %v15008_v63 = vadd.f32 %v9960_v9, %v9959_v58  ;;  %v15010_v5 = vadd.f32 %v10314_v49, %v10313_v25  ;;  %vm5846_vm4 = vcmp.eq.s32.totalorder %v14072_v34, 43 }
 0x35b   :  { %9386 = vmatmul.mubr.msk.f32.gmra.mrb[106].mxu1 %vm1902_vm5, %v17814_v2  ;;  %12343 = vmatprep.subr.bf16.mxu0 %v14062_v29  ;;  %vm5851_vm5 = vcmp.eq.s32.totalorder %v14084_v40, 43 }
 0x35c   :  { %17867 = vst [vmem:[#allocation40_spill] sm:$0xff] %v15010_v5  ;;  %9387 = vmatprep.mubr.msk.f32.mxu1 %vm2234_vm6, %v17814_v2  ;;  %v9962_v10 = vpop.f32.mrb[16].mxu1  ;;  %v10316_v16 = vpop.f32.mrb[114].mxu0  ;;  %vm2245_vm6 = vcmp.eq.s32.totalorder %v14117_v61, 3 }
 0x35d   :  { %v9963_v36 = vpop.f32.mrb[17].mxu1  ;;  %v10317_v43 = vpop.f32.mrb[115].mxu0  ;;  %9726 = vmatmul.mubr.msk.f32.gmra.mrb[220].mxu0 %vm5506_vm7, %v17814_v2  ;;  %vm2250_vm7 = vcmp.eq.s32.totalorder %v14135_v6, 3 }
 0x35e   :  { %v15019_v25 = vadd.f32 %v9963_v36, %v9962_v10  ;;  %v15021_v58 = vadd.f32 %v10317_v43, %v10316_v16  ;;  %12345 = vmatpush3.bf16.msra.mxu0 %v13994_v32  ;;  %9727 = vmatprep.mubr.msk.f32.mxu0 %vm5511_vm8, %v17814_v2  ;;  %vm5850_vm8 = vcmp.eq.s32.totalorder %v14093_v45, 43 }
 0x35f   :  { %9388 = vmatmul.mubr.msk.f32.vlgmr.msra.gmra.mrb[108].mxu1 %vm2233_vm9, %v17814_v2  ;;  %12371 = vmatprep.subr.bf16.mxu0 %v13998_v44  ;;  %vm5855_vm9 = vcmp.eq.s32.totalorder %v14110_v53, 43 }
 0x360   :  { %17868 = vst [vmem:[#allocation41_spill] sm:$0xff] %v15021_v58  ;;  %11788 = vmatpush1.bf16.msra.mxu1 %v14102_v50  ;;  %9389 = vmatprep.mubr.msk.f32.mxu1 %vm2238_vm10, %v17814_v2  ;;  %v10351_v36 = vpop.f32.mrb[116].mxu0  ;;  %vm2249_vm10 = vcmp.eq.s32.totalorder %v14145_v12, 3 }
 0x361   :  { %11789 = vmatprep.subr.bf16.mxu1 %v17836_v17  ;;  %v10352_v43 = vpop.f32.mrb[117].mxu0  ;;  %9728 = vmatmul.mubr.msk.f32.gmra.mrb[222].mxu0 %vm5510_vm11, %v17814_v2  ;;  %vm2254_vm11 = vcmp.eq.s32.totalorder %v14163_v22, 3 }
 0x362   :  { %v15035_v16 = vadd.f32 %v10352_v43, %v10351_v36  ;;  %9747 = vmatprep.mubr.msk.f32.mxu0 %vm5843_vm13, %v17814_v2  ;;  %vm5854_vm13 = vcmp.eq.s32.totalorder %v14117_v61, 43 }
 0x363   :  { %9390 = vmatmul.mubr.msk.f32.gmra.mrb[110].mxu1 %vm2237_vm14, %v17814_v2  ;;  %vm5859_vm14 = vcmp.eq.s32.totalorder %v14135_v6, 43 }
 0x364   :  { %17869 = vst [vmem:[#allocation42_spill] sm:$0xff] %v15035_v16  ;;  %11791 = vmatpush1.bf16.msra.mxu1 %v14155_v21  ;;  %9391 = vmatprep.mubr.msk.f32.mxu1 %vm2242_vm15, %v17814_v2  ;;  %v10354_v9 = vpop.f32.mrb[118].mxu0  ;;  %vm2253_vm15 = vcmp.eq.s32.totalorder %v14170_v24, 3 }
 0x365   :  { %11792 = vmatprep.subr.bf16.mxu1 %v17836_v17  ;;  %v10355_v49 = vpop.f32.mrb[119].mxu0  ;;  %9748 = vmatmul.mubr.msk.f32.vlgmr.msra.gmra.mrb[224].mxu0 %vm5842_vm0, %v17814_v2  ;;  %vm2258_vm0 = vcmp.eq.s32.totalorder %v14188_v38, 3 }
 0x366   :  { %v15047_v10 = vadd.f32 %v10355_v49, %v10354_v9  ;;  %12373 = vmatpush3.bf16.msra.mxu0 %v13966_v8  ;;  %9749 = vmatprep.mubr.msk.f32.mxu0 %vm5847_vm1, %v17814_v2  ;;  %vm5858_vm1 = vcmp.eq.s32.totalorder %v14145_v12, 43 }
 0x367   :  { %9392 = vmatmul.mubr.msk.f32.gmra.mrb[112].mxu1 %vm2241_vm2, %v17814_v2  ;;  %12375 = vmatprep.subr.bf16.mxu0 %v14006_v62  ;;  %vm5863_vm2 = vcmp.eq.s32.totalorder %v14163_v22, 43 }
 0x368   :  { %17870 = vst [vmem:[#allocation43_spill] sm:$0xff] %v15047_v10  ;;  %11794 = vmatpush1.bf16.msra.mxu1 %v14208_v3  ;;  %9393 = vmatprep.mubr.msk.f32.mxu1 %vm2246_vm3, %v17814_v2  ;;  %v10357_v36 = vpop.f32.mrb[120].mxu0  ;;  %vm2257_vm3 = vcmp.eq.s32.totalorder %v14198_v47, 3 }
 0x369   :  { %11795 = vmatprep.subr.bf16.mxu1 %v17836_v17  ;;  %v10358_v43 = vpop.f32.mrb[121].mxu0  ;;  %9750 = vmatmul.mubr.msk.f32.gmra.mrb[226].mxu0 %vm5846_vm4, %v17814_v2  ;;  %vm2262_vm4 = vcmp.eq.s32.totalorder %v14216_v4, 3 }
 0x36a   :  { %v15061_v9 = vadd.f32 %v10358_v43, %v10357_v36  ;;  %12377 = vmatpush3.bf16.msra.mxu0 %v13970_v19  ;;  %9751 = vmatprep.mubr.msk.f32.mxu0 %vm5851_vm5, %v17814_v2  ;;  %vm5862_vm5 = vcmp.eq.s32.totalorder %v14170_v24, 43 }
 0x36b   :  { %9394 = vmatmul.mubr.msk.f32.gmra.mrb[114].mxu1 %vm2245_vm6, %v17814_v2  ;;  %12379 = vmatprep.subr.bf16.mxu0 %v14014_v13  ;;  %vm5867_vm6 = vcmp.eq.s32.totalorder %v14188_v38, 43 }
 0x36c   :  { %17871 = vst [vmem:[#allocation44_spill] sm:$0xff] %v15061_v9  ;;  %11797 = vmatpush1.bf16.msra.mxu1 %v14263_v1  ;;  %9395 = vmatprep.mubr.msk.f32.mxu1 %vm2250_vm7, %v17814_v2  ;;  %v10360_v49 = vpop.f32.mrb[122].mxu0  ;;  %vm2261_vm7 = vcmp.eq.s32.totalorder %v14230_v15, 3 }
 0x36d   :  { %11798 = vmatprep.subr.bf16.mxu1 %v17836_v17  ;;  %v10361_v36 = vpop.f32.mrb[123].mxu0  ;;  %9752 = vmatmul.mubr.msk.f32.gmra.mrb[228].mxu0 %vm5850_vm8, %v17814_v2  ;;  %vm2266_vm8 = vcmp.eq.s32.totalorder %v14244_v33, 3 }
 0x36e   :  { %v15075_v43 = vadd.f32 %v10361_v36, %v10360_v49  ;;  %12381 = vmatpush3.bf16.msra.mxu0 %v13974_v30  ;;  %9753 = vmatprep.mubr.msk.f32.mxu0 %vm5855_vm9, %v17814_v2  ;;  %vm5866_vm9 = vcmp.eq.s32.totalorder %v14198_v47, 43 }
 0x36f   :  { %9396 = vmatmul.mubr.msk.f32.gmra.mrb[116].mxu1 %vm2249_vm10, %v17814_v2  ;;  %12383 = vmatprep.subr.bf16.mxu0 %v14022_v26 }
 0x370   :  { %17872 = vst [vmem:[#allocation45_spill] sm:$0xff] %v15075_v43  ;;  %11800 = vmatpush1.bf16.msra.mxu1 %v14293_v0  ;;  %9397 = vmatprep.mubr.msk.f32.mxu1 %vm2254_vm11, %v17814_v2  ;;  %v10363_v9 = vpop.f32.mrb[124].mxu0  ;;  %v17874_v43 = vld [vmem:[#allocation17_spill] sm:$0xff]  ;;  %vm5871_vm11 = vcmp.eq.s32.totalorder %v14216_v4, 43 }
 0x371   :  { %11801 = vmatprep.subr.bf16.mxu1 %v17836_v17  ;;  %v10364_v49 = vpop.f32.mrb[125].mxu0  ;;  %9754 = vmatmul.mubr.msk.f32.gmra.mrb[230].mxu0 %vm5854_vm13, %v17814_v2  ;;  %vm1493_vm13 = vcmask 130048  }
 0x372   :  { %v15089_v36 = vadd.f32 %v10364_v49, %v10363_v9  ;;  %12385 = vmatpush3.bf16.msra.mxu0 %v13978_v41  ;;  %9755 = vmatprep.mubr.msk.f32.mxu0 %vm5859_vm14, %v17814_v2  ;;  %vm2265_vm14 = vcmp.eq.s32.totalorder %v14270_v59, 3 }
 0x373   :  { %9398 = vmatmul.mubr.msk.f32.gmra.mrb[118].mxu1 %vm2253_vm15, %v17814_v2  ;;  %12387 = vmatprep.subr.bf16.mxu0 %v14030_v39  ;;  %vm5870_vm15 = vcmp.eq.s32.totalorder %v14230_v15, 43 }
 0x374   :  { %17873 = vst [vmem:[#allocation46_spill] sm:$0xff] %v15089_v36  ;;  %11803 = vmatpush1.bf16.msra.mxu1 %v17874_v43  ;;  %9399 = vmatprep.mubr.msk.f32.mxu1 %vm2258_vm0, %v17814_v2  ;;  %v10366_v10 = vpop.f32.mrb[126].mxu0  ;;  %v17876_v36 = vld [vmem:[#allocation18_spill] sm:$0xff]  ;;  %v17881_v43 = vld [vmem:[#allocation23_spill] sm:$0xff] }
 0x375   :  { %11804 = vmatprep.subr.bf16.mxu1 %v17836_v17  ;;  %v10367_v9 = vpop.f32.mrb[127].mxu0  ;;  %9756 = vmatmul.mubr.msk.f32.gmra.mrb[232].mxu0 %vm5858_vm1, %v17814_v2  ;;  %vm5875_vm1 = vcmp.eq.s32.totalorder %v14244_v33, 43 }
 0x376   :  { %v15103_v49 = vadd.f32 %v10367_v9, %v10366_v10  ;;  %12389 = vmatpush3.bf16.msra.mxu0 %v13982_v55  ;;  %9757 = vmatprep.mubr.msk.f32.mxu0 %vm5863_vm2, %v17814_v2 }
 0x377   :  { %9400 = vmatmul.mubr.msk.f32.gmra.mrb[120].mxu1 %vm2257_vm3, %v17814_v2  ;;  %12391 = vmatprep.subr.bf16.mxu0 %v14038_v56  ;;  %vm5874_vm3 = vcmp.eq.s32.totalorder %v14270_v59, 43 }
 0x378   :  { %17875 = vst [vmem:[#allocation47_spill] sm:$0xff] %v15103_v49  ;;  %11806 = vmatpush1.bf16.msra.mxu1 %v17876_v36  ;;  %9401 = vmatprep.mubr.msk.f32.mxu1 %vm2262_vm4, %v17814_v2  ;;  %v10369_v16 = vpop.f32.mrb[128].mxu0  ;;  %v17878_v49 = vld [vmem:[#allocation19_spill] sm:$0xff] }
 0x379   :  { %11807 = vmatprep.subr.bf16.mxu1 %v17836_v17  ;;  %v10370_v10 = vpop.f32.mrb[129].mxu0  ;;  %9758 = vmatmul.mubr.msk.f32.gmra.mrb[234].mxu0 %vm5862_vm5, %v17814_v2  ;;  %vm6207_vm5 = vcmp.eq.s32.totalorder %v13958_v60, 44 }
 0x37a   :  { %v15117_v9 = vadd.f32 %v10370_v10, %v10369_v16  ;;  %12393 = vmatpush3.bf16.msra.mxu0 %v13986_v7  ;;  %9759 = vmatprep.mubr.msk.f32.mxu0 %vm5867_vm6, %v17814_v2  ;;  %v17879_v16 = vld [vmem:[#allocation14_spill] sm:$0xff] }
 0x37b   :  { %9402 = vmatmul.mubr.msk.f32.gmra.mrb[122].mxu1 %vm2261_vm7, %v17814_v2  ;;  %12395 = vmatprep.subr.bf16.mxu0 %v14046_v11  ;;  %vm2236_vm10 = vcmp.eq.s32.totalorder %v17879_v16, 3  ;;  %vm6206_vm7 = vcmp.eq.s32.totalorder %v14058_v27, 44 }
 0x37c   :  { %17877 = vst [vmem:[#allocation48_spill] sm:$0xff] %v15117_v9  ;;  %11809 = vmatpush1.bf16.msra.mxu1 %v17878_v49  ;;  %9403 = vmatprep.mubr.msk.f32.mxu1 %vm2266_vm8, %v17814_v2  ;;  %v10372_v58 = vpop.f32.mrb[130].mxu0  ;;  %v2272_v16 = vsel %vm2236_vm10, 1.0, %v17843_v35  ;;  %vm2248_vm8 = vcmp.eq.s32.totalorder %v14394_v18, 3 }
 0x37d   :  { %v1449_v10 = vpop.f32.mrb[18].mxu1  ;;  %2474 = vmatprep.subr.mxu1 %v17843_v35  ;;  %v10373_v9 = vpop.f32.mrb[131].mxu0  ;;  %9760 = vmatmul.mubr.msk.f32.gmra.mrb[236].mxu0 %vm5866_vm9, %v17814_v2  ;;  %vm6211_vm9 = vcmp.eq.s32.totalorder %v14066_v31, 44 }
 0x37e   :  { %v1450_v5 = vadd.f32 %v14891_v37, %v1449_v10  ;;  %v15133_v36 = vadd.f32 %v10373_v9, %v10372_v58  ;;  %12397 = vmatpush3.bf16.msra.mxu0 %v13990_v20  ;;  %v1451_v49 = vpop.f32.mrb[19].mxu1  ;;  %9761 = vmatprep.mubr.msk.f32.mxu0 %vm5871_vm11, %v17814_v2  ;;  %v17882_v58 = vld [vmem:[#allocation20_spill] sm:$0xff]  ;;  %vm6210_vm11 = vcmp.eq.s32.totalorder %v14072_v34, 44 }
 0x37f   :  { %9404 = vmatmul.mubr.msk.f32.gmra.mrb[124].mxu1 %vm2265_vm14, %v17814_v2  ;;  %12399 = vmatprep.subr.bf16.mxu0 %v14062_v29  ;;  %vm2240_vm0 = vcmp.eq.s32.totalorder %v17882_v58, 3  ;;  %vm2252_vm14 = vcmp.eq.s32.totalorder %v14414_v14, 3 }
 0x380   :  { %17880 = vst [vmem:[#allocation49_spill] sm:$0xff] %v15133_v36  ;;  %2475 = vmatpush1.msra.mxu1 %v17881_v43  ;;  %9405 = vmatprep.mubr.msk.f32.mxu1 %vm1245_vm12, %v2272_v16  ;;  %v10375_v37 = vpop.f32.mrb[132].mxu0  ;;  %1494 = vst.msk [vmem:[#allocation2] sm:$0xff] %vm1493_vm13, %v1450_v5  ;;  %v17884_v43 = vld [vmem:[#allocation21_spill] sm:$0xff]  ;;  %v2276_v5 = vsel %vm2240_vm0, 1.0, %v17843_v35 }
 0x381   :  { %11811 = vmatprep.subr.bf16.mxu1 %v13998_v44  ;;  %v1454_v49 = vpop.f32.mrb[20].mxu1  ;;  %v10376_v9 = vpop.f32.mrb[133].mxu0  ;;  %9762 = vmatmul.mubr.msk.f32.gmra.mrb[238].mxu0 %vm5870_vm15, %v17814_v2  ;;  %vm2235_vm2 = vcmp.eq.s32.totalorder %v17884_v43, 3  ;;  %vm6215_vm15 = vcmp.eq.s32.totalorder %v14084_v40, 44 }
 0x382   :  { %v1455_v10 = vadd.f32 %v14907_v23, %v1454_v49  ;;  %v15150_v36 = vadd.f32 %v10376_v9, %v10375_v37  ;;  %12401 = vmatpush3.bf16.msra.mxu0 %v13994_v32  ;;  %v1456_v16 = vpop.f32.mrb[21].mxu1  ;;  %9763 = vmatprep.mubr.msk.f32.mxu0 %vm5875_vm1, %v17814_v2  ;;  %v17885_v37 = vld [vmem:[#allocation22_spill] sm:$0xff]  ;;  %vm6214_vm1 = vcmp.eq.s32.totalorder %v14093_v45, 44 }
 0x383   :  { %9406 = vmatmul.mubr.msk.f32.vlgmr.msra.gmra.mrb[126].mxu1 %vm2235_vm2, %v17814_v2  ;;  %12427 = vmatprep.subr.bf16.mxu0 %v13998_v44  ;;  %vm2244_vm4 = vcmp.eq.s32.totalorder %v17885_v37, 3  ;;  %vm2256_vm2 = vcmp.eq.s32.totalorder %v14433_v46, 3 }
 0x384   :  { %17883 = vst [vmem:[#allocation20_spill] sm:$0xff] %v15150_v36  ;;  %11813 = vmatpush3.bf16.msra.mxu1 %v13966_v8  ;;  %9407 = vmatprep.mubr.msk.f32.mxu1 %vm1245_vm12, %v2276_v5  ;;  %v10410_v23 = vpop.f32.mrb[134].mxu0  ;;  %1495 = vst.msk [vmem:[#allocation2 + $0x10] sm:$0xff] %vm1493_vm13, %v1455_v10  ;;  %v17887_v36 = vld [vmem:[#allocation24_spill] sm:$0xff]  ;;  %v2280_v10 = vsel %vm2244_vm4, 1.0, %v17843_v35 }
 0x385   :  { %11815 = vmatprep.subr.bf16.mxu1 %v14006_v62  ;;  %v10411_v49 = vpop.f32.mrb[135].mxu0  ;;  %9764 = vmatmul.mubr.msk.f32.gmra.mrb[240].mxu0 %vm5874_vm3, %v17814_v2  ;;  %vm2239_vm6 = vcmp.eq.s32.totalorder %v17887_v36, 3  ;;  %vm6219_vm3 = vcmp.eq.s32.totalorder %v14110_v53, 44 }
 0x386   :  { %v1459_v9 = vpop.f32.mrb[22].mxu1  ;;  %v15166_v16 = vadd.f32 %v10411_v49, %v10410_v23  ;;  %9783 = vmatprep.mubr.msk.f32.mxu0 %vm6207_vm5, %v17814_v2  ;;  %v17889_v49 = vld [vmem:[#allocation25_spill] sm:$0xff]  ;;  %vm6218_vm5 = vcmp.eq.s32.totalorder %v14117_v61, 44 }
 0x387   :  { %v1460_v5 = vadd.f32 %v14924_v54, %v1459_v9  ;;  %v1461_v43 = vpop.f32.mrb[23].mxu1  ;;  %9408 = vmatmul.mubr.msk.f32.gmra.mrb[128].mxu1 %vm2239_vm6, %v17814_v2  ;;  %vm2243_vm10 = vcmp.eq.s32.totalorder %v17889_v49, 3  ;;  %vm2260_vm6 = vcmp.eq.s32.totalorder %v17858_v48, 3 }
 0x388   :  { %17886 = vst [vmem:[#allocation50_spill] sm:$0xff] %v15166_v16  ;;  %11817 = vmatpush3.bf16.msra.mxu1 %v13970_v19  ;;  %9409 = vmatprep.mubr.msk.f32.mxu1 %vm1245_vm12, %v2280_v10  ;;  %v10413_v37 = vpop.f32.mrb[136].mxu0  ;;  %v2284_v16 = vsel %vm2248_vm8, 1.0, %v17843_v35 }
 0x389   :  { %11819 = vmatprep.subr.bf16.mxu1 %v14014_v13  ;;  %v10414_v23 = vpop.f32.mrb[137].mxu0  ;;  %9784 = vmatmul.mubr.msk.f32.vlgmr.msra.gmra.mrb[242].mxu0 %vm6206_vm7, %v17814_v2  ;;  %1496 = vst.msk [vmem:[#allocation2 + $0x20] sm:$0xff] %vm1493_vm13, %v1460_v5  ;;  %vm6223_vm7 = vcmp.eq.s32.totalorder %v14135_v6, 44 }
 0x38a   :  { %v1464_v54 = vpop.f32.mrb[24].mxu1  ;;  %v15181_v43 = vadd.f32 %v10414_v23, %v10413_v37  ;;  %12429 = vmatpush3.bf16.msra.mxu0 %v13966_v8  ;;  %9785 = vmatprep.mubr.msk.f32.mxu0 %vm6211_vm9, %v17814_v2  ;;  %vm6222_vm9 = vcmp.eq.s32.totalorder %v14145_v12, 44 }
 0x38b   :  { %v1465_v9 = vadd.f32 %v14941_v57, %v1464_v54  ;;  %v1466_v10 = vpop.f32.mrb[25].mxu1  ;;  %9410 = vmatmul.mubr.msk.f32.gmra.mrb[130].mxu1 %vm2243_vm10, %v17814_v2  ;;  %12431 = vmatprep.subr.bf16.mxu0 %v14006_v62  ;;  %vm2264_vm10 = vcmp.eq.s32.totalorder %v14475_v51, 3 }
 0x38c   :  { %17888 = vst [vmem:[#allocation24_spill] sm:$0xff] %v15181_v43  ;;  %11821 = vmatpush3.bf16.msra.mxu1 %v13974_v30  ;;  %9411 = vmatprep.mubr.msk.f32.mxu1 %vm1245_vm12, %v2284_v16  ;;  %v10416_v37 = vpop.f32.mrb[138].mxu0  ;;  %v17891_v16 = vld [vmem:[#allocation26_spill] sm:$0xff]  ;;  %v2288_v43 = vsel %vm2252_vm14, 1.0, %v17843_v35 }
 0x38d   :  { %11823 = vmatprep.subr.bf16.mxu1 %v14022_v26  ;;  %v10417_v5 = vpop.f32.mrb[139].mxu0  ;;  %9786 = vmatmul.mubr.msk.f32.gmra.mrb[244].mxu0 %vm6210_vm11, %v17814_v2  ;;  %1497 = vst.msk [vmem:[#allocation2 + $0x30] sm:$0xff] %vm1493_vm13, %v1465_v9  ;;  %vm2247_vm0 = vcmp.eq.s32.totalorder %v17891_v16, 3  ;;  %vm6227_vm11 = vcmp.eq.s32.totalorder %v14163_v22, 44 }
 0x38e   :  { %v1469_v57 = vpop.f32.mrb[26].mxu1  ;;  %v15198_v23 = vadd.f32 %v10417_v5, %v10416_v37  ;;  %12433 = vmatpush3.bf16.msra.mxu0 %v13970_v19  ;;  %9787 = vmatprep.mubr.msk.f32.mxu0 %vm6215_vm15, %v17814_v2  ;;  %vm6226_vm15 = vcmp.eq.s32.totalorder %v14170_v24, 44 }
 0x38f   :  { %v1470_v54 = vadd.f32 %v14958_v52, %v1469_v57  ;;  %v1471_v10 = vpop.f32.mrb[27].mxu1  ;;  %9412 = vmatmul.mubr.msk.f32.gmra.mrb[132].mxu1 %vm2247_vm0, %v17814_v2  ;;  %12435 = vmatprep.subr.bf16.mxu0 %v14014_v13 }
 0x390   :  { %17890 = vst [vmem:[#allocation25_spill] sm:$0xff] %v15198_v23  ;;  %11825 = vmatpush3.bf16.msra.mxu1 %v13978_v41  ;;  %9413 = vmatprep.mubr.msk.f32.mxu1 %vm1245_vm12, %v2288_v43  ;;  %v10419_v9 = vpop.f32.mrb[140].mxu0  ;;  %v17893_v43 = vld [vmem:[#allocation27_spill] sm:$0xff]  ;;  %v2292_v23 = vsel %vm2256_vm2, 1.0, %v17843_v35 }
 0x391   :  { %11827 = vmatprep.subr.bf16.mxu1 %v14030_v39  ;;  %v10420_v37 = vpop.f32.mrb[141].mxu0  ;;  %9788 = vmatmul.mubr.msk.f32.gmra.mrb[246].mxu0 %vm6214_vm1, %v17814_v2  ;;  %1498 = vst.msk [vmem:[#allocation2 + $0x40] sm:$0xff] %vm1493_vm13, %v1470_v54  ;;  %vm2251_vm4 = vcmp.eq.s32.totalorder %v17893_v43, 3  ;;  %vm6231_vm1 = vcmp.eq.s32.totalorder %v14188_v38, 44 }
 0x392   :  { %v1474_v52 = vpop.f32.mrb[28].mxu1  ;;  %v15215_v5 = vadd.f32 %v10420_v37, %v10419_v9  ;;  %12437 = vmatpush3.bf16.msra.mxu0 %v13974_v30  ;;  %9789 = vmatprep.mubr.msk.f32.mxu0 %vm6219_vm3, %v17814_v2  ;;  %vm6230_vm3 = vcmp.eq.s32.totalorder %v14198_v47, 44 }
 0x393   :  { %v1475_v57 = vadd.f32 %v14975_v28, %v1474_v52  ;;  %v1476_v10 = vpop.f32.mrb[29].mxu1  ;;  %9414 = vmatmul.mubr.msk.f32.gmra.mrb[134].mxu1 %vm2251_vm4, %v17814_v2  ;;  %12439 = vmatprep.subr.bf16.mxu0 %v14022_v26  ;;  %vm6235_vm4 = vcmp.eq.s32.totalorder %v14216_v4, 44 }
 0x394   :  { %17892 = vst [vmem:[#allocation26_spill] sm:$0xff] %v15215_v5  ;;  %11829 = vmatpush3.bf16.msra.mxu1 %v13982_v55  ;;  %9415 = vmatprep.mubr.msk.f32.mxu1 %vm1245_vm12, %v2292_v23  ;;  %v10422_v54 = vpop.f32.mrb[142].mxu0  ;;  %v17895_v23 = vld [vmem:[#allocation29_spill] sm:$0xff]  ;;  %v2296_v5 = vsel %vm2260_vm6, 1.0, %v17843_v35  ;;  %vm2599_vm6 = vcmp.eq.s32.totalorder %v13958_v60, 14 }
 0x395   :  { %11831 = vmatprep.subr.bf16.mxu1 %v14038_v56  ;;  %v10423_v9 = vpop.f32.mrb[143].mxu0  ;;  %9790 = vmatmul.mubr.msk.f32.gmra.mrb[248].mxu0 %vm6218_vm5, %v17814_v2  ;;  %1499 = vst.msk [vmem:[#allocation2 + $0x50] sm:$0xff] %vm1493_vm13, %v1475_v57  ;;  %vm2255_vm8 = vcmp.eq.s32.totalorder %v17895_v23, 3 }
 0x396   :  { %v1479_v28 = vpop.f32.mrb[30].mxu1  ;;  %v15232_v37 = vadd.f32 %v10423_v9, %v10422_v54  ;;  %12441 = vmatpush3.bf16.msra.mxu0 %v13978_v41  ;;  %9791 = vmatprep.mubr.msk.f32.mxu0 %vm6223_vm7, %v17814_v2  ;;  %vm6234_vm7 = vcmp.eq.s32.totalorder %v14230_v15, 44 }
 0x397   :  { %v1480_v52 = vadd.f32 %v14992_v42, %v1479_v28  ;;  %v1481_v10 = vpop.f32.mrb[31].mxu1  ;;  %9416 = vmatmul.mubr.msk.f32.gmra.mrb[136].mxu1 %vm2255_vm8, %v17814_v2  ;;  %12443 = vmatprep.subr.bf16.mxu0 %v14030_v39  ;;  %vm6239_vm8 = vcmp.eq.s32.totalorder %v14244_v33, 44 }
 0x398   :  { %17894 = vst [vmem:[#allocation27_spill] sm:$0xff] %v15232_v37  ;;  %11833 = vmatpush3.bf16.msra.mxu1 %v13986_v7  ;;  %9417 = vmatprep.mubr.msk.f32.mxu1 %vm1245_vm12, %v2296_v5  ;;  %v10425_v57 = vpop.f32.mrb[144].mxu0  ;;  %v17897_v5 = vld [vmem:[#allocation30_spill] sm:$0xff]  ;;  %v2300_v37 = vsel %vm2264_vm10, 1.0, %v17843_v35  ;;  %vm2603_vm10 = vcmp.eq.s32.totalorder %v14066_v31, 14 }
 0x399   :  { %11835 = vmatprep.subr.bf16.mxu1 %v14046_v11  ;;  %v10426_v54 = vpop.f32.mrb[145].mxu0  ;;  %9792 = vmatmul.mubr.msk.f32.gmra.mrb[250].mxu0 %vm6222_vm9, %v17814_v2  ;;  %1500 = vst.msk [vmem:[#allocation2 + $0x60] sm:$0xff] %vm1493_vm13, %v1480_v52  ;;  %vm2259_vm14 = vcmp.eq.s32.totalorder %v17897_v5, 3  ;;  %vm2598_vm9 = vcmp.eq.s32.totalorder %v14058_v27, 14 }
 0x39a   :  { %v1484_v42 = vpop.f32.mrb[32].mxu1  ;;  %v15249_v9 = vadd.f32 %v10426_v54, %v10425_v57  ;;  %12445 = vmatpush3.bf16.msra.mxu0 %v13982_v55  ;;  %9793 = vmatprep.mubr.msk.f32.mxu0 %vm6227_vm11, %v17814_v2  ;;  %v17898_v57 = vld [vmem:[#allocation31_spill] sm:$0xff]  ;;  %vm6238_vm11 = vcmp.eq.s32.totalorder %v14270_v59, 44 }
 0x39b   :  { %v1485_v28 = vadd.f32 %v15008_v63, %v1484_v42  ;;  %v1486_v10 = vpop.f32.mrb[33].mxu1  ;;  %9418 = vmatmul.mubr.msk.f32.gmra.mrb[138].mxu1 %vm2259_vm14, %v17814_v2  ;;  %12447 = vmatprep.subr.bf16.mxu0 %v14038_v56  ;;  %vm2268_vm0 = vcmp.eq.s32.totalorder %v17898_v57, 3  ;;  %vm6571_vm14 = vcmp.eq.s32.totalorder %v13958_v60, 45 }
 0x39c   :  { %17896 = vst [vmem:[#allocation29_spill] sm:$0xff] %v15249_v9  ;;  %11837 = vmatpush3.bf16.msra.mxu1 %v13990_v20  ;;  %9419 = vmatprep.mubr.msk.f32.mxu1 %vm1245_vm12, %v2300_v37  ;;  %v10428_v52 = vpop.f32.mrb[146].mxu0  ;;  %v17900_v37 = vld [vmem:[#allocation32_spill] sm:$0xff]  ;;  %v2304_v57 = vsel %vm2268_vm0, 1.0, %v17843_v35  ;;  %vm2607_vm0 = vcmp.eq.s32.totalorder %v14084_v40, 14 }
 0x39d   :  { %11839 = vmatprep.subr.bf16.mxu1 %v14062_v29  ;;  %v10429_v54 = vpop.f32.mrb[147].mxu0  ;;  %9794 = vmatmul.mubr.msk.f32.gmra.mrb[252].mxu0 %vm6226_vm15, %v17814_v2  ;;  %1501 = vst.msk [vmem:[#allocation2 + $0x70] sm:$0xff] %vm1493_vm13, %v1485_v28  ;;  %vm2263_vm2 = vcmp.eq.s32.totalorder %v17900_v37, 3  ;;  %vm2602_vm15 = vcmp.eq.s32.totalorder %v14072_v34, 14 }
 0x39e   :  { %v1489_v63 = vpop.f32.mrb[34].mxu1  ;;  %v15266_v42 = vadd.f32 %v10429_v54, %v10428_v52  ;;  %12449 = vmatpush3.bf16.msra.mxu0 %v13986_v7  ;;  %9795 = vmatprep.mubr.msk.f32.mxu0 %vm6231_vm1, %v17814_v2  ;;  %v17902_v54 = vld [vmem:[#allocation33_spill] sm:$0xff]  ;;  %vm6570_vm1 = vcmp.eq.s32.totalorder %v14058_v27, 45 }
 0x39f   :  { %v1490_v10 = vadd.f32 %v15019_v25, %v1489_v63  ;;  %v1491_v9 = vpop.f32.mrb[35].mxu1  ;;  %9420 = vmatmul.mubr.msk.f32.gmra.mrb[140].mxu1 %vm2263_vm2, %v17814_v2  ;;  %12451 = vmatprep.subr.bf16.mxu0 %v14046_v11  ;;  %vm2267_vm5 = vcmp.eq.s32.totalorder %v17902_v54, 3  ;;  %vm6575_vm2 = vcmp.eq.s32.totalorder %v14066_v31, 45 }
 0x3a0   :  { %17899 = vst [vmem:[#allocation30_spill] sm:$0xff] %v15266_v42  ;;  %11841 = vmatpush3.bf16.msra.mxu1 %v13994_v32  ;;  %9421 = vmatprep.mubr.msk.f32.mxu1 %vm1245_vm12, %v2304_v57  ;;  %v10431_v28 = vpop.f32.mrb[148].mxu0 }
 0x3a1   :  { %v10432_v52 = vpop.f32.mrb[149].mxu0  ;;  %9796 = vmatmul.mubr.msk.f32.gmra.mrb[254].mxu0 %vm6230_vm3, %v17814_v2  ;;  %11842 = vmatprep.subr.bf16.mxu1 %v17836_v17  ;;  %1502 = vst.msk [vmem:[#allocation2 + $0x80] sm:$0xff] %vm1493_vm13, %v1490_v10  ;;  %vm2606_vm3 = vcmp.eq.s32.totalorder %v14093_v45, 14 }
 0x3a2   :  { %v9997_v25 = vpop.f32.mrb[36].mxu1  ;;  %v15282_v9 = vadd.f32 %v10432_v52, %v10431_v28  ;;  %12453 = vmatpush3.bf16.msra.mxu0 %v13990_v20  ;;  %9797 = vmatprep.mubr.msk.f32.mxu0 %vm6235_vm4, %v17814_v2  ;;  %vm2611_vm4 = vcmp.eq.s32.totalorder %v14110_v53, 14 }
 0x3a3   :  { %v9998_v57 = vpop.f32.mrb[37].mxu1  ;;  %9422 = vmatmul.mubr.msk.f32.gmra.mrb[142].mxu1 %vm2267_vm5, %v17814_v2  ;;  %12455 = vmatprep.subr.bf16.mxu0 %v14062_v29  ;;  %vm6574_vm5 = vcmp.eq.s32.totalorder %v14072_v34, 45 }
 0x3a4   :  { %17901 = vst [vmem:[#allocation32_spill] sm:$0xff] %v15282_v9  ;;  %v15290_v63 = vadd.f32 %v9998_v57, %v9997_v25  ;;  %9423 = vmatprep.mubr.msk.f32.mxu1 %vm2599_vm6, %v17814_v2  ;;  %v10434_v10 = vpop.f32.mrb[150].mxu0  ;;  %vm6579_vm6 = vcmp.eq.s32.totalorder %v14084_v40, 45 }
 0x3a5   :  { %v10435_v28 = vpop.f32.mrb[151].mxu0  ;;  %9798 = vmatmul.mubr.msk.f32.gmra.mrb[0].mxu0 %vm6234_vm7, %v17814_v2  ;;  %vm2610_vm7 = vcmp.eq.s32.totalorder %v14117_v61, 14 }
 0x3a6   :  { %v10000_v52 = vpop.f32.mrb[38].mxu1  ;;  %v15296_v9 = vadd.f32 %v10435_v28, %v10434_v10  ;;  %12457 = vmatpush3.bf16.msra.mxu0 %v13994_v32  ;;  %9799 = vmatprep.mubr.msk.f32.mxu0 %vm6239_vm8, %v17814_v2  ;;  %vm2615_vm8 = vcmp.eq.s32.totalorder %v14135_v6, 14 }
 0x3a7   :  { %v10001_v25 = vpop.f32.mrb[39].mxu1  ;;  %9424 = vmatmul.mubr.msk.f32.vlgmr.msra.gmra.mrb[144].mxu1 %vm2598_vm9, %v17814_v2  ;;  %vm6578_vm9 = vcmp.eq.s32.totalorder %v14093_v45, 45 }
 0x3a8   :  { %17903 = vst [vmem:[#allocation33_spill] sm:$0xff] %v15296_v9  ;;  %v15303_v57 = vadd.f32 %v10001_v25, %v10000_v52  ;;  %11844 = vmatpush1.bf16.msra.mxu1 %v14102_v50  ;;  %9425 = vmatprep.mubr.msk.f32.mxu1 %vm2603_vm10, %v17814_v2  ;;  %v10469_v42 = vpop.f32.mrb[152].mxu0  ;;  %vm6583_vm10 = vcmp.eq.s32.totalorder %v14110_v53, 45 }
 0x3a9   :  { %11845 = vmatprep.subr.bf16.mxu1 %v17836_v17  ;;  %v10470_v10 = vpop.f32.mrb[153].mxu0  ;;  %9800 = vmatmul.mubr.msk.f32.gmra.mrb[2].mxu0 %vm6238_vm11, %v17814_v2  ;;  %vm2614_vm11 = vcmp.eq.s32.totalorder %v14145_v12, 14 }
 0x3aa   :  { %v10003_v28 = vpop.f32.mrb[40].mxu1  ;;  %v15311_v9 = vadd.f32 %v10470_v10, %v10469_v42  ;;  %9819 = vmatprep.mubr.msk.f32.mxu0 %vm6571_vm14, %v17814_v2  ;;  %vm2619_vm14 = vcmp.eq.s32.totalorder %v14163_v22, 14 }
 0x3ab   :  { %v10004_v52 = vpop.f32.mrb[41].mxu1  ;;  %9426 = vmatmul.mubr.msk.f32.gmra.mrb[146].mxu1 %vm2602_vm15, %v17814_v2  ;;  %vm6582_vm15 = vcmp.eq.s32.totalorder %v14117_v61, 45 }
 0x3ac   :  { %17904 = vst [vmem:[#allocation51_spill] sm:$0xff] %v15311_v9  ;;  %v15317_v25 = vadd.f32 %v10004_v52, %v10003_v28  ;;  %11847 = vmatpush1.bf16.msra.mxu1 %v14155_v21  ;;  %9427 = vmatprep.mubr.msk.f32.mxu1 %vm2607_vm0, %v17814_v2  ;;  %v10472_v50 = vpop.f32.mrb[154].mxu0  ;;  %vm6587_vm0 = vcmp.eq.s32.totalorder %v14135_v6, 45 }
 0x3ad   :  { %11848 = vmatprep.subr.bf16.mxu1 %v17836_v17  ;;  %v10473_v42 = vpop.f32.mrb[155].mxu0  ;;  %9820 = vmatmul.mubr.msk.f32.vlgmr.msra.gmra.mrb[4].mxu0 %vm6570_vm1, %v17814_v2  ;;  %vm2618_vm1 = vcmp.eq.s32.totalorder %v14170_v24, 14 }
 0x3ae   :  { %v10006_v10 = vpop.f32.mrb[42].mxu1  ;;  %v15325_v9 = vadd.f32 %v10473_v42, %v10472_v50  ;;  %9821 = vmatprep.mubr.msk.f32.mxu0 %vm6575_vm2, %v17814_v2  ;;  %vm2623_vm2 = vcmp.eq.s32.totalorder %v14188_v38, 14 }
 0x3af   :  { %v10007_v28 = vpop.f32.mrb[43].mxu1  ;;  %9428 = vmatmul.mubr.msk.f32.gmra.mrb[148].mxu1 %vm2606_vm3, %v17814_v2  ;;  %vm6586_vm3 = vcmp.eq.s32.totalorder %v14145_v12, 45 }
 0x3b0   :  { %17905 = vst [vmem:[#allocation52_spill] sm:$0xff] %v15325_v9  ;;  %v15331_v52 = vadd.f32 %v10007_v28, %v10006_v10  ;;  %11850 = vmatpush1.bf16.msra.mxu1 %v14208_v3  ;;  %9429 = vmatprep.mubr.msk.f32.mxu1 %vm2611_vm4, %v17814_v2  ;;  %v10475_v21 = vpop.f32.mrb[156].mxu0  ;;  %vm6591_vm4 = vcmp.eq.s32.totalorder %v14163_v22, 45 }
 0x3b1   :  { %11851 = vmatprep.subr.bf16.mxu1 %v17836_v17  ;;  %v10476_v50 = vpop.f32.mrb[157].mxu0  ;;  %9822 = vmatmul.mubr.msk.f32.gmra.mrb[6].mxu0 %vm6574_vm5, %v17814_v2  ;;  %vm2622_vm5 = vcmp.eq.s32.totalorder %v14198_v47, 14 }
 0x3b2   :  { %v10009_v42 = vpop.f32.mrb[44].mxu1  ;;  %v15339_v9 = vadd.f32 %v10476_v50, %v10475_v21  ;;  %9823 = vmatprep.mubr.msk.f32.mxu0 %vm6579_vm6, %v17814_v2  ;;  %vm2627_vm6 = vcmp.eq.s32.totalorder %v14216_v4, 14 }
 0x3b3   :  { %v10010_v10 = vpop.f32.mrb[45].mxu1  ;;  %9430 = vmatmul.mubr.msk.f32.gmra.mrb[150].mxu1 %vm2610_vm7, %v17814_v2  ;;  %vm6590_vm7 = vcmp.eq.s32.totalorder %v14170_v24, 45 }
 0x3b4   :  { %17906 = vst [vmem:[#allocation53_spill] sm:$0xff] %v15339_v9  ;;  %v15345_v28 = vadd.f32 %v10010_v10, %v10009_v42  ;;  %11853 = vmatpush1.bf16.msra.mxu1 %v14263_v1  ;;  %9431 = vmatprep.mubr.msk.f32.mxu1 %vm2615_vm8, %v17814_v2  ;;  %v10478_v3 = vpop.f32.mrb[158].mxu0  ;;  %vm6595_vm8 = vcmp.eq.s32.totalorder %v14188_v38, 45 }
 0x3b5   :  { %11854 = vmatprep.subr.bf16.mxu1 %v17836_v17  ;;  %v10479_v21 = vpop.f32.mrb[159].mxu0  ;;  %9824 = vmatmul.mubr.msk.f32.gmra.mrb[8].mxu0 %vm6578_vm9, %v17814_v2  ;;  %vm2626_vm9 = vcmp.eq.s32.totalorder %v14230_v15, 14 }
 0x3b6   :  { %v10012_v50 = vpop.f32.mrb[46].mxu1  ;;  %v15353_v9 = vadd.f32 %v10479_v21, %v10478_v3  ;;  %9825 = vmatprep.mubr.msk.f32.mxu0 %vm6583_vm10, %v17814_v2  ;;  %vm2631_vm10 = vcmp.eq.s32.totalorder %v14244_v33, 14 }
 0x3b7   :  { %v10013_v42 = vpop.f32.mrb[47].mxu1  ;;  %9432 = vmatmul.mubr.msk.f32.gmra.mrb[152].mxu1 %vm2614_vm11, %v17814_v2  ;;  %vm6594_vm11 = vcmp.eq.s32.totalorder %v14198_v47, 45 }
 0x3b8   :  { %17907 = vst [vmem:[#allocation54_spill] sm:$0xff] %v15353_v9  ;;  %v15359_v10 = vadd.f32 %v10013_v42, %v10012_v50  ;;  %11856 = vmatpush1.bf16.msra.mxu1 %v14293_v0  ;;  %9433 = vmatprep.mubr.msk.f32.mxu1 %vm2619_vm14, %v17814_v2  ;;  %v10481_v1 = vpop.f32.mrb[160].mxu0  ;;  %v17909_v0 = vld [vmem:[#allocation17_spill] sm:$0xff] }
 0x3b9   :  { %11857 = vmatprep.subr.bf16.mxu1 %v17836_v17  ;;  %v10482_v3 = vpop.f32.mrb[161].mxu0  ;;  %9826 = vmatmul.mubr.msk.f32.gmra.mrb[10].mxu0 %vm6582_vm15, %v17814_v2  ;;  %vm6599_vm15 = vcmp.eq.s32.totalorder %v14216_v4, 45 }
 0x3ba   :  { %v10015_v21 = vpop.f32.mrb[48].mxu1  ;;  %v15367_v9 = vadd.f32 %v10482_v3, %v10481_v1  ;;  %9827 = vmatprep.mubr.msk.f32.mxu0 %vm6587_vm0, %v17814_v2  ;;  %vm2630_vm0 = vcmp.eq.s32.totalorder %v14270_v59, 14 }
 0x3bb   :  { %v10016_v50 = vpop.f32.mrb[49].mxu1  ;;  %9434 = vmatmul.mubr.msk.f32.gmra.mrb[154].mxu1 %vm2618_vm1, %v17814_v2  ;;  %vm2605_vm1 = vcmp.eq.s32.totalorder %v17882_v58, 14 }
 0x3bc   :  { %17908 = vst [vmem:[#allocation55_spill] sm:$0xff] %v15367_v9  ;;  %v15373_v42 = vadd.f32 %v10016_v50, %v10015_v21  ;;  %11859 = vmatpush1.bf16.msra.mxu1 %v17909_v0  ;;  %9435 = vmatprep.mubr.msk.f32.mxu1 %vm2623_vm2, %v17814_v2  ;;  %v10484_v61 = vpop.f32.mrb[162].mxu0  ;;  %v17911_v0 = vld [vmem:[#allocation18_spill] sm:$0xff]  ;;  %vm6598_vm2 = vcmp.eq.s32.totalorder %v14230_v15, 45 }
 0x3bd   :  { %11860 = vmatprep.subr.bf16.mxu1 %v17836_v17  ;;  %v10485_v1 = vpop.f32.mrb[163].mxu0  ;;  %9828 = vmatmul.mubr.msk.f32.gmra.mrb[12].mxu0 %vm6586_vm3, %v17814_v2 }
 0x3be   :  { %v10018_v3 = vpop.f32.mrb[50].mxu1  ;;  %v15381_v9 = vadd.f32 %v10485_v1, %v10484_v61  ;;  %9829 = vmatprep.mubr.msk.f32.mxu0 %vm6591_vm4, %v17814_v2  ;;  %vm6603_vm4 = vcmp.eq.s32.totalorder %v14244_v33, 45 }
 0x3bf   :  { %v10019_v21 = vpop.f32.mrb[51].mxu1  ;;  %9436 = vmatmul.mubr.msk.f32.gmra.mrb[156].mxu1 %vm2622_vm5, %v17814_v2 }
 0x3c0   :  { %17910 = vst [vmem:[#allocation56_spill] sm:$0xff] %v15381_v9  ;;  %v15387_v50 = vadd.f32 %v10019_v21, %v10018_v3  ;;  %11862 = vmatpush1.bf16.msra.mxu1 %v17911_v0  ;;  %9437 = vmatprep.mubr.msk.f32.mxu1 %vm2627_vm6, %v17814_v2  ;;  %v10487_v12 = vpop.f32.mrb[164].mxu0  ;;  %v17913_v0 = vld [vmem:[#allocation19_spill] sm:$0xff]  ;;  %vm6602_vm6 = vcmp.eq.s32.totalorder %v14270_v59, 45 }
 0x3c1   :  { %11863 = vmatprep.subr.bf16.mxu1 %v17836_v17  ;;  %v10488_v61 = vpop.f32.mrb[165].mxu0  ;;  %9830 = vmatmul.mubr.msk.f32.gmra.mrb[14].mxu0 %vm6590_vm7, %v17814_v2  ;;  %vm2604_vm7 = vcmp.eq.s32.totalorder %v17887_v36, 14 }
 0x3c2   :  { %v10021_v1 = vpop.f32.mrb[52].mxu1  ;;  %v15395_v9 = vadd.f32 %v10488_v61, %v10487_v12  ;;  %9831 = vmatprep.mubr.msk.f32.mxu0 %vm6595_vm8, %v17814_v2  ;;  %v17914_v12 = vld [vmem:[#allocation14_spill] sm:$0xff]  ;;  %vm2613_vm8 = vcmp.eq.s32.totalorder %v14394_v18, 14 }
 0x3c3   :  { %v10022_v3 = vpop.f32.mrb[53].mxu1  ;;  %9438 = vmatmul.mubr.msk.f32.gmra.mrb[158].mxu1 %vm2626_vm9, %v17814_v2  ;;  %vm2601_vm14 = vcmp.eq.s32.totalorder %v17914_v12, 14  ;;  %vm2608_vm9 = vcmp.eq.s32.totalorder %v17889_v49, 14 }
 0x3c4   :  { %17912 = vst [vmem:[#allocation57_spill] sm:$0xff] %v15395_v9  ;;  %v15401_v21 = vadd.f32 %v10022_v3, %v10021_v1  ;;  %11865 = vmatpush1.bf16.msra.mxu1 %v17913_v0  ;;  %9439 = vmatprep.mubr.msk.f32.mxu1 %vm2631_vm10, %v17814_v2  ;;  %v10490_v24 = vpop.f32.mrb[166].mxu0  ;;  %v2637_v12 = vsel %vm2601_vm14, 1.0, %v17843_v35  ;;  %v17915_v0 = vld [vmem:[#allocation23_spill] sm:$0xff]  ;;  %vm2617_vm10 = vcmp.eq.s32.totalorder %v14414_v14, 14  ;;  %vm2621_vm14 = vcmp.eq.s32.totalorder %v14433_v46, 14 }
 0x3c5   :  { %2839 = vmatprep.subr.mxu1 %v17843_v35  ;;  %v10491_v61 = vpop.f32.mrb[167].mxu0  ;;  %9832 = vmatmul.mubr.msk.f32.gmra.mrb[16].mxu0 %vm6594_vm11, %v17814_v2  ;;  %vm2612_vm11 = vcmp.eq.s32.totalorder %v17891_v16, 14 }
 0x3c6   :  { %v1778_v9 = vpop.f32.mrb[54].mxu1  ;;  %v15410_v38 = vadd.f32 %v10491_v61, %v10490_v24  ;;  %9833 = vmatprep.mubr.msk.f32.mxu0 %vm6599_vm15, %v17814_v2  ;;  %v17916_v61 = vld [vmem:[#allocation21_spill] sm:$0xff]  ;;  %vm2616_vm15 = vcmp.eq.s32.totalorder %v17893_v43, 14 }
 0x3c7   :  { %v1779_v1 = vadd.f32 %v15290_v63, %v1778_v9  ;;  %v1780_v3 = vpop.f32.mrb[55].mxu1  ;;  %9440 = vmatmul.mubr.msk.f32.gmra.mrb[160].mxu1 %vm2630_vm0, %v17814_v2  ;;  %vm2600_vm3 = vcmp.eq.s32.totalorder %v17916_v61, 14  ;;  %vm2625_vm0 = vcmp.eq.s32.totalorder %v17858_v48, 14 }
 0x3c8   :  { %2840 = vmatpush1.msra.mxu1 %v17915_v0  ;;  %9441 = vmatprep.mubr.msk.f32.mxu1 %vm1245_vm12, %v2637_v12  ;;  %v10493_v47 = vpop.f32.mrb[168].mxu0 }
 0x3c9   :  { %11867 = vmatprep.subr.bf16.mxu1 %v13998_v44  ;;  %1831 = vrot.lane.b32.xlu0 %v1779_v1, %s12994_s1  ;;  %v10494_v24 = vpop.f32.mrb[169].mxu0  ;;  %v2641_v44 = vsel %vm2605_vm1, 1.0, %v17843_v35  ;;  %v17917_v1 = vld [vmem:[#allocation22_spill] sm:$0xff]  ;;  %vm2620_vm1 = vcmp.eq.s32.totalorder %v17895_v23, 14 }
 0x3ca   :  { %v1783_v9 = vpop.f32.mrb[56].mxu1  ;;  %v15423_v63 = vadd.f32 %v10494_v24, %v10493_v47  ;;  %9834 = vmatmul.mubr.msk.f32.gmra.mrb[18].mxu0 %vm6598_vm2, %v17814_v2  ;;  %vm2609_vm5 = vcmp.eq.s32.totalorder %v17917_v1, 14  ;;  %vm2629_vm2 = vcmp.eq.s32.totalorder %v14475_v51, 14 }
 0x3cb   :  { %v1784_v12 = vadd.f32 %v15303_v57, %v1783_v9  ;;  %v1785_v3 = vpop.f32.mrb[57].mxu1  ;;  %9442 = vmatmul.mubr.msk.f32.vlgmr.msra.gmra.mrb[162].mxu1 %vm2600_vm3, %v17814_v2  ;;  %9835 = vmatprep.mubr.msk.f32.mxu0 %vm6603_vm4, %v17814_v2  ;;  %vm2624_vm3 = vcmp.eq.s32.totalorder %v17897_v5, 14 }
 0x3cc   :  { %11869 = vmatpush3.bf16.msra.mxu1 %v13966_v8  ;;  %9443 = vmatprep.mubr.msk.f32.mxu1 %vm1245_vm12, %v2641_v44  ;;  %v10528_v47 = vpop.f32.mrb[170].mxu0  ;;  %v2645_v44 = vsel %vm2609_vm5, 1.0, %v17843_v35  ;;  %vm2628_vm5 = vcmp.eq.s32.totalorder %v17900_v37, 14 }
 0x3cd   :  { %11871 = vmatprep.subr.bf16.mxu1 %v14006_v62  ;;  %1833 = vrot.lane.b32.xlu1 %v1784_v12, %s12994_s1  ;;  %v10529_v24 = vpop.f32.mrb[171].mxu0 }
 0x3ce   :  { %v1788_v57 = vpop.f32.mrb[58].mxu1  ;;  %v15438_v9 = vadd.f32 %v10529_v24, %v10528_v47  ;;  %9836 = vmatmul.mubr.msk.f32.gmra.mrb[20].mxu0 %vm6602_vm6, %v17814_v2  ;;  %vm2632_vm6 = vcmp.eq.s32.totalorder %v17902_v54, 14 }
 0x3cf   :  { %v1789_v8 = vadd.f32 %v15317_v25, %v1788_v57  ;;  %v1790_v3 = vpop.f32.mrb[59].mxu1  ;;  %9444 = vmatmul.mubr.msk.f32.gmra.mrb[164].mxu1 %vm2604_vm7, %v17814_v2  ;;  %vm2964_vm7 = vcmp.eq.s32.totalorder %v13958_v60, 15 }
 0x3d0   :  { %11873 = vmatpush3.bf16.msra.mxu1 %v13970_v19  ;;  %9445 = vmatprep.mubr.msk.f32.mxu1 %vm1245_vm12, %v2645_v44  ;;  %v10531_v62 = vpop.f32.mrb[172].mxu0  ;;  %v2649_v19 = vsel %vm2613_vm8, 1.0, %v17843_v35  ;;  %vm2963_vm8 = vcmp.eq.s32.totalorder %v14058_v27, 15 }
 0x3d1   :  { %11875 = vmatprep.subr.bf16.mxu1 %v14014_v13  ;;  %1835 = vrot.lane.b32.xlu1 %v1789_v8, %s12994_s1  ;;  %v10532_v12 = vpop.f32.mrb[173].mxu0 }
 0x3d2   :  { %v1793_v47 = vpop.f32.mrb[60].mxu1  ;;  %v15450_v24 = vadd.f32 %v10532_v12, %v10531_v62 }
 0x3d3   :  { %v1794_v25 = vadd.f32 %v15331_v52, %v1793_v47  ;;  %v1795_v57 = vpop.f32.mrb[61].mxu1  ;;  %9446 = vmatmul.mubr.msk.f32.gmra.mrb[166].mxu1 %vm2608_vm9, %v17814_v2  ;;  %vm2968_vm9 = vcmp.eq.s32.totalorder %v14066_v31, 15 }
 0x3d4   :  { %11877 = vmatpush3.bf16.msra.mxu1 %v13974_v30  ;;  %9447 = vmatprep.mubr.msk.f32.mxu1 %vm1245_vm12, %v2649_v19  ;;  %v10534_v13 = vpop.f32.mrb[174].mxu0  ;;  %v2653_v30 = vsel %vm2617_vm10, 1.0, %v17843_v35  ;;  %vm2967_vm10 = vcmp.eq.s32.totalorder %v14072_v34, 15 }
 0x3d5   :  { %11879 = vmatprep.subr.bf16.mxu1 %v14022_v26  ;;  %1837 = vrot.lane.b32.xlu1 %v1794_v25, %s12994_s1  ;;  %v10535_v8 = vpop.f32.mrb[175].mxu0 }
 0x3d6   :  { %v1798_v3 = vpop.f32.mrb[62].mxu1  ;;  %v15461_v44 = vadd.f32 %v10535_v8, %v10534_v13 }
 0x3d7   :  { %v1799_v52 = vadd.f32 %v15345_v28, %v1798_v3  ;;  %v1800_v62 = vpop.f32.mrb[63].mxu1  ;;  %9448 = vmatmul.mubr.msk.f32.gmra.mrb[168].mxu1 %vm2612_vm11, %v17814_v2  ;;  %vm2972_vm11 = vcmp.eq.s32.totalorder %v14084_v40, 15 }
 0x3d8   :  { %11881 = vmatpush3.bf16.msra.mxu1 %v13978_v41  ;;  %9449 = vmatprep.mubr.msk.f32.mxu1 %vm1245_vm12, %v2653_v30  ;;  %v10537_v26 = vpop.f32.mrb[176].mxu0  ;;  %v2657_v41 = vsel %vm2621_vm14, 1.0, %v17843_v35  ;;  %vm2971_vm14 = vcmp.eq.s32.totalorder %v14093_v45, 15 }
 0x3d9   :  { %11883 = vmatprep.subr.bf16.mxu1 %v14030_v39  ;;  %1839 = vrot.lane.b32.xlu1 %v1799_v52, %s12994_s1  ;;  %v10538_v12 = vpop.f32.mrb[177].mxu0 }
 0x3da   :  { %v1803_v47 = vpop.f32.mrb[64].mxu1  ;;  %v15472_v25 = vadd.f32 %v10538_v12, %v10537_v26  ;;  %v17918_v12 = vld [vmem:[#allocation31_spill] sm:$0xff] }
 0x3db   :  { %v1804_v28 = vadd.f32 %v15359_v10, %v1803_v47  ;;  %v1805_v57 = vpop.f32.mrb[65].mxu1  ;;  %9450 = vmatmul.mubr.msk.f32.gmra.mrb[170].mxu1 %vm2616_vm15, %v17814_v2  ;;  %vm2633_vm4 = vcmp.eq.s32.totalorder %v17918_v12, 14  ;;  %vm2976_vm15 = vcmp.eq.s32.totalorder %v14110_v53, 15 }
 0x3dc   :  { %11885 = vmatpush3.bf16.msra.mxu1 %v13982_v55  ;;  %9451 = vmatprep.mubr.msk.f32.mxu1 %vm1245_vm12, %v2657_v41  ;;  %v10540_v39 = vpop.f32.mrb[178].mxu0  ;;  %v2661_v55 = vsel %vm2625_vm0, 1.0, %v17843_v35 }
 0x3dd   :  { %11887 = vmatprep.subr.bf16.mxu1 %v14038_v56  ;;  %1841 = vrot.lane.b32.xlu1 %v1804_v28, %s12994_s1  ;;  %v10541_v19 = vpop.f32.mrb[179].mxu0 }
 0x3de   :  { %v1808_v13 = vpop.f32.mrb[66].mxu1  ;;  %v15483_v8 = vadd.f32 %v10541_v19, %v10540_v39 }
 0x3df   :  { %v1809_v10 = vadd.f32 %v15373_v42, %v1808_v13  ;;  %v1810_v3 = vpop.f32.mrb[67].mxu1  ;;  %9452 = vmatmul.mubr.msk.f32.gmra.mrb[172].mxu1 %vm2620_vm1, %v17814_v2  ;;  %vm2980_vm1 = vcmp.eq.s32.totalorder %v14135_v6, 15 }
 0x3e0   :  { %11889 = vmatpush3.bf16.msra.mxu1 %v13986_v7  ;;  %9453 = vmatprep.mubr.msk.f32.mxu1 %vm1245_vm12, %v2661_v55  ;;  %v10543_v56 = vpop.f32.mrb[180].mxu0  ;;  %v2665_v7 = vsel %vm2629_vm2, 1.0, %v17843_v35 }
 0x3e1   :  { %11891 = vmatprep.subr.bf16.mxu1 %v14046_v11  ;;  %1843 = vrot.lane.b32.xlu1 %v1809_v10, %s12994_s1  ;;  %v10544_v52 = vpop.f32.mrb[181].mxu0 }
 0x3e2   :  { %v1813_v62 = vpop.f32.mrb[68].mxu1  ;;  %v15494_v30 = vadd.f32 %v10544_v52, %v10543_v56 }
 0x3e3   :  { %v1814_v42 = vadd.f32 %v15387_v50, %v1813_v62  ;;  %v1815_v26 = vpop.f32.mrb[69].mxu1  ;;  %9454 = vmatmul.mubr.msk.f32.gmra.mrb[174].mxu1 %vm2624_vm3, %v17814_v2  ;;  %vm2984_vm3 = vcmp.eq.s32.totalorder %v14163_v22, 15 }
 0x3e4   :  { %11893 = vmatpush3.bf16.msra.mxu1 %v13990_v20  ;;  %9455 = vmatprep.mubr.msk.f32.mxu1 %vm1245_vm12, %v2665_v7  ;;  %v10546_v11 = vpop.f32.mrb[182].mxu0  ;;  %v2669_v20 = vsel %vm2633_vm4, 1.0, %v17843_v35 }
 0x3e5   :  { %11895 = vmatprep.subr.bf16.mxu1 %v14062_v29  ;;  %1845 = vrot.lane.b32.xlu1 %v1814_v42, %s12994_s1  ;;  %v10547_v47 = vpop.f32.mrb[183].mxu0  ;;  %v17919_v42 = vld [vmem:[#allocation6_spill] sm:$0xff] }
 0x3e6   :  { %v1818_v28 = vpop.f32.mrb[70].mxu1  ;;  %v15505_v57 = vadd.f32 %v10547_v47, %v10546_v11  ;;  %v17920_v47 = vld [vmem:[#allocation9_spill] sm:$0xff] }
 0x3e7   :  { %v1819_v50 = vadd.f32 %v15401_v21, %v1818_v28  ;;  %v1820_v41 = vpop.f32.mrb[71].mxu1  ;;  %9456 = vmatmul.mubr.msk.f32.gmra.mrb[176].mxu1 %vm2628_vm5, %v17814_v2 }
 0x3e8   :  { %11897 = vmatpush3.bf16.msra.mxu1 %v13994_v32  ;;  %9457 = vmatprep.mubr.msk.f32.mxu1 %vm1245_vm12, %v2669_v20  ;;  %v10549_v29 = vpop.f32.mrb[184].mxu0 }
 0x3e9   :  { %1847 = vrot.lane.b32.xlu1 %v1819_v50, %s12994_s1  ;;  %v10550_v39 = vpop.f32.mrb[185].mxu0  ;;  %11898 = vmatprep.subr.bf16.mxu1 %v17836_v17 }
 0x3ea   :  { %v10056_v19 = vpop.f32.mrb[72].mxu1  ;;  %v15515_v13 = vadd.f32 %v10550_v39, %v10549_v29  ;;  %v17921_v29 = vld [vmem:[#allocation13_spill] sm:$0xff] }
 0x3eb   :  { %v10057_v21 = vpop.f32.mrb[73].mxu1  ;;  %9458 = vmatmul.mubr.msk.f32.gmra.mrb[178].mxu1 %vm2632_vm6, %v17814_v2 }
 0x3ec   :  { %v15520_v10 = vadd.f32 %v10057_v21, %v10056_v19  ;;  %9459 = vmatprep.mubr.msk.f32.mxu1 %vm2964_vm7, %v17814_v2  ;;  %v10552_v32 = vpop.f32.mrb[186].mxu0  ;;  %vm2992_vm7 = vcmp.eq.s32.totalorder %v14216_v4, 15 }
 0x3ed   :  { %v10553_v3 = vpop.f32.mrb[187].mxu0 }
 0x3ee   :  { %v10059_v55 = vpop.f32.mrb[74].mxu1  ;;  %v15523_v56 = vadd.f32 %v10553_v3, %v10552_v32  ;;  %v17922_v3 = vld [vmem:[#allocation7_spill] sm:$0xff] }
 0x3ef   :  { %v10060_v52 = vpop.f32.mrb[75].mxu1  ;;  %9460 = vmatmul.mubr.msk.f32.vlgmr.msra.gmra.mrb[180].mxu1 %vm2963_vm8, %v17814_v2  ;;  %vm2975_vm0 = vcmp.eq.s32.totalorder %v17922_v3, 15  ;;  %vm2991_vm8 = vcmp.eq.s32.totalorder %v14230_v15, 15 }
 0x3f0   :  { %v15528_v62 = vadd.f32 %v10060_v52, %v10059_v55  ;;  %11900 = vmatpush1.bf16.msra.mxu1 %v17919_v42  ;;  %9461 = vmatprep.mubr.msk.f32.mxu1 %vm2968_vm9, %v17814_v2  ;;  %v10587_v60 = vpop.f32.mrb[188].mxu0  ;;  %v17923_v55 = vld [vmem:[#allocation15_spill] sm:$0xff]  ;;  %vm2996_vm9 = vcmp.eq.s32.totalorder %v14244_v33, 15 }
 0x3f1   :  { %11901 = vmatprep.subr.bf16.mxu1 %v17836_v17  ;;  %v10588_v26 = vpop.f32.mrb[189].mxu0 }
 0x3f2   :  { %v10062_v7 = vpop.f32.mrb[76].mxu1  ;;  %v15533_v11 = vadd.f32 %v10588_v26, %v10587_v60 }
 0x3f3   :  { %v10063_v27 = vpop.f32.mrb[77].mxu1  ;;  %9462 = vmatmul.mubr.msk.f32.gmra.mrb[182].mxu1 %vm2967_vm10, %v17814_v2 }
 0x3f4   :  { %v15538_v31 = vadd.f32 %v10063_v27, %v10062_v7  ;;  %11903 = vmatpush1.bf16.msra.mxu1 %v17920_v47  ;;  %9463 = vmatprep.mubr.msk.f32.mxu1 %vm2972_vm11, %v17814_v2  ;;  %v10590_v28 = vpop.f32.mrb[190].mxu0  ;;  %v17924_v27 = vld [vmem:[#allocation8_spill] sm:$0xff]  ;;  %vm2995_vm11 = vcmp.eq.s32.totalorder %v14270_v59, 15 }
 0x3f5   :  { %11904 = vmatprep.subr.bf16.mxu1 %v17836_v17  ;;  %v10591_v50 = vpop.f32.mrb[191].mxu0  ;;  %vm2979_vm2 = vcmp.eq.s32.totalorder %v17924_v27, 15 }
 0x3f6   :  { %v10065_v41 = vpop.f32.mrb[78].mxu1  ;;  %v15543_v20 = vadd.f32 %v10591_v50, %v10590_v28  ;;  %v17925_v50 = vld [vmem:[#allocation16_spill] sm:$0xff] }
 0x3f7   :  { %v10066_v34 = vpop.f32.mrb[79].mxu1  ;;  %9464 = vmatmul.mubr.msk.f32.gmra.mrb[184].mxu1 %vm2971_vm14, %v17814_v2  ;;  %vm2970_vm14 = vcmp.eq.s32.totalorder %v17882_v58, 15 }
 0x3f8   :  { %v15548_v40 = vadd.f32 %v10066_v34, %v10065_v41  ;;  %11906 = vmatpush1.bf16.msra.mxu1 %v17921_v29  ;;  %9465 = vmatprep.mubr.msk.f32.mxu1 %vm2976_vm15, %v17814_v2  ;;  %v10593_v39 = vpop.f32.mrb[192].mxu0  ;;  %vm2965_vm15 = vcmp.eq.s32.totalorder %v17916_v61, 15 }
 0x3f9   :  { %11907 = vmatprep.subr.bf16.mxu1 %v17836_v17  ;;  %v10594_v19 = vpop.f32.mrb[193].mxu0 }
 0x3fa   :  { %v10068_v21 = vpop.f32.mrb[80].mxu1  ;;  %v15553_v32 = vadd.f32 %v10594_v19, %v10593_v39 }
 0x3fb   :  { %v10069_v45 = vpop.f32.mrb[81].mxu1  ;;  %9466 = vmatmul.mubr.msk.f32.gmra.mrb[186].mxu1 %vm2975_vm0, %v17814_v2  ;;  %vm2974_vm0 = vcmp.eq.s32.totalorder %v17917_v1, 15 }
 0x3fc   :  { %v15558_v53 = vadd.f32 %v10069_v45, %v10068_v21  ;;  %11909 = vmatpush1.bf16.msra.mxu1 %v17923_v55  ;;  %9467 = vmatprep.mubr.msk.f32.mxu1 %vm2980_vm1, %v17814_v2  ;;  %v10596_v52 = vpop.f32.mrb[194].mxu0  ;;  %v17927_v21 = vld [vmem:[#allocation10_spill] sm:$0xff]  ;;  %v17928_v45 = vld [vmem:[#allocation11_spill] sm:$0xff]  ;;  %vm2969_vm1 = vcmp.eq.s32.totalorder %v17887_v36, 15 }
 0x3fd   :  { %11910 = vmatprep.subr.bf16.mxu1 %v17836_v17  ;;  %v10597_v60 = vpop.f32.mrb[195].mxu0  ;;  %vm2983_vm4 = vcmp.eq.s32.totalorder %v17927_v21, 15  ;;  %vm2988_vm5 = vcmp.eq.s32.totalorder %v17928_v45, 15  ;;  %v17932_v21 = vld [vmem:[#allocation18_spill] sm:$0xff] }
 0x3fe   :  { %v10071_v26 = vpop.f32.mrb[82].mxu1  ;;  %v15563_v7 = vadd.f32 %v10597_v60, %v10596_v52  ;;  %v17929_v52 = vld [vmem:[#allocation17_spill] sm:$0xff] }
 0x3ff   :  { %v10072_v28 = vpop.f32.mrb[83].mxu1  ;;  %9468 = vmatmul.mubr.msk.f32.gmra.mrb[188].mxu1 %vm2979_vm2, %v17814_v2  ;;  %vm2978_vm2 = vcmp.eq.s32.totalorder %v14394_v18, 15 }
 0x400   :  { %v15568_v6 = vadd.f32 %v10072_v28, %v10071_v26  ;;  %11912 = vmatpush1.bf16.msra.mxu1 %v17925_v50  ;;  %9469 = vmatprep.mubr.msk.f32.mxu1 %vm2984_vm3, %v17814_v2  ;;  %v10599_v41 = vpop.f32.mrb[196].mxu0  ;;  %vm2973_vm3 = vcmp.eq.s32.totalorder %v17889_v49, 15 }
 0x401   :  { %11913 = vmatprep.subr.bf16.mxu1 %v17836_v17  ;;  %v10600_v34 = vpop.f32.mrb[197].mxu0 }
 0x402   :  { %v10074_v39 = vpop.f32.mrb[84].mxu1  ;;  %v15573_v19 = vadd.f32 %v10600_v34, %v10599_v41  ;;  %v17931_v41 = vld [vmem:[#allocation12_spill] sm:$0xff] }
 0x403   :  { %v10075_v3 = vpop.f32.mrb[85].mxu1  ;;  %9470 = vmatmul.mubr.msk.f32.gmra.mrb[190].mxu1 %vm2983_vm4, %v17814_v2  ;;  %vm2987_vm6 = vcmp.eq.s32.totalorder %v17931_v41, 15  ;;  %vm2982_vm4 = vcmp.eq.s32.totalorder %v14414_v14, 15 }
 0x404   :  { %17926 = vst [vmem:[#allocation23_spill] sm:$0xff] %v15573_v19  ;;  %v15578_v22 = vadd.f32 %v10075_v3, %v10074_v39  ;;  %11915 = vmatpush1.bf16.msra.mxu1 %v17929_v52  ;;  %9471 = vmatprep.mubr.msk.f32.mxu1 %vm2988_vm5, %v17814_v2  ;;  %v10602_v60 = vpop.f32.mrb[198].mxu0  ;;  %vm2977_vm5 = vcmp.eq.s32.totalorder %v17891_v16, 15 }
 0x405   :  { %11916 = vmatprep.subr.bf16.mxu1 %v17836_v17  ;;  %v10603_v26 = vpop.f32.mrb[199].mxu0 }
 0x406   :  { %v10077_v27 = vpop.f32.mrb[86].mxu1  ;;  %v15583_v28 = vadd.f32 %v10603_v26, %v10602_v60 }
 0x407   :  { %v10078_v34 = vpop.f32.mrb[87].mxu1  ;;  %9472 = vmatmul.mubr.msk.f32.gmra.mrb[192].mxu1 %vm2987_vm6, %v17814_v2  ;;  %vm2986_vm6 = vcmp.eq.s32.totalorder %v14433_v46, 15 }
 0x408   :  { %17930 = vst [vmem:[#allocation21_spill] sm:$0xff] %v15583_v28  ;;  %v15588_v39 = vadd.f32 %v10078_v34, %v10077_v27  ;;  %11918 = vmatpush1.bf16.msra.mxu1 %v17932_v21  ;;  %9473 = vmatprep.mubr.msk.f32.mxu1 %vm2992_vm7, %v17814_v2  ;;  %v10605_v3 = vpop.f32.mrb[200].mxu0  ;;  %v17934_v27 = vld [vmem:[#allocation19_spill] sm:$0xff]  ;;  %v17935_v34 = vld [vmem:[#allocation14_spill] sm:$0xff]  ;;  %vm2981_vm7 = vcmp.eq.s32.totalorder %v17893_v43, 15 }
 0x409   :  { %11919 = vmatprep.subr.bf16.mxu1 %v17836_v17  ;;  %v10606_v45 = vpop.f32.mrb[201].mxu0  ;;  %vm2966_vm10 = vcmp.eq.s32.totalorder %v17935_v34, 15 }
 0x40a   :  { %v10080_v19 = vpop.f32.mrb[88].mxu1  ;;  %v15593_v60 = vadd.f32 %v10606_v45, %v10605_v3 }
 0x40b   :  { %v10081_v26 = vpop.f32.mrb[89].mxu1  ;;  %9474 = vmatmul.mubr.msk.f32.gmra.mrb[194].mxu1 %vm2991_vm8, %v17814_v2  ;;  %vm2990_vm8 = vcmp.eq.s32.totalorder %v17858_v48, 15 }
 0x40c   :  { %17933 = vst [vmem:[#allocation22_spill] sm:$0xff] %v15593_v60  ;;  %v15598_v4 = vadd.f32 %v10081_v26, %v10080_v19  ;;  %11921 = vmatpush1.bf16.msra.mxu1 %v17934_v27  ;;  %9475 = vmatprep.mubr.msk.f32.mxu1 %vm2996_vm9, %v17814_v2  ;;  %v10608_v41 = vpop.f32.mrb[202].mxu0  ;;  %v3002_v19 = vsel %vm2966_vm10, 1.0, %v17843_v35  ;;  %vm2985_vm9 = vcmp.eq.s32.totalorder %v17895_v23, 15  ;;  %vm2994_vm10 = vcmp.eq.s32.totalorder %v14475_v51, 15 }
 0x40d   :  { %3204 = vmatprep.subr.mxu1 %v17843_v35  ;;  %v10609_v3 = vpop.f32.mrb[203].mxu0 }
 0x40e   :  { %v2143_v45 = vpop.f32.mrb[90].mxu1  ;;  %v15604_v60 = vadd.f32 %v10609_v3, %v10608_v41 }
 0x40f   :  { %v2144_v15 = vadd.f32 %v15520_v10, %v2143_v45  ;;  %v2145_v33 = vpop.f32.mrb[91].mxu1  ;;  %9476 = vmatmul.mubr.msk.f32.gmra.mrb[196].mxu1 %vm2995_vm11, %v17814_v2  ;;  %vm2989_vm11 = vcmp.eq.s32.totalorder %v17897_v5, 15 }
 0x410   :  { %17936 = vst [vmem:[#allocation31_spill] sm:$0xff] %v15604_v60  ;;  %3205 = vmatpush1.msra.mxu1 %v17915_v0  ;;  %9477 = vmatprep.mubr.msk.f32.mxu1 %vm1245_vm12, %v3002_v19  ;;  %v10611_v26 = vpop.f32.mrb[204].mxu0  ;;  %v3006_v33 = vsel %vm2970_vm14, 1.0, %v17843_v35  ;;  %vm2998_vm14 = vcmp.eq.s32.totalorder %v17918_v12, 15 }
 0x411   :  { %2196 = vrot.lane.b32.xlu0 %v2144_v15, %s12995_s30  ;;  %11954 = vmatprep.subr.bf16.mxu1 %v17836_v17  ;;  %v10612_v59 = vpop.f32.mrb[205].mxu0 }
 0x412   :  { %v2148_v41 = vpop.f32.mrb[92].mxu1  ;;  %v15615_v10 = vadd.f32 %v10612_v59, %v10611_v26 }
 0x413   :  { %v2149_v3 = vadd.f32 %v15528_v62, %v2148_v41  ;;  %v2150_v45 = vpop.f32.mrb[93].mxu1  ;;  %9478 = vmatmul.mubr.msk.f32.vlgmr.msra.gmra.mrb[198].mxu1 %vm2965_vm15, %v17814_v2  ;;  %vm2993_vm15 = vcmp.eq.s32.totalorder %v17900_v37, 15 }
 0x414   :  { %17937 = vst [vmem:[#allocation6_spill] sm:$0xff] %v15615_v10  ;;  %11956 = vmatpush1.bf16.msra.mxu1 %v17919_v42  ;;  %9479 = vmatprep.mubr.msk.f32.mxu1 %vm1245_vm12, %v3006_v33  ;;  %v10646_v15 = vpop.f32.mrb[206].mxu0  ;;  %v3010_v45 = vsel %vm2974_vm0, 1.0, %v17843_v35  ;;  %vm3331_vm0 = vcmp.eq.s32.totalorder %v17935_v34, 16 }
 0x415   :  { %2198 = vrot.lane.b32.xlu1 %v2149_v3, %s12995_s30  ;;  %11957 = vmatprep.subr.bf16.mxu1 %v17836_v17  ;;  %v10647_v19 = vpop.f32.mrb[207].mxu0 }
 0x416   :  { %v2153_v26 = vpop.f32.mrb[94].mxu1  ;;  %v15626_v59 = vadd.f32 %v10647_v19, %v10646_v15 }
 0x417   :  { %v2154_v62 = vadd.f32 %v15538_v31, %v2153_v26  ;;  %v2155_v41 = vpop.f32.mrb[95].mxu1  ;;  %9480 = vmatmul.mubr.msk.f32.gmra.mrb[200].mxu1 %vm2969_vm1, %v17814_v2  ;;  %vm2997_vm1 = vcmp.eq.s32.totalorder %v17902_v54, 15 }
 0x418   :  { %17938 = vst [vmem:[#allocation9_spill] sm:$0xff] %v15626_v59  ;;  %11959 = vmatpush1.bf16.msra.mxu1 %v17920_v47  ;;  %9481 = vmatprep.mubr.msk.f32.mxu1 %vm1245_vm12, %v3010_v45  ;;  %v10649_v3 = vpop.f32.mrb[208].mxu0  ;;  %v3014_v41 = vsel %vm2978_vm2, 1.0, %v17843_v35  ;;  %vm3335_vm2 = vcmp.eq.s32.totalorder %v17882_v58, 16 }
 0x419   :  { %2200 = vrot.lane.b32.xlu1 %v2154_v62, %s12995_s30  ;;  %11960 = vmatprep.subr.bf16.mxu1 %v17836_v17  ;;  %v10650_v33 = vpop.f32.mrb[209].mxu0 }
 0x41a   :  { %v2158_v15 = vpop.f32.mrb[96].mxu1  ;;  %v15637_v19 = vadd.f32 %v10650_v33, %v10649_v3 }
 0x41b   :  { %v2159_v31 = vadd.f32 %v15548_v40, %v2158_v15  ;;  %v2160_v26 = vpop.f32.mrb[97].mxu1  ;;  %9482 = vmatmul.mubr.msk.f32.gmra.mrb[202].mxu1 %vm2973_vm3, %v17814_v2  ;;  %vm3330_vm3 = vcmp.eq.s32.totalorder %v17916_v61, 16 }
 0x41c   :  { %17939 = vst [vmem:[#allocation13_spill] sm:$0xff] %v15637_v19  ;;  %11962 = vmatpush1.bf16.msra.mxu1 %v17921_v29  ;;  %9483 = vmatprep.mubr.msk.f32.mxu1 %vm1245_vm12, %v3014_v41  ;;  %v10652_v62 = vpop.f32.mrb[210].mxu0  ;;  %v3018_v26 = vsel %vm2982_vm4, 1.0, %v17843_v35  ;;  %vm3339_vm4 = vcmp.eq.s32.totalorder %v17917_v1, 16 }
 0x41d   :  { %2202 = vrot.lane.b32.xlu1 %v2159_v31, %s12995_s30  ;;  %11963 = vmatprep.subr.bf16.mxu1 %v17836_v17  ;;  %v10653_v45 = vpop.f32.mrb[211].mxu0 }
 0x41e   :  { %v2163_v3 = vpop.f32.mrb[98].mxu1  ;;  %v15648_v33 = vadd.f32 %v10653_v45, %v10652_v62 }
 0x41f   :  { %v2164_v40 = vadd.f32 %v15558_v53, %v2163_v3  ;;  %v2165_v15 = vpop.f32.mrb[99].mxu1  ;;  %9484 = vmatmul.mubr.msk.f32.gmra.mrb[204].mxu1 %vm2977_vm5, %v17814_v2  ;;  %vm1858_vm5 = vcmask 261248  }
 0x420   :  { %17940 = vst [vmem:[#allocation7_spill] sm:$0xff] %v15648_v33  ;;  %11965 = vmatpush1.bf16.msra.mxu1 %v17923_v55  ;;  %9485 = vmatprep.mubr.msk.f32.mxu1 %vm1245_vm12, %v3018_v26  ;;  %v10655_v31 = vpop.f32.mrb[212].mxu0  ;;  %v3022_v15 = vsel %vm2986_vm6, 1.0, %v17843_v35  ;;  %vm3334_vm6 = vcmp.eq.s32.totalorder %v17887_v36, 16 }
 0x421   :  { %2204 = vrot.lane.b32.xlu1 %v2164_v40, %s12995_s30  ;;  %11966 = vmatprep.subr.bf16.mxu1 %v17836_v17  ;;  %v10656_v41 = vpop.f32.mrb[213].mxu0 }
 0x422   :  { %v2168_v62 = vpop.f32.mrb[100].mxu1  ;;  %v15659_v45 = vadd.f32 %v10656_v41, %v10655_v31 }
 0x423   :  { %v2169_v53 = vadd.f32 %v15568_v6, %v2168_v62  ;;  %v2170_v3 = vpop.f32.mrb[101].mxu1  ;;  %9486 = vmatmul.mubr.msk.f32.gmra.mrb[206].mxu1 %vm2981_vm7, %v17814_v2  ;;  %vm3343_vm7 = vcmp.eq.s32.totalorder %v14394_v18, 16 }
 0x424   :  { %17941 = vst [vmem:[#allocation15_spill] sm:$0xff] %v15659_v45  ;;  %11968 = vmatpush1.bf16.msra.mxu1 %v17925_v50  ;;  %9487 = vmatprep.mubr.msk.f32.mxu1 %vm1245_vm12, %v3022_v15  ;;  %v10658_v40 = vpop.f32.mrb[214].mxu0  ;;  %v3026_v3 = vsel %vm2990_vm8, 1.0, %v17843_v35  ;;  %vm3338_vm8 = vcmp.eq.s32.totalorder %v17889_v49, 16 }
 0x425   :  { %2206 = vrot.lane.b32.xlu1 %v2169_v53, %s12995_s30  ;;  %11969 = vmatprep.subr.bf16.mxu1 %v17836_v17  ;;  %v10659_v26 = vpop.f32.mrb[215].mxu0 }
 0x426   :  { %v2173_v31 = vpop.f32.mrb[102].mxu1  ;;  %v15670_v41 = vadd.f32 %v10659_v26, %v10658_v40 }
 0x427   :  { %v2174_v6 = vadd.f32 %v15578_v22, %v2173_v31  ;;  %v2175_v62 = vpop.f32.mrb[103].mxu1  ;;  %9488 = vmatmul.mubr.msk.f32.gmra.mrb[208].mxu1 %vm2985_vm9, %v17814_v2  ;;  %vm3347_vm9 = vcmp.eq.s32.totalorder %v14414_v14, 16 }
 0x428   :  { %17942 = vst [vmem:[#allocation8_spill] sm:$0xff] %v15670_v41  ;;  %11971 = vmatpush1.bf16.msra.mxu1 %v17929_v52  ;;  %9489 = vmatprep.mubr.msk.f32.mxu1 %vm1245_vm12, %v3026_v3  ;;  %v10661_v53 = vpop.f32.mrb[216].mxu0  ;;  %v3030_v62 = vsel %vm2994_vm10, 1.0, %v17843_v35  ;;  %vm3342_vm10 = vcmp.eq.s32.totalorder %v17891_v16, 16 }
 0x429   :  { %2208 = vrot.lane.b32.xlu1 %v2174_v6, %s12995_s30  ;;  %11972 = vmatprep.subr.bf16.mxu1 %v17836_v17  ;;  %v10662_v15 = vpop.f32.mrb[217].mxu0 }
 0x42a   :  { %v2178_v40 = vpop.f32.mrb[104].mxu1  ;;  %v15681_v26 = vadd.f32 %v10662_v15, %v10661_v53 }
 0x42b   :  { %v2179_v22 = vadd.f32 %v15588_v39, %v2178_v40  ;;  %v2180_v31 = vpop.f32.mrb[105].mxu1  ;;  %9490 = vmatmul.mubr.msk.f32.gmra.mrb[210].mxu1 %vm2989_vm11, %v17814_v2  ;;  %vm3351_vm11 = vcmp.eq.s32.totalorder %v14433_v46, 16 }
 0x42c   :  { %17943 = vst [vmem:[#allocation16_spill] sm:$0xff] %v15681_v26  ;;  %11974 = vmatpush1.bf16.msra.mxu1 %v17932_v21  ;;  %9491 = vmatprep.mubr.msk.f32.mxu1 %vm1245_vm12, %v3030_v62  ;;  %v10664_v6 = vpop.f32.mrb[218].mxu0  ;;  %v3034_v31 = vsel %vm2998_vm14, 1.0, %v17843_v35  ;;  %vm3346_vm14 = vcmp.eq.s32.totalorder %v17893_v43, 16 }
 0x42d   :  { %2210 = vrot.lane.b32.xlu1 %v2179_v22, %s12995_s30  ;;  %11975 = vmatprep.subr.bf16.mxu1 %v17836_v17  ;;  %v10665_v3 = vpop.f32.mrb[219].mxu0 }
 0x42e   :  { %v2183_v53 = vpop.f32.mrb[106].mxu1  ;;  %v15692_v15 = vadd.f32 %v10665_v3, %v10664_v6 }
 0x42f   :  { %v2184_v39 = vadd.f32 %v15598_v4, %v2183_v53  ;;  %v2185_v40 = vpop.f32.mrb[107].mxu1  ;;  %9492 = vmatmul.mubr.msk.f32.gmra.mrb[212].mxu1 %vm2993_vm15, %v17814_v2  ;;  %v3367_v53 = vsel %vm3331_vm0, 1.0, %v17843_v35  ;;  %vm3355_vm15 = vcmp.eq.s32.totalorder %v17858_v48, 16  ;;  %vm3350_vm0 = vcmp.eq.s32.totalorder %v17895_v23, 16 }
 0x430   :  { %17944 = vst [vmem:[#allocation10_spill] sm:$0xff] %v15692_v15  ;;  %11977 = vmatpush1.bf16.msra.mxu1 %v17934_v27  ;;  %9493 = vmatprep.mubr.msk.f32.mxu1 %vm1245_vm12, %v3034_v31  ;;  %v10667_v22 = vpop.f32.mrb[220].mxu0 }
 0x431   :  { %2212 = vrot.lane.b32.xlu0 %v2184_v39, %s12995_s30  ;;  %3569 = vmatprep.subr.mxu1 %v17843_v35  ;;  %v10668_v62 = vpop.f32.mrb[221].mxu0 }
 0x432   :  { %v10115_v6 = vpop.f32.mrb[108].mxu1  ;;  %v15703_v3 = vadd.f32 %v10668_v62, %v10667_v22 }
 0x433   :  { %v10116_v4 = vpop.f32.mrb[109].mxu1  ;;  %9494 = vmatmul.mubr.msk.f32.gmra.mrb[214].mxu1 %vm2997_vm1, %v17814_v2  ;;  %vm3359_vm1 = vcmp.eq.s32.totalorder %v14475_v51, 16 }
 0x434   :  { %17945 = vst [vmem:[#allocation11_spill] sm:$0xff] %v15703_v3  ;;  %v15708_v40 = vadd.f32 %v10116_v4, %v10115_v6  ;;  %3570 = vmatpush1.msra.mxu1 %v17915_v0  ;;  %9513 = vmatprep.mubr.msk.f32.mxu1 %vm1245_vm12, %v3367_v53  ;;  %v10670_v39 = vpop.f32.mrb[222].mxu0  ;;  %v17947_v3 = vmov 1.0   ;;  %v3371_v6 = vsel %vm3335_vm2, 1.0, %v17843_v35  ;;  %vm3354_vm2 = vcmp.eq.s32.totalorder %v17897_v5, 16 }
 0x435   :  { %12010 = vmatprep.subr.bf16.mxu1 %v17836_v17  ;;  %v10671_v31 = vpop.f32.mrb[223].mxu0 }
 0x436   :  { %v10118_v22 = vpop.f32.mrb[110].mxu1  ;;  %v15714_v62 = vadd.f32 %v10671_v31, %v10670_v39 }
 0x437   :  { %v10119_v2 = vpop.f32.mrb[111].mxu1  ;;  %9514 = vmatmul.mubr.msk.f32.vlgmr.msra.gmra.mrb[216].mxu1 %vm3330_vm3, %v17947_v3  ;;  %vm3363_vm3 = vcmp.eq.s32.totalorder %v17918_v12, 16 }
 0x438   :  { %17946 = vst [vmem:[#allocation17_spill] sm:$0xff] %v15714_v62  ;;  %v15719_v4 = vadd.f32 %v10119_v2, %v10118_v22  ;;  %12012 = vmatpush1.bf16.msra.mxu1 %v17919_v42  ;;  %9515 = vmatprep.mubr.msk.f32.mxu1 %vm1245_vm12, %v3371_v6  ;;  %v10705_v53 = vpop.f32.mrb[224].mxu0  ;;  %v3375_v22 = vsel %vm3339_vm4, 1.0, %v17843_v35  ;;  %vm3358_vm4 = vcmp.eq.s32.totalorder %v17900_v37, 16 }
 0x439   :  { %12013 = vmatprep.subr.bf16.mxu1 %v17836_v17  ;;  %v10706_v39 = vpop.f32.mrb[225].mxu0 }
 0x43a   :  { %v10121_v31 = vpop.f32.mrb[112].mxu1  ;;  %v15725_v62 = vadd.f32 %v10706_v39, %v10705_v53 }
 0x43b   :  { %v10122_v15 = vpop.f32.mrb[113].mxu1  ;;  %9516 = vmatmul.mubr.msk.f32.gmra.mrb[218].mxu1 %vm3334_vm6, %v17947_v3  ;;  %v1832_v2 = vpop.permute.xlu0 %1831  ;;  %vm3696_vm6 = vcmp.eq.s32.totalorder %v17935_v34, 17 }
 0x43c   :  { %17948 = vst [vmem:[#allocation12_spill] sm:$0xff] %v15725_v62  ;;  %v15730_v26 = vadd.f32 %v10122_v15, %v10121_v31  ;;  %12015 = vmatpush1.bf16.msra.mxu1 %v17920_v47  ;;  %1859 = vst.msk [vmem:[#allocation2] sm:$0xff] %vm1858_vm5, %v1832_v2  ;;  %9517 = vmatprep.mubr.msk.f32.mxu1 %vm1245_vm12, %v3375_v22  ;;  %v10708_v6 = vpop.f32.mrb[226].mxu0  ;;  %v3379_v31 = vsel %vm3343_vm7, 1.0, %v17843_v35  ;;  %vm3362_vm7 = vcmp.eq.s32.totalorder %v17902_v54, 16 }
 0x43d   :  { %12016 = vmatprep.subr.bf16.mxu1 %v17836_v17  ;;  %v10709_v53 = vpop.f32.mrb[227].mxu0 }
 0x43e   :  { %v10124_v39 = vpop.f32.mrb[114].mxu1  ;;  %v15737_v62 = vadd.f32 %v10709_v53, %v10708_v6 }
 0x43f   :  { %v10125_v41 = vpop.f32.mrb[115].mxu1  ;;  %9518 = vmatmul.mubr.msk.f32.gmra.mrb[220].mxu1 %vm3338_vm8, %v17947_v3  ;;  %v1834_v15 = vpop.permute.xlu1 %1833  ;;  %vm3700_vm8 = vcmp.eq.s32.totalorder %v17882_v58, 17 }
 0x440   :  { %17949 = vst [vmem:[#allocation18_spill] sm:$0xff] %v15737_v62  ;;  %v15742_v2 = vadd.f32 %v10125_v41, %v10124_v39  ;;  %12018 = vmatpush1.bf16.msra.mxu1 %v17921_v29  ;;  %1860 = vst.msk [vmem:[#allocation2 + $0x10] sm:$0xff] %vm1858_vm5, %v1834_v15  ;;  %9519 = vmatprep.mubr.msk.f32.mxu1 %vm1245_vm12, %v3379_v31  ;;  %v10711_v22 = vpop.f32.mrb[228].mxu0  ;;  %v3383_v39 = vsel %vm3347_vm9, 1.0, %v17843_v35  ;;  %vm3695_vm9 = vcmp.eq.s32.totalorder %v17916_v61, 17 }
 0x441   :  { %12019 = vmatprep.subr.bf16.mxu1 %v17836_v17  ;;  %v10712_v6 = vpop.f32.mrb[229].mxu0 }
 0x442   :  { %v10127_v53 = vpop.f32.mrb[116].mxu1  ;;  %v15749_v62 = vadd.f32 %v10712_v6, %v10711_v22 }
 0x443   :  { %v10128_v45 = vpop.f32.mrb[117].mxu1  ;;  %9520 = vmatmul.mubr.msk.f32.gmra.mrb[222].mxu1 %vm3342_vm10, %v17947_v3  ;;  %v1836_v41 = vpop.permute.xlu1 %1835  ;;  %vm3704_vm10 = vcmp.eq.s32.totalorder %v17917_v1, 17 }
 0x444   :  { %17950 = vst [vmem:[#allocation19_spill] sm:$0xff] %v15749_v62  ;;  %v15754_v15 = vadd.f32 %v10128_v45, %v10127_v53  ;;  %12021 = vmatpush1.bf16.msra.mxu1 %v17923_v55  ;;  %1861 = vst.msk [vmem:[#allocation2 + $0x20] sm:$0xff] %vm1858_vm5, %v1836_v41  ;;  %9521 = vmatprep.mubr.msk.f32.mxu1 %vm1245_vm12, %v3383_v39  ;;  %v10714_v31 = vpop.f32.mrb[230].mxu0  ;;  %v3387_v53 = vsel %vm3351_vm11, 1.0, %v17843_v35  ;;  %vm3699_vm11 = vcmp.eq.s32.totalorder %v17887_v36, 17 }
 0x445   :  { %12022 = vmatprep.subr.bf16.mxu1 %v17836_v17  ;;  %v10715_v22 = vpop.f32.mrb[231].mxu0 }
 0x446   :  { %v10130_v6 = vpop.f32.mrb[118].mxu1  ;;  %v15761_v62 = vadd.f32 %v10715_v22, %v10714_v31 }
 0x447   :  { %v10131_v33 = vpop.f32.mrb[119].mxu1  ;;  %9522 = vmatmul.mubr.msk.f32.gmra.mrb[224].mxu1 %vm3346_vm14, %v17947_v3  ;;  %v1838_v45 = vpop.permute.xlu1 %1837  ;;  %vm3708_vm14 = vcmp.eq.s32.totalorder %v14394_v18, 17 }
 0x448   :  { %17951 = vst [vmem:[#allocation14_spill] sm:$0xff] %v15761_v62  ;;  %v15766_v41 = vadd.f32 %v10131_v33, %v10130_v6  ;;  %12024 = vmatpush1.bf16.msra.mxu1 %v17925_v50  ;;  %1862 = vst.msk [vmem:[#allocation2 + $0x30] sm:$0xff] %vm1858_vm5, %v1838_v45  ;;  %9523 = vmatprep.mubr.msk.f32.mxu1 %vm1245_vm12, %v3387_v53  ;;  %v10717_v39 = vpop.f32.mrb[232].mxu0  ;;  %v3391_v6 = vsel %vm3355_vm15, 1.0, %v17843_v35  ;;  %vm3703_vm15 = vcmp.eq.s32.totalorder %v17889_v49, 17 }
 0x449   :  { %12025 = vmatprep.subr.bf16.mxu1 %v17836_v17  ;;  %v10718_v31 = vpop.f32.mrb[233].mxu0 }
 0x44a   :  { %v10133_v22 = vpop.f32.mrb[120].mxu1  ;;  %v15773_v62 = vadd.f32 %v10718_v31, %v10717_v39 }
 0x44b   :  { %v10134_v19 = vpop.f32.mrb[121].mxu1  ;;  %9524 = vmatmul.mubr.msk.f32.gmra.mrb[226].mxu1 %vm3350_vm0, %v17947_v3  ;;  %v1840_v33 = vpop.permute.xlu1 %1839  ;;  %vm3712_vm0 = vcmp.eq.s32.totalorder %v14414_v14, 17 }
 0x44c   :  { %17952 = vst [vmem:[#allocation58_spill] sm:$0xff] %v15773_v62  ;;  %v15778_v45 = vadd.f32 %v10134_v19, %v10133_v22  ;;  %12027 = vmatpush1.bf16.msra.mxu1 %v17929_v52  ;;  %1863 = vst.msk [vmem:[#allocation2 + $0x40] sm:$0xff] %vm1858_vm5, %v1840_v33  ;;  %9525 = vmatprep.mubr.msk.f32.mxu1 %vm1245_vm12, %v3391_v6  ;;  %v10720_v53 = vpop.f32.mrb[234].mxu0  ;;  %v3395_v22 = vsel %vm3359_vm1, 1.0, %v17843_v35  ;;  %vm3707_vm1 = vcmp.eq.s32.totalorder %v17891_v16, 17 }
 0x44d   :  { %12028 = vmatprep.subr.bf16.mxu1 %v17836_v17  ;;  %v10721_v39 = vpop.f32.mrb[235].mxu0 }
 0x44e   :  { %v10136_v31 = vpop.f32.mrb[122].mxu1  ;;  %v15785_v62 = vadd.f32 %v10721_v39, %v10720_v53 }
 0x44f   :  { %v10137_v59 = vpop.f32.mrb[123].mxu1  ;;  %9526 = vmatmul.mubr.msk.f32.gmra.mrb[228].mxu1 %vm3354_vm2, %v17947_v3  ;;  %v1842_v19 = vpop.permute.xlu1 %1841  ;;  %vm3716_vm2 = vcmp.eq.s32.totalorder %v14433_v46, 17 }
 0x450   :  { %17953 = vst [vmem:[#allocation59_spill] sm:$0xff] %v15785_v62  ;;  %v15790_v33 = vadd.f32 %v10137_v59, %v10136_v31  ;;  %12030 = vmatpush1.bf16.msra.mxu1 %v17932_v21  ;;  %1864 = vst.msk [vmem:[#allocation2 + $0x50] sm:$0xff] %vm1858_vm5, %v1842_v19  ;;  %9527 = vmatprep.mubr.msk.f32.mxu1 %vm1245_vm12, %v3395_v22  ;;  %v10723_v6 = vpop.f32.mrb[236].mxu0  ;;  %v3399_v31 = vsel %vm3363_vm3, 1.0, %v17843_v35  ;;  %vm3711_vm3 = vcmp.eq.s32.totalorder %v17893_v43, 17 }
 0x451   :  { %12031 = vmatprep.subr.bf16.mxu1 %v17836_v17  ;;  %v10724_v53 = vpop.f32.mrb[237].mxu0 }
 0x452   :  { %v10139_v39 = vpop.f32.mrb[124].mxu1  ;;  %v15797_v62 = vadd.f32 %v10724_v53, %v10723_v6 }
 0x453   :  { %v10140_v10 = vpop.f32.mrb[125].mxu1  ;;  %9528 = vmatmul.mubr.msk.f32.gmra.mrb[230].mxu1 %vm3358_vm4, %v17947_v3  ;;  %v1844_v59 = vpop.permute.xlu1 %1843  ;;  %vm3720_vm4 = vcmp.eq.s32.totalorder %v17858_v48, 17 }
 0x454   :  { %17954 = vst [vmem:[#allocation60_spill] sm:$0xff] %v15797_v62  ;;  %v15802_v19 = vadd.f32 %v10140_v10, %v10139_v39  ;;  %12033 = vmatpush1.bf16.msra.mxu1 %v17934_v27  ;;  %1865 = vst.msk [vmem:[#allocation2 + $0x60] sm:$0xff] %vm1858_vm5, %v1844_v59  ;;  %9529 = vmatprep.mubr.msk.f32.mxu1 %vm1245_vm12, %v3399_v31  ;;  %v10726_v22 = vpop.f32.mrb[238].mxu0  ;;  %v3732_v59 = vsel %vm3696_vm6, 1.0, %v17843_v35  ;;  %vm3715_vm6 = vcmp.eq.s32.totalorder %v17895_v23, 17 }
 0x455   :  { %3934 = vmatprep.subr.mxu1 %v17843_v35  ;;  %v10727_v6 = vpop.f32.mrb[239].mxu0 }
 0x456   :  { %v2508_v53 = vpop.f32.mrb[126].mxu1  ;;  %v15809_v62 = vadd.f32 %v10727_v6, %v10726_v22 }
 0x457   :  { %v2509_v10 = vadd.f32 %v15708_v40, %v2508_v53  ;;  %v2510_v39 = vpop.f32.mrb[127].mxu1  ;;  %9530 = vmatmul.mubr.msk.f32.gmra.mrb[232].mxu1 %vm3362_vm7, %v17947_v3  ;;  %v1846_v60 = vpop.permute.xlu1 %1845  ;;  %vm3724_vm7 = vcmp.eq.s32.totalorder %v14475_v51, 17 }
 0x458   :  { %17955 = vst [vmem:[#allocation61_spill] sm:$0xff] %v15809_v62  ;;  %3935 = vmatpush1.msra.mxu1 %v17915_v0  ;;  %1866 = vst.msk [vmem:[#allocation2 + $0x70] sm:$0xff] %vm1858_vm5, %v1846_v60  ;;  %9549 = vmatprep.mubr.msk.f32.mxu1 %vm1245_vm12, %v3732_v59  ;;  %v10729_v31 = vpop.f32.mrb[240].mxu0  ;;  %v3736_v59 = vsel %vm3700_vm8, 1.0, %v17843_v35  ;;  %vm3719_vm8 = vcmp.eq.s32.totalorder %v17897_v5, 17 }
 0x459   :  { %2561 = vrot.lane.b32.xlu0 %v2509_v10, %s12996_s21  ;;  %12066 = vmatprep.subr.bf16.mxu1 %v17836_v17  ;;  %v10730_v40 = vpop.f32.mrb[241].mxu0 }
 0x45a   :  { %v2513_v22 = vpop.f32.mrb[128].mxu1  ;;  %v15821_v6 = vadd.f32 %v10730_v40, %v10729_v31 }
 0x45b   :  { %v2514_v53 = vadd.f32 %v15719_v4, %v2513_v22  ;;  %v2515_v39 = vpop.f32.mrb[129].mxu1  ;;  %9550 = vmatmul.mubr.msk.f32.vlgmr.msra.gmra.mrb[234].mxu1 %vm3695_vm9, %v17947_v3  ;;  %v1848_v60 = vpop.permute.xlu1 %1847  ;;  %vm3728_vm9 = vcmp.eq.s32.totalorder %v17918_v12, 17 }
 0x45c   :  { %17956 = vst [vmem:[#allocation62_spill] sm:$0xff] %v15821_v6  ;;  %12068 = vmatpush1.bf16.msra.mxu1 %v17919_v42  ;;  %1867 = vst.msk [vmem:[#allocation2 + $0x80] sm:$0xff] %vm1858_vm5, %v1848_v60  ;;  %9551 = vmatprep.mubr.msk.f32.mxu1 %vm1245_vm12, %v3736_v59  ;;  %v10764_v10 = vpop.f32.mrb[242].mxu0  ;;  %v3740_v60 = vsel %vm3704_vm10, 1.0, %v17843_v35  ;;  %vm3723_vm10 = vcmp.eq.s32.totalorder %v17900_v37, 17 }
 0x45d   :  { %2563 = vrot.lane.b32.xlu1 %v2514_v53, %s12996_s21  ;;  %12069 = vmatprep.subr.bf16.mxu1 %v17836_v17  ;;  %v10765_v4 = vpop.f32.mrb[243].mxu0 }
 0x45e   :  { %v2518_v31 = vpop.f32.mrb[130].mxu1  ;;  %v15833_v40 = vadd.f32 %v10765_v4, %v10764_v10 }
 0x45f   :  { %v2519_v22 = vadd.f32 %v15730_v26, %v2518_v31  ;;  %v2520_v39 = vpop.f32.mrb[131].mxu1  ;;  %9552 = vmatmul.mubr.msk.f32.gmra.mrb[236].mxu1 %vm3699_vm11, %v17947_v3  ;;  %vm4061_vm11 = vcmp.eq.s32.totalorder %v17935_v34, 28 }
 0x460   :  { %17957 = vst [vmem:[#allocation63_spill] sm:$0xff] %v15833_v40  ;;  %12071 = vmatpush1.bf16.msra.mxu1 %v17920_v47  ;;  %9553 = vmatprep.mubr.msk.f32.mxu1 %vm1245_vm12, %v3740_v60  ;;  %v10767_v53 = vpop.f32.mrb[244].mxu0  ;;  %v3744_v39 = vsel %vm3708_vm14, 1.0, %v17843_v35  ;;  %vm3727_vm14 = vcmp.eq.s32.totalorder %v17902_v54, 17 }
 0x461   :  { %2565 = vrot.lane.b32.xlu1 %v2519_v22, %s12996_s21  ;;  %12072 = vmatprep.subr.bf16.mxu1 %v17836_v17  ;;  %v10768_v59 = vpop.f32.mrb[245].mxu0 }
 0x462   :  { %v2523_v10 = vpop.f32.mrb[132].mxu1  ;;  %v15844_v4 = vadd.f32 %v10768_v59, %v10767_v53 }
 0x463   :  { %v2524_v26 = vadd.f32 %v15742_v2, %v2523_v10  ;;  %v2525_v31 = vpop.f32.mrb[133].mxu1  ;;  %9554 = vmatmul.mubr.msk.f32.gmra.mrb[238].mxu1 %vm3703_vm15, %v17947_v3  ;;  %vm4065_vm15 = vcmp.eq.s32.totalorder %v17882_v58, 28 }
 0x464   :  { %17958 = vst [vmem:[#allocation64_spill] sm:$0xff] %v15844_v4  ;;  %12074 = vmatpush1.bf16.msra.mxu1 %v17921_v29  ;;  %9555 = vmatprep.mubr.msk.f32.mxu1 %vm1245_vm12, %v3744_v39  ;;  %v10770_v22 = vpop.f32.mrb[246].mxu0  ;;  %v3748_v31 = vsel %vm3712_vm0, 1.0, %v17843_v35  ;;  %vm4060_vm0 = vcmp.eq.s32.totalorder %v17916_v61, 28 }
 0x465   :  { %2567 = vrot.lane.b32.xlu1 %v2524_v26, %s12996_s21  ;;  %12075 = vmatprep.subr.bf16.mxu1 %v17836_v17  ;;  %v10771_v60 = vpop.f32.mrb[247].mxu0 }
 0x466   :  { %v2528_v53 = vpop.f32.mrb[134].mxu1  ;;  %v15855_v59 = vadd.f32 %v10771_v60, %v10770_v22 }
 0x467   :  { %v2529_v2 = vadd.f32 %v15754_v15, %v2528_v53  ;;  %v2530_v10 = vpop.f32.mrb[135].mxu1  ;;  %9556 = vmatmul.mubr.msk.f32.gmra.mrb[240].mxu1 %vm3707_vm1, %v17947_v3  ;;  %vm4069_vm1 = vcmp.eq.s32.totalorder %v17917_v1, 28 }
 0x468   :  { %17959 = vst [vmem:[#allocation65_spill] sm:$0xff] %v15855_v59  ;;  %12077 = vmatpush1.bf16.msra.mxu1 %v17923_v55  ;;  %9557 = vmatprep.mubr.msk.f32.mxu1 %vm1245_vm12, %v3748_v31  ;;  %v10773_v26 = vpop.f32.mrb[248].mxu0  ;;  %v3752_v10 = vsel %vm3716_vm2, 1.0, %v17843_v35  ;;  %vm2223_vm2 = vcmask 392448  }
 0x469   :  { %2569 = vrot.lane.b32.xlu1 %v2529_v2, %s12996_s21  ;;  %12078 = vmatprep.subr.bf16.mxu1 %v17836_v17  ;;  %v10774_v39 = vpop.f32.mrb[249].mxu0 }
 0x46a   :  { %v2533_v22 = vpop.f32.mrb[136].mxu1  ;;  %v15866_v60 = vadd.f32 %v10774_v39, %v10773_v26 }
 0x46b   :  { %v2534_v15 = vadd.f32 %v15766_v41, %v2533_v22  ;;  %v2535_v53 = vpop.f32.mrb[137].mxu1  ;;  %9558 = vmatmul.mubr.msk.f32.gmra.mrb[242].mxu1 %vm3711_vm3, %v17947_v3  ;;  %vm4064_vm3 = vcmp.eq.s32.totalorder %v17887_v36, 28 }
 0x46c   :  { %17960 = vst [vmem:[#allocation66_spill] sm:$0xff] %v15866_v60  ;;  %12080 = vmatpush1.bf16.msra.mxu1 %v17925_v50  ;;  %9559 = vmatprep.mubr.msk.f32.mxu1 %vm1245_vm12, %v3752_v10  ;;  %v10776_v2 = vpop.f32.mrb[250].mxu0  ;;  %v3756_v53 = vsel %vm3720_vm4, 1.0, %v17843_v35  ;;  %vm4073_vm4 = vcmp.eq.s32.totalorder %v14394_v18, 28 }
 0x46d   :  { %2571 = vrot.lane.b32.xlu1 %v2534_v15, %s12996_s21  ;;  %12081 = vmatprep.subr.bf16.mxu1 %v17836_v17  ;;  %v10777_v31 = vpop.f32.mrb[251].mxu0 }
 0x46e   :  { %v2538_v26 = vpop.f32.mrb[138].mxu1  ;;  %v15877_v39 = vadd.f32 %v10777_v31, %v10776_v2 }
 0x46f   :  { %v2539_v41 = vadd.f32 %v15778_v45, %v2538_v26  ;;  %v2540_v22 = vpop.f32.mrb[139].mxu1  ;;  %9560 = vmatmul.mubr.msk.f32.gmra.mrb[244].mxu1 %vm3715_vm6, %v17947_v3  ;;  %vm4068_vm6 = vcmp.eq.s32.totalorder %v17889_v49, 28 }
 0x470   :  { %17961 = vst [vmem:[#allocation67_spill] sm:$0xff] %v15877_v39  ;;  %12083 = vmatpush1.bf16.msra.mxu1 %v17929_v52  ;;  %9561 = vmatprep.mubr.msk.f32.mxu1 %vm1245_vm12, %v3756_v53  ;;  %v10779_v15 = vpop.f32.mrb[252].mxu0  ;;  %v3760_v22 = vsel %vm3724_vm7, 1.0, %v17843_v35  ;;  %vm4077_vm7 = vcmp.eq.s32.totalorder %v14414_v14, 28 }
 0x471   :  { %2573 = vrot.lane.b32.xlu1 %v2539_v41, %s12996_s21  ;;  %12084 = vmatprep.subr.bf16.mxu1 %v17836_v17  ;;  %v10780_v10 = vpop.f32.mrb[253].mxu0 }
 0x472   :  { %v2543_v2 = vpop.f32.mrb[140].mxu1  ;;  %v15888_v31 = vadd.f32 %v10780_v10, %v10779_v15 }
 0x473   :  { %v2544_v45 = vadd.f32 %v15790_v33, %v2543_v2  ;;  %v2545_v26 = vpop.f32.mrb[141].mxu1  ;;  %9562 = vmatmul.mubr.msk.f32.gmra.mrb[246].mxu1 %vm3719_vm8, %v17947_v3  ;;  %vm4072_vm8 = vcmp.eq.s32.totalorder %v17891_v16, 28 }
 0x474   :  { %17962 = vst [vmem:[#allocation68_spill] sm:$0xff] %v15888_v31  ;;  %12086 = vmatpush1.bf16.msra.mxu1 %v17932_v21  ;;  %9563 = vmatprep.mubr.msk.f32.mxu1 %vm1245_vm12, %v3760_v22  ;;  %v10782_v41 = vpop.f32.mrb[254].mxu0  ;;  %v3764_v26 = vsel %vm3728_vm9, 1.0, %v17843_v35  ;;  %vm4081_vm9 = vcmp.eq.s32.totalorder %v14433_v46, 28 }
 0x475   :  { %2575 = vrot.lane.b32.xlu1 %v2544_v45, %s12996_s21  ;;  %12087 = vmatprep.subr.bf16.mxu1 %v17836_v17  ;;  %v10783_v53 = vpop.f32.mrb[255].mxu0 }
 0x476   :  { %v2548_v15 = vpop.f32.mrb[142].mxu1  ;;  %v15899_v10 = vadd.f32 %v10783_v53, %v10782_v41 }
 0x477   :  { %v2549_v33 = vadd.f32 %v15802_v19, %v2548_v15  ;;  %v2550_v2 = vpop.f32.mrb[143].mxu1  ;;  %9564 = vmatmul.mubr.msk.f32.gmra.mrb[248].mxu1 %vm3723_vm10, %v17947_v3  ;;  %v4097_v15 = vsel %vm4061_vm11, 1.0, %v17843_v35  ;;  %vm4076_vm10 = vcmp.eq.s32.totalorder %v17893_v43, 28  ;;  %vm4085_vm11 = vcmp.eq.s32.totalorder %v17858_v48, 28 }
 0x478   :  { %17963 = vst [vmem:[#allocation69_spill] sm:$0xff] %v15899_v10  ;;  %12089 = vmatpush1.bf16.msra.mxu1 %v17934_v27  ;;  %9565 = vmatprep.mubr.msk.f32.mxu1 %vm1245_vm12, %v3764_v26  ;;  %v10785_v45 = vpop.f32.mrb[0].mxu0 }
 0x479   :  { %2577 = vrot.lane.b32.xlu0 %v2549_v33, %s12996_s21  ;;  %4299 = vmatprep.subr.mxu1 %v17843_v35  ;;  %v10786_v22 = vpop.f32.mrb[1].mxu0 }
 0x47a   :  { %v10174_v41 = vpop.f32.mrb[144].mxu1  ;;  %v15910_v53 = vadd.f32 %v10786_v22, %v10785_v45 }
 0x47b   :  { %v10175_v19 = vpop.f32.mrb[145].mxu1  ;;  %9566 = vmatmul.mubr.msk.f32.gmra.mrb[250].mxu1 %vm3727_vm14, %v17947_v3  ;;  %vm4080_vm14 = vcmp.eq.s32.totalorder %v17895_v23, 28 }
 0x47c   :  { %17964 = vst [vmem:[#allocation70_spill] sm:$0xff] %v15910_v53  ;;  %v15915_v2 = vadd.f32 %v10175_v19, %v10174_v41  ;;  %4300 = vmatpush1.msra.mxu1 %v17915_v0  ;;  %9585 = vmatprep.mubr.msk.f32.mxu1 %vm1245_vm12, %v4097_v15  ;;  %v10788_v33 = vpop.f32.mrb[2].mxu0  ;;  %v4101_v41 = vsel %vm4065_vm15, 1.0, %v17843_v35  ;;  %vm4089_vm15 = vcmp.eq.s32.totalorder %v14475_v51, 28 }
 0x47d   :  { %12122 = vmatprep.subr.bf16.mxu1 %v17836_v17  ;;  %v10789_v26 = vpop.f32.mrb[3].mxu0 }
 0x47e   :  { %v10177_v45 = vpop.f32.mrb[146].mxu1  ;;  %v15921_v22 = vadd.f32 %v10789_v26, %v10788_v33 }
 0x47f   :  { %v10178_v53 = vpop.f32.mrb[147].mxu1  ;;  %9586 = vmatmul.mubr.msk.f32.vlgmr.msra.gmra.mrb[252].mxu1 %vm4060_vm0, %v17947_v3  ;;  %vm4084_vm0 = vcmp.eq.s32.totalorder %v17897_v5, 28 }
 0x480   :  { %17965 = vst [vmem:[#allocation71_spill] sm:$0xff] %v15921_v22  ;;  %v15926_v19 = vadd.f32 %v10178_v53, %v10177_v45  ;;  %12124 = vmatpush1.bf16.msra.mxu1 %v17919_v42  ;;  %9587 = vmatprep.mubr.msk.f32.mxu1 %vm1245_vm12, %v4101_v41  ;;  %v10823_v15 = vpop.f32.mrb[4].mxu0  ;;  %v4105_v45 = vsel %vm4069_vm1, 1.0, %v17843_v35  ;;  %vm4093_vm1 = vcmp.eq.s32.totalorder %v17918_v12, 28 }
 0x481   :  { %12125 = vmatprep.subr.bf16.mxu1 %v17836_v17  ;;  %v10824_v33 = vpop.f32.mrb[5].mxu0 }
 0x482   :  { %v10180_v26 = vpop.f32.mrb[148].mxu1  ;;  %v15932_v22 = vadd.f32 %v10824_v33, %v10823_v15 }
 0x483   :  { %v10181_v10 = vpop.f32.mrb[149].mxu1  ;;  %9588 = vmatmul.mubr.msk.f32.gmra.mrb[254].mxu1 %vm4064_vm3, %v17947_v3  ;;  %v2197_v53 = vpop.permute.xlu0 %2196  ;;  %vm4088_vm3 = vcmp.eq.s32.totalorder %v17900_v37, 28 }
 0x484   :  { %17966 = vst [vmem:[#allocation72_spill] sm:$0xff] %v15932_v22  ;;  %v15937_v31 = vadd.f32 %v10181_v10, %v10180_v26  ;;  %12127 = vmatpush1.bf16.msra.mxu1 %v17920_v47  ;;  %2224 = vst.msk [vmem:[#allocation2] sm:$0xff] %vm2223_vm2, %v2197_v53  ;;  %9589 = vmatprep.mubr.msk.f32.mxu1 %vm1245_vm12, %v4105_v45  ;;  %v10826_v41 = vpop.f32.mrb[6].mxu0  ;;  %v4109_v26 = vsel %vm4073_vm4, 1.0, %v17843_v35  ;;  %vm4389_vm4 = vcmp.eq.s32.totalorder %v17935_v34, 29 }
 0x485   :  { %12128 = vmatprep.subr.bf16.mxu1 %v17836_v17  ;;  %v10827_v15 = vpop.f32.mrb[7].mxu0 }
 0x486   :  { %v10183_v33 = vpop.f32.mrb[150].mxu1  ;;  %v15944_v22 = vadd.f32 %v10827_v15, %v10826_v41 }
 0x487   :  { %v10184_v39 = vpop.f32.mrb[151].mxu1  ;;  %9590 = vmatmul.mubr.msk.f32.gmra.mrb[0].mxu1 %vm4068_vm6, %v17947_v3  ;;  %v2199_v10 = vpop.permute.xlu1 %2198  ;;  %vm4092_vm6 = vcmp.eq.s32.totalorder %v17902_v54, 28 }
 0x488   :  { %17967 = vst [vmem:[#allocation73_spill] sm:$0xff] %v15944_v22  ;;  %v15949_v53 = vadd.f32 %v10184_v39, %v10183_v33  ;;  %12130 = vmatpush1.bf16.msra.mxu1 %v17921_v29  ;;  %2225 = vst.msk [vmem:[#allocation2 + $0x10] sm:$0xff] %vm2223_vm2, %v2199_v10  ;;  %9591 = vmatprep.mubr.msk.f32.mxu1 %vm1245_vm12, %v4109_v26  ;;  %v10829_v45 = vpop.f32.mrb[8].mxu0  ;;  %v4113_v33 = vsel %vm4077_vm7, 1.0, %v17843_v35  ;;  %vm4393_vm7 = vcmp.eq.s32.totalorder %v17882_v58, 29 }
 0x489   :  { %12131 = vmatprep.subr.bf16.mxu1 %v17836_v17  ;;  %v10830_v41 = vpop.f32.mrb[9].mxu0 }
 0x48a   :  { %v10186_v15 = vpop.f32.mrb[152].mxu1  ;;  %v15956_v22 = vadd.f32 %v10830_v41, %v10829_v45 }
 0x48b   :  { %v10187_v60 = vpop.f32.mrb[153].mxu1  ;;  %9592 = vmatmul.mubr.msk.f32.gmra.mrb[2].mxu1 %vm4072_vm8, %v17947_v3  ;;  %v2201_v39 = vpop.permute.xlu1 %2200  ;;  %vm4388_vm8 = vcmp.eq.s32.totalorder %v17916_v61, 29 }
 0x48c   :  { %17968 = vst [vmem:[#allocation74_spill] sm:$0xff] %v15956_v22  ;;  %v15961_v10 = vadd.f32 %v10187_v60, %v10186_v15  ;;  %12133 = vmatpush1.bf16.msra.mxu1 %v17923_v55  ;;  %2226 = vst.msk [vmem:[#allocation2 + $0x20] sm:$0xff] %vm2223_vm2, %v2201_v39  ;;  %9593 = vmatprep.mubr.msk.f32.mxu1 %vm1245_vm12, %v4113_v33  ;;  %v10832_v26 = vpop.f32.mrb[10].mxu0  ;;  %v4117_v15 = vsel %vm4081_vm9, 1.0, %v17843_v35  ;;  %vm4397_vm9 = vcmp.eq.s32.totalorder %v17917_v1, 29 }
 0x48d   :  { %12134 = vmatprep.subr.bf16.mxu1 %v17836_v17  ;;  %v10833_v45 = vpop.f32.mrb[11].mxu0 }
 0x48e   :  { %v10189_v41 = vpop.f32.mrb[154].mxu1  ;;  %v15968_v22 = vadd.f32 %v10833_v45, %v10832_v26 }
 0x48f   :  { %v10190_v59 = vpop.f32.mrb[155].mxu1  ;;  %9594 = vmatmul.mubr.msk.f32.gmra.mrb[4].mxu1 %vm4076_vm10, %v17947_v3  ;;  %v2203_v60 = vpop.permute.xlu1 %2202  ;;  %vm4392_vm10 = vcmp.eq.s32.totalorder %v17887_v36, 29 }
 0x490   :  { %17969 = vst [vmem:[#allocation75_spill] sm:$0xff] %v15968_v22  ;;  %v15973_v39 = vadd.f32 %v10190_v59, %v10189_v41  ;;  %12136 = vmatpush1.bf16.msra.mxu1 %v17925_v50  ;;  %2227 = vst.msk [vmem:[#allocation2 + $0x30] sm:$0xff] %vm2223_vm2, %v2203_v60  ;;  %9595 = vmatprep.mubr.msk.f32.mxu1 %vm1245_vm12, %v4117_v15  ;;  %v10835_v33 = vpop.f32.mrb[12].mxu0  ;;  %v4121_v41 = vsel %vm4085_vm11, 1.0, %v17843_v35  ;;  %vm4401_vm11 = vcmp.eq.s32.totalorder %v14394_v18, 29 }
 0x491   :  { %12137 = vmatprep.subr.bf16.mxu1 %v17836_v17  ;;  %v10836_v26 = vpop.f32.mrb[13].mxu0 }
 0x492   :  { %v10192_v45 = vpop.f32.mrb[156].mxu1  ;;  %v15980_v22 = vadd.f32 %v10836_v26, %v10835_v33 }
 0x493   :  { %v10193_v4 = vpop.f32.mrb[157].mxu1  ;;  %9596 = vmatmul.mubr.msk.f32.gmra.mrb[6].mxu1 %vm4080_vm14, %v17947_v3  ;;  %v2205_v59 = vpop.permute.xlu1 %2204  ;;  %vm4396_vm14 = vcmp.eq.s32.totalorder %v17889_v49, 29 }
 0x494   :  { %17970 = vst [vmem:[#allocation76_spill] sm:$0xff] %v15980_v22  ;;  %12139 = vmatpush1.bf16.msra.mxu1 %v17929_v52  ;;  %2228 = vst.msk [vmem:[#allocation2 + $0x40] sm:$0xff] %vm2223_vm2, %v2205_v59  ;;  %9597 = vmatprep.mubr.msk.f32.mxu1 %vm1245_vm12, %v4121_v41  ;;  %v10838_v60 = vpop.f32.mrb[14].mxu0  ;;  %v15989_v15 = vadd.f32 %v10193_v4, %v10192_v45  ;;  %v4125_v59 = vsel %vm4089_vm15, 1.0, %v17843_v35  ;;  %vm4405_vm15 = vcmp.eq.s32.totalorder %v14414_v14, 29 }
 0x495   :  { %12140 = vmatprep.subr.bf16.mxu1 %v17836_v17  ;;  %v10839_v33 = vpop.f32.mrb[15].mxu0 }
 0x496   :  { %v10195_v26 = vpop.f32.mrb[158].mxu1  ;;  %v15992_v22 = vadd.f32 %v10839_v33, %v10838_v60 }
 0x497   :  { %v10196_v40 = vpop.f32.mrb[159].mxu1  ;;  %9598 = vmatmul.mubr.msk.f32.gmra.mrb[8].mxu1 %vm4084_vm0, %v17947_v3  ;;  %v2207_v6 = vpop.permute.xlu1 %2206  ;;  %vm4400_vm0 = vcmp.eq.s32.totalorder %v17891_v16, 29 }
 0x498   :  { %17971 = vst [vmem:[#allocation77_spill] sm:$0xff] %v15992_v22  ;;  %12142 = vmatpush1.bf16.msra.mxu1 %v17932_v21  ;;  %2229 = vst.msk [vmem:[#allocation2 + $0x50] sm:$0xff] %vm2223_vm2, %v2207_v6  ;;  %9599 = vmatprep.mubr.msk.f32.mxu1 %vm1245_vm12, %v4125_v59  ;;  %v10841_v4 = vpop.f32.mrb[16].mxu0  ;;  %v16001_v45 = vadd.f32 %v10196_v40, %v10195_v26  ;;  %v4129_v6 = vsel %vm4093_vm1, 1.0, %v17843_v35  ;;  %vm4409_vm1 = vcmp.eq.s32.totalorder %v14433_v46, 29 }
 0x499   :  { %12143 = vmatprep.subr.bf16.mxu1 %v17836_v17  ;;  %v10842_v41 = vpop.f32.mrb[17].mxu0 }
 0x49a   :  { %v10198_v60 = vpop.f32.mrb[160].mxu1  ;;  %v16004_v33 = vadd.f32 %v10842_v41, %v10841_v4 }
 0x49b   :  { %v10199_v22 = vpop.f32.mrb[161].mxu1  ;;  %9600 = vmatmul.mubr.msk.f32.gmra.mrb[10].mxu1 %vm4088_vm3, %v17947_v3  ;;  %v2209_v62 = vpop.permute.xlu1 %2208  ;;  %vm4404_vm3 = vcmp.eq.s32.totalorder %v17893_v43, 29 }
 0x49c   :  { %17972 = vst [vmem:[#allocation78_spill] sm:$0xff] %v16004_v33  ;;  %12145 = vmatpush1.bf16.msra.mxu1 %v17934_v27  ;;  %2230 = vst.msk [vmem:[#allocation2 + $0x60] sm:$0xff] %vm2223_vm2, %v2209_v62  ;;  %9601 = vmatprep.mubr.msk.f32.mxu1 %vm1245_vm12, %v4129_v6  ;;  %v16013_v40 = vadd.f32 %v10199_v22, %v10198_v60  ;;  %v4425_v6 = vsel %vm4389_vm4, 1.0, %v17843_v35  ;;  %vm4413_vm4 = vcmp.eq.s32.totalorder %v17858_v48, 29 }
 0x49d   :  { %v10844_v26 = vpop.f32.mrb[18].mxu0  ;;  %4627 = vmatprep.subr.mxu1 %v17843_v35 }
 0x49e   :  { %v2873_v59 = vpop.f32.mrb[162].mxu1  ;;  %v10845_v4 = vpop.f32.mrb[19].mxu0 }
 0x49f   :  { %v2874_v41 = vadd.f32 %v15915_v2, %v2873_v59  ;;  %v16018_v33 = vadd.f32 %v10845_v4, %v10844_v26  ;;  %v2875_v28 = vpop.f32.mrb[163].mxu1  ;;  %9602 = vmatmul.mubr.msk.f32.gmra.mrb[12].mxu1 %vm4092_vm6, %v17947_v3  ;;  %v2211_v62 = vpop.permute.xlu1 %2210  ;;  %vm4408_vm6 = vcmp.eq.s32.totalorder %v17895_v23, 29 }
 0x4a0   :  { %4628 = vmatpush1.msra.mxu1 %v17915_v0  ;;  %2231 = vst.msk [vmem:[#allocation2 + $0x70] sm:$0xff] %vm2223_vm2, %v2211_v62  ;;  %9621 = vmatprep.mubr.msk.f32.mxu1 %vm1245_vm12, %v4425_v6  ;;  %v4429_v62 = vsel %vm4393_vm7, 1.0, %v17843_v35  ;;  %vm4417_vm7 = vcmp.eq.s32.totalorder %v14475_v51, 29 }
 0x4a1   :  { %v10847_v22 = vpop.f32.mrb[20].mxu0  ;;  %2926 = vrot.lane.b32.xlu0 %v2874_v41, %s12997_s0  ;;  %12178 = vmatprep.subr.bf16.mxu1 %v17836_v17 }
 0x4a2   :  { %v2878_v28 = vpop.f32.mrb[164].mxu1  ;;  %v10848_v2 = vpop.f32.mrb[21].mxu0 }
 0x4a3   :  { %v2879_v60 = vadd.f32 %v15926_v19, %v2878_v28  ;;  %v16030_v26 = vadd.f32 %v10848_v2, %v10847_v22  ;;  %v2880_v59 = vpop.f32.mrb[165].mxu1  ;;  %9622 = vmatmul.mubr.msk.f32.vlgmr.msra.gmra.mrb[14].mxu1 %vm4388_vm8, %v17947_v3  ;;  %v2213_v4 = vpop.permute.xlu0 %2212  ;;  %v4433_v22 = vsel %vm4397_vm9, 1.0, %v17843_v35  ;;  %vm4412_vm8 = vcmp.eq.s32.totalorder %v17897_v5, 29 }
 0x4a4   :  { %12180 = vmatpush1.bf16.msra.mxu1 %v17919_v42  ;;  %2232 = vst.msk [vmem:[#allocation2 + $0x80] sm:$0xff] %vm2223_vm2, %v2213_v4  ;;  %9623 = vmatprep.mubr.msk.f32.mxu1 %vm1245_vm12, %v4429_v62  ;;  %v4441_v62 = vsel %vm4405_vm15, 1.0, %v17843_v35  ;;  %vm4421_vm9 = vcmp.eq.s32.totalorder %v17918_v12, 29  ;;  %vm4757_vm15 = vcmp.eq.s32.totalorder %v17882_v58, 30 }
 0x4a5   :  { %2928 = vrot.lane.b32.xlu0 %v2879_v60, %s12997_s0  ;;  %12181 = vmatprep.subr.bf16.mxu1 %v17836_v17  ;;  %v4437_v60 = vsel %vm4401_vm11, 1.0, %v17843_v35  ;;  %vm4753_vm11 = vcmp.eq.s32.totalorder %v17935_v34, 30 }
 0x4a6   :  { %v2883_v19 = vpop.f32.mrb[166].mxu1 }
 0x4a7   :  { %v2884_v41 = vadd.f32 %v15937_v31, %v2883_v19  ;;  %v2885_v6 = vpop.f32.mrb[167].mxu1  ;;  %9624 = vmatmul.mubr.msk.f32.gmra.mrb[16].mxu1 %vm4392_vm10, %v17947_v3  ;;  %vm4416_vm10 = vcmp.eq.s32.totalorder %v17900_v37, 29 }
 0x4a8   :  { %12183 = vmatpush1.bf16.msra.mxu1 %v17920_v47  ;;  %9625 = vmatprep.mubr.msk.f32.mxu1 %vm1245_vm12, %v4433_v22  ;;  %v4445_v6 = vsel %vm4409_vm1, 1.0, %v17843_v35  ;;  %vm4761_vm1 = vcmp.eq.s32.totalorder %v17917_v1, 30 }
 0x4a9   :  { %2930 = vrot.lane.b32.xlu0 %v2884_v41, %s12997_s0  ;;  %12184 = vmatprep.subr.bf16.mxu1 %v17836_v17 }
 0x4aa   :  { %v2888_v28 = vpop.f32.mrb[168].mxu1 }
 0x4ab   :  { %v2889_v31 = vadd.f32 %v15949_v53, %v2888_v28  ;;  %v2890_v2 = vpop.f32.mrb[169].mxu1  ;;  %9626 = vmatmul.mubr.msk.f32.gmra.mrb[18].mxu1 %vm4396_vm14, %v17947_v3  ;;  %vm4420_vm14 = vcmp.eq.s32.totalorder %v17902_v54, 29 }
 0x4ac   :  { %12186 = vmatpush1.bf16.msra.mxu1 %v17921_v29  ;;  %9627 = vmatprep.mubr.msk.f32.mxu1 %vm1245_vm12, %v4437_v60 }
 0x4ad   :  { %2932 = vrot.lane.b32.xlu0 %v2889_v31, %s12997_s0  ;;  %12187 = vmatprep.subr.bf16.mxu1 %v17836_v17  ;;  %v4449_v31 = vsel %vm4413_vm4, 1.0, %v17843_v35  ;;  %vm4756_vm4 = vcmp.eq.s32.totalorder %v17887_v36, 30 }
 0x4ae   :  { %v2893_v59 = vpop.f32.mrb[170].mxu1 }
 0x4af   :  { %v2894_v53 = vadd.f32 %v15961_v10, %v2893_v59  ;;  %v2895_v4 = vpop.f32.mrb[171].mxu1  ;;  %9628 = vmatmul.mubr.msk.f32.gmra.mrb[20].mxu1 %vm4400_vm0, %v17947_v3  ;;  %v4453_v59 = vsel %vm4417_vm7, 1.0, %v17843_v35  ;;  %vm4752_vm0 = vcmp.eq.s32.totalorder %v17916_v61, 30  ;;  %vm4760_vm7 = vcmp.eq.s32.totalorder %v17889_v49, 30 }
 0x4b0   :  { %12189 = vmatpush1.bf16.msra.mxu1 %v17923_v55  ;;  %9629 = vmatprep.mubr.msk.f32.mxu1 %vm1245_vm12, %v4441_v62  ;;  %v4457_v62 = vsel %vm4421_vm9, 1.0, %v17843_v35  ;;  %vm4764_vm9 = vcmp.eq.s32.totalorder %v17891_v16, 30 }
 0x4b1   :  { %2934 = vrot.lane.b32.xlu0 %v2894_v53, %s12997_s0  ;;  %12190 = vmatprep.subr.bf16.mxu1 %v17836_v17 }
 0x4b2   :  { %v2898_v19 = vpop.f32.mrb[172].mxu1 }
 0x4b3   :  { %v2899_v10 = vadd.f32 %v15973_v39, %v2898_v19  ;;  %v2900_v41 = vpop.f32.mrb[173].mxu1  ;;  %9630 = vmatmul.mubr.msk.f32.gmra.mrb[22].mxu1 %vm4404_vm3, %v17947_v3  ;;  %vm2588_vm3 = vcmask 523648  }
 0x4b4   :  { %12192 = vmatpush1.bf16.msra.mxu1 %v17925_v50  ;;  %9631 = vmatprep.mubr.msk.f32.mxu1 %vm1245_vm12, %v4445_v6 }
 0x4b5   :  { %2936 = vrot.lane.b32.xlu0 %v2899_v10, %s12997_s0  ;;  %12193 = vmatprep.subr.bf16.mxu1 %v17836_v17 }
 0x4b6   :  { %v2903_v22 = vpop.f32.mrb[174].mxu1 }
 0x4b7   :  { %v2904_v39 = vadd.f32 %v15989_v15, %v2903_v22  ;;  %v2905_v28 = vpop.f32.mrb[175].mxu1  ;;  %9632 = vmatmul.mubr.msk.f32.gmra.mrb[24].mxu1 %vm4408_vm6, %v17947_v3  ;;  %vm4765_vm6 = vcmp.eq.s32.totalorder %v14394_v18, 30 }
 0x4b8   :  { %12195 = vmatpush1.bf16.msra.mxu1 %v17929_v52  ;;  %9633 = vmatprep.mubr.msk.f32.mxu1 %vm1245_vm12, %v4449_v31 }
 0x4b9   :  { %2938 = vrot.lane.b32.xlu0 %v2904_v39, %s12997_s0  ;;  %12196 = vmatprep.subr.bf16.mxu1 %v17836_v17  ;;  %v4793_v39 = vsel %vm4757_vm15, 1.0, %v17843_v35  ;;  %vm4772_vm15 = vcmp.eq.s32.totalorder %v17895_v23, 30 }
 0x4ba   :  { %v2908_v2 = vpop.f32.mrb[176].mxu1 }
 0x4bb   :  { %v2909_v15 = vadd.f32 %v16001_v45, %v2908_v2  ;;  %v2910_v60 = vpop.f32.mrb[177].mxu1  ;;  %9634 = vmatmul.mubr.msk.f32.gmra.mrb[26].mxu1 %vm4412_vm8, %v17947_v3  ;;  %vm4769_vm8 = vcmp.eq.s32.totalorder %v14414_v14, 30 }
 0x4bc   :  { %12198 = vmatpush1.bf16.msra.mxu1 %v17932_v21  ;;  %9635 = vmatprep.mubr.msk.f32.mxu1 %vm1245_vm12, %v4453_v59  ;;  %v4797_v60 = vsel %vm4761_vm1, 1.0, %v17843_v35  ;;  %vm4776_vm1 = vcmp.eq.s32.totalorder %v17897_v5, 30 }
 0x4bd   :  { %2940 = vrot.lane.b32.xlu0 %v2909_v15, %s12997_s0  ;;  %12199 = vmatprep.subr.bf16.mxu1 %v17836_v17 }
 0x4be   :  { %v2913_v53 = vpop.f32.mrb[178].mxu1 }
 0x4bf   :  { %v2914_v45 = vadd.f32 %v16013_v40, %v2913_v53  ;;  %v2915_v4 = vpop.f32.mrb[179].mxu1  ;;  %9636 = vmatmul.mubr.msk.f32.gmra.mrb[28].mxu1 %vm4416_vm10, %v17947_v3  ;;  %v4789_v40 = vsel %vm4753_vm11, 1.0, %v17843_v35  ;;  %vm4773_vm10 = vcmp.eq.s32.totalorder %v14433_v46, 30  ;;  %vm4768_vm11 = vcmp.eq.s32.totalorder %v17893_v43, 30 }
 0x4c0   :  { %12201 = vmatpush1.bf16.msra.mxu1 %v17934_v27  ;;  %9637 = vmatprep.mubr.msk.f32.mxu1 %vm1245_vm12, %v4457_v62  ;;  %v4801_v62 = vsel %vm4765_vm6, 1.0, %v17843_v35  ;;  %vm4780_vm6 = vcmp.eq.s32.totalorder %v17900_v37, 30 }
 0x4c1   :  { %2942 = vrot.lane.b32.xlu0 %v2914_v45, %s12997_s0  ;;  %4991 = vmatprep.subr.mxu1 %v17843_v35 }
 0x4c2   :  { %v10233_v19 = vpop.f32.mrb[180].mxu1 }
 0x4c3   :  { %v10234_v10 = vpop.f32.mrb[181].mxu1  ;;  %9638 = vmatmul.mubr.msk.f32.gmra.mrb[30].mxu1 %vm4420_vm14, %v17947_v3  ;;  %vm4777_vm14 = vcmp.eq.s32.totalorder %v17858_v48, 30 }
 0x4c4   :  { %v16106_v41 = vadd.f32 %v10234_v10, %v10233_v19  ;;  %4992 = vmatpush1.msra.mxu1 %v17915_v0  ;;  %9657 = vmatprep.mubr.msk.f32.mxu1 %vm1245_vm12, %v4789_v40 }
 0x4c5   :  { %12234 = vmatprep.subr.bf16.mxu1 %v17836_v17 }
 0x4c6   :  { %v10236_v6 = vpop.f32.mrb[182].mxu1 }
 0x4c7   :  { %v10237_v22 = vpop.f32.mrb[183].mxu1  ;;  %9658 = vmatmul.mubr.msk.f32.vlgmr.msra.gmra.mrb[32].mxu1 %vm4752_vm0, %v17947_v3  ;;  %vm4781_vm0 = vcmp.eq.s32.totalorder %v14475_v51, 30 }
 0x4c8   :  { %v16115_v28 = vadd.f32 %v10237_v22, %v10236_v6  ;;  %12236 = vmatpush1.bf16.msra.mxu1 %v17919_v42  ;;  %9659 = vmatprep.mubr.msk.f32.mxu1 %vm1245_vm12, %v4793_v39  ;;  %v4805_v22 = vsel %vm4769_vm8, 1.0, %v17843_v35  ;;  %vm4784_vm8 = vcmp.eq.s32.totalorder %v17902_v54, 30 }
 0x4c9   :  { %12237 = vmatprep.subr.bf16.mxu1 %v17836_v17 }
 0x4ca   :  { %v10239_v31 = vpop.f32.mrb[184].mxu1 }
 0x4cb   :  { %v10240_v2 = vpop.f32.mrb[185].mxu1  ;;  %9660 = vmatmul.mubr.msk.f32.gmra.mrb[34].mxu1 %vm4756_vm4, %v17947_v3  ;;  %v2562_v15 = vpop.permute.xlu0 %2561  ;;  %vm4785_vm4 = vcmp.eq.s32.totalorder %v17918_v12, 30 }
 0x4cc   :  { %v16124_v59 = vadd.f32 %v10240_v2, %v10239_v31  ;;  %12239 = vmatpush1.bf16.msra.mxu1 %v17920_v47  ;;  %2589 = vst.msk [vmem:[#allocation2] sm:$0xff] %vm2588_vm3, %v2562_v15  ;;  %9661 = vmatprep.mubr.msk.f32.mxu1 %vm1245_vm12, %v4797_v60  ;;  %v4809_v60 = vsel %vm4773_vm10, 1.0, %v17843_v35  ;;  %vm5116_vm10 = vcmp.eq.s32.totalorder %v17916_v61, 31 }
 0x4cd   :  { %12240 = vmatprep.subr.bf16.mxu1 %v17836_v17 }
 0x4ce   :  { %v10242_v53 = vpop.f32.mrb[186].mxu1 }
 0x4cf   :  { %v10243_v45 = vpop.f32.mrb[187].mxu1  ;;  %9662 = vmatmul.mubr.msk.f32.gmra.mrb[36].mxu1 %vm4760_vm7, %v17947_v3  ;;  %v2564_v4 = vpop.permute.xlu1 %2563  ;;  %vm5117_vm7 = vcmp.eq.s32.totalorder %v17935_v34, 31 }
 0x4d0   :  { %v16134_v19 = vadd.f32 %v10243_v45, %v10242_v53  ;;  %12242 = vmatpush1.bf16.msra.mxu1 %v17921_v29  ;;  %2590 = vst.msk [vmem:[#allocation2 + $0x10] sm:$0xff] %vm2588_vm3, %v2564_v4  ;;  %9663 = vmatprep.mubr.msk.f32.mxu1 %vm1245_vm12, %v4801_v62 }
 0x4d1   :  { %12243 = vmatprep.subr.bf16.mxu1 %v17836_v17 }
 0x4d2   :  { %v10245_v10 = vpop.f32.mrb[188].mxu1 }
 0x4d3   :  { %v10246_v40 = vpop.f32.mrb[189].mxu1  ;;  %9664 = vmatmul.mubr.msk.f32.gmra.mrb[38].mxu1 %vm4764_vm9, %v17947_v3  ;;  %v2566_v6 = vpop.permute.xlu1 %2565  ;;  %vm5121_vm9 = vcmp.eq.s32.totalorder %v17882_v58, 31 }
 0x4d4   :  { %v16144_v39 = vadd.f32 %v10246_v40, %v10245_v10  ;;  %12245 = vmatpush1.bf16.msra.mxu1 %v17923_v55  ;;  %2591 = vst.msk [vmem:[#allocation2 + $0x20] sm:$0xff] %vm2588_vm3, %v2566_v6  ;;  %9665 = vmatprep.mubr.msk.f32.mxu1 %vm1245_vm12, %v4805_v22  ;;  %v4813_v10 = vsel %vm4777_vm14, 1.0, %v17843_v35  ;;  %vm5120_vm14 = vcmp.eq.s32.totalorder %v17887_v36, 31 }
 0x4d5   :  { %12246 = vmatprep.subr.bf16.mxu1 %v17836_v17 }
 0x4d6   :  { %v10248_v31 = vpop.f32.mrb[190].mxu1 }
 0x4d7   :  { %v10249_v2 = vpop.f32.mrb[191].mxu1  ;;  %9666 = vmatmul.mubr.msk.f32.gmra.mrb[40].mxu1 %vm4768_vm11, %v17947_v3  ;;  %v2568_v15 = vpop.permute.xlu1 %2567  ;;  %vm5125_vm11 = vcmp.eq.s32.totalorder %v17917_v1, 31 }
 0x4d8   :  { %v16154_v53 = vadd.f32 %v10249_v2, %v10248_v31  ;;  %12248 = vmatpush1.bf16.msra.mxu1 %v17925_v50  ;;  %2592 = vst.msk [vmem:[#allocation2 + $0x30] sm:$0xff] %vm2588_vm3, %v2568_v15  ;;  %9667 = vmatprep.mubr.msk.f32.mxu1 %vm1245_vm12, %v4809_v60  ;;  %v4817_v2 = vsel %vm4781_vm0, 1.0, %v17843_v35  ;;  %vm5124_vm0 = vcmp.eq.s32.totalorder %v17889_v49, 31 }
 0x4d9   :  { %12249 = vmatprep.subr.bf16.mxu1 %v17836_v17 }
 0x4da   :  { %v10251_v45 = vpop.f32.mrb[192].mxu1 }
 0x4db   :  { %v10252_v4 = vpop.f32.mrb[193].mxu1  ;;  %9668 = vmatmul.mubr.msk.f32.gmra.mrb[42].mxu1 %vm4772_vm15, %v17947_v3  ;;  %v2570_v62 = vpop.permute.xlu1 %2569  ;;  %vm5129_vm15 = vcmp.eq.s32.totalorder %v14394_v18, 31 }
 0x4dc   :  { %v16164_v40 = vadd.f32 %v10252_v4, %v10251_v45  ;;  %12251 = vmatpush1.bf16.msra.mxu1 %v17929_v52  ;;  %2593 = vst.msk [vmem:[#allocation2 + $0x40] sm:$0xff] %vm2588_vm3, %v2570_v62  ;;  %9669 = vmatprep.mubr.msk.f32.mxu1 %vm1245_vm12, %v4813_v10  ;;  %v4821_v62 = vsel %vm4785_vm4, 1.0, %v17843_v35  ;;  %vm5128_vm4 = vcmp.eq.s32.totalorder %v17891_v16, 31 }
 0x4dd   :  { %12252 = vmatprep.subr.bf16.mxu1 %v17836_v17 }
 0x4de   :  { %v10254_v6 = vpop.f32.mrb[194].mxu1 }
 0x4df   :  { %v10255_v22 = vpop.f32.mrb[195].mxu1  ;;  %9670 = vmatmul.mubr.msk.f32.gmra.mrb[44].mxu1 %vm4776_vm1, %v17947_v3  ;;  %v2572_v31 = vpop.permute.xlu1 %2571  ;;  %vm5133_vm1 = vcmp.eq.s32.totalorder %v14414_v14, 31 }
 0x4e0   :  { %v16174_v15 = vadd.f32 %v10255_v22, %v10254_v6  ;;  %12254 = vmatpush1.bf16.msra.mxu1 %v17932_v21  ;;  %2594 = vst.msk [vmem:[#allocation2 + $0x50] sm:$0xff] %vm2588_vm3, %v2572_v31  ;;  %9671 = vmatprep.mubr.msk.f32.mxu1 %vm1245_vm12, %v4817_v2 }
 0x4e1   :  { %12255 = vmatprep.subr.bf16.mxu1 %v17836_v17 }
 0x4e2   :  { %v10257_v60 = vpop.f32.mrb[196].mxu1 }
 0x4e3   :  { %v10258_v45 = vpop.f32.mrb[197].mxu1  ;;  %9672 = vmatmul.mubr.msk.f32.gmra.mrb[46].mxu1 %vm4780_vm6, %v17947_v3  ;;  %v2574_v4 = vpop.permute.xlu1 %2573  ;;  %vm5137_vm6 = vcmp.eq.s32.totalorder %v14433_v46, 31 }
 0x4e4   :  { %v16184_v10 = vadd.f32 %v10258_v45, %v10257_v60  ;;  %12257 = vmatpush1.bf16.msra.mxu1 %v17934_v27  ;;  %2595 = vst.msk [vmem:[#allocation2 + $0x60] sm:$0xff] %vm2588_vm3, %v2574_v4  ;;  %9673 = vmatprep.mubr.msk.f32.mxu1 %vm1245_vm12, %v4821_v62  ;;  %v5153_v60 = vsel %vm5117_vm7, 1.0, %v17843_v35  ;;  %vm5132_vm7 = vcmp.eq.s32.totalorder %v17893_v43, 31 }
 0x4e5   :  { %5355 = vmatprep.subr.mxu1 %v17843_v35 }
 0x4e6   :  { %v3238_v6 = vpop.f32.mrb[198].mxu1 }
 0x4e7   :  { %v3239_v22 = vadd.f32 %v16106_v41, %v3238_v6  ;;  %v3240_v31 = vpop.f32.mrb[199].mxu1  ;;  %9674 = vmatmul.mubr.msk.f32.gmra.mrb[48].mxu1 %vm4784_vm8, %v17947_v3  ;;  %v2576_v2 = vpop.permute.xlu1 %2575  ;;  %v5157_v6 = vsel %vm5121_vm9, 1.0, %v17843_v35  ;;  %vm5141_vm8 = vcmp.eq.s32.totalorder %v17858_v48, 31  ;;  %vm5136_vm9 = vcmp.eq.s32.totalorder %v17895_v23, 31 }
 0x4e8   :  { %5356 = vmatpush1.msra.mxu1 %v17915_v0  ;;  %2596 = vst.msk [vmem:[#allocation2 + $0x70] sm:$0xff] %vm2588_vm3, %v2576_v2  ;;  %9693 = vmatprep.mubr.msk.f32.mxu1 %vm1245_vm12, %v5153_v60  ;;  %v5161_v2 = vsel %vm5125_vm11, 1.0, %v17843_v35  ;;  %vm5140_vm11 = vcmp.eq.s32.totalorder %v17897_v5, 31 }
 0x4e9   :  { %3291 = vrot.lane.b32.xlu0 %v3239_v22, %s12998_s3  ;;  %12290 = vmatprep.subr.bf16.mxu1 %v17836_v17 }
 0x4ea   :  { %v3243_v41 = vpop.f32.mrb[200].mxu1 }
 0x4eb   :  { %v3244_v45 = vadd.f32 %v16115_v28, %v3243_v41  ;;  %v3245_v4 = vpop.f32.mrb[201].mxu1  ;;  %9694 = vmatmul.mubr.msk.f32.vlgmr.msra.gmra.mrb[50].mxu1 %vm5116_vm10, %v17947_v3  ;;  %v2578_v62 = vpop.permute.xlu0 %2577  ;;  %vm5145_vm10 = vcmp.eq.s32.totalorder %v14475_v51, 31 }
 0x4ec   :  { %12292 = vmatpush1.bf16.msra.mxu1 %v17919_v42  ;;  %2597 = vst.msk [vmem:[#allocation2 + $0x80] sm:$0xff] %vm2588_vm3, %v2578_v62  ;;  %9695 = vmatprep.mubr.msk.f32.mxu1 %vm1245_vm12, %v5157_v6  ;;  %v5169_v6 = vsel %vm5133_vm1, 1.0, %v17843_v35  ;;  %vm5148_vm1 = vcmp.eq.s32.totalorder %v17902_v54, 31 }
 0x4ed   :  { %3293 = vrot.lane.b32.xlu0 %v3244_v45, %s12998_s3  ;;  %12293 = vmatprep.subr.bf16.mxu1 %v17836_v17  ;;  %v5165_v45 = vsel %vm5129_vm15, 1.0, %v17843_v35  ;;  %vm5144_vm15 = vcmp.eq.s32.totalorder %v17900_v37, 31 }
 0x4ee   :  { %v3248_v22 = vpop.f32.mrb[202].mxu1 }
 0x4ef   :  { %v3249_v28 = vadd.f32 %v16124_v59, %v3248_v22  ;;  %v3250_v31 = vpop.f32.mrb[203].mxu1  ;;  %9696 = vmatmul.mubr.msk.f32.gmra.mrb[52].mxu1 %vm5120_vm14, %v17947_v3  ;;  %vm5149_vm14 = vcmp.eq.s32.totalorder %v17918_v12, 31 }
 0x4f0   :  { %12295 = vmatpush1.bf16.msra.mxu1 %v17920_v47  ;;  %9697 = vmatprep.mubr.msk.f32.mxu1 %vm1245_vm12, %v5161_v2  ;;  %v5173_v31 = vsel %vm5137_vm6, 1.0, %v17843_v35  ;;  %vm5480_vm6 = vcmp.eq.s32.totalorder %v17916_v61, 42 }
 0x4f1   :  { %3295 = vrot.lane.b32.xlu0 %v3249_v28, %s12998_s3  ;;  %12296 = vmatprep.subr.bf16.mxu1 %v17836_v17 }
 0x4f2   :  { %v3253_v60 = vpop.f32.mrb[204].mxu1 }
 0x4f3   :  { %v3254_v59 = vadd.f32 %v16134_v19, %v3253_v60  ;;  %v3255_v41 = vpop.f32.mrb[205].mxu1  ;;  %9698 = vmatmul.mubr.msk.f32.gmra.mrb[54].mxu1 %vm5124_vm0, %v17947_v3  ;;  %vm5481_vm0 = vcmp.eq.s32.totalorder %v17935_v34, 42 }
 0x4f4   :  { %12298 = vmatpush1.bf16.msra.mxu1 %v17921_v29  ;;  %9699 = vmatprep.mubr.msk.f32.mxu1 %vm1245_vm12, %v5165_v45 }
 0x4f5   :  { %3297 = vrot.lane.b32.xlu0 %v3254_v59, %s12998_s3  ;;  %12299 = vmatprep.subr.bf16.mxu1 %v17836_v17  ;;  %v5177_v59 = vsel %vm5141_vm8, 1.0, %v17843_v35  ;;  %vm2953_vm8 = vcmask 654848  }
 0x4f6   :  { %v3258_v4 = vpop.f32.mrb[206].mxu1 }
 0x4f7   :  { %v3259_v19 = vadd.f32 %v16144_v39, %v3258_v4  ;;  %v3260_v62 = vpop.f32.mrb[207].mxu1  ;;  %9700 = vmatmul.mubr.msk.f32.gmra.mrb[56].mxu1 %vm5128_vm4, %v17947_v3  ;;  %v5181_v4 = vsel %vm5145_vm10, 1.0, %v17843_v35  ;;  %vm5485_vm4 = vcmp.eq.s32.totalorder %v17882_v58, 42  ;;  %vm5493_vm10 = vcmp.eq.s32.totalorder %v14394_v18, 42 }
 0x4f8   :  { %12301 = vmatpush1.bf16.msra.mxu1 %v17923_v55  ;;  %9701 = vmatprep.mubr.msk.f32.mxu1 %vm1245_vm12, %v5169_v6  ;;  %v5185_v6 = vsel %vm5149_vm14, 1.0, %v17843_v35  ;;  %vm5497_vm14 = vcmp.eq.s32.totalorder %v14414_v14, 42 }
 0x4f9   :  { %3299 = vrot.lane.b32.xlu0 %v3259_v19, %s12998_s3  ;;  %12302 = vmatprep.subr.bf16.mxu1 %v17836_v17 }
 0x4fa   :  { %v3263_v22 = vpop.f32.mrb[208].mxu1 }
 0x4fb   :  { %v3264_v39 = vadd.f32 %v16154_v53, %v3263_v22  ;;  %v3265_v28 = vpop.f32.mrb[209].mxu1  ;;  %9702 = vmatmul.mubr.msk.f32.gmra.mrb[58].mxu1 %vm5132_vm7, %v17947_v3  ;;  %vm5489_vm7 = vcmp.eq.s32.totalorder %v17917_v1, 42 }
 0x4fc   :  { %12304 = vmatpush1.bf16.msra.mxu1 %v17925_v50  ;;  %9703 = vmatprep.mubr.msk.f32.mxu1 %vm1245_vm12, %v5173_v31  ;;  %v5517_v31 = vsel %vm5481_vm0, 1.0, %v17843_v35  ;;  %vm5501_vm0 = vcmp.eq.s32.totalorder %v14433_v46, 42 }
 0x4fd   :  { %3301 = vrot.lane.b32.xlu0 %v3264_v39, %s12998_s3  ;;  %12305 = vmatprep.subr.bf16.mxu1 %v17836_v17  ;;  %v17973_v39 = vld [vmem:[#allocation28_spill] sm:$0xff] }
 0x4fe   :  { %v3268_v2 = vpop.f32.mrb[210].mxu1 }
 0x4ff   :  { %v3269_v53 = vadd.f32 %v16164_v40, %v3268_v2  ;;  %v3270_v60 = vpop.f32.mrb[211].mxu1  ;;  %9704 = vmatmul.mubr.msk.f32.gmra.mrb[60].mxu1 %vm5136_vm9, %v17947_v3  ;;  %vm5484_vm9 = vcmp.eq.s32.totalorder %v17887_v36, 42 }
 0x500   :  { %12307 = vmatpush1.bf16.msra.mxu1 %v17929_v52  ;;  %9705 = vmatprep.mubr.msk.f32.mxu1 %vm1245_vm12, %v5177_v59 }
 0x501   :  { %3303 = vrot.lane.b32.xlu0 %v3269_v53, %s12998_s3  ;;  %12308 = vmatprep.subr.bf16.mxu1 %v17836_v17  ;;  %v17974_v53 = vld [vmem:[#allocation34_spill] sm:$0xff] }
 0x502   :  { %v3273_v41 = vpop.f32.mrb[212].mxu1 }
 0x503   :  { %v3274_v40 = vadd.f32 %v16174_v15, %v3273_v41  ;;  %v3275_v45 = vpop.f32.mrb[213].mxu1  ;;  %9706 = vmatmul.mubr.msk.f32.gmra.mrb[62].mxu1 %vm5140_vm11, %v17947_v3  ;;  %v5521_v41 = vsel %vm5485_vm4, 1.0, %v17843_v35  ;;  %vm5488_vm11 = vcmp.eq.s32.totalorder %v17889_v49, 42  ;;  %vm5505_vm4 = vcmp.eq.s32.totalorder %v17858_v48, 42 }
 0x504   :  { %12310 = vmatpush1.bf16.msra.mxu1 %v17932_v21  ;;  %9707 = vmatprep.mubr.msk.f32.mxu1 %vm1245_vm12, %v5181_v4  ;;  %v17975_v45 = vld [vmem:[#allocation35_spill] sm:$0xff] }
 0x505   :  { %3305 = vrot.lane.b32.xlu0 %v3274_v40, %s12998_s3  ;;  %12311 = vmatprep.subr.bf16.mxu1 %v17836_v17 }
 0x506   :  { %v3278_v19 = vpop.f32.mrb[214].mxu1 }
 0x507   :  { %v3279_v15 = vadd.f32 %v16184_v10, %v3278_v19  ;;  %v3280_v62 = vpop.f32.mrb[215].mxu1  ;;  %9708 = vmatmul.mubr.msk.f32.gmra.mrb[64].mxu1 %vm5144_vm15, %v17947_v3  ;;  %vm5492_vm15 = vcmp.eq.s32.totalorder %v17891_v16, 42 }
 0x508   :  { %12313 = vmatpush1.bf16.msra.mxu1 %v17934_v27  ;;  %9709 = vmatprep.mubr.msk.f32.mxu1 %vm1245_vm12, %v5185_v6  ;;  %v5525_v62 = vsel %vm5489_vm7, 1.0, %v17843_v35  ;;  %vm5509_vm7 = vcmp.eq.s32.totalorder %v14475_v51, 42 }
 0x509   :  { %3307 = vrot.lane.b32.xlu0 %v3279_v15, %s12998_s3  ;;  %5719 = vmatprep.subr.mxu1 %v17843_v35 }
 0x50a   :  { %v3603_v22 = vpop.f32.mrb[216].mxu1 }
 0x50b   :  { %v3604_v10 = vadd.f32 %v17973_v39, %v3603_v22  ;;  %v3605_v28 = vpop.f32.mrb[217].mxu1  ;;  %9710 = vmatmul.mubr.msk.f32.gmra.mrb[66].mxu1 %vm5148_vm1, %v17947_v3  ;;  %v17976_v22 = vld [vmem:[#allocation36_spill] sm:$0xff]  ;;  %vm5496_vm1 = vcmp.eq.s32.totalorder %v17893_v43, 42 }
 0x50c   :  { %5720 = vmatpush1.msra.mxu1 %v17915_v0  ;;  %9729 = vmatprep.mubr.msk.f32.mxu1 %vm1245_vm12, %v5517_v31  ;;  %v5529_v31 = vsel %vm5493_vm10, 1.0, %v17843_v35  ;;  %vm5513_vm10 = vcmp.eq.s32.totalorder %v17918_v12, 42 }
 0x50d   :  { %3656 = vrot.lane.b32.xlu0 %v3604_v10, %s12999_s23  ;;  %12346 = vmatprep.subr.bf16.mxu1 %v17836_v17 }
 0x50e   :  { %v3608_v2 = vpop.f32.mrb[218].mxu1 }
 0x50f   :  { %v3609_v60 = vadd.f32 %v17974_v53, %v3608_v2  ;;  %v3610_v59 = vpop.f32.mrb[219].mxu1  ;;  %9730 = vmatmul.mubr.msk.f32.vlgmr.msra.gmra.mrb[68].mxu1 %vm5480_vm6, %v17947_v3  ;;  %v17977_v53 = vld [vmem:[#allocation37_spill] sm:$0xff]  ;;  %vm5500_vm6 = vcmp.eq.s32.totalorder %v17895_v23, 42 }
 0x510   :  { %12348 = vmatpush1.bf16.msra.mxu1 %v17919_v42  ;;  %9731 = vmatprep.mubr.msk.f32.mxu1 %vm1245_vm12, %v5521_v41 }
 0x511   :  { %3658 = vrot.lane.b32.xlu0 %v3609_v60, %s12999_s23  ;;  %12349 = vmatprep.subr.bf16.mxu1 %v17836_v17 }
 0x512   :  { %v3613_v40 = vpop.f32.mrb[220].mxu1 }
 0x513   :  { %v3614_v4 = vadd.f32 %v17975_v45, %v3613_v40  ;;  %v3615_v19 = vpop.f32.mrb[221].mxu1  ;;  %9732 = vmatmul.mubr.msk.f32.gmra.mrb[70].mxu1 %vm5484_vm9, %v17947_v3  ;;  %v2927_v15 = vpop.permute.xlu0 %2926  ;;  %v5533_v40 = vsel %vm5497_vm14, 1.0, %v17843_v35  ;;  %vm5504_vm9 = vcmp.eq.s32.totalorder %v17897_v5, 42  ;;  %vm5845_vm14 = vcmp.eq.s32.totalorder %v17935_v34, 43 }
 0x514   :  { %12351 = vmatpush1.bf16.msra.mxu1 %v17920_v47  ;;  %2954 = vst.msk [vmem:[#allocation2] sm:$0xff] %vm2953_vm8, %v2927_v15  ;;  %9733 = vmatprep.mubr.msk.f32.mxu1 %vm1245_vm12, %v5525_v62 }
 0x515   :  { %3660 = vrot.lane.b32.xlu0 %v3614_v4, %s12999_s23  ;;  %12352 = vmatprep.subr.bf16.mxu1 %v17836_v17  ;;  %v17978_v4 = vld [vmem:[#allocation38_spill] sm:$0xff] }
 0x516   :  { %v3618_v6 = vpop.f32.mrb[222].mxu1 }
 0x517   :  { %v3619_v39 = vadd.f32 %v17976_v22, %v3618_v6  ;;  %v3620_v10 = vpop.f32.mrb[223].mxu1  ;;  %9734 = vmatmul.mubr.msk.f32.gmra.mrb[72].mxu1 %vm5488_vm11, %v17947_v3  ;;  %v2929_v28 = vpop.permute.xlu0 %2928  ;;  %v5537_v6 = vsel %vm5501_vm0, 1.0, %v17843_v35  ;;  %vm5508_vm11 = vcmp.eq.s32.totalorder %v17900_v37, 42  ;;  %vm5849_vm0 = vcmp.eq.s32.totalorder %v17882_v58, 43 }
 0x518   :  { %12354 = vmatpush1.bf16.msra.mxu1 %v17921_v29  ;;  %2955 = vst.msk [vmem:[#allocation2 + $0x10] sm:$0xff] %vm2953_vm8, %v2929_v28  ;;  %9735 = vmatprep.mubr.msk.f32.mxu1 %vm1245_vm12, %v5529_v31 }
 0x519   :  { %3662 = vrot.lane.b32.xlu0 %v3619_v39, %s12999_s23  ;;  %12355 = vmatprep.subr.bf16.mxu1 %v17836_v17  ;;  %v17979_v39 = vld [vmem:[#allocation39_spill] sm:$0xff] }
 0x51a   :  { %v3623_v2 = vpop.f32.mrb[224].mxu1 }
 0x51b   :  { %v3624_v60 = vadd.f32 %v17977_v53, %v3623_v2  ;;  %v3625_v59 = vpop.f32.mrb[225].mxu1  ;;  %9736 = vmatmul.mubr.msk.f32.gmra.mrb[74].mxu1 %vm5492_vm15, %v17947_v3  ;;  %v2931_v41 = vpop.permute.xlu0 %2930  ;;  %v5541_v2 = vsel %vm5505_vm4, 1.0, %v17843_v35  ;;  %vm5512_vm15 = vcmp.eq.s32.totalorder %v17902_v54, 42  ;;  %vm5853_vm4 = vcmp.eq.s32.totalorder %v17917_v1, 43 }
 0x51c   :  { %12357 = vmatpush1.bf16.msra.mxu1 %v17923_v55  ;;  %2956 = vst.msk [vmem:[#allocation2 + $0x20] sm:$0xff] %vm2953_vm8, %v2931_v41  ;;  %9737 = vmatprep.mubr.msk.f32.mxu1 %vm1245_vm12, %v5533_v40 }
 0x51d   :  { %3664 = vrot.lane.b32.xlu0 %v3624_v60, %s12999_s23  ;;  %12358 = vmatprep.subr.bf16.mxu1 %v17836_v17  ;;  %v17980_v60 = vld [vmem:[#allocation40_spill] sm:$0xff] }
 0x51e   :  { %v3628_v45 = vpop.f32.mrb[226].mxu1 }
 0x51f   :  { %v3629_v19 = vadd.f32 %v17978_v4, %v3628_v45  ;;  %v3630_v15 = vpop.f32.mrb[227].mxu1  ;;  %9738 = vmatmul.mubr.msk.f32.gmra.mrb[76].mxu1 %vm5496_vm1, %v17947_v3  ;;  %v2933_v62 = vpop.permute.xlu0 %2932  ;;  %v5545_v45 = vsel %vm5509_vm7, 1.0, %v17843_v35  ;;  %vm5844_vm1 = vcmp.eq.s32.totalorder %v17916_v61, 43  ;;  %vm5857_vm7 = vcmp.eq.s32.totalorder %v14394_v18, 43 }
 0x520   :  { %12360 = vmatpush1.bf16.msra.mxu1 %v17925_v50  ;;  %2957 = vst.msk [vmem:[#allocation2 + $0x30] sm:$0xff] %vm2953_vm8, %v2933_v62  ;;  %9739 = vmatprep.mubr.msk.f32.mxu1 %vm1245_vm12, %v5537_v6 }
 0x521   :  { %3666 = vrot.lane.b32.xlu0 %v3629_v19, %s12999_s23  ;;  %12361 = vmatprep.subr.bf16.mxu1 %v17836_v17  ;;  %v17981_v19 = vld [vmem:[#allocation41_spill] sm:$0xff] }
 0x522   :  { %v3633_v22 = vpop.f32.mrb[228].mxu1 }
 0x523   :  { %v3634_v10 = vadd.f32 %v17979_v39, %v3633_v22  ;;  %v3635_v28 = vpop.f32.mrb[229].mxu1  ;;  %9740 = vmatmul.mubr.msk.f32.gmra.mrb[78].mxu1 %vm5500_vm6, %v17947_v3  ;;  %v2935_v31 = vpop.permute.xlu0 %2934  ;;  %v5549_v22 = vsel %vm5513_vm10, 1.0, %v17843_v35  ;;  %vm5848_vm6 = vcmp.eq.s32.totalorder %v17887_v36, 43  ;;  %vm5861_vm10 = vcmp.eq.s32.totalorder %v14414_v14, 43 }
 0x524   :  { %12363 = vmatpush1.bf16.msra.mxu1 %v17929_v52  ;;  %2958 = vst.msk [vmem:[#allocation2 + $0x40] sm:$0xff] %vm2953_vm8, %v2935_v31  ;;  %9741 = vmatprep.mubr.msk.f32.mxu1 %vm1245_vm12, %v5541_v2 }
 0x525   :  { %3668 = vrot.lane.b32.xlu0 %v3634_v10, %s12999_s23  ;;  %12364 = vmatprep.subr.bf16.mxu1 %v17836_v17  ;;  %v17982_v10 = vld [vmem:[#allocation42_spill] sm:$0xff] }
 0x526   :  { %v3638_v53 = vpop.f32.mrb[230].mxu1 }
 0x527   :  { %v3639_v59 = vadd.f32 %v17980_v60, %v3638_v53  ;;  %v3640_v41 = vpop.f32.mrb[231].mxu1  ;;  %9742 = vmatmul.mubr.msk.f32.gmra.mrb[80].mxu1 %vm5504_vm9, %v17947_v3  ;;  %v2937_v40 = vpop.permute.xlu0 %2936  ;;  %v5881_v53 = vsel %vm5845_vm14, 1.0, %v17843_v35  ;;  %vm5852_vm9 = vcmp.eq.s32.totalorder %v17889_v49, 43  ;;  %vm5865_vm14 = vcmp.eq.s32.totalorder %v14433_v46, 43 }
 0x528   :  { %12366 = vmatpush1.bf16.msra.mxu1 %v17932_v21  ;;  %2959 = vst.msk [vmem:[#allocation2 + $0x50] sm:$0xff] %vm2953_vm8, %v2937_v40  ;;  %9743 = vmatprep.mubr.msk.f32.mxu1 %vm1245_vm12, %v5545_v45 }
 0x529   :  { %3670 = vrot.lane.b32.xlu0 %v3639_v59, %s12999_s23  ;;  %12367 = vmatprep.subr.bf16.mxu1 %v17836_v17  ;;  %v17983_v59 = vld [vmem:[#allocation43_spill] sm:$0xff] }
 0x52a   :  { %v3643_v4 = vpop.f32.mrb[232].mxu1 }
 0x52b   :  { %v16354_v15 = vadd.f32 %v17981_v19, %v3643_v4  ;;  %v3645_v62 = vpop.f32.mrb[233].mxu1  ;;  %9744 = vmatmul.mubr.msk.f32.gmra.mrb[82].mxu1 %vm5508_vm11, %v17947_v3  ;;  %v2939_v6 = vpop.permute.xlu0 %2938  ;;  %v5885_v4 = vsel %vm5849_vm0, 1.0, %v17843_v35  ;;  %vm5856_vm11 = vcmp.eq.s32.totalorder %v17891_v16, 43  ;;  %vm5869_vm0 = vcmp.eq.s32.totalorder %v17858_v48, 43 }
 0x52c   :  { %12369 = vmatpush1.bf16.msra.mxu1 %v17934_v27  ;;  %2960 = vst.msk [vmem:[#allocation2 + $0x60] sm:$0xff] %vm2953_vm8, %v2939_v6  ;;  %9745 = vmatprep.mubr.msk.f32.mxu1 %vm1245_vm12, %v5549_v22  ;;  %v17984_v62 = vld [vmem:[#allocation44_spill] sm:$0xff] }
 0x52d   :  { %6083 = vmatprep.subr.mxu1 %v17843_v35 }
 0x52e   :  { %v3968_v39 = vpop.f32.mrb[234].mxu1 }
 0x52f   :  { %v3969_v28 = vadd.f32 %v17982_v10, %v3968_v39  ;;  %v3970_v31 = vpop.f32.mrb[235].mxu1  ;;  %9746 = vmatmul.mubr.msk.f32.gmra.mrb[84].mxu1 %vm5512_vm15, %v17947_v3  ;;  %v2941_v2 = vpop.permute.xlu0 %2940  ;;  %v5889_v39 = vsel %vm5853_vm4, 1.0, %v17843_v35  ;;  %vm5860_vm15 = vcmp.eq.s32.totalorder %v17893_v43, 43  ;;  %vm5873_vm4 = vcmp.eq.s32.totalorder %v14475_v51, 43 }
 0x530   :  { %6084 = vmatpush1.msra.mxu1 %v17915_v0  ;;  %2961 = vst.msk [vmem:[#allocation2 + $0x70] sm:$0xff] %vm2953_vm8, %v2941_v2  ;;  %9765 = vmatprep.mubr.msk.f32.mxu1 %vm1245_vm12, %v5881_v53  ;;  %v5893_v53 = vsel %vm5857_vm7, 1.0, %v17843_v35  ;;  %vm5877_vm7 = vcmp.eq.s32.totalorder %v17918_v12, 43 }
 0x531   :  { %4021 = vrot.lane.b32.xlu0 %v3969_v28, %s13000_s24  ;;  %12402 = vmatprep.subr.bf16.mxu1 %v17836_v17  ;;  %v17985_v28 = vld [vmem:[#allocation45_spill] sm:$0xff] }
 0x532   :  { %v3973_v60 = vpop.f32.mrb[236].mxu1 }
 0x533   :  { %v3974_v41 = vadd.f32 %v17983_v59, %v3973_v60  ;;  %v3975_v40 = vpop.f32.mrb[237].mxu1  ;;  %9766 = vmatmul.mubr.msk.f32.vlgmr.msra.gmra.mrb[86].mxu1 %vm5844_vm1, %v17947_v3  ;;  %v2943_v45 = vpop.permute.xlu0 %2942  ;;  %v17986_v59 = vld [vmem:[#allocation46_spill] sm:$0xff]  ;;  %vm5864_vm1 = vcmp.eq.s32.totalorder %v17895_v23, 43 }
 0x534   :  { %12404 = vmatpush1.bf16.msra.mxu1 %v17919_v42  ;;  %2962 = vst.msk [vmem:[#allocation2 + $0x80] sm:$0xff] %vm2953_vm8, %v2943_v45  ;;  %9767 = vmatprep.mubr.msk.f32.mxu1 %vm1245_vm12, %v5885_v4  ;;  %v5897_v45 = vsel %vm5861_vm10, 1.0, %v17843_v35  ;;  %vm6209_vm10 = vcmp.eq.s32.totalorder %v17935_v34, 44 }
 0x535   :  { %4023 = vrot.lane.b32.xlu0 %v3974_v41, %s13000_s24  ;;  %12405 = vmatprep.subr.bf16.mxu1 %v17836_v17 }
 0x536   :  { %v3978_v19 = vpop.f32.mrb[238].mxu1 }
 0x537   :  { %v3979_v6 = vadd.f32 %v17984_v62, %v3978_v19  ;;  %v3980_v22 = vpop.f32.mrb[239].mxu1  ;;  %9768 = vmatmul.mubr.msk.f32.gmra.mrb[88].mxu1 %vm5848_vm6, %v17947_v3  ;;  %v17987_v19 = vld [vmem:[#allocation47_spill] sm:$0xff]  ;;  %vm5868_vm6 = vcmp.eq.s32.totalorder %v17897_v5, 43 }
 0x538   :  { %12407 = vmatpush1.bf16.msra.mxu1 %v17920_v47  ;;  %9769 = vmatprep.mubr.msk.f32.mxu1 %vm1245_vm12, %v5889_v39  ;;  %v5901_v22 = vsel %vm5865_vm14, 1.0, %v17843_v35  ;;  %vm6213_vm14 = vcmp.eq.s32.totalorder %v17882_v58, 44 }
 0x539   :  { %4025 = vrot.lane.b32.xlu0 %v3979_v6, %s13000_s24  ;;  %12408 = vmatprep.subr.bf16.mxu1 %v17836_v17 }
 0x53a   :  { %v3983_v10 = vpop.f32.mrb[240].mxu1 }
 0x53b   :  { %v3984_v31 = vadd.f32 %v17985_v28, %v3983_v10  ;;  %v3985_v2 = vpop.f32.mrb[241].mxu1  ;;  %9770 = vmatmul.mubr.msk.f32.gmra.mrb[90].mxu1 %vm5852_vm9, %v17947_v3  ;;  %v17988_v10 = vld [vmem:[#allocation48_spill] sm:$0xff]  ;;  %vm5872_vm9 = vcmp.eq.s32.totalorder %v17900_v37, 43 }
 0x53c   :  { %12410 = vmatpush1.bf16.msra.mxu1 %v17921_v29  ;;  %9771 = vmatprep.mubr.msk.f32.mxu1 %vm1245_vm12, %v5893_v53  ;;  %v5905_v2 = vsel %vm5869_vm0, 1.0, %v17843_v35  ;;  %vm6217_vm0 = vcmp.eq.s32.totalorder %v17917_v1, 44 }
 0x53d   :  { %4027 = vrot.lane.b32.xlu0 %v3984_v31, %s13000_s24  ;;  %12411 = vmatprep.subr.bf16.mxu1 %v17836_v17 }
 0x53e   :  { %v3988_v60 = vpop.f32.mrb[242].mxu1 }
 0x53f   :  { %v3989_v41 = vadd.f32 %v17986_v59, %v3988_v60  ;;  %v3990_v40 = vpop.f32.mrb[243].mxu1  ;;  %9772 = vmatmul.mubr.msk.f32.gmra.mrb[92].mxu1 %vm5856_vm11, %v17947_v3  ;;  %v17989_v60 = vld [vmem:[#allocation49_spill] sm:$0xff]  ;;  %vm5876_vm11 = vcmp.eq.s32.totalorder %v17902_v54, 43 }
 0x540   :  { %12413 = vmatpush1.bf16.msra.mxu1 %v17923_v55  ;;  %9773 = vmatprep.mubr.msk.f32.mxu1 %vm1245_vm12, %v5897_v45  ;;  %v5909_v40 = vsel %vm5873_vm4, 1.0, %v17843_v35  ;;  %vm6212_vm4 = vcmp.eq.s32.totalorder %v17887_v36, 44 }
 0x541   :  { %4029 = vrot.lane.b32.xlu0 %v3989_v41, %s13000_s24  ;;  %12414 = vmatprep.subr.bf16.mxu1 %v17836_v17 }
 0x542   :  { %v3993_v4 = vpop.f32.mrb[244].mxu1 }
 0x543   :  { %v3994_v62 = vadd.f32 %v17987_v19, %v3993_v4  ;;  %v3995_v6 = vpop.f32.mrb[245].mxu1  ;;  %9774 = vmatmul.mubr.msk.f32.gmra.mrb[94].mxu1 %vm5860_vm15, %v17947_v3  ;;  %v17990_v4 = vld [vmem:[#allocation20_spill] sm:$0xff]  ;;  %vm6208_vm15 = vcmp.eq.s32.totalorder %v17916_v61, 44 }
 0x544   :  { %12416 = vmatpush1.bf16.msra.mxu1 %v17925_v50  ;;  %9775 = vmatprep.mubr.msk.f32.mxu1 %vm1245_vm12, %v5901_v22  ;;  %v5913_v6 = vsel %vm5877_vm7, 1.0, %v17843_v35  ;;  %vm6216_vm7 = vcmp.eq.s32.totalorder %v17889_v49, 44 }
 0x545   :  { %4031 = vrot.lane.b32.xlu0 %v3994_v62, %s13000_s24  ;;  %12417 = vmatprep.subr.bf16.mxu1 %v17836_v17 }
 0x546   :  { %v3998_v39 = vpop.f32.mrb[246].mxu1 }
 0x547   :  { %v3999_v28 = vadd.f32 %v17988_v10, %v3998_v39  ;;  %v4000_v31 = vpop.f32.mrb[247].mxu1  ;;  %9776 = vmatmul.mubr.msk.f32.gmra.mrb[96].mxu1 %vm5864_vm1, %v17947_v3  ;;  %v17991_v39 = vld [vmem:[#allocation50_spill] sm:$0xff]  ;;  %vm3318_vm1 = vcmask 786048  }
 0x548   :  { %12419 = vmatpush1.bf16.msra.mxu1 %v17929_v52  ;;  %9777 = vmatprep.mubr.msk.f32.mxu1 %vm1245_vm12, %v5905_v2  ;;  %v6245_v31 = vsel %vm6209_vm10, 1.0, %v17843_v35  ;;  %vm6220_vm10 = vcmp.eq.s32.totalorder %v17891_v16, 44 }
 0x549   :  { %4033 = vrot.lane.b32.xlu0 %v3999_v28, %s13000_s24  ;;  %12420 = vmatprep.subr.bf16.mxu1 %v17836_v17 }
 0x54a   :  { %v4003_v53 = vpop.f32.mrb[248].mxu1 }
 0x54b   :  { %v4004_v59 = vadd.f32 %v17989_v60, %v4003_v53  ;;  %v4005_v41 = vpop.f32.mrb[249].mxu1  ;;  %9778 = vmatmul.mubr.msk.f32.gmra.mrb[98].mxu1 %vm5868_vm6, %v17947_v3  ;;  %v17992_v53 = vld [vmem:[#allocation24_spill] sm:$0xff]  ;;  %vm6221_vm6 = vcmp.eq.s32.totalorder %v14394_v18, 44 }
 0x54c   :  { %12422 = vmatpush1.bf16.msra.mxu1 %v17932_v21  ;;  %9779 = vmatprep.mubr.msk.f32.mxu1 %vm1245_vm12, %v5909_v40  ;;  %v6249_v41 = vsel %vm6213_vm14, 1.0, %v17843_v35  ;;  %vm6224_vm14 = vcmp.eq.s32.totalorder %v17893_v43, 44 }
 0x54d   :  { %4035 = vrot.lane.b32.xlu0 %v4004_v59, %s13000_s24  ;;  %12423 = vmatprep.subr.bf16.mxu1 %v17836_v17 }
 0x54e   :  { %v4008_v45 = vpop.f32.mrb[250].mxu1 }
 0x54f   :  { %v16439_v19 = vadd.f32 %v17990_v4, %v4008_v45  ;;  %v4010_v62 = vpop.f32.mrb[251].mxu1  ;;  %9780 = vmatmul.mubr.msk.f32.gmra.mrb[100].mxu1 %vm5872_vm9, %v17947_v3  ;;  %v17993_v45 = vld [vmem:[#allocation25_spill] sm:$0xff]  ;;  %vm6225_vm9 = vcmp.eq.s32.totalorder %v14414_v14, 44 }
 0x550   :  { %12425 = vmatpush1.bf16.msra.mxu1 %v17934_v27  ;;  %9781 = vmatprep.mubr.msk.f32.mxu1 %vm1245_vm12, %v5913_v6 }
 0x551   :  { %6447 = vmatprep.subr.mxu1 %v17843_v35 }
 0x552   :  { %v4333_v22 = vpop.f32.mrb[252].mxu1 }
 0x553   :  { %v4334_v10 = vadd.f32 %v17991_v39, %v4333_v22  ;;  %v4335_v28 = vpop.f32.mrb[253].mxu1  ;;  %9782 = vmatmul.mubr.msk.f32.gmra.mrb[102].mxu1 %vm5876_vm11, %v17947_v3  ;;  %v17994_v39 = vld [vmem:[#allocation26_spill] sm:$0xff]  ;;  %vm6229_vm11 = vcmp.eq.s32.totalorder %v14433_v46, 44 }
 0x554   :  { %6448 = vmatpush1.msra.mxu1 %v17915_v0  ;;  %9801 = vmatprep.mubr.msk.f32.mxu1 %vm1245_vm12, %v6245_v31 }
 0x555   :  { %4377 = vst.msk [vmem:[#allocation2 + $0x8] sm:$0xff] %vm1493_vm13, %v4334_v10  ;;  %12458 = vmatprep.subr.bf16.mxu1 %v17836_v17 }
 0x556   :  { %v4338_v2 = vpop.f32.mrb[254].mxu1 }
 0x557   :  { %v4339_v60 = vadd.f32 %v17992_v53, %v4338_v2  ;;  %v4340_v59 = vpop.f32.mrb[255].mxu1  ;;  %9802 = vmatmul.mubr.msk.f32.vlgmr.msra.gmra.mrb[104].mxu1 %vm6208_vm15, %v17947_v3  ;;  %v17995_v53 = vld [vmem:[#allocation27_spill] sm:$0xff]  ;;  %vm6233_vm15 = vcmp.eq.s32.totalorder %v17858_v48, 44 }
 0x558   :  { %12460 = vmatpush1.bf16.msra.mxu1 %v17919_v42  ;;  %9803 = vmatprep.mubr.msk.f32.mxu1 %vm1245_vm12, %v6249_v41  ;;  %v6253_v42 = vsel %vm6217_vm0, 1.0, %v17843_v35  ;;  %vm6228_vm0 = vcmp.eq.s32.totalorder %v17895_v23, 44 }
 0x559   :  { %4378 = vst.msk [vmem:[#allocation2 + $0x18] sm:$0xff] %vm1493_vm13, %v4339_v60  ;;  %12461 = vmatprep.subr.bf16.mxu1 %v17836_v17 }
 0x55a   :  { %v4343_v40 = vpop.f32.mrb[0].mxu1 }
 0x55b   :  { %v4344_v4 = vadd.f32 %v17993_v45, %v4343_v40  ;;  %v4345_v62 = vpop.f32.mrb[1].mxu1  ;;  %9804 = vmatmul.mubr.msk.f32.gmra.mrb[106].mxu1 %vm6212_vm4, %v17947_v3  ;;  %v3292_v6 = vpop.permute.xlu0 %3291  ;;  %v17996_v45 = vld [vmem:[#allocation29_spill] sm:$0xff]  ;;  %vm6237_vm4 = vcmp.eq.s32.totalorder %v14475_v51, 44 }
 0x55c   :  { %12463 = vmatpush1.bf16.msra.mxu1 %v17920_v47  ;;  %3319 = vst.msk [vmem:[#allocation2] sm:$0xff] %vm3318_vm1, %v3292_v6  ;;  %9805 = vmatprep.mubr.msk.f32.mxu1 %vm1245_vm12, %v6253_v42  ;;  %v6257_v47 = vsel %vm6221_vm6, 1.0, %v17843_v35  ;;  %vm6232_vm6 = vcmp.eq.s32.totalorder %v17897_v5, 44 }
 0x55d   :  { %4379 = vst.msk [vmem:[#allocation2 + $0x28] sm:$0xff] %vm1493_vm13, %v4344_v4  ;;  %12464 = vmatprep.subr.bf16.mxu1 %v17836_v17 }
 0x55e   :  { %v4348_v22 = vpop.f32.mrb[2].mxu1 }
 0x55f   :  { %v4349_v10 = vadd.f32 %v17994_v39, %v4348_v22  ;;  %v4350_v28 = vpop.f32.mrb[3].mxu1  ;;  %9806 = vmatmul.mubr.msk.f32.gmra.mrb[108].mxu1 %vm6216_vm7, %v17947_v3  ;;  %v3294_v31 = vpop.permute.xlu0 %3293  ;;  %v17997_v22 = vld [vmem:[#allocation30_spill] sm:$0xff]  ;;  %vm6241_vm7 = vcmp.eq.s32.totalorder %v17918_v12, 44 }
 0x560   :  { %12466 = vmatpush1.bf16.msra.mxu1 %v17921_v29  ;;  %3320 = vst.msk [vmem:[#allocation2 + $0x10] sm:$0xff] %vm3318_vm1, %v3294_v31  ;;  %9807 = vmatprep.mubr.msk.f32.mxu1 %vm1245_vm12, %v6257_v47  ;;  %v6261_v29 = vsel %vm6225_vm9, 1.0, %v17843_v35  ;;  %v17998_v47 = vld [vmem:[#allocation32_spill] sm:$0xff]  ;;  %vm6236_vm9 = vcmp.eq.s32.totalorder %v17900_v37, 44 }
 0x561   :  { %4380 = vst.msk [vmem:[#allocation2 + $0x38] sm:$0xff] %vm1493_vm13, %v4349_v10  ;;  %12467 = vmatprep.subr.bf16.mxu1 %v17836_v17 }
 0x562   :  { %v4353_v2 = vpop.f32.mrb[4].mxu1 }
 0x563   :  { %v4354_v60 = vadd.f32 %v17995_v53, %v4353_v2  ;;  %v4355_v59 = vpop.f32.mrb[5].mxu1  ;;  %9808 = vmatmul.mubr.msk.f32.gmra.mrb[110].mxu1 %vm6220_vm10, %v17947_v3  ;;  %v3296_v41 = vpop.permute.xlu0 %3295  ;;  %vm6573_vm10 = vcmp.eq.s32.totalorder %v17935_v34, 45 }
 0x564   :  { %12469 = vmatpush1.bf16.msra.mxu1 %v17923_v55  ;;  %3321 = vst.msk [vmem:[#allocation2 + $0x20] sm:$0xff] %vm3318_vm1, %v3296_v41  ;;  %9809 = vmatprep.mubr.msk.f32.mxu1 %vm1245_vm12, %v6261_v29  ;;  %v6265_v55 = vsel %vm6229_vm11, 1.0, %v17843_v35  ;;  %v17999_v41 = vld [vmem:[#allocation33_spill] sm:$0xff]  ;;  %vm6240_vm11 = vcmp.eq.s32.totalorder %v17902_v54, 44 }
 0x565   :  { %4381 = vst.msk [vmem:[#allocation2 + $0x48] sm:$0xff] %vm1493_vm13, %v4354_v60  ;;  %12470 = vmatprep.subr.bf16.mxu1 %v17836_v17 }
 0x566   :  { %v4358_v40 = vpop.f32.mrb[6].mxu1 }
 0x567   :  { %v4359_v4 = vadd.f32 %v17996_v45, %v4358_v40  ;;  %v4360_v62 = vpop.f32.mrb[7].mxu1  ;;  %9810 = vmatmul.mubr.msk.f32.gmra.mrb[112].mxu1 %vm6224_vm14, %v17947_v3  ;;  %v3298_v6 = vpop.permute.xlu0 %3297  ;;  %vm6572_vm14 = vcmp.eq.s32.totalorder %v17916_v61, 45 }
 0x568   :  { %12472 = vmatpush1.bf16.msra.mxu1 %v17925_v50  ;;  %3322 = vst.msk [vmem:[#allocation2 + $0x30] sm:$0xff] %vm3318_vm1, %v3298_v6  ;;  %9811 = vmatprep.mubr.msk.f32.mxu1 %vm1245_vm12, %v6265_v55  ;;  %v6269_v50 = vsel %vm6233_vm15, 1.0, %v17843_v35  ;;  %v18000_v62 = vld [vmem:[#allocation51_spill] sm:$0xff]  ;;  %vm6581_vm15 = vcmp.eq.s32.totalorder %v17917_v1, 45 }
 0x569   :  { %4382 = vst.msk [vmem:[#allocation2 + $0x58] sm:$0xff] %vm1493_vm13, %v4359_v4  ;;  %12473 = vmatprep.subr.bf16.mxu1 %v17836_v17 }
 0x56a   :  { %v4363_v42 = vpop.f32.mrb[8].mxu1 }
 0x56b   :  { %v4364_v39 = vadd.f32 %v17997_v22, %v4363_v42  ;;  %v4365_v10 = vpop.f32.mrb[9].mxu1  ;;  %9812 = vmatmul.mubr.msk.f32.gmra.mrb[114].mxu1 %vm6228_vm0, %v17947_v3  ;;  %v3300_v28 = vpop.permute.xlu0 %3299  ;;  %v18001_v22 = vld [vmem:[#allocation52_spill] sm:$0xff]  ;;  %vm3683_vm0 = vcmask 917248  }
 0x56c   :  { %12475 = vmatpush1.bf16.msra.mxu1 %v17929_v52  ;;  %3323 = vst.msk [vmem:[#allocation2 + $0x40] sm:$0xff] %vm3318_vm1, %v3300_v28  ;;  %9813 = vmatprep.mubr.msk.f32.mxu1 %vm1245_vm12, %v6269_v50  ;;  %v6273_v52 = vsel %vm6237_vm4, 1.0, %v17843_v35  ;;  %vm6576_vm4 = vcmp.eq.s32.totalorder %v17887_v36, 45  ;;  %v18003_v36 = vld [vmem:[#allocation54_spill] sm:$0xff] }
 0x56d   :  { %4383 = vst.msk [vmem:[#allocation2 + $0x68] sm:$0xff] %vm1493_vm13, %v4364_v39  ;;  %12476 = vmatprep.subr.bf16.mxu1 %v17836_v17 }
 0x56e   :  { %v4368_v31 = vpop.f32.mrb[10].mxu1 }
 0x56f   :  { %v4369_v2 = vadd.f32 %v17998_v47, %v4368_v31  ;;  %v4370_v53 = vpop.f32.mrb[11].mxu1  ;;  %9814 = vmatmul.mubr.msk.f32.gmra.mrb[116].mxu1 %vm6232_vm6, %v17947_v3  ;;  %v3302_v60 = vpop.permute.xlu0 %3301  ;;  %vm6585_vm6 = vcmp.eq.s32.totalorder %v14394_v18, 45 }
 0x570   :  { %12478 = vmatpush1.bf16.msra.mxu1 %v17932_v21  ;;  %3324 = vst.msk [vmem:[#allocation2 + $0x50] sm:$0xff] %vm3318_vm1, %v3302_v60  ;;  %9815 = vmatprep.mubr.msk.f32.mxu1 %vm1245_vm12, %v6273_v52  ;;  %v6277_v21 = vsel %vm6241_vm7, 1.0, %v17843_v35  ;;  %vm6580_vm7 = vcmp.eq.s32.totalorder %v17889_v49, 45  ;;  %v18004_v49 = vld [vmem:[#allocation55_spill] sm:$0xff] }
 0x571   :  { %4384 = vst.msk [vmem:[#allocation2 + $0x78] sm:$0xff] %vm1493_vm13, %v4369_v2  ;;  %12479 = vmatprep.subr.bf16.mxu1 %v17836_v17  ;;  %v6617_v2 = vsel %vm6581_vm15, 1.0, %v17843_v35  ;;  %vm6592_vm15 = vcmp.eq.s32.totalorder %v17895_v23, 45 }
 0x572   :  { %v4373_v59 = vpop.f32.mrb[12].mxu1 }
 0x573   :  { %v4374_v29 = vadd.f32 %v17999_v41, %v4373_v59  ;;  %v4375_v40 = vpop.f32.mrb[13].mxu1  ;;  %9816 = vmatmul.mubr.msk.f32.gmra.mrb[118].mxu1 %vm6236_vm9, %v17947_v3  ;;  %v3304_v45 = vpop.permute.xlu0 %3303  ;;  %v6621_v59 = vsel %vm6585_vm6, 1.0, %v17843_v35  ;;  %vm6589_vm9 = vcmp.eq.s32.totalorder %v14414_v14, 45  ;;  %vm6596_vm6 = vcmp.eq.s32.totalorder %v17897_v5, 45 }
 0x574   :  { %12481 = vmatpush1.bf16.msra.mxu1 %v17934_v27  ;;  %3325 = vst.msk [vmem:[#allocation2 + $0x60] sm:$0xff] %vm3318_vm1, %v3304_v45  ;;  %9817 = vmatprep.mubr.msk.f32.mxu1 %vm1245_vm12, %v6277_v21  ;;  %v6609_v27 = vsel %vm6573_vm10, 1.0, %v17843_v35  ;;  %vm6584_vm10 = vcmp.eq.s32.totalorder %v17891_v16, 45  ;;  %v6625_v45 = vsel %vm6589_vm9, 1.0, %v17843_v35  ;;  %v18005_v16 = vld [vmem:[#allocation56_spill] sm:$0xff]  ;;  %vm6600_vm9 = vcmp.eq.s32.totalorder %v17900_v37, 45 }
 0x575   :  { %4385 = vst.msk [vmem:[#allocation2 + $0x88] sm:$0xff] %vm1493_vm13, %v4374_v29  ;;  %6811 = vmatprep.subr.mxu1 %v17843_v35  ;;  %vm6577_vm13 = vcmp.eq.s32.totalorder %v17882_v58, 45  ;;  %v18002_v58 = vld [vmem:[#allocation53_spill] sm:$0xff] }
 0x576   :  { %v4661_v4 = vpop.f32.mrb[14].mxu1  ;;  %v6613_v50 = vsel %vm6577_vm13, 1.0, %v17843_v35  ;;  %vm6588_vm13 = vcmp.eq.s32.totalorder %v17893_v43, 45  ;;  %v18006_v43 = vld [vmem:[#allocation57_spill] sm:$0xff] }
 0x577   :  { %v4662_v6 = vadd.f32 %v18000_v62, %v4661_v4  ;;  %v4663_v55 = vpop.f32.mrb[15].mxu1  ;;  %9818 = vmatmul.mubr.msk.f32.gmra.mrb[120].mxu1 %vm6240_vm11, %v17947_v3  ;;  %v3306_v42 = vpop.permute.xlu0 %3305  ;;  %vm6593_vm11 = vcmp.eq.s32.totalorder %v14433_v46, 45 }
 0x578   :  { %6812 = vmatpush1.msra.mxu1 %v17915_v0  ;;  %3326 = vst.msk [vmem:[#allocation2 + $0x70] sm:$0xff] %vm3318_vm1, %v3306_v42  ;;  %9837 = vmatprep.mubr.msk.f32.mxu1 %vm1245_vm12, %v6609_v27 }
 0x579   :  { %4714 = vrot.lane.b32.xlu1 %v4662_v6, %s12994_s1  ;;  %v6629_v6 = vsel %vm6593_vm11, 1.0, %v17843_v35 }
 0x57a   :  { %v4666_v34 = vpop.f32.mrb[16].mxu1 }
 0x57b   :  { %v4667_v39 = vadd.f32 %v18001_v22, %v4666_v34  ;;  %v4668_v10 = vpop.f32.mrb[17].mxu1  ;;  %9838 = vmatmul.mubr.msk.f32.vlgmr.msra.gmra.mrb[122].mxu1 %vm6572_vm14, %v17947_v3  ;;  %v3308_v28 = vpop.permute.xlu0 %3307  ;;  %vm6597_vm14 = vcmp.eq.s32.totalorder %v17858_v48, 45 }
 0x57c   :  { %3327 = vst.msk [vmem:[#allocation2 + $0x80] sm:$0xff] %vm3318_vm1, %v3308_v28  ;;  %9839 = vmatprep.mubr.msk.f32.mxu1 %vm1245_vm12, %v6613_v50  ;;  %v6633_v34 = vsel %vm6597_vm14, 1.0, %v17843_v35 }
 0x57d   :  { %4716 = vrot.lane.b32.xlu1 %v4667_v39, %s12994_s1 }
 0x57e   :  { %v4671_v0 = vpop.f32.mrb[18].mxu1 }
 0x57f   :  { %v4672_v61 = vadd.f32 %v18002_v58, %v4671_v0  ;;  %v4673_v31 = vpop.f32.mrb[19].mxu1  ;;  %9840 = vmatmul.mubr.msk.f32.gmra.mrb[124].mxu1 %vm6576_vm4, %v17947_v3  ;;  %v3657_v47 = vpop.permute.xlu0 %3656  ;;  %vm6601_vm4 = vcmp.eq.s32.totalorder %v14475_v51, 45 }
 0x580   :  { %3684 = vst.msk [vmem:[#allocation2] sm:$0xff] %vm3683_vm0, %v3657_v47  ;;  %9841 = vmatprep.mubr.msk.f32.mxu1 %vm1245_vm12, %v6617_v2  ;;  %v6637_v10 = vsel %vm6601_vm4, 1.0, %v17843_v35 }
 0x581   :  { %4718 = vrot.lane.b32.xlu1 %v4672_v61, %s12994_s1 }
 0x582   :  { %v4676_v1 = vpop.f32.mrb[20].mxu1 }
 0x583   :  { %v4677_v53 = vadd.f32 %v18003_v36, %v4676_v1  ;;  %v4678_v60 = vpop.f32.mrb[21].mxu1  ;;  %9842 = vmatmul.mubr.msk.f32.gmra.mrb[126].mxu1 %vm6580_vm7, %v17947_v3  ;;  %v3659_v52 = vpop.permute.xlu0 %3658  ;;  %vm6605_vm7 = vcmp.eq.s32.totalorder %v17918_v12, 45 }
 0x584   :  { %3685 = vst.msk [vmem:[#allocation2 + $0x10] sm:$0xff] %vm3683_vm0, %v3659_v52  ;;  %9843 = vmatprep.mubr.msk.f32.mxu1 %vm1245_vm12, %v6621_v59  ;;  %v6641_v50 = vsel %vm6605_vm7, 1.0, %v17843_v35 }
 0x585   :  { %4720 = vrot.lane.b32.xlu1 %v4677_v53, %s12994_s1 }
 0x586   :  { %v4681_v18 = vpop.f32.mrb[22].mxu1 }
 0x587   :  { %v4682_v41 = vadd.f32 %v18004_v49, %v4681_v18  ;;  %v4683_v29 = vpop.f32.mrb[23].mxu1  ;;  %9844 = vmatmul.mubr.msk.f32.gmra.mrb[128].mxu1 %vm6584_vm10, %v17947_v3  ;;  %v3661_v40 = vpop.permute.xlu0 %3660  ;;  %vm6604_vm10 = vcmp.eq.s32.totalorder %v17902_v54, 45 }
 0x588   :  { %3686 = vst.msk [vmem:[#allocation2 + $0x20] sm:$0xff] %vm3683_vm0, %v3661_v40  ;;  %9845 = vmatprep.mubr.msk.f32.mxu1 %vm1245_vm12, %v6625_v45 }
 0x589   :  { %4722 = vrot.lane.b32.xlu1 %v4682_v41, %s12994_s1 }
 0x58a   :  { %v4686_v14 = vpop.f32.mrb[24].mxu1 }
 0x58b   :  { %v4687_v21 = vadd.f32 %v18005_v16, %v4686_v14  ;;  %v4688_v4 = vpop.f32.mrb[25].mxu1  ;;  %9846 = vmatmul.mubr.msk.f32.gmra.mrb[130].mxu1 %vm6588_vm13, %v17947_v3  ;;  %v3663_v62 = vpop.permute.xlu0 %3662 }
 0x58c   :  { %3687 = vst.msk [vmem:[#allocation2 + $0x30] sm:$0xff] %vm3683_vm0, %v3663_v62  ;;  %9847 = vmatprep.mubr.msk.f32.mxu1 %vm1245_vm12, %v6629_v6 }
 0x58d   :  { %4724 = vrot.lane.b32.xlu1 %v4687_v21, %s12994_s1 }
 0x58e   :  { %v4691_v46 = vpop.f32.mrb[26].mxu1 }
 0x58f   :  { %v4692_v55 = vadd.f32 %v18006_v43, %v4691_v46  ;;  %v4693_v42 = vpop.f32.mrb[27].mxu1  ;;  %9848 = vmatmul.mubr.msk.f32.gmra.mrb[132].mxu1 %vm6592_vm15, %v17947_v3  ;;  %v3665_v27 = vpop.permute.xlu0 %3664 }
 0x590   :  { %3688 = vst.msk [vmem:[#allocation2 + $0x40] sm:$0xff] %vm3683_vm0, %v3665_v27  ;;  %9849 = vmatprep.mubr.msk.f32.mxu1 %vm1245_vm12, %v6633_v34 }
 0x591   :  { %4726 = vrot.lane.b32.xlu1 %v4692_v55, %s12994_s1 }
 0x592   :  { %v4696_v48 = vpop.f32.mrb[28].mxu1 }
 0x593   :  { %v4697_v23 = vadd.f32 %v15410_v38, %v4696_v48  ;;  %v4698_v22 = vpop.f32.mrb[29].mxu1  ;;  %9850 = vmatmul.mubr.msk.f32.gmra.mrb[134].mxu1 %vm6596_vm6, %v17947_v3  ;;  %v3667_v39 = vpop.permute.xlu0 %3666 }
 0x594   :  { %3689 = vst.msk [vmem:[#allocation2 + $0x50] sm:$0xff] %vm3683_vm0, %v3667_v39  ;;  %9851 = vmatprep.mubr.msk.f32.mxu1 %vm1245_vm12, %v6637_v10  ;;  %v18007_v10 = vld [vmem:[#allocation23_spill] sm:$0xff] }
 0x595   :  { %4728 = vrot.lane.b32.xlu1 %v4697_v23, %s12994_s1 }
 0x596   :  { %v4701_v51 = vpop.f32.mrb[30].mxu1 }
 0x597   :  { %v4702_v5 = vadd.f32 %v15423_v63, %v4701_v51  ;;  %v4703_v38 = vpop.f32.mrb[31].mxu1  ;;  %9852 = vmatmul.mubr.msk.f32.gmra.mrb[136].mxu1 %vm6600_vm9, %v17947_v3  ;;  %v3669_v28 = vpop.permute.xlu0 %3668 }
 0x598   :  { %3690 = vst.msk [vmem:[#allocation2 + $0x60] sm:$0xff] %vm3683_vm0, %v3669_v28  ;;  %9853 = vmatprep.mubr.msk.f32.mxu1 %vm1245_vm12, %v6641_v50  ;;  %vm4048_vm12 = vcmask 1048448   ;;  %v18008_v38 = vld [vmem:[#allocation21_spill] sm:$0xff] }
 0x599   :  { %4730 = vrot.lane.b32.xlu1 %v4702_v5, %s12994_s1 }
 0x59a   :  { %v5025_v12 = vpop.f32.mrb[32].mxu1 }
 0x59b   :  { %v5026_v0 = vadd.f32 %v15438_v9, %v5025_v12  ;;  %v5027_v37 = vpop.f32.mrb[33].mxu1  ;;  %9854 = vmatmul.mubr.msk.f32.gmra.mrb[138].mxu1 %vm6604_vm10, %v17947_v3  ;;  %v3671_v63 = vpop.permute.xlu0 %3670  ;;  %v18009_v12 = vld [vmem:[#allocation22_spill] sm:$0xff] }
 0x59c   :  { %3691 = vst.msk [vmem:[#allocation2 + $0x70] sm:$0xff] %vm3683_vm0, %v3671_v63  ;;  %v18010_v63 = vld [vmem:[#allocation31_spill] sm:$0xff] }
 0x59d   :  { %5078 = vrot.lane.b32.xlu1 %v5026_v0, %s12995_s30 }
 0x59e   :  { %v5030_v58 = vpop.f32.mrb[34].mxu1 }
 0x59f   :  { %v5031_v61 = vadd.f32 %v15450_v24, %v5030_v58  ;;  %v5032_v31 = vpop.f32.mrb[35].mxu1 }
 0x5a1   :  { %5080 = vrot.lane.b32.xlu1 %v5031_v61, %s12995_s30 }
 0x5a2   :  { %v5035_v47 = vpop.f32.mrb[36].mxu1 }
 0x5a3   :  { %v5036_v54 = vadd.f32 %v15461_v44, %v5035_v47  ;;  %v5037_v2 = vpop.f32.mrb[37].mxu1  ;;  %v4022_v9 = vpop.permute.xlu0 %4021  ;;  %v18011_v47 = vld [vmem:[#allocation6_spill] sm:$0xff] }
 0x5a4   :  { %4049 = vst.msk [vmem:[#allocation2] sm:$0xff] %vm4048_vm12, %v4022_v9 }
 0x5a5   :  { %5082 = vrot.lane.b32.xlu1 %v5036_v54, %s12995_s30 }
 0x5a6   :  { %v5040_v3 = vpop.f32.mrb[38].mxu1 }
 0x5a7   :  { %v5041_v1 = vadd.f32 %v15472_v25, %v5040_v3  ;;  %v5042_v36 = vpop.f32.mrb[39].mxu1  ;;  %v4024_v53 = vpop.permute.xlu0 %4023  ;;  %v18012_v3 = vld [vmem:[#allocation9_spill] sm:$0xff] }
 0x5a8   :  { %4050 = vst.msk [vmem:[#allocation2 + $0x10] sm:$0xff] %vm4048_vm12, %v4024_v53 }
 0x5a9   :  { %5084 = vrot.lane.b32.xlu1 %v5041_v1, %s12995_s30 }
 0x5aa   :  { %v5045_v24 = vpop.f32.mrb[40].mxu1 }
 0x5ab   :  { %v5046_v60 = vadd.f32 %v15483_v8, %v5045_v24  ;;  %v5047_v52 = vpop.f32.mrb[41].mxu1  ;;  %v4026_v44 = vpop.permute.xlu0 %4025  ;;  %v18013_v24 = vld [vmem:[#allocation13_spill] sm:$0xff] }
 0x5ac   :  { %4051 = vst.msk [vmem:[#allocation2 + $0x20] sm:$0xff] %vm4048_vm12, %v4026_v44 }
 0x5ad   :  { %5086 = vrot.lane.b32.xlu1 %v5046_v60, %s12995_s30 }
 0x5ae   :  { %v5050_v59 = vpop.f32.mrb[42].mxu1 }
 0x5af   :  { %v5051_v18 = vadd.f32 %v15494_v30, %v5050_v59  ;;  %v5052_v49 = vpop.f32.mrb[43].mxu1  ;;  %v4028_v25 = vpop.permute.xlu0 %4027  ;;  %v18014_v59 = vld [vmem:[#allocation7_spill] sm:$0xff] }
 0x5b0   :  { %4052 = vst.msk [vmem:[#allocation2 + $0x30] sm:$0xff] %vm4048_vm12, %v4028_v25 }
 0x5b1   :  { %5088 = vrot.lane.b32.xlu1 %v5051_v18, %s12995_s30 }
 0x5b2   :  { %v5055_v41 = vpop.f32.mrb[44].mxu1 }
 0x5b3   :  { %v5056_v29 = vadd.f32 %v15505_v57, %v5055_v41  ;;  %v5057_v40 = vpop.f32.mrb[45].mxu1  ;;  %v4030_v8 = vpop.permute.xlu0 %4029 }
 0x5b4   :  { %4053 = vst.msk [vmem:[#allocation2 + $0x40] sm:$0xff] %vm4048_vm12, %v4030_v8 }
 0x5b5   :  { %5090 = vrot.lane.b32.xlu1 %v5056_v29, %s12995_s30  ;;  %v18015_v29 = vld [vmem:[#allocation15_spill] sm:$0xff] }
 0x5b6   :  { %v5060_v45 = vpop.f32.mrb[46].mxu1 }
 0x5b7   :  { %v5061_v14 = vadd.f32 %v15515_v13, %v5060_v45  ;;  %v5062_v16 = vpop.f32.mrb[47].mxu1  ;;  %v4032_v30 = vpop.permute.xlu0 %4031 }
 0x5b8   :  { %4054 = vst.msk [vmem:[#allocation2 + $0x50] sm:$0xff] %vm4048_vm12, %v4032_v30  ;;  %v18016_v16 = vld [vmem:[#allocation8_spill] sm:$0xff] }
 0x5b9   :  { %5092 = vrot.lane.b32.xlu1 %v5061_v14, %s12995_s30 }
 0x5ba   :  { %v5065_v21 = vpop.f32.mrb[48].mxu1 }
 0x5bb   :  { %v5066_v4 = vadd.f32 %v15523_v56, %v5065_v21  ;;  %v5067_v62 = vpop.f32.mrb[49].mxu1  ;;  %v4034_v57 = vpop.permute.xlu0 %4033 }
 0x5bc   :  { %4055 = vst.msk [vmem:[#allocation2 + $0x60] sm:$0xff] %vm4048_vm12, %v4034_v57  ;;  %v18017_v57 = vld [vmem:[#allocation16_spill] sm:$0xff] }
 0x5bd   :  { %5094 = vrot.lane.b32.xlu1 %v5066_v4, %s12995_s30 }
 0x5be   :  { %v5389_v6 = vpop.f32.mrb[50].mxu1 }
 0x5bf   :  { %v5390_v46 = vadd.f32 %v15533_v11, %v5389_v6  ;;  %v5391_v43 = vpop.f32.mrb[51].mxu1  ;;  %v4036_v13 = vpop.permute.xlu0 %4035 }
 0x5c0   :  { %4056 = vst.msk [vmem:[#allocation2 + $0x70] sm:$0xff] %vm4048_vm12, %v4036_v13 }
 0x5c1   :  { %5442 = vrot.lane.b32.xlu1 %v5390_v46, %s12996_s21 }
 0x5c2   :  { %v5394_v55 = vpop.f32.mrb[52].mxu1 }
 0x5c3   :  { %v5395_v42 = vadd.f32 %v15543_v20, %v5394_v55  ;;  %v5396_v27 = vpop.f32.mrb[53].mxu1  ;;  %v18018_v55 = vld [vmem:[#allocation10_spill] sm:$0xff] }
 0x5c5   :  { %5444 = vrot.lane.b32.xlu1 %v5395_v42, %s12996_s21 }
 0x5c6   :  { %v5399_v56 = vpop.f32.mrb[54].mxu1 }
 0x5c7   :  { %v5400_v34 = vadd.f32 %v15553_v32, %v5399_v56  ;;  %v5401_v48 = vpop.f32.mrb[55].mxu1 }
 0x5c8   :  { %v18019_v48 = vld [vmem:[#allocation11_spill] sm:$0xff] }
 0x5c9   :  { %5446 = vrot.lane.b32.xlu1 %v5400_v34, %s12996_s21 }
 0x5ca   :  { %v5404_v23 = vpop.f32.mrb[56].mxu1 }
 0x5cb   :  { %v5405_v11 = vadd.f32 %v15563_v7, %v5404_v23  ;;  %v5406_v22 = vpop.f32.mrb[57].mxu1 }
 0x5cd   :  { %5448 = vrot.lane.b32.xlu1 %v5405_v11, %s12996_s21 }
 0x5ce   :  { %v5409_v39 = vpop.f32.mrb[58].mxu1 }
 0x5cf   :  { %v5410_v51 = vadd.f32 %v18007_v10, %v5409_v39  ;;  %v5411_v5 = vpop.f32.mrb[59].mxu1  ;;  %v18020_v10 = vld [vmem:[#allocation17_spill] sm:$0xff] }
 0x5d1   :  { %5450 = vrot.lane.b32.xlu1 %v5410_v51, %s12996_s21 }
 0x5d2   :  { %v5414_v20 = vpop.f32.mrb[60].mxu1 }
 0x5d3   :  { %v5415_v28 = vadd.f32 %v18008_v38, %v5414_v20  ;;  %v5416_v50 = vpop.f32.mrb[61].mxu1 }
 0x5d5   :  { %5452 = vrot.lane.b32.xlu1 %v5415_v28, %s12996_s21  ;;  %v18021_v28 = vld [vmem:[#allocation12_spill] sm:$0xff] }
 0x5d6   :  { %v5419_v32 = vpop.f32.mrb[62].mxu1 }
 0x5d7   :  { %v5420_v0 = vadd.f32 %v18009_v12, %v5419_v32  ;;  %v5421_v37 = vpop.f32.mrb[63].mxu1 }
 0x5d8   :  { %v18022_v37 = vld [vmem:[#allocation18_spill] sm:$0xff] }
 0x5d9   :  { %5454 = vrot.lane.b32.xlu1 %v5420_v0, %s12996_s21 }
 0x5da   :  { %v5424_v7 = vpop.f32.mrb[64].mxu1 }
 0x5db   :  { %v5425_v58 = vadd.f32 %v18010_v63, %v5424_v7  ;;  %v5426_v61 = vpop.f32.mrb[65].mxu1 }
 0x5dd   :  { %5456 = vrot.lane.b32.xlu1 %v5425_v58, %s12996_s21 }
 0x5de   :  { %v5429_v31 = vpop.f32.mrb[66].mxu1 }
 0x5df   :  { %v5430_v54 = vadd.f32 %v18011_v47, %v5429_v31  ;;  %v5431_v2 = vpop.f32.mrb[67].mxu1  ;;  %v18023_v31 = vld [vmem:[#allocation19_spill] sm:$0xff] }
 0x5e1   :  { %5458 = vrot.lane.b32.xlu1 %v5430_v54, %s12996_s21 }
 0x5e2   :  { %v5753_v9 = vpop.f32.mrb[68].mxu1 }
 0x5e3   :  { %v5754_v1 = vadd.f32 %v18012_v3, %v5753_v9  ;;  %v5755_v36 = vpop.f32.mrb[69].mxu1  ;;  %v18024_v3 = vld [vmem:[#allocation14_spill] sm:$0xff] }
 0x5e5   :  { %5806 = vrot.lane.b32.xlu1 %v5754_v1, %s12997_s0 }
 0x5e6   :  { %v5758_v53 = vpop.f32.mrb[70].mxu1 }
 0x5e7   :  { %v5759_v60 = vadd.f32 %v18013_v24, %v5758_v53  ;;  %v5760_v52 = vpop.f32.mrb[71].mxu1 }
 0x5e9   :  { %5808 = vrot.lane.b32.xlu1 %v5759_v60, %s12997_s0  ;;  %v18025_v60 = vld [vmem:[#allocation58_spill] sm:$0xff] }
 0x5ea   :  { %v5763_v44 = vpop.f32.mrb[72].mxu1 }
 0x5eb   :  { %v5764_v18 = vadd.f32 %v18014_v59, %v5763_v44  ;;  %v5765_v49 = vpop.f32.mrb[73].mxu1  ;;  %v4715_v25 = vpop.permute.xlu1 %4714 }
 0x5ec   :  { %4741 = vst.msk [vmem:[#allocation2 + $0x8] sm:$0xff] %vm1858_vm5, %v4715_v25  ;;  %v18026_v49 = vld [vmem:[#allocation59_spill] sm:$0xff] }
 0x5ed   :  { %5810 = vrot.lane.b32.xlu1 %v5764_v18, %s12997_s0 }
 0x5ee   :  { %v5768_v41 = vpop.f32.mrb[74].mxu1 }
 0x5ef   :  { %v5769_v40 = vadd.f32 %v18015_v29, %v5768_v41  ;;  %v5770_v8 = vpop.f32.mrb[75].mxu1  ;;  %v4717_v45 = vpop.permute.xlu1 %4716 }
 0x5f0   :  { %4742 = vst.msk [vmem:[#allocation2 + $0x18] sm:$0xff] %vm1858_vm5, %v4717_v45  ;;  %v18027_v8 = vld [vmem:[#allocation60_spill] sm:$0xff] }
 0x5f1   :  { %5812 = vrot.lane.b32.xlu1 %v5769_v40, %s12997_s0 }
 0x5f2   :  { %v5773_v14 = vpop.f32.mrb[76].mxu1 }
 0x5f3   :  { %v5774_v30 = vadd.f32 %v18016_v16, %v5773_v14  ;;  %v5775_v21 = vpop.f32.mrb[77].mxu1  ;;  %v4719_v4 = vpop.permute.xlu1 %4718 }
 0x5f4   :  { %4743 = vst.msk [vmem:[#allocation2 + $0x28] sm:$0xff] %vm1858_vm5, %v4719_v4  ;;  %v18028_v21 = vld [vmem:[#allocation61_spill] sm:$0xff] }
 0x5f5   :  { %5814 = vrot.lane.b32.xlu1 %v5774_v30, %s12997_s0 }
 0x5f6   :  { %v5778_v62 = vpop.f32.mrb[78].mxu1 }
 0x5f7   :  { %v5779_v6 = vadd.f32 %v18017_v57, %v5778_v62  ;;  %v5780_v46 = vpop.f32.mrb[79].mxu1  ;;  %v4721_v43 = vpop.permute.xlu1 %4720 }
 0x5f8   :  { %4744 = vst.msk [vmem:[#allocation2 + $0x38] sm:$0xff] %vm1858_vm5, %v4721_v43  ;;  %v18029_v46 = vld [vmem:[#allocation62_spill] sm:$0xff] }
 0x5f9   :  { %5816 = vrot.lane.b32.xlu1 %v5779_v6, %s12997_s0 }
 0x5fa   :  { %v5783_v13 = vpop.f32.mrb[80].mxu1 }
 0x5fb   :  { %v5784_v42 = vadd.f32 %v18018_v55, %v5783_v13  ;;  %v5785_v27 = vpop.f32.mrb[81].mxu1  ;;  %v4723_v56 = vpop.permute.xlu1 %4722 }
 0x5fc   :  { %4745 = vst.msk [vmem:[#allocation2 + $0x48] sm:$0xff] %vm1858_vm5, %v4723_v56  ;;  %v18030_v27 = vld [vmem:[#allocation63_spill] sm:$0xff] }
 0x5fd   :  { %5818 = vrot.lane.b32.xlu1 %v5784_v42, %s12997_s0 }
 0x5fe   :  { %v5788_v34 = vpop.f32.mrb[82].mxu1 }
 0x5ff   :  { %v5789_v23 = vadd.f32 %v18019_v48, %v5788_v34  ;;  %v5790_v11 = vpop.f32.mrb[83].mxu1  ;;  %v4725_v22 = vpop.permute.xlu1 %4724 }
 0x600   :  { %4746 = vst.msk [vmem:[#allocation2 + $0x58] sm:$0xff] %vm1858_vm5, %v4725_v22  ;;  %v6969_v11 = vld [vmem:[%s17733_s4 + $0x88] sm:$0xff]  ;;  %v6952_v22 = vld [vmem:[%s17733_s4] sm:$0xff] }
 0x601   :  { %5820 = vrot.lane.b32.xlu1 %v5789_v23, %s12997_s0  ;;  %v6968_v23 = vld [vmem:[%s17733_s4 + $0x80] sm:$0xff] }
 0x602   :  { %v5793_v39 = vpop.f32.mrb[84].mxu1 }
 0x603   :  { %v5794_v51 = vadd.f32 %v18020_v10, %v5793_v39  ;;  %v5795_v5 = vpop.f32.mrb[85].mxu1  ;;  %v4727_v20 = vpop.permute.xlu1 %4726  ;;  %v12482_v10 = vpack.c.bf16 %v6969_v11, %v6968_v23  ;;  %v6963_v11 = vld [vmem:[%s17733_s4 + $0x58] sm:$0xff] }
 0x604   :  { %4747 = vst.msk [vmem:[#allocation2 + $0x68] sm:$0xff] %vm1858_vm5, %v4727_v20  ;;  %v18031_v5 = vld [vmem:[#allocation64_spill] sm:$0xff] }
 0x605   :  { %5822 = vrot.lane.b32.xlu1 %v5794_v51, %s12997_s0  ;;  %v6953_v51 = vld [vmem:[%s17733_s4 + $0x8] sm:$0xff]  ;;  %12483 = vmatprep.subr.bf16.mxu0 %v12482_v10  ;;  %v18036_v10 = vld [vmem:[#allocation69_spill] sm:$0xff] }
 0x606   :  { %v6117_v38 = vpop.f32.mrb[86].mxu1 }
 0x607   :  { %v6118_v50 = vadd.f32 %v18021_v28, %v6117_v38  ;;  %v6119_v32 = vpop.f32.mrb[87].mxu1  ;;  %v4729_v12 = vpop.permute.xlu1 %4728 }
 0x608   :  { %4748 = vst.msk [vmem:[#allocation2 + $0x78] sm:$0xff] %vm1858_vm5, %v4729_v12  ;;  %v6970_v32 = vld [vmem:[%s17733_s4 + $0x90] sm:$0xff]  ;;  %v6971_v12 = vld [vmem:[%s17733_s4 + $0x98] sm:$0xff] }
 0x609   :  { %6170 = vrot.lane.b32.xlu0 %v6118_v50, %s12998_s3  ;;  %v12484_v50 = vpack.c.bf16 %v6953_v51, %v6952_v22 }
 0x60a   :  { %v6122_v0 = vpop.f32.mrb[88].mxu1 }
 0x60b   :  { %v6123_v7 = vadd.f32 %v18022_v37, %v6122_v0  ;;  %v6124_v63 = vpop.f32.mrb[89].mxu1  ;;  %v4731_v58 = vpop.permute.xlu1 %4730  ;;  %v6954_v0 = vld [vmem:[%s17733_s4 + $0x10] sm:$0xff]  ;;  %12485 = vmatpush3.bf16.msra.mxu0 %v12484_v50  ;;  %v12486_v37 = vpack.c.bf16 %v6971_v12, %v6970_v32  ;;  %v6964_v50 = vld [vmem:[%s17733_s4 + $0x60] sm:$0xff]  ;;  %v6965_v12 = vld [vmem:[%s17733_s4 + $0x68] sm:$0xff] }
 0x60c   :  { %4749 = vst.msk [vmem:[#allocation2 + $0x88] sm:$0xff] %vm1858_vm5, %v4731_v58  ;;  %vm7156_vm5 = vcmask 588800  }
 0x60d   :  { %6172 = vrot.lane.b32.xlu0 %v6123_v7, %s12998_s3  ;;  %v6955_v7 = vld [vmem:[%s17733_s4 + $0x18] sm:$0xff]  ;;  %12487 = vmatprep.subr.bf16.mxu0 %v12486_v37  ;;  %v12508_v37 = vpack.c.bf16 %v6965_v12, %v6964_v50 }
 0x60e   :  { %v6127_v61 = vpop.f32.mrb[90].mxu1  ;;  %v12488_v58 = vpack.c.bf16 %v6955_v7, %v6954_v0  ;;  %v18037_v7 = vld [vmem:[#allocation70_spill] sm:$0xff] }
 0x60f   :  { %v6128_v47 = vadd.f32 %v18023_v31, %v6127_v61  ;;  %v6129_v54 = vpop.f32.mrb[91].mxu1  ;;  %v5079_v2 = vpop.permute.xlu1 %5078  ;;  %v18032_v61 = vld [vmem:[#allocation65_spill] sm:$0xff] }
 0x610   :  { %5105 = vst.msk [vmem:[#allocation2 + $0x8] sm:$0xff] %vm2223_vm2, %v5079_v2  ;;  %v6972_v2 = vld [vmem:[%s17733_s4 + $0xa0] sm:$0xff]  ;;  %12489 = vmatpush3.bf16.msra.mxu0 %v12488_v58 }
 0x611   :  { %6174 = vrot.lane.b32.xlu0 %v6128_v47, %s12998_s3 }
 0x612   :  { %v6132_v9 = vpop.f32.mrb[92].mxu1 }
 0x613   :  { %v6133_v1 = vadd.f32 %v18024_v3, %v6132_v9  ;;  %v6134_v36 = vpop.f32.mrb[93].mxu1  ;;  %v5081_v53 = vpop.permute.xlu1 %5080  ;;  %v6973_v9 = vld [vmem:[%s17733_s4 + $0xa8] sm:$0xff]  ;;  %v6956_v3 = vld [vmem:[%s17733_s4 + $0x20] sm:$0xff] }
 0x614   :  { %5106 = vst.msk [vmem:[#allocation2 + $0x18] sm:$0xff] %vm2223_vm2, %v5081_v53  ;;  %v6957_v36 = vld [vmem:[%s17733_s4 + $0x28] sm:$0xff] }
 0x615   :  { %6176 = vrot.lane.b32.xlu0 %v6133_v1, %s12998_s3  ;;  %v12490_v1 = vpack.c.bf16 %v6973_v9, %v6972_v2  ;;  %v6967_v9 = vld [vmem:[%s17733_s4 + $0x78] sm:$0xff] }
 0x616   :  { %v6137_v24 = vpop.f32.mrb[94].mxu1 }
 0x617   :  { %v6138_v52 = vadd.f32 %v18025_v60, %v6137_v24  ;;  %v6139_v44 = vpop.f32.mrb[95].mxu1  ;;  %v5083_v59 = vpop.permute.xlu1 %5082  ;;  %v12492_v24 = vpack.c.bf16 %v6957_v36, %v6956_v3  ;;  %v18033_v60 = vld [vmem:[#allocation66_spill] sm:$0xff]  ;;  %12491 = vmatprep.subr.bf16.mxu0 %v12490_v1  ;;  %v18038_v36 = vld [vmem:[#allocation71_spill] sm:$0xff] }
 0x618   :  { %5107 = vst.msk [vmem:[#allocation2 + $0x28] sm:$0xff] %vm2223_vm2, %v5083_v59 }
 0x619   :  { %6178 = vrot.lane.b32.xlu0 %v6138_v52, %s12998_s3  ;;  %12493 = vmatpush3.bf16.msra.mxu0 %v12492_v24 }
 0x61a   :  { %v6142_v18 = vpop.f32.mrb[96].mxu1 }
 0x61b   :  { %v6143_v25 = vadd.f32 %v18026_v49, %v6142_v18  ;;  %v6144_v41 = vpop.f32.mrb[97].mxu1  ;;  %v5085_v29 = vpop.permute.xlu1 %5084  ;;  %v6974_v18 = vld [vmem:[%s17733_s4 + $0xb0] sm:$0xff]  ;;  %v6975_v49 = vld [vmem:[%s17733_s4 + $0xb8] sm:$0xff] }
 0x61c   :  { %5108 = vst.msk [vmem:[#allocation2 + $0x38] sm:$0xff] %vm2223_vm2, %v5085_v29  ;;  %v12494_v41 = vpack.c.bf16 %v6975_v49, %v6974_v18  ;;  %v6959_v29 = vld [vmem:[%s17733_s4 + $0x38] sm:$0xff] }
 0x61d   :  { %6180 = vrot.lane.b32.xlu0 %v6143_v25, %s12998_s3  ;;  %v6958_v25 = vld [vmem:[%s17733_s4 + $0x30] sm:$0xff] }
 0x61e   :  { %v6147_v40 = vpop.f32.mrb[98].mxu1  ;;  %12495 = vmatprep.subr.bf16.mxu0 %v12494_v41  ;;  %v18040_v41 = vld [vmem:[#allocation73_spill] sm:$0xff] }
 0x61f   :  { %v6148_v45 = vadd.f32 %v18027_v8, %v6147_v40  ;;  %v6149_v14 = vpop.f32.mrb[99].mxu1  ;;  %v5087_v16 = vpop.permute.xlu1 %5086  ;;  %v12496_v8 = vpack.c.bf16 %v6959_v29, %v6958_v25 }
 0x620   :  { %5109 = vst.msk [vmem:[#allocation2 + $0x48] sm:$0xff] %vm2223_vm2, %v5087_v16 }
 0x621   :  { %6182 = vrot.lane.b32.xlu0 %v6148_v45, %s12998_s3  ;;  %v18034_v45 = vld [vmem:[#allocation67_spill] sm:$0xff]  ;;  %12497 = vmatpush3.bf16.msra.mxu0 %v12496_v8 }
 0x622   :  { %v6152_v30 = vpop.f32.mrb[100].mxu1 }
 0x623   :  { %v6153_v4 = vadd.f32 %v18028_v21, %v6152_v30  ;;  %v6154_v62 = vpop.f32.mrb[101].mxu1  ;;  %v5089_v57 = vpop.permute.xlu1 %5088  ;;  %v6976_v21 = vld [vmem:[%s17733_s4 + $0xc0] sm:$0xff] }
 0x624   :  { %5110 = vst.msk [vmem:[#allocation2 + $0x58] sm:$0xff] %vm2223_vm2, %v5089_v57  ;;  %v6960_v62 = vld [vmem:[%s17733_s4 + $0x40] sm:$0xff] }
 0x625   :  { %6184 = vrot.lane.b32.xlu1 %v6153_v4, %s12998_s3  ;;  %v6977_v4 = vld [vmem:[%s17733_s4 + $0xc8] sm:$0xff] }
 0x626   :  { %v6157_v6 = vpop.f32.mrb[102].mxu1  ;;  %v12498_v57 = vpack.c.bf16 %v6977_v4, %v6976_v21 }
 0x627   :  { %v6158_v43 = vadd.f32 %v18029_v46, %v6157_v6  ;;  %v6159_v13 = vpop.f32.mrb[103].mxu1  ;;  %v5091_v55 = vpop.permute.xlu1 %5090  ;;  %v6961_v6 = vld [vmem:[%s17733_s4 + $0x48] sm:$0xff] }
 0x628   :  { %5111 = vst.msk [vmem:[#allocation2 + $0x68] sm:$0xff] %vm2223_vm2, %v5091_v55  ;;  %v18035_v13 = vld [vmem:[#allocation68_spill] sm:$0xff]  ;;  %12499 = vmatprep.subr.bf16.mxu0 %v12498_v57 }
 0x629   :  { %6186 = vrot.lane.b32.xlu1 %v6158_v43, %s12998_s3  ;;  %v12500_v43 = vpack.c.bf16 %v6961_v6, %v6960_v62  ;;  %v18042_v62 = vld [vmem:[#allocation75_spill] sm:$0xff] }
 0x62a   :  { %v6481_v42 = vpop.f32.mrb[104].mxu1 }
 0x62b   :  { %v6482_v56 = vadd.f32 %v18030_v27, %v6481_v42  ;;  %v6483_v34 = vpop.f32.mrb[105].mxu1  ;;  %v5093_v48 = vpop.permute.xlu1 %5092  ;;  %12501 = vmatpush3.bf16.msra.mxu0 %v12500_v43 }
 0x62c   :  { %5112 = vst.msk [vmem:[#allocation2 + $0x78] sm:$0xff] %vm2223_vm2, %v5093_v48  ;;  %v6979_v34 = vld [vmem:[%s17733_s4 + $0xd8] sm:$0xff]  ;;  %v6962_v48 = vld [vmem:[%s17733_s4 + $0x50] sm:$0xff] }
 0x62d   :  { %6534 = vrot.lane.b32.xlu0 %v6482_v56, %s12999_s23  ;;  %v6978_v56 = vld [vmem:[%s17733_s4 + $0xd0] sm:$0xff] }
 0x62e   :  { %v6486_v39 = vpop.f32.mrb[106].mxu1  ;;  %v12502_v23 = vpack.c.bf16 %v6979_v34, %v6978_v56  ;;  %v18044_v34 = vld [vmem:[#allocation77_spill] sm:$0xff] }
 0x62f   :  { %v6487_v20 = vadd.f32 %v18031_v5, %v6486_v39  ;;  %v6488_v38 = vpop.f32.mrb[107].mxu1  ;;  %v5095_v28 = vpop.permute.xlu1 %5094  ;;  %v12504_v39 = vpack.c.bf16 %v6963_v11, %v6962_v48 }
 0x630   :  { %5113 = vst.msk [vmem:[#allocation2 + $0x88] sm:$0xff] %vm2223_vm2, %v5095_v28  ;;  %12503 = vmatprep.subr.bf16.mxu0 %v12502_v23  ;;  %v6980_v38 = vld [vmem:[%s17733_s4 + $0xe0] sm:$0xff]  ;;  %v6981_v28 = vld [vmem:[%s17733_s4 + $0xe8] sm:$0xff] }
 0x631   :  { %6536 = vrot.lane.b32.xlu0 %v6487_v20, %s12999_s23  ;;  %12505 = vmatpush3.bf16.msra.mxu0 %v12504_v39  ;;  %v12506_v32 = vpack.c.bf16 %v6981_v28, %v6980_v38  ;;  %v18045_v39 = vld [vmem:[#allocation78_spill] sm:$0xff] }
 0x632   :  { %v6491_v63 = vpop.f32.mrb[108].mxu1 }
 0x633   :  { %v6492_v31 = vadd.f32 %v18032_v61, %v6491_v63  ;;  %v6493_v47 = vpop.f32.mrb[109].mxu1  ;;  %v5443_v54 = vpop.permute.xlu1 %5442  ;;  %12507 = vmatprep.subr.bf16.mxu0 %v12506_v32 }
 0x634   :  { %5469 = vst.msk [vmem:[#allocation2 + $0x8] sm:$0xff] %vm2588_vm3, %v5443_v54  ;;  %v6983_v47 = vld [vmem:[%s17733_s4 + $0xf8] sm:$0xff]  ;;  %v6966_v54 = vld [vmem:[%s17733_s4 + $0x70] sm:$0xff] }
 0x635   :  { %6538 = vrot.lane.b32.xlu0 %v6492_v31, %s12999_s23  ;;  %v6982_v31 = vld [vmem:[%s17733_s4 + $0xf0] sm:$0xff]  ;;  %12509 = vmatpush3.bf16.msra.mxu0 %v12508_v37  ;;  %v12512_v1 = vpack.c.bf16 %v6967_v9, %v6966_v54 }
 0x636   :  { %v6496_v53 = vpop.f32.mrb[110].mxu1  ;;  %v12510_v2 = vpack.c.bf16 %v6983_v47, %v6982_v31 }
 0x637   :  { %v6497_v52 = vadd.f32 %v18033_v60, %v6496_v53  ;;  %v6498_v44 = vpop.f32.mrb[111].mxu1  ;;  %v5445_v59 = vpop.permute.xlu1 %5444 }
 0x638   :  { %5470 = vst.msk [vmem:[#allocation2 + $0x18] sm:$0xff] %vm2588_vm3, %v5445_v59  ;;  %12511 = vmatprep.subr.bf16.mxu0 %v12510_v2  ;;  %v18039_v44 = vld [vmem:[#allocation72_spill] sm:$0xff] }
 0x639   :  { %6540 = vrot.lane.b32.xlu0 %v6497_v52, %s12999_s23  ;;  %12513 = vmatpush3.bf16.msra.mxu0 %v12512_v1 }
 0x63a   :  { %v6501_v40 = vpop.f32.mrb[112].mxu1 }
 0x63b   :  { %v6502_v14 = vadd.f32 %v18034_v45, %v6501_v40  ;;  %v6503_v16 = vpop.f32.mrb[113].mxu1  ;;  %v5447_v30 = vpop.permute.xlu1 %5446 }
 0x63c   :  { %5471 = vst.msk [vmem:[#allocation2 + $0x28] sm:$0xff] %vm2588_vm3, %v5447_v30 }
 0x63d   :  { %6542 = vrot.lane.b32.xlu0 %v6502_v14, %s12999_s23  ;;  %v18041_v14 = vld [vmem:[#allocation74_spill] sm:$0xff] }
 0x63e   :  { %v6506_v46 = vpop.f32.mrb[114].mxu1 }
 0x63f   :  { %v6507_v55 = vadd.f32 %v18035_v13, %v6506_v46  ;;  %v6508_v42 = vpop.f32.mrb[115].mxu1  ;;  %v5449_v27 = vpop.permute.xlu1 %5448  ;;  %v18043_v13 = vld [vmem:[#allocation76_spill] sm:$0xff] }
 0x640   :  { %5472 = vst.msk [vmem:[#allocation2 + $0x38] sm:$0xff] %vm2588_vm3, %v5449_v27 }
 0x641   :  { %6544 = vrot.lane.b32.xlu0 %v6507_v55, %s12999_s23 }
 0x642   :  { %v6511_v22 = vpop.f32.mrb[116].mxu1 }
 0x643   :  { %v6512_v51 = vadd.f32 %v18036_v10, %v6511_v22  ;;  %v6513_v5 = vpop.f32.mrb[117].mxu1  ;;  %v5451_v20 = vpop.permute.xlu1 %5450 }
 0x644   :  { %5473 = vst.msk [vmem:[#allocation2 + $0x48] sm:$0xff] %vm2588_vm3, %v5451_v20 }
 0x645   :  { %6546 = vrot.lane.b32.xlu0 %v6512_v51, %s12999_s23 }
 0x646   :  { %v6516_v0 = vpop.f32.mrb[118].mxu1 }
 0x647   :  { %v6517_v63 = vadd.f32 %v18037_v7, %v6516_v0  ;;  %v6518_v58 = vpop.f32.mrb[119].mxu1  ;;  %v5453_v61 = vpop.permute.xlu1 %5452 }
 0x648   :  { %5474 = vst.msk [vmem:[#allocation2 + $0x58] sm:$0xff] %vm2588_vm3, %v5453_v61  ;;  %v7131_v58 = vld [vmem:[%s17734_s6 + $0x18] sm:$0xff] }
 0x649   :  { %6548 = vrot.lane.b32.xlu1 %v6517_v63, %s12999_s23  ;;  %v7129_v63 = vld [vmem:[%s17734_s6 + $0x8] sm:$0xff] }
 0x64a   :  { %v6521_v3 = vpop.f32.mrb[120].mxu1 }
 0x64b   :  { %v6522_v53 = vadd.f32 %v18038_v36, %v6521_v3  ;;  %v6523_v24 = vpop.f32.mrb[121].mxu1  ;;  %v5455_v60 = vpop.permute.xlu1 %5454 }
 0x64c   :  { %5475 = vst.msk [vmem:[#allocation2 + $0x68] sm:$0xff] %vm2588_vm3, %v5455_v60 }
 0x64d   :  { %6550 = vrot.lane.b32.xlu1 %v6522_v53, %s12999_s23 }
 0x64e   :  { %v6845_v52 = vpop.f32.mrb[122].mxu1 }
 0x64f   :  { %v6846_v59 = vadd.f32 %v18039_v44, %v6845_v52  ;;  %v6847_v18 = vpop.f32.mrb[123].mxu1  ;;  %v5457_v49 = vpop.permute.xlu1 %5456 }
 0x650   :  { %5476 = vst.msk [vmem:[#allocation2 + $0x78] sm:$0xff] %vm2588_vm3, %v5457_v49 }
 0x651   :  { %6898 = vrot.lane.b32.xlu0 %v6846_v59, %s13000_s24 }
 0x652   :  { %v6850_v25 = vpop.f32.mrb[124].mxu1 }
 0x653   :  { %v6851_v29 = vadd.f32 %v18040_v41, %v6850_v25  ;;  %v6852_v40 = vpop.f32.mrb[125].mxu1  ;;  %v5459_v8 = vpop.permute.xlu1 %5458 }
 0x654   :  { %5477 = vst.msk [vmem:[#allocation2 + $0x88] sm:$0xff] %vm2588_vm3, %v5459_v8  ;;  %v6934_v8 = vld [vmem:[#allocation2] sm:$0xff] }
 0x655   :  { %6900 = vrot.lane.b32.xlu0 %v6851_v29, %s13000_s24 }
 0x656   :  { %v6855_v45 = vpop.f32.mrb[126].mxu1 }
 0x657   :  { %v6856_v16 = vadd.f32 %v18041_v14, %v6855_v45  ;;  %v6857_v30 = vpop.f32.mrb[127].mxu1  ;;  %v5807_v21 = vpop.permute.xlu1 %5806 }
 0x658   :  { %5833 = vst.msk [vmem:[#allocation2 + $0x8] sm:$0xff] %vm2953_vm8, %v5807_v21 }
 0x659   :  { %6902 = vrot.lane.b32.xlu0 %v6856_v16, %s13000_s24  ;;  %v6936_v16 = vld [vmem:[#allocation2 + $0x10] sm:$0xff] }
 0x65a   :  { %v6860_v4 = vpop.f32.mrb[128].mxu1 }
 0x65b   :  { %v6861_v57 = vadd.f32 %v18042_v62, %v6860_v4  ;;  %v6862_v6 = vpop.f32.mrb[129].mxu1  ;;  %v5809_v46 = vpop.permute.xlu1 %5808  ;;  %v6938_v4 = vld [vmem:[#allocation2 + $0x20] sm:$0xff] }
 0x65c   :  { %5834 = vst.msk [vmem:[#allocation2 + $0x18] sm:$0xff] %vm2953_vm8, %v5809_v46  ;;  %v6940_v6 = vld [vmem:[#allocation2 + $0x30] sm:$0xff] }
 0x65d   :  { %6904 = vrot.lane.b32.xlu0 %v6861_v57, %s13000_s24 }
 0x65e   :  { %v6865_v43 = vpop.f32.mrb[130].mxu1 }
 0x65f   :  { %v6866_v55 = vadd.f32 %v18043_v13, %v6865_v43  ;;  %v6867_v42 = vpop.f32.mrb[131].mxu1  ;;  %v5811_v27 = vpop.permute.xlu1 %5810  ;;  %v6942_v13 = vld [vmem:[#allocation2 + $0x40] sm:$0xff] }
 0x660   :  { %5835 = vst.msk [vmem:[#allocation2 + $0x28] sm:$0xff] %vm2953_vm8, %v5811_v27  ;;  %v6944_v27 = vld [vmem:[#allocation2 + $0x50] sm:$0xff] }
 0x661   :  { %6906 = vrot.lane.b32.xlu0 %v6866_v55, %s13000_s24 }
 0x662   :  { %v6870_v56 = vpop.f32.mrb[132].mxu1 }
 0x663   :  { %v6871_v48 = vadd.f32 %v18044_v34, %v6870_v56  ;;  %v6872_v23 = vpop.f32.mrb[133].mxu1  ;;  %v5813_v11 = vpop.permute.xlu1 %5812 }
 0x664   :  { %5836 = vst.msk [vmem:[#allocation2 + $0x38] sm:$0xff] %vm2953_vm8, %v5813_v11  ;;  %v6946_v23 = vld [vmem:[#allocation2 + $0x60] sm:$0xff] }
 0x665   :  { %6908 = vrot.lane.b32.xlu0 %v6871_v48, %s13000_s24 }
 0x666   :  { %v6875_v22 = vpop.f32.mrb[134].mxu1 }
 0x667   :  { %v6876_v10 = vadd.f32 %v18045_v39, %v6875_v22  ;;  %v6877_v51 = vpop.f32.mrb[135].mxu1  ;;  %v5815_v5 = vpop.permute.xlu1 %5814  ;;  %v6948_v39 = vld [vmem:[#allocation2 + $0x70] sm:$0xff] }
 0x668   :  { %5837 = vst.msk [vmem:[#allocation2 + $0x48] sm:$0xff] %vm2953_vm8, %v5815_v5 }
 0x669   :  { %6910 = vrot.lane.b32.xlu0 %v6876_v10, %s13000_s24 }
 0x66a   :  { %v6880_v20 = vpop.f32.mrb[136].mxu1 }
 0x66b   :  { %v6881_v38 = vadd.f32 %v16018_v33, %v6880_v20  ;;  %v6882_v28 = vpop.f32.mrb[137].mxu1  ;;  %v5817_v50 = vpop.permute.xlu1 %5816  ;;  %v7128_v33 = vld [vmem:[%s17734_s6] sm:$0xff]  ;;  %v18046_v20 = vld [vmem:[#allocation5_spill] sm:$0xff] }
 0x66c   :  { %5838 = vst.msk [vmem:[#allocation2 + $0x58] sm:$0xff] %vm2953_vm8, %v5817_v50 }
 0x66d   :  { %6912 = vrot.lane.b32.xlu0 %v6881_v38, %s13000_s24 }
 0x66e   :  { %v6885_v32 = vpop.f32.mrb[138].mxu1 }
 0x66f   :  { %v6886_v12 = vadd.f32 %v16030_v26, %v6885_v32  ;;  %v6887_v0 = vpop.f32.mrb[139].mxu1  ;;  %v5819_v37 = vpop.permute.xlu1 %5818  ;;  %v7130_v26 = vld [vmem:[%s17734_s6 + $0x10] sm:$0xff] }
 0x670   :  { %5839 = vst.msk [vmem:[#allocation2 + $0x68] sm:$0xff] %vm2953_vm8, %v5819_v37 }
 0x671   :  { %6914 = vrot.lane.b32.xlu1 %v6886_v12, %s13000_s24  ;;  %3672 = vrot.lane.b32.xlu0 %v16354_v15, %s12999_s23  ;;  %v16915_v12 = vld [vmem:[%s17735_s5] ss:$0 sm:$0xff] }
 0x673   :  { %v5821_v7 = vpop.permute.xlu1 %5820 }
 0x674   :  { %5840 = vst.msk [vmem:[#allocation2 + $0x78] sm:$0xff] %vm2953_vm8, %v5821_v7 }
 0x675   :  { %7133 = vperm.xlu1 %12971, %v7128_v33   ;;  %4037 = vrot.lane.b32.xlu0 %v16439_v19, %s13000_s24 }
 0x677   :  { %v5823_v15 = vpop.permute.xlu1 %5822 }
 0x678   :  { %5841 = vst.msk [vmem:[#allocation2 + $0x88] sm:$0xff] %vm2953_vm8, %v5823_v15 }
 0x679   :  { %7139 = vperm.xlu1 %12971, %v7130_v26   ;;  %7136 = vperm.xlu0 %12970, %v7129_v63  }
 0x67b   :  { %v6171_v61 = vpop.permute.xlu0 %6170 }
 0x67c   :  { %6197 = vst.msk [vmem:[#allocation2 + $0x8] sm:$0xff] %vm3318_vm1, %v6171_v61 }
 0x67d   :  { %7142 = vperm.xlu0 %12970, %v7131_v58  }
 0x67f   :  { %v6173_v19 = vpop.permute.xlu0 %6172 }
 0x680   :  { %6198 = vst.msk [vmem:[#allocation2 + $0x18] sm:$0xff] %vm3318_vm1, %v6173_v19 }
 0x683   :  { %v6175_v31 = vpop.permute.xlu0 %6174 }
 0x684   :  { %6199 = vst.msk [vmem:[#allocation2 + $0x28] sm:$0xff] %vm3318_vm1, %v6175_v31 }
 0x687   :  { %v6177_v47 = vpop.permute.xlu0 %6176 }
 0x688   :  { %6200 = vst.msk [vmem:[#allocation2 + $0x38] sm:$0xff] %vm3318_vm1, %v6177_v47 }
 0x68b   :  { %v6179_v54 = vpop.permute.xlu0 %6178 }
 0x68c   :  { %6201 = vst.msk [vmem:[#allocation2 + $0x48] sm:$0xff] %vm3318_vm1, %v6179_v54 }
 0x68f   :  { %v6181_v2 = vpop.permute.xlu0 %6180 }
 0x690   :  { %6202 = vst.msk [vmem:[#allocation2 + $0x58] sm:$0xff] %vm3318_vm1, %v6181_v2 }
 0x693   :  { %v6183_v9 = vpop.permute.xlu0 %6182 }
 0x694   :  { %6203 = vst.msk [vmem:[#allocation2 + $0x68] sm:$0xff] %vm3318_vm1, %v6183_v9 }
 0x697   :  { %v6185_v3 = vpop.permute.xlu1 %6184 }
 0x698   :  { %6204 = vst.msk [vmem:[#allocation2 + $0x78] sm:$0xff] %vm3318_vm1, %v6185_v3 }
 0x69b   :  { %v6187_v1 = vpop.permute.xlu1 %6186 }
 0x69c   :  { %6205 = vst.msk [vmem:[#allocation2 + $0x88] sm:$0xff] %vm3318_vm1, %v6187_v1 }
 0x69f   :  { %v6535_v36 = vpop.permute.xlu0 %6534 }
 0x6a0   :  { %6561 = vst.msk [vmem:[#allocation2 + $0x8] sm:$0xff] %vm3683_vm0, %v6535_v36 }
 0x6a3   :  { %v6537_v53 = vpop.permute.xlu0 %6536 }
 0x6a4   :  { %6562 = vst.msk [vmem:[#allocation2 + $0x18] sm:$0xff] %vm3683_vm0, %v6537_v53 }
 0x6a7   :  { %v6539_v24 = vpop.permute.xlu0 %6538 }
 0x6a8   :  { %6563 = vst.msk [vmem:[#allocation2 + $0x28] sm:$0xff] %vm3683_vm0, %v6539_v24 }
 0x6ab   :  { %v6541_v60 = vpop.permute.xlu0 %6540 }
 0x6ac   :  { %6564 = vst.msk [vmem:[#allocation2 + $0x38] sm:$0xff] %vm3683_vm0, %v6541_v60 }
 0x6af   :  { %v6543_v52 = vpop.permute.xlu0 %6542 }
 0x6b0   :  { %6565 = vst.msk [vmem:[#allocation2 + $0x48] sm:$0xff] %vm3683_vm0, %v6543_v52 }
 0x6b3   :  { %v6545_v44 = vpop.permute.xlu0 %6544 }
 0x6b4   :  { %6566 = vst.msk [vmem:[#allocation2 + $0x58] sm:$0xff] %vm3683_vm0, %v6545_v44 }
 0x6b7   :  { %v6547_v59 = vpop.permute.xlu0 %6546 }
 0x6b8   :  { %6567 = vst.msk [vmem:[#allocation2 + $0x68] sm:$0xff] %vm3683_vm0, %v6547_v59 }
 0x6bb   :  { %v6549_v18 = vpop.permute.xlu1 %6548 }
 0x6bc   :  { %6568 = vst.msk [vmem:[#allocation2 + $0x78] sm:$0xff] %vm3683_vm0, %v6549_v18 }
 0x6bf   :  { %v6551_v49 = vpop.permute.xlu1 %6550 }
 0x6c0   :  { %6569 = vst.msk [vmem:[#allocation2 + $0x88] sm:$0xff] %vm3683_vm0, %v6551_v49 }
 0x6c3   :  { %v6899_v25 = vpop.permute.xlu0 %6898 }
 0x6c4   :  { %6925 = vst.msk [vmem:[#allocation2 + $0x8] sm:$0xff] %vm4048_vm12, %v6899_v25 }
 0x6c7   :  { %v6901_v41 = vpop.permute.xlu0 %6900 }
 0x6c8   :  { %6926 = vst.msk [vmem:[#allocation2 + $0x18] sm:$0xff] %vm4048_vm12, %v6901_v41 }
 0x6cb   :  { %v6903_v29 = vpop.permute.xlu0 %6902  ;;  %v6935_v40 = vld [vmem:[#allocation2 + $0x8] sm:$0xff] }
 0x6cc   :  { %6927 = vst.msk [vmem:[#allocation2 + $0x28] sm:$0xff] %vm4048_vm12, %v6903_v29  ;;  %7055 = vmatprep.mubr.f32.mxu0 %v6935_v40 }
 0x6cd   :  { %7056 = vmatmul.mubr.f32.vlgmr.msra.gmra.mrb[22].mxu0 %v6934_v8 }
 0x6cf   :  { %v6905_v45 = vpop.permute.xlu0 %6904  ;;  %v6937_v14 = vld [vmem:[#allocation2 + $0x18] sm:$0xff] }
 0x6d0   :  { %6928 = vst.msk [vmem:[#allocation2 + $0x38] sm:$0xff] %vm4048_vm12, %v6905_v45  ;;  %7060 = vmatprep.mubr.f32.mxu0 %v6937_v14 }
 0x6d1   :  { %7061 = vmatmul.mubr.f32.gmra.mrb[24].mxu0 %v6936_v16 }
 0x6d3   :  { %v6907_v30 = vpop.permute.xlu0 %6906  ;;  %v6939_v21 = vld [vmem:[#allocation2 + $0x28] sm:$0xff] }
 0x6d4   :  { %6929 = vst.msk [vmem:[#allocation2 + $0x48] sm:$0xff] %vm4048_vm12, %v6907_v30  ;;  %7065 = vmatprep.mubr.f32.mxu0 %v6939_v21 }
 0x6d5   :  { %7066 = vmatmul.mubr.f32.gmra.mrb[26].mxu0 %v6938_v4 }
 0x6d7   :  { %v6909_v62 = vpop.permute.xlu0 %6908  ;;  %v6941_v57 = vld [vmem:[#allocation2 + $0x38] sm:$0xff] }
 0x6d8   :  { %6930 = vst.msk [vmem:[#allocation2 + $0x58] sm:$0xff] %vm4048_vm12, %v6909_v62  ;;  %7070 = vmatprep.mubr.f32.mxu0 %v6941_v57 }
 0x6d9   :  { %7071 = vmatmul.mubr.f32.gmra.mrb[28].mxu0 %v6940_v6 }
 0x6db   :  { %v6911_v46 = vpop.permute.xlu0 %6910  ;;  %v6943_v43 = vld [vmem:[#allocation2 + $0x48] sm:$0xff] }
 0x6dc   :  { %6931 = vst.msk [vmem:[#allocation2 + $0x68] sm:$0xff] %vm4048_vm12, %v6911_v46  ;;  %7075 = vmatprep.mubr.f32.mxu0 %v6943_v43 }
 0x6dd   :  { %7076 = vmatmul.mubr.f32.gmra.mrb[30].mxu0 %v6942_v13 }
 0x6df   :  { %v6913_v55 = vpop.permute.xlu0 %6912  ;;  %v6945_v42 = vld [vmem:[#allocation2 + $0x58] sm:$0xff] }
 0x6e0   :  { %6932 = vst.msk [vmem:[#allocation2 + $0x78] sm:$0xff] %vm4048_vm12, %v6913_v55  ;;  %7080 = vmatprep.mubr.f32.mxu0 %v6945_v42 }
 0x6e1   :  { %7081 = vmatmul.mubr.f32.gmra.mrb[32].mxu0 %v6944_v27 }
 0x6e3   :  { %v6915_v56 = vpop.permute.xlu1 %6914  ;;  %v3673_v34 = vpop.permute.xlu0 %3672  ;;  %v6947_v48 = vld [vmem:[#allocation2 + $0x68] sm:$0xff] }
 0x6e4   :  { %6933 = vst.msk [vmem:[#allocation2 + $0x88] sm:$0xff] %vm4048_vm12, %v6915_v56  ;;  %7085 = vmatprep.mubr.f32.mxu0 %v6947_v48 }
 0x6e5   :  { %3692 = vst.msk [vmem:[#allocation2 + $0x80] sm:$0xff] %vm3683_vm0, %v3673_v34  ;;  %7086 = vmatmul.mubr.f32.gmra.mrb[34].mxu0 %v6946_v23 }
 0x6e7   :  { %v4038_v11 = vpop.permute.xlu0 %4037  ;;  %v6949_v22 = vld [vmem:[#allocation2 + $0x78] sm:$0xff] }
 0x6e8   :  { %4057 = vst.msk [vmem:[#allocation2 + $0x80] sm:$0xff] %vm4048_vm12, %v4038_v11  ;;  %7090 = vmatprep.mubr.f32.mxu0 %v6949_v22 }
 0x6e9   :  { %7091 = vmatmul.mubr.f32.gmra.mrb[36].mxu0 %v6948_v39 }
 0x6eb   :  { %v6951_v10 = vld [vmem:[#allocation2 + $0x88] sm:$0xff] }
 0x6ec   :  { %7095 = vmatprep.mubr.f32.mxu0 %v6951_v10 }
 0x6ef   :  { %v6950_v51 = vld [vmem:[#allocation2 + $0x80] sm:$0xff] }
 0x6f0   :  { %7096 = vmatmul.mubr.f32.gmra.mrb[38].mxu0 %v6950_v51 }
 0x6f4   :  { %v7134_v5 = vpop.permute.xlu1 %7133 }
 0x6f5   :  { %v16904_v38 = vsub.s32 %v18046_v20, %v7134_v5 }
 0x6f7   :  { %vm7148_vm2 = vcmp.eq.s32.totalorder %v16904_v38, 0  ;;  %vm7385_vm3 = vcmp.eq.s32.totalorder %v16904_v38, 2 }
 0x6f8   :  { %v7152_v28 = vsel %vm7148_vm2, 1.0, %v17843_v35  ;;  %v7389_v50 = vsel %vm7385_vm3, 1.0, %v17843_v35  ;;  %v7137_v34 = vpop.permute.xlu0 %7136  ;;  %v7140_v10 = vpop.permute.xlu1 %7139 }
 0x6f9   :  { %11202 = vmatprep.mubr.msk.f32.mxu1 %vm7156_vm5, %v7152_v28  ;;  %11250 = vmatprep.mubr.msk.f32.mxu0 %vm7156_vm5, %v7389_v50  ;;  %v16946_v28 = vsub.s32 %v18046_v20, %v7137_v34 }
 0x6fb   :  { %vm7149_vm7 = vcmp.eq.s32.totalorder %v16946_v28, 0  ;;  %vm7386_vm9 = vcmp.eq.s32.totalorder %v16946_v28, 2 }
 0x7a0   :  { %v10882_v32 = vpop.f32.mrb[22].mxu0 }
 0x7a1   :  { %v10883_v0 = vpop.f32.mrb[23].mxu0 }
 0x7a2   :  { %v10884_v37 = vadd.f32 %v10883_v0, %v10882_v32  ;;  %v16952_v32 = vsub.s32 %v18046_v20, %v7140_v10  ;;  %v7143_v0 = vpop.permute.xlu0 %7142 }
 0x7a4   :  { %v7058_v33 = vadd.f32 %v10884_v37, %v16915_v12  ;;  %v10885_v7 = vpop.f32.mrb[24].mxu0  ;;  %vm7150_vm10 = vcmp.eq.s32.totalorder %v16952_v32, 0  ;;  %vm7387_vm12 = vcmp.eq.s32.totalorder %v16952_v32, 2 }
 0x7a5   :  { %v10886_v26 = vpop.f32.mrb[25].mxu0 }
 0x7a6   :  { %v10887_v63 = vadd.f32 %v10886_v26, %v10885_v7  ;;  %v7110_v15 = vmul.f32 0.01, %v7058_v33  ;;  %vm7101_vm8 = vcmp.gt.f32.partialorder %v7058_v33, 0.0  ;;  %v7153_v7 = vsel %vm7149_vm7, 1.0, %v17843_v35 }
 0x7a7   :  { %v7154_v26 = vsel %vm7150_vm10, 1.0, %v17843_v35  ;;  %vm7871_vm7 = vcmp.eq.s32.totalorder %v16904_v38, 12  ;;  %vm7872_vm10 = vcmp.eq.s32.totalorder %v16946_v28, 12 }
 0x7a8   :  { %v7063_v58 = vadd.f32 %v10887_v63, %v16915_v12  ;;  %v10888_v61 = vpop.f32.mrb[26].mxu0  ;;  %v7119_v54 = vsel %vm7101_vm8, %v7058_v33, %v7110_v15  ;;  %v16958_v33 = vsub.s32 %v18046_v20, %v7143_v0  ;;  %v7390_v20 = vsel %vm7386_vm9, 1.0, %v17843_v35 }
 0x7a9   :  { %v10889_v19 = vpop.f32.mrb[27].mxu0  ;;  %v7391_v63 = vsel %vm7387_vm12, 1.0, %v17843_v35  ;;  %vm7259_vm8 = vcmp.eq.s32.totalorder %v16904_v38, 1  ;;  %vm7512_vm9 = vcmp.eq.s32.totalorder %v16946_v28, 6  ;;  %vm7513_vm12 = vcmp.eq.s32.totalorder %v16952_v32, 6 }
 0x7aa   :  { %vm7102_vm1 = vcmp.gt.f32.partialorder %v7063_v58, 0.0  ;;  %v7111_v31 = vmul.f32 0.01, %v7063_v58  ;;  %v10890_v47 = vadd.f32 %v10889_v19, %v10888_v61  ;;  %vm7151_vm2 = vcmp.eq.s32.totalorder %v16958_v33, 0 }
 0x7ab   :  { %vm7388_vm3 = vcmp.eq.s32.totalorder %v16958_v33, 2  ;;  %v7155_v15 = vsel %vm7151_vm2, 1.0, %v17843_v35  ;;  %v7263_v61 = vsel %vm7259_vm8, 1.0, %v17843_v35  ;;  %vm7873_vm2 = vcmp.eq.s32.totalorder %v16952_v32, 12 }
 0x7ac   :  { %v7120_v2 = vsel %vm7102_vm1, %v7063_v58, %v7111_v31  ;;  %v7068_v9 = vadd.f32 %v10890_v47, %v16915_v12  ;;  %v10891_v3 = vpop.f32.mrb[28].mxu0  ;;  %vm7637_vm1 = vcmp.eq.s32.totalorder %v16904_v38, 7  ;;  %v7392_v58 = vsel %vm7388_vm3, 1.0, %v17843_v35 }
 0x7ad   :  { %v16920_v1 = vpack.c.bf16 %v7120_v2, %v7119_v54  ;;  %v10892_v36 = vpop.f32.mrb[29].mxu0  ;;  %v7641_v19 = vsel %vm7637_vm1, 1.0, %v17843_v35  ;;  %vm7514_vm3 = vcmp.eq.s32.totalorder %v16958_v33, 6  ;;  %vm7874_vm8 = vcmp.eq.s32.totalorder %v16958_v33, 12 }
 0x7ae   :  { %v10893_v53 = vadd.f32 %v10892_v36, %v10891_v3  ;;  %v7112_v24 = vmul.f32 0.01, %v7068_v9  ;;  %vm7103_vm0 = vcmp.gt.f32.partialorder %v7068_v9, 0.0  ;;  %vm7746_vm1 = vcmp.eq.s32.totalorder %v16904_v38, 8 }
 0x7af   :  { %12515 = vmatprep.subr.bf16.mxu1 %v16920_v1  ;;  %12547 = vmatprep.subr.bf16.mxu0 %v16920_v1 }
 0x7b0   :  { %v7073_v60 = vadd.f32 %v10893_v53, %v16915_v12  ;;  %v10894_v52 = vpop.f32.mrb[30].mxu0  ;;  %12517 = vmatpush3.bf16.msra.mxu1 %v16920_v1  ;;  %12549 = vmatpush3.bf16.msra.mxu0 %v16920_v1  ;;  %v7121_v49 = vsel %vm7103_vm0, %v7068_v9, %v7112_v24  ;;  %vm7260_vm0 = vcmp.eq.s32.totalorder %v16946_v28, 1  ;;  %v7875_v53 = vsel %vm7871_vm7, 1.0, %v17843_v35 }
 0x7b1   :  { %v10895_v44 = vpop.f32.mrb[31].mxu0  ;;  %v7264_v31 = vsel %vm7260_vm0, 1.0, %v17843_v35  ;;  %v7516_v24 = vsel %vm7512_vm9, 1.0, %v17843_v35  ;;  %vm8121_vm0 = vcmp.eq.s32.totalorder %v16904_v38, 14  ;;  %vm7996_vm7 = vcmp.eq.s32.totalorder %v16904_v38, 13 }
 0x7b2   :  { %vm7104_vm11 = vcmp.gt.f32.partialorder %v7073_v60, 0.0  ;;  %v7113_v59 = vmul.f32 0.01, %v7073_v60  ;;  %v10896_v18 = vadd.f32 %v10895_v44, %v10894_v52  ;;  %v7517_v52 = vsel %vm7513_vm12, 1.0, %v17843_v35 }
 0x7b3   :  { %v7877_v44 = vsel %vm7873_vm2, 1.0, %v17843_v35  ;;  %vm7997_vm9 = vcmp.eq.s32.totalorder %v16946_v28, 13  ;;  %vm7999_vm12 = vcmp.eq.s32.totalorder %v16958_v33, 13  ;;  %vm7380_vm2 = vcmask 523520  }
 0x7b4   :  { %v7122_v25 = vsel %vm7104_vm11, %v7073_v60, %v7113_v59  ;;  %v7078_v41 = vadd.f32 %v10896_v18, %v16915_v12  ;;  %v10897_v29 = vpop.f32.mrb[32].mxu0  ;;  %vm7638_vm11 = vcmp.eq.s32.totalorder %v16946_v28, 7  ;;  %v7876_v60 = vsel %vm7872_vm10, 1.0, %v17843_v35 }
 0x7b5   :  { %v16928_v40 = vpack.c.bf16 %v7122_v25, %v7121_v49  ;;  %v10898_v8 = vpop.f32.mrb[33].mxu0  ;;  %v7642_v47 = vsel %vm7638_vm11, 1.0, %v17843_v35  ;;  %v7518_v59 = vsel %vm7514_vm3, 1.0, %v17843_v35  ;;  %v7878_v18 = vsel %vm7874_vm8, 1.0, %v17843_v35 }
 0x7b6   :  { %v10899_v45 = vadd.f32 %v10898_v8, %v10897_v29  ;;  %v7114_v14 = vmul.f32 0.01, %v7078_v41  ;;  %vm7105_vm13 = vcmp.gt.f32.partialorder %v7078_v41, 0.0  ;;  %v7750_v49 = vsel %vm7746_vm1, 1.0, %v17843_v35 }
 0x7b7   :  { %12519 = vmatprep.subr.bf16.mxu1 %v16928_v40  ;;  %12551 = vmatprep.subr.bf16.mxu0 %v16928_v40  ;;  %v8125_v25 = vsel %vm8121_vm0, 1.0, %v17843_v35  ;;  %vm7747_vm11 = vcmp.eq.s32.totalorder %v16946_v28, 8  ;;  %vm7998_vm10 = vcmp.eq.s32.totalorder %v16952_v32, 13  ;;  %vm7506_vm3 = vcmask 785920  }
 0x7b8   :  { %v7083_v16 = vadd.f32 %v10899_v45, %v16915_v12  ;;  %v10900_v30 = vpop.f32.mrb[34].mxu0  ;;  %12521 = vmatpush3.bf16.msra.mxu1 %v16928_v40  ;;  %12553 = vmatpush3.bf16.msra.mxu0 %v16928_v40  ;;  %v7123_v57 = vsel %vm7105_vm13, %v7078_v41, %v7114_v14  ;;  %vm7261_vm13 = vcmp.eq.s32.totalorder %v16952_v32, 1  ;;  %v7751_v41 = vsel %vm7747_vm11, 1.0, %v17843_v35 }
 0x7b9   :  { %v10901_v21 = vpop.f32.mrb[35].mxu0  ;;  %v7265_v54 = vsel %vm7261_vm13, 1.0, %v17843_v35  ;;  %vm8122_vm13 = vcmp.eq.s32.totalorder %v16946_v28, 14  ;;  %vm7632_vm8 = vcmask 1048320   ;;  %vm8479_vm1 = vcmask 254976  }
 0x7ba   :  { %vm7106_vm14 = vcmp.gt.f32.partialorder %v7083_v16, 0.0  ;;  %v7115_v4 = vmul.f32 0.01, %v7083_v16  ;;  %v10902_v62 = vadd.f32 %v10901_v21, %v10900_v30  ;;  %v8126_v29 = vsel %vm8122_vm13, 1.0, %v17843_v35  ;;  %v8274_v21 = vld [vmem:[%s17736_s7 + $0x100] sm:$0xff] }
 0x7bb   :  { %v8000_v30 = vsel %vm7996_vm7, 1.0, %v17843_v35  ;;  %vm13002_vm7 = vmmov 0  }
 0x7bc   :  { %v7124_v6 = vsel %vm7106_vm14, %v7083_v16, %v7115_v4  ;;  %v7088_v46 = vadd.f32 %v10902_v62, %v16915_v12  ;;  %v10903_v43 = vpop.f32.mrb[36].mxu0  ;;  %vm7639_vm14 = vcmp.eq.s32.totalorder %v16952_v32, 7  ;;  %v8275_v4 = vld [vmem:[%s17736_s7 + $0x108] sm:$0xff] }
 0x7bd   :  { %v16936_v13 = vpack.c.bf16 %v7124_v6, %v7123_v57  ;;  %v10904_v55 = vpop.f32.mrb[37].mxu0  ;;  %v7643_v2 = vsel %vm7639_vm14, 1.0, %v17843_v35  ;;  %vm7748_vm14 = vcmp.eq.s32.totalorder %v16952_v32, 8  ;;  %v12690_v62 = vpack.c.bf16 %v8275_v4, %v8274_v21  ;;  %v8276_v57 = vld [vmem:[%s17736_s7 + $0x110] sm:$0xff]  ;;  %v8277_v6 = vld [vmem:[%s17736_s7 + $0x118] sm:$0xff] }
 0x7be   :  { %v10905_v42 = vadd.f32 %v10904_v55, %v10903_v43  ;;  %v7116_v27 = vmul.f32 0.01, %v7088_v46  ;;  %vm7107_vm15 = vcmp.gt.f32.partialorder %v7088_v46, 0.0  ;;  %v7752_v8 = vsel %vm7748_vm14, 1.0, %v17843_v35 }
 0x7bf   :  { %12523 = vmatprep.subr.bf16.mxu1 %v16936_v13  ;;  %12555 = vmatprep.subr.bf16.mxu0 %v16936_v13 }
 0x7c0   :  { %v7093_v56 = vadd.f32 %v10905_v42, %v16915_v12  ;;  %12525 = vmatpush3.bf16.msra.mxu1 %v16936_v13  ;;  %12557 = vmatpush3.bf16.msra.mxu0 %v16936_v13  ;;  %v7125_v11 = vsel %vm7107_vm15, %v7088_v46, %v7116_v27  ;;  %vm7262_vm15 = vcmp.eq.s32.totalorder %v16958_v33, 1  ;;  %v12694_v46 = vpack.c.bf16 %v8277_v6, %v8276_v57 }
 0x7c1   :  { %v7266_v9 = vsel %vm7262_vm15, 1.0, %v17843_v35  ;;  %vm8123_vm15 = vcmp.eq.s32.totalorder %v16952_v32, 14 }
 0x7c2   :  { %vm7108_vm4 = vcmp.gt.f32.partialorder %v7093_v56, 0.0  ;;  %v7117_v48 = vmul.f32 0.01, %v7093_v56  ;;  %v8127_v45 = vsel %vm8123_vm15, 1.0, %v17843_v35  ;;  %vm8493_vm15 = vcmask 517376  }
 0x7c3   :  { %v10906_v23 = vpop.f32.mrb[38].mxu0 }
 0x7c4   :  { %v7126_v22 = vsel %vm7108_vm4, %v7093_v56, %v7117_v48  ;;  %v10907_v39 = vpop.f32.mrb[39].mxu0  ;;  %vm7640_vm4 = vcmp.eq.s32.totalorder %v16958_v33, 7 }
 0x7c5   :  { %v16943_v51 = vpack.c.bf16 %v7126_v22, %v7125_v11  ;;  %v10908_v5 = vadd.f32 %v10907_v39, %v10906_v23  ;;  %v7644_v3 = vsel %vm7640_vm4, 1.0, %v17843_v35  ;;  %vm7749_vm4 = vcmp.eq.s32.totalorder %v16958_v33, 8 }
 0x7c6   :  { %v7753_v14 = vsel %vm7749_vm4, 1.0, %v17843_v35  ;;  %vm8506_vm4 = vcmask 779776  }
 0x7c7   :  { %v7098_v50 = vadd.f32 %v10908_v5, %v16915_v12  ;;  %12527 = vmatprep.subr.bf16.mxu1 %v16943_v51  ;;  %12559 = vmatprep.subr.bf16.mxu0 %v16943_v51 }
 0x7c8   :  { %12529 = vmatpush3.bf16.msra.mxu1 %v16943_v51  ;;  %12561 = vmatpush3.bf16.msra.mxu0 %v16943_v51 }
 0x7c9   :  { %vm7109_vm6 = vcmp.gt.f32.partialorder %v7098_v50, 0.0  ;;  %v7118_v37 = vmul.f32 0.01, %v7098_v50 }
 0x7cb   :  { %v16960_v12 = vsel %vm7109_vm6, %v7098_v50, %v7118_v37  ;;  %vm7511_vm6 = vcmp.eq.s32.totalorder %v16904_v38, 6  ;;  %v8001_v38 = vsel %vm7997_vm9, 1.0, %v17843_v35  ;;  %vm8859_vm9 = vcmask 523264  }
 0x7cc   :  { %11200 = vmatprep.subr.mxu1 %v16960_v12  ;;  %11248 = vmatprep.subr.mxu0 %v16960_v12  ;;  %v7515_v36 = vsel %vm7511_vm6, 1.0, %v17843_v35  ;;  %vm8124_vm6 = vcmp.eq.s32.totalorder %v16958_v33, 14  ;;  %v8258_v33 = vld [vmem:[%s17736_s7 + $0x80] sm:$0xff] }
 0x7cd   :  { %11201 = vmatpush3.msra.mxu1 %v16960_v12  ;;  %11249 = vmatpush3.msra.mxu0 %v16960_v12  ;;  %v8128_v16 = vsel %vm8124_vm6, 1.0, %v17843_v35  ;;  %vm8512_vm6 = vcmask 1042176  }
 0x7ce   :  { %11203 = vmatmul.mubr.msk.f32.vlgmr.msra.gmra.mrb[140].mxu1 %vm7156_vm5, %v7153_v7  ;;  %12531 = vmatprep.subr.bf16.mxu1 %v16920_v1 }
 0x7cf   :  { %11251 = vmatmul.mubr.msk.f32.vlgmr.msra.gmra.mrb[40].mxu0 %vm7156_vm5, %v7390_v20  ;;  %12579 = vmatprep.subr.bf16.mxu0 %v16920_v1 }
 0x7d0   :  { %11205 = vmatprep.mubr.msk.f32.mxu1 %vm7156_vm5, %v7154_v26  ;;  %12533 = vmatpush3.bf16.msra.mxu1 %v16920_v1 }
 0x7d1   :  { %11253 = vmatprep.mubr.msk.f32.mxu0 %vm7156_vm5, %v7391_v63  ;;  %12581 = vmatpush3.bf16.msra.mxu0 %v16920_v1 }
 0x7d2   :  { %12535 = vmatprep.subr.bf16.mxu1 %v16928_v40  ;;  %12583 = vmatprep.subr.bf16.mxu0 %v16928_v40 }
 0x7d3   :  { %11206 = vmatmul.mubr.msk.f32.gmra.mrb[142].mxu1 %vm7156_vm5, %v7155_v15  ;;  %11254 = vmatmul.mubr.msk.f32.gmra.mrb[42].mxu0 %vm7156_vm5, %v7392_v58  ;;  %v8242_v58 = vld [vmem:[%s17736_s7] sm:$0xff] }
 0x7d4   :  { %12537 = vmatpush3.bf16.msra.mxu1 %v16928_v40  ;;  %11226 = vmatprep.mubr.msk.f32.mxu1 %vm7156_vm5, %v7263_v61  ;;  %v8243_v61 = vld [vmem:[%s17736_s7 + $0x8] sm:$0xff] }
 0x7d5   :  { %12585 = vmatpush3.bf16.msra.mxu0 %v16928_v40  ;;  %11298 = vmatprep.mubr.msk.f32.mxu0 %vm7156_vm5, %v7641_v19  ;;  %v8260_v19 = vld [vmem:[%s17736_s7 + $0x90] sm:$0xff] }
 0x7d6   :  { %12539 = vmatprep.subr.bf16.mxu1 %v16936_v13  ;;  %12587 = vmatprep.subr.bf16.mxu0 %v16936_v13 }
 0x7d8   :  { %12541 = vmatpush3.bf16.msra.mxu1 %v16936_v13 }
 0x7d9   :  { %12589 = vmatpush3.bf16.msra.mxu0 %v16936_v13  ;;  %12543 = vmatprep.subr.bf16.mxu1 %v16943_v51 }
 0x7da   :  { %12591 = vmatprep.subr.bf16.mxu0 %v16943_v51 }
 0x7dc   :  { %12545 = vmatpush3.bf16.msra.mxu1 %v16943_v51 }
 0x7dd   :  { %12593 = vmatpush3.bf16.msra.mxu0 %v16943_v51  ;;  %11224 = vmatprep.subr.mxu1 %v16960_v12 }
 0x7de   :  { %11296 = vmatprep.subr.mxu0 %v16960_v12 }
 0x7e0   :  { %11225 = vmatpush3.msra.mxu1 %v16960_v12 }
 0x7e1   :  { %11297 = vmatpush3.msra.mxu0 %v16960_v12  ;;  %11227 = vmatmul.mubr.msk.f32.vlgmr.msra.gmra.mrb[144].mxu1 %vm7156_vm5, %v7264_v31  ;;  %v12660_v31 = vpack.c.bf16 %v8243_v61, %v8242_v58 }
 0x7e2   :  { %12563 = vmatprep.subr.bf16.mxu1 %v16920_v1  ;;  %11299 = vmatmul.mubr.msk.f32.vlgmr.msra.gmra.mrb[44].mxu0 %vm7156_vm5, %v7642_v47  ;;  %v8261_v47 = vld [vmem:[%s17736_s7 + $0x98] sm:$0xff] }
 0x7e3   :  { %12611 = vmatprep.subr.bf16.mxu0 %v16920_v1  ;;  %11229 = vmatprep.mubr.msk.f32.mxu1 %vm7156_vm5, %v7265_v54  ;;  %v12662_v54 = vpack.c.bf16 %v8261_v47, %v8260_v19 }
 0x7e4   :  { %12565 = vmatpush3.bf16.msra.mxu1 %v16920_v1  ;;  %11301 = vmatprep.mubr.msk.f32.mxu0 %vm7156_vm5, %v7643_v2  ;;  %v8244_v2 = vld [vmem:[%s17736_s7 + $0x10] sm:$0xff] }
 0x7e5   :  { %12613 = vmatpush3.bf16.msra.mxu0 %v16920_v1  ;;  %12567 = vmatprep.subr.bf16.mxu1 %v16928_v40 }
 0x7e6   :  { %12615 = vmatprep.subr.bf16.mxu0 %v16928_v40  ;;  %11230 = vmatmul.mubr.msk.f32.gmra.mrb[146].mxu1 %vm7156_vm5, %v7266_v9  ;;  %v8245_v9 = vld [vmem:[%s17736_s7 + $0x18] sm:$0xff] }
 0x7e7   :  { %11302 = vmatmul.mubr.msk.f32.gmra.mrb[46].mxu0 %vm7156_vm5, %v7644_v3  ;;  %11274 = vmatprep.mubr.msk.f32.mxu1 %vm7156_vm5, %v7515_v36  ;;  %v8262_v3 = vld [vmem:[%s17736_s7 + $0xa0] sm:$0xff]  ;;  %v12664_v36 = vpack.c.bf16 %v8245_v9, %v8244_v2 }
 0x7e8   :  { %12569 = vmatpush3.bf16.msra.mxu1 %v16928_v40  ;;  %11346 = vmatprep.mubr.msk.f32.mxu0 %vm7156_vm5, %v7875_v53  ;;  %v8263_v53 = vld [vmem:[%s17736_s7 + $0xa8] sm:$0xff] }
 0x7e9   :  { %12617 = vmatpush3.bf16.msra.mxu0 %v16928_v40  ;;  %12571 = vmatprep.subr.bf16.mxu1 %v16936_v13 }
 0x7ea   :  { %12619 = vmatprep.subr.bf16.mxu0 %v16936_v13 }
 0x7ec   :  { %12573 = vmatpush3.bf16.msra.mxu1 %v16936_v13 }
 0x7ed   :  { %12621 = vmatpush3.bf16.msra.mxu0 %v16936_v13  ;;  %12575 = vmatprep.subr.bf16.mxu1 %v16943_v51 }
 0x7ee   :  { %12623 = vmatprep.subr.bf16.mxu0 %v16943_v51 }
 0x7f0   :  { %12577 = vmatpush3.bf16.msra.mxu1 %v16943_v51 }
 0x7f1   :  { %12625 = vmatpush3.bf16.msra.mxu0 %v16943_v51  ;;  %11272 = vmatprep.subr.mxu1 %v16960_v12 }
 0x7f2   :  { %11344 = vmatprep.subr.mxu0 %v16960_v12 }
 0x7f4   :  { %11273 = vmatpush3.msra.mxu1 %v16960_v12 }
 0x7f5   :  { %11345 = vmatpush3.msra.mxu0 %v16960_v12  ;;  %11275 = vmatmul.mubr.msk.f32.vlgmr.msra.gmra.mrb[148].mxu1 %vm7156_vm5, %v7516_v24  ;;  %v12666_v24 = vpack.c.bf16 %v8263_v53, %v8262_v3 }
 0x7f6   :  { %12595 = vmatprep.subr.bf16.mxu1 %v16920_v1  ;;  %11347 = vmatmul.mubr.msk.f32.vlgmr.msra.gmra.mrb[48].mxu0 %vm7156_vm5, %v7876_v60  ;;  %v8246_v60 = vld [vmem:[%s17736_s7 + $0x20] sm:$0xff] }
 0x7f7   :  { %12643 = vmatprep.subr.bf16.mxu0 %v16920_v1  ;;  %11277 = vmatprep.mubr.msk.f32.mxu1 %vm7156_vm5, %v7517_v52  ;;  %v8247_v52 = vld [vmem:[%s17736_s7 + $0x28] sm:$0xff] }
 0x7f8   :  { %12597 = vmatpush3.bf16.msra.mxu1 %v16920_v1  ;;  %11349 = vmatprep.mubr.msk.f32.mxu0 %vm7156_vm5, %v7877_v44  ;;  %v8264_v44 = vld [vmem:[%s17736_s7 + $0xb0] sm:$0xff] }
 0x7f9   :  { %12645 = vmatpush3.bf16.msra.mxu0 %v16920_v1  ;;  %12599 = vmatprep.subr.bf16.mxu1 %v16928_v40 }
 0x7fa   :  { %12647 = vmatprep.subr.bf16.mxu0 %v16928_v40  ;;  %11278 = vmatmul.mubr.msk.f32.gmra.mrb[150].mxu1 %vm7156_vm5, %v7518_v59  ;;  %v12668_v59 = vpack.c.bf16 %v8247_v52, %v8246_v60 }
 0x7fb   :  { %11350 = vmatmul.mubr.msk.f32.gmra.mrb[50].mxu0 %vm7156_vm5, %v7878_v18  ;;  %11322 = vmatprep.mubr.msk.f32.mxu1 %vm7156_vm5, %v7750_v49  ;;  %v8265_v18 = vld [vmem:[%s17736_s7 + $0xb8] sm:$0xff] }
 0x7fc   :  { %12601 = vmatpush3.bf16.msra.mxu1 %v16928_v40  ;;  %11394 = vmatprep.mubr.msk.f32.mxu0 %vm7156_vm5, %v8125_v25  ;;  %v12670_v49 = vpack.c.bf16 %v8265_v18, %v8264_v44 }
 0x7fd   :  { %12649 = vmatpush3.bf16.msra.mxu0 %v16928_v40  ;;  %12603 = vmatprep.subr.bf16.mxu1 %v16936_v13 }
 0x7fe   :  { %12651 = vmatprep.subr.bf16.mxu0 %v16936_v13 }
 0x800   :  { %12605 = vmatpush3.bf16.msra.mxu1 %v16936_v13 }
 0x801   :  { %12653 = vmatpush3.bf16.msra.mxu0 %v16936_v13  ;;  %12607 = vmatprep.subr.bf16.mxu1 %v16943_v51 }
 0x802   :  { %12655 = vmatprep.subr.bf16.mxu0 %v16943_v51 }
 0x804   :  { %12609 = vmatpush3.bf16.msra.mxu1 %v16943_v51 }
 0x805   :  { %12657 = vmatpush3.bf16.msra.mxu0 %v16943_v51  ;;  %11320 = vmatprep.subr.mxu1 %v16960_v12 }
 0x806   :  { %11392 = vmatprep.subr.mxu0 %v16960_v12 }
 0x808   :  { %11321 = vmatpush3.msra.mxu1 %v16960_v12 }
 0x809   :  { %11393 = vmatpush3.msra.mxu0 %v16960_v12  ;;  %11323 = vmatmul.mubr.msk.f32.vlgmr.msra.gmra.mrb[152].mxu1 %vm7156_vm5, %v7751_v41 }
 0x80a   :  { %12627 = vmatprep.subr.bf16.mxu1 %v16920_v1  ;;  %11395 = vmatmul.mubr.msk.f32.vlgmr.msra.gmra.mrb[52].mxu0 %vm7156_vm5, %v8126_v29 }
 0x80b   :  { %11325 = vmatprep.mubr.msk.f32.mxu1 %vm7156_vm5, %v7752_v8  ;;  %12629 = vmatpush3.bf16.msra.mxu1 %v16920_v1  ;;  %v8002_v1 = vsel %vm7998_vm10, 1.0, %v17843_v35  ;;  %v8248_v8 = vld [vmem:[%s17736_s7 + $0x30] sm:$0xff] }
 0x80c   :  { %11397 = vmatprep.mubr.msk.f32.mxu0 %vm7156_vm5, %v8127_v45  ;;  %12631 = vmatprep.subr.bf16.mxu1 %v16928_v40  ;;  %v8249_v45 = vld [vmem:[%s17736_s7 + $0x38] sm:$0xff] }
 0x80d   :  { %11326 = vmatmul.mubr.msk.f32.gmra.mrb[154].mxu1 %vm7156_vm5, %v7753_v14  ;;  %12691 = vmatprep.subr.bf16.mxu0 %v12690_v62  ;;  %v8266_v14 = vld [vmem:[%s17736_s7 + $0xc0] sm:$0xff] }
 0x80e   :  { %11398 = vmatmul.mubr.msk.f32.gmra.mrb[54].mxu0 %vm7156_vm5, %v8128_v16  ;;  %11370 = vmatprep.mubr.msk.f32.mxu1 %vm7156_vm5, %v8000_v30  ;;  %v12672_v30 = vpack.c.bf16 %v8249_v45, %v8248_v8 }
 0x80f   :  { %12633 = vmatpush3.bf16.msra.mxu1 %v16928_v40  ;;  %v8003_v40 = vsel %vm7999_vm12, 1.0, %v17843_v35  ;;  %12693 = vmatpush3.bf16.msra.mxu0 %v12690_v62  ;;  %vm9197_vm12 = vcmask 123904  }
 0x810   :  { %12635 = vmatprep.subr.bf16.mxu1 %v16936_v13  ;;  %12695 = vmatprep.subr.bf16.mxu0 %v12694_v46 }
 0x813   :  { %12637 = vmatpush3.bf16.msra.mxu1 %v16936_v13  ;;  %12697 = vmatpush3.bf16.msra.mxu0 %v12694_v46 }
 0x814   :  { %12639 = vmatprep.subr.bf16.mxu1 %v16943_v51 }
 0x817   :  { %12641 = vmatpush3.bf16.msra.mxu1 %v16943_v51 }
 0x818   :  { %11368 = vmatprep.subr.mxu1 %v16960_v12 }
 0x81b   :  { %11369 = vmatpush3.msra.mxu1 %v16960_v12  ;;  %v8259_v12 = vld [vmem:[%s17736_s7 + $0x88] sm:$0xff] }
 0x81c   :  { %11371 = vmatmul.mubr.msk.f32.vlgmr.msra.gmra.mrb[156].mxu1 %vm7156_vm5, %v8001_v38  ;;  %v12658_v20 = vpack.c.bf16 %v8259_v12, %v8258_v33  ;;  %v8267_v38 = vld [vmem:[%s17736_s7 + $0xc8] sm:$0xff]  ;;  %v8257_v33 = vld [vmem:[%s17736_s7 + $0x78] sm:$0xff] }
 0x81d   :  { %11373 = vmatprep.mubr.msk.f32.mxu1 %vm7156_vm5, %v8002_v1  ;;  %v8250_v1 = vld [vmem:[%s17736_s7 + $0x40] sm:$0xff]  ;;  %v12674_v21 = vpack.c.bf16 %v8267_v38, %v8266_v14 }
 0x81e   :  { %12659 = vmatprep.subr.bf16.mxu1 %v12658_v20 }
 0x81f   :  { %12661 = vmatpush3.bf16.msra.mxu1 %v12660_v31 }
 0x820   :  { %11374 = vmatmul.mubr.msk.f32.gmra.mrb[158].mxu1 %vm7156_vm5, %v8003_v40  ;;  %vm7254_vm5 = vcmask 261120   ;;  %12663 = vmatprep.subr.bf16.mxu1 %v12662_v54  ;;  %v8251_v40 = vld [vmem:[%s17736_s7 + $0x48] sm:$0xff] }
 0x821   :  { %v12676_v62 = vpack.c.bf16 %v8251_v40, %v8250_v1 }
 0x823   :  { %12665 = vmatpush3.bf16.msra.mxu1 %v12664_v36 }
 0x824   :  { %12667 = vmatprep.subr.bf16.mxu1 %v12666_v24 }
 0x827   :  { %12669 = vmatpush3.bf16.msra.mxu1 %v12668_v59 }
 0x828   :  { %12671 = vmatprep.subr.bf16.mxu1 %v12670_v49 }
 0x82b   :  { %12673 = vmatpush3.bf16.msra.mxu1 %v12672_v30 }
 0x82c   :  { %12675 = vmatprep.subr.bf16.mxu1 %v12674_v21 }
 0x82f   :  { %12677 = vmatpush3.bf16.msra.mxu1 %v12676_v62 }
 0x8a1   :  { %v11204_v43 = vpop.f32.mrb[140].mxu1 }
 0x8a2   :  { %7256 = vst.msk [vmem:[#allocation3 + $0x18] sm:$0xff] %vm7254_vm5, %v11204_v43  ;;  %v11252_v13 = vpop.f32.mrb[40].mxu0  ;;  %v7235_v55 = vpop.f32.mrb[141].mxu1  ;;  %v8268_v43 = vld [vmem:[%s17736_s7 + $0xd0] sm:$0xff] }
 0x8a3   :  { %7496 = vrot.lane.b32.xlu0 %v11252_v13, %s12997_s0  ;;  %7255 = vst.msk [vmem:[#allocation3] sm:$0xff] %vm7254_vm5, %v7235_v55  ;;  %v7471_v42 = vpop.f32.mrb[41].mxu0  ;;  %v8269_v13 = vld [vmem:[%s17736_s7 + $0xd8] sm:$0xff]  ;;  %v8252_v55 = vld [vmem:[%s17736_s7 + $0x50] sm:$0xff] }
 0x8a6   :  { %v11207_v27 = vpop.f32.mrb[142].mxu1  ;;  %v11255_v56 = vpop.f32.mrb[42].mxu0 }
 0x8a7   :  { %7258 = vst.msk [vmem:[#allocation3 + $0x48] sm:$0xff] %vm7254_vm5, %v11207_v27  ;;  %7494 = vrot.lane.b32.xlu0 %v7471_v42, %s12997_s0  ;;  %v7245_v34 = vpop.f32.mrb[143].mxu1  ;;  %v7481_v48 = vpop.f32.mrb[43].mxu0  ;;  %v12678_v42 = vpack.c.bf16 %v8269_v13, %v8268_v43  ;;  %v8253_v27 = vld [vmem:[%s17736_s7 + $0x58] sm:$0xff]  ;;  %v13001_v43 = vmov 1983009808  }
 0x8a8   :  { %7257 = vst.msk [vmem:[#allocation3 + $0x30] sm:$0xff] %vm7254_vm5, %v7245_v34  ;;  %v8483_v13 = vunpack.c.l.s4 %v13001_v43 }
 0x8a9   :  { %12679 = vmatprep.subr.bf16.mxu1 %v12678_v42  ;;  %v17317_v42 = vld [vmem:[%s17737_s8] ss:$0 sm:$0xff] }
 0x8ab   :  { %7498 = vrot.lane.b32.xlu0 %v7481_v48, %s12997_s0 }
 0x8b4   :  { %v11228_v23 = vpop.f32.mrb[144].mxu1 }
 0x8b5   :  { %v11300_v11 = vpop.f32.mrb[44].mxu0  ;;  %7370 = vrot.lane.b32.xlu0 %v11228_v23, %s12995_s30  ;;  %v7345_v22 = vpop.f32.mrb[145].mxu1  ;;  %v8270_v23 = vld [vmem:[%s17736_s7 + $0xe0] sm:$0xff] }
 0x8b6   :  { %7743 = vst.msk [vmem:[#allocation3 + $0x20] sm:$0xff] %vm7254_vm5, %v11300_v11  ;;  %v7723_v39 = vpop.f32.mrb[45].mxu0  ;;  %v8271_v11 = vld [vmem:[%s17736_s7 + $0xe8] sm:$0xff] }
 0x8b7   :  { %7742 = vst.msk [vmem:[#allocation3 + $0x8] sm:$0xff] %vm7254_vm5, %v7723_v39  ;;  %v12682_v39 = vpack.c.bf16 %v8271_v11, %v8270_v23 }
 0x8b9   :  { %v11231_v10 = vpop.f32.mrb[146].mxu1  ;;  %7368 = vrot.lane.b32.xlu0 %v7345_v22, %s12995_s30  ;;  %v8254_v22 = vld [vmem:[%s17736_s7 + $0x60] sm:$0xff] }
 0x8ba   :  { %v11303_v51 = vpop.f32.mrb[46].mxu0  ;;  %v7355_v5 = vpop.f32.mrb[147].mxu1 }
 0x8bb   :  { %7745 = vst.msk [vmem:[#allocation3 + $0x50] sm:$0xff] %vm7254_vm5, %v11303_v51  ;;  %v7733_v28 = vpop.f32.mrb[47].mxu0 }
 0x8bc   :  { %7744 = vst.msk [vmem:[#allocation3 + $0x38] sm:$0xff] %vm7254_vm5, %v7733_v28 }
 0x8bd   :  { %7374 = vrot.lane.b32.xlu0 %v11231_v10, %s12995_s30  ;;  %v8255_v10 = vld [vmem:[%s17736_s7 + $0x68] sm:$0xff] }
 0x8be   :  { %v12684_v51 = vpack.c.bf16 %v8255_v10, %v8254_v22 }
 0x8c1   :  { %7372 = vrot.lane.b32.xlu0 %v7355_v5, %s12995_s30 }
 0x8c8   :  { %v11276_v50 = vpop.f32.mrb[148].mxu1 }
 0x8c9   :  { %v11348_v32 = vpop.f32.mrb[48].mxu0  ;;  %7622 = vrot.lane.b32.xlu0 %v11276_v50, %s12999_s23  ;;  %v7597_v0 = vpop.f32.mrb[149].mxu1  ;;  %v8272_v50 = vld [vmem:[%s17736_s7 + $0xf0] sm:$0xff] }
 0x8ca   :  { %7982 = vrot.lane.b32.xlu1 %v11348_v32, %s12997_s0  ;;  %v7957_v37 = vpop.f32.mrb[49].mxu0  ;;  %v8273_v32 = vld [vmem:[%s17736_s7 + $0xf8] sm:$0xff] }
 0x8cd   :  { %v11279_v7 = vpop.f32.mrb[150].mxu1  ;;  %7620 = vrot.lane.b32.xlu0 %v7597_v0, %s12999_s23  ;;  %v8256_v0 = vld [vmem:[%s17736_s7 + $0x70] sm:$0xff] }
 0x8ce   :  { %v17173_v26 = vpop.f32.mrb[50].mxu0  ;;  %7980 = vrot.lane.b32.xlu1 %v7957_v37, %s12997_s0  ;;  %v7607_v63 = vpop.f32.mrb[151].mxu1  ;;  %v12686_v37 = vpack.c.bf16 %v8273_v32, %v8272_v50  ;;  %v12688_v12 = vpack.c.bf16 %v8257_v33, %v8256_v0  ;;  %v8625_v50 = vld [vmem:[%s17738_s9 + $0x88] sm:$0xff]  ;;  %v8608_v32 = vld [vmem:[%s17738_s9] sm:$0xff] }
 0x8cf   :  { %v7967_v15 = vpop.f32.mrb[51].mxu0 }
 0x8d1   :  { %7624 = vrot.lane.b32.xlu0 %v7607_v63, %s12999_s23 }
 0x8d2   :  { %7984 = vrot.lane.b32.xlu1 %v7967_v15, %s12997_s0 }
 0x8d5   :  { %7500 = vrot.lane.b32.xlu0 %v11255_v56, %s12997_s0  ;;  %v12680_v56 = vpack.c.bf16 %v8253_v27, %v8252_v55 }
 0x8d7   :  { %12681 = vmatpush3.bf16.msra.mxu1 %v12680_v56 }
 0x8d8   :  { %12683 = vmatprep.subr.bf16.mxu1 %v12682_v39 }
 0x8d9   :  { %7626 = vrot.lane.b32.xlu0 %v11279_v7, %s12999_s23 }
 0x8db   :  { %12685 = vmatpush3.bf16.msra.mxu1 %v12684_v51 }
 0x8dc   :  { %v11324_v25 = vpop.f32.mrb[152].mxu1  ;;  %12687 = vmatprep.subr.bf16.mxu1 %v12686_v37 }
 0x8dd   :  { %v11396_v41 = vpop.f32.mrb[52].mxu0  ;;  %7857 = vrot.lane.b32.xlu1 %v11324_v25, %s12995_s30  ;;  %v7832_v29 = vpop.f32.mrb[153].mxu1 }
 0x8de   :  { %8227 = vst.msk [vmem:[#allocation3 + $0x28] sm:$0xff] %vm7254_vm5, %v11396_v41  ;;  %v8207_v16 = vpop.f32.mrb[53].mxu0 }
 0x8df   :  { %8226 = vst.msk [vmem:[#allocation3 + $0x10] sm:$0xff] %vm7254_vm5, %v8207_v16  ;;  %12689 = vmatpush3.bf16.msra.mxu1 %v12688_v12 }
 0x8e0   :  { %v11327_v4 = vpop.f32.mrb[154].mxu1 }
 0x8e1   :  { %v11399_v57 = vpop.f32.mrb[54].mxu0  ;;  %7855 = vrot.lane.b32.xlu1 %v7832_v29, %s12995_s30  ;;  %v7842_v6 = vpop.f32.mrb[155].mxu1 }
 0x8e2   :  { %8229 = vst.msk [vmem:[#allocation3 + $0x58] sm:$0xff] %vm7254_vm5, %v11399_v57  ;;  %v8217_v46 = vpop.f32.mrb[55].mxu0 }
 0x8e3   :  { %8228 = vst.msk [vmem:[#allocation3 + $0x40] sm:$0xff] %vm7254_vm5, %v8217_v46 }
 0x8e5   :  { %7861 = vrot.lane.b32.xlu1 %v11327_v4, %s12995_s30  ;;  %v8235_v48 = vld [vmem:[#allocation3 + $0x28] sm:$0xff] }
 0x8e6   :  { %v8232_v34 = vld [vmem:[#allocation3 + $0x10] sm:$0xff] }
 0x8e7   :  { %11408 = vmatprep.mubr.msk.f32.mxu0 %vm7254_vm5, %v8232_v34  ;;  %v8484_v34 = vunpack.c.0.s8 %v8483_v13 }
 0x8e8   :  { %11409 = vmatmul.mubr.msk.f32.vlgmr.msra.gmra.mrb[56].mxu0 %vm7254_vm5, %v8235_v48  ;;  %v18047_v48 = vlaneseq }
 0x8e9   :  { %7859 = vrot.lane.b32.xlu1 %v7842_v6, %s12995_s30  ;;  %v8241_v28 = vld [vmem:[#allocation3 + $0x58] sm:$0xff] }
 0x8ea   :  { %v8238_v5 = vld [vmem:[#allocation3 + $0x40] sm:$0xff]  ;;  %v8486_v23 = vshrl.u32 %v18047_v48, 7 }
 0x8eb   :  { %11411 = vmatprep.mubr.msk.f32.mxu0 %vm7254_vm5, %v8238_v5 }
 0x8ec   :  { %11412 = vmatmul.mubr.msk.f32.gmra.mrb[58].mxu0 %vm7254_vm5, %v8241_v28  ;;  %v17321_v5 = vsub.s32 %v8484_v34, %v8486_v23  ;;  %v8624_v28 = vld [vmem:[%s17738_s9 + $0x80] sm:$0xff]  ;;  %vm9230_vm5 = vcmask 255104  }
 0x8ed   :  { %v12698_v12 = vpack.c.bf16 %v8625_v50, %v8624_v28  ;;  %v8630_v28 = vld [vmem:[%s17738_s9 + $0xb0] sm:$0xff]  ;;  %v8631_v50 = vld [vmem:[%s17738_s9 + $0xb8] sm:$0xff] }
 0x8ef   :  { %v11372_v7 = vpop.f32.mrb[156].mxu1  ;;  %12699 = vmatprep.subr.bf16.mxu0 %v12698_v12  ;;  %v8615_v12 = vld [vmem:[%s17738_s9 + $0x38] sm:$0xff] }
 0x8f0   :  { %8107 = vrot.lane.b32.xlu1 %v11372_v7, %s12999_s23  ;;  %v8082_v20 = vpop.f32.mrb[157].mxu1  ;;  %v8609_v7 = vld [vmem:[%s17738_s9 + $0x8] sm:$0xff] }
 0x8f3   :  { %v11375_v63 = vpop.f32.mrb[158].mxu1 }
 0x8f4   :  { %8105 = vrot.lane.b32.xlu1 %v8082_v20, %s12999_s23  ;;  %v8092_v15 = vpop.f32.mrb[159].mxu1  ;;  %v8656_v20 = vld [vmem:[%s17738_s9 + $0x180] sm:$0xff] }
 0x8f8   :  { %7986 = vrot.lane.b32.xlu1 %v17173_v26, %s12997_s0 }
 0x8fc   :  { %8109 = vrot.lane.b32.xlu1 %v8092_v15, %s12999_s23  ;;  %v12700_v15 = vpack.c.bf16 %v8609_v7, %v8608_v32  ;;  %v8614_v32 = vld [vmem:[%s17738_s9 + $0x30] sm:$0xff] }
 0x8fd   :  { %v8662_v7 = vld [vmem:[%s17738_s9 + $0x1b0] sm:$0xff] }
 0x8fe   :  { %12701 = vmatpush3.bf16.msra.mxu0 %v12700_v15 }
 0x900   :  { %8111 = vrot.lane.b32.xlu1 %v11375_v63, %s12999_s23 }
 0x915   :  { %v7497_v58 = vpop.permute.xlu0 %7496 }
 0x919   :  { %v7495_v61 = vpop.permute.xlu0 %7494 }
 0x91d   :  { %v7499_v19 = vpop.permute.xlu0 %7498 }
 0x927   :  { %v7371_v31 = vpop.permute.xlu0 %7370 }
 0x928   :  { %7382 = vst.msk [vmem:[#allocation3 + $0x18] sm:$0xff] %vm7380_vm2, %v7371_v31 }
 0x929   :  { %7508 = vst.msk [vmem:[#allocation3 + $0x18] sm:$0xff] %vm7506_vm3, %v7497_v58  ;;  %v8657_v58 = vld [vmem:[%s17738_s9 + $0x188] sm:$0xff] }
 0x92b   :  { %v7369_v47 = vpop.permute.xlu0 %7368 }
 0x92c   :  { %7381 = vst.msk [vmem:[#allocation3] sm:$0xff] %vm7380_vm2, %v7369_v47  ;;  %v12730_v47 = vpack.c.bf16 %v8657_v58, %v8656_v20  ;;  %v8663_v20 = vld [vmem:[%s17738_s9 + $0x1b8] sm:$0xff]  ;;  %v12712_v58 = vpack.c.bf16 %v8615_v12, %v8614_v32  ;;  %v8622_v32 = vld [vmem:[%s17738_s9 + $0x70] sm:$0xff] }
 0x92d   :  { %7507 = vst.msk [vmem:[#allocation3] sm:$0xff] %vm7506_vm3, %v7495_v61  ;;  %v8670_v12 = vld [vmem:[%s17738_s9 + $0x1f0] sm:$0xff] }
 0x92e   :  { %12731 = vmatprep.subr.bf16.mxu1 %v12730_v47  ;;  %v8647_v47 = vld [vmem:[%s17738_s9 + $0x138] sm:$0xff] }
 0x92f   :  { %v7375_v26 = vpop.permute.xlu0 %7374 }
 0x930   :  { %7384 = vst.msk [vmem:[#allocation3 + $0x48] sm:$0xff] %vm7380_vm2, %v7375_v26  ;;  %v8640_v26 = vld [vmem:[%s17738_s9 + $0x100] sm:$0xff] }
 0x933   :  { %v7373_v54 = vpop.permute.xlu0 %7372 }
 0x934   :  { %7383 = vst.msk [vmem:[#allocation3 + $0x30] sm:$0xff] %vm7380_vm2, %v7373_v54  ;;  %v8641_v54 = vld [vmem:[%s17738_s9 + $0x108] sm:$0xff] }
 0x935   :  { %7509 = vst.msk [vmem:[#allocation3 + $0x30] sm:$0xff] %vm7506_vm3, %v7499_v19 }
 0x93b   :  { %v7623_v2 = vpop.permute.xlu0 %7622 }
 0x93c   :  { %7634 = vst.msk [vmem:[#allocation3 + $0x18] sm:$0xff] %vm7632_vm8, %v7623_v2  ;;  %v7983_v9 = vpop.permute.xlu1 %7982  ;;  %v8626_v2 = vld [vmem:[%s17738_s9 + $0x90] sm:$0xff] }
 0x93f   :  { %v7621_v3 = vpop.permute.xlu0 %7620 }
 0x940   :  { %7633 = vst.msk [vmem:[#allocation3] sm:$0xff] %vm7632_vm8, %v7621_v3  ;;  %v7981_v53 = vpop.permute.xlu1 %7980  ;;  %v12732_v3 = vpack.c.bf16 %v8641_v54, %v8640_v26  ;;  %v8632_v26 = vld [vmem:[%s17738_s9 + $0xc0] sm:$0xff]  ;;  %v8633_v54 = vld [vmem:[%s17738_s9 + $0xc8] sm:$0xff] }
 0x943   :  { %v7625_v36 = vpop.permute.xlu0 %7624  ;;  %v8233_v38 = vld [vmem:[#allocation3 + $0x18] sm:$0xff] }
 0x944   :  { %7635 = vst.msk [vmem:[#allocation3 + $0x30] sm:$0xff] %vm7632_vm8, %v7625_v36  ;;  %v7985_v60 = vpop.permute.xlu1 %7984  ;;  %v8627_v36 = vld [vmem:[%s17738_s9 + $0x98] sm:$0xff] }
 0x947   :  { %v7501_v24 = vpop.permute.xlu0 %7500  ;;  %v8230_v14 = vld [vmem:[#allocation3] sm:$0xff] }
 0x948   :  { %7510 = vst.msk [vmem:[#allocation3 + $0x48] sm:$0xff] %vm7506_vm3, %v7501_v24  ;;  %v8611_v24 = vld [vmem:[%s17738_s9 + $0x18] sm:$0xff] }
 0x94b   :  { %v7627_v52 = vpop.permute.xlu0 %7626  ;;  %v8236_v40 = vld [vmem:[#allocation3 + $0x30] sm:$0xff] }
 0x94c   :  { %7636 = vst.msk [vmem:[#allocation3 + $0x48] sm:$0xff] %vm7632_vm8, %v7627_v52 }
 0x94f   :  { %v7858_v44 = vpop.permute.xlu1 %7857 }
 0x950   :  { %7868 = vst.msk [vmem:[#allocation3 + $0x20] sm:$0xff] %vm7380_vm2, %v7858_v44 }
 0x951   :  { %7993 = vst.msk [vmem:[#allocation3 + $0x20] sm:$0xff] %vm7506_vm3, %v7983_v9 }
 0x953   :  { %v7856_v59 = vpop.permute.xlu1 %7855  ;;  %v8239_v4 = vld [vmem:[#allocation3 + $0x48] sm:$0xff] }
 0x954   :  { %7867 = vst.msk [vmem:[#allocation3 + $0x8] sm:$0xff] %vm7380_vm2, %v7856_v59  ;;  %v12702_v59 = vpack.c.bf16 %v8627_v36, %v8626_v2  ;;  %v8616_v2 = vld [vmem:[%s17738_s9 + $0x40] sm:$0xff] }
 0x955   :  { %7992 = vst.msk [vmem:[#allocation3 + $0x8] sm:$0xff] %vm7506_vm3, %v7981_v53  ;;  %v8610_v53 = vld [vmem:[%s17738_s9 + $0x10] sm:$0xff] }
 0x956   :  { %12703 = vmatprep.subr.bf16.mxu0 %v12702_v59 }
 0x957   :  { %v7862_v18 = vpop.permute.xlu1 %7861 }
 0x958   :  { %7870 = vst.msk [vmem:[#allocation3 + $0x50] sm:$0xff] %vm7380_vm2, %v7862_v18  ;;  %v8658_v18 = vld [vmem:[%s17738_s9 + $0x190] sm:$0xff] }
 0x95b   :  { %v7860_v49 = vpop.permute.xlu1 %7859 }
 0x95c   :  { %7869 = vst.msk [vmem:[#allocation3 + $0x38] sm:$0xff] %vm7380_vm2, %v7860_v49  ;;  %v8659_v49 = vld [vmem:[%s17738_s9 + $0x198] sm:$0xff]  ;;  %vm9251_vm2 = vcmask 386304  }
 0x95d   :  { %7994 = vst.msk [vmem:[#allocation3 + $0x38] sm:$0xff] %vm7506_vm3, %v7985_v60 }
 0x962   :  { %v8108_v25 = vpop.permute.xlu1 %8107 }
 0x963   :  { %8118 = vst.msk [vmem:[#allocation3 + $0x20] sm:$0xff] %vm7632_vm8, %v8108_v25 }
 0x966   :  { %v8106_v41 = vpop.permute.xlu1 %8105 }
 0x967   :  { %8117 = vst.msk [vmem:[#allocation3 + $0x8] sm:$0xff] %vm7632_vm8, %v8106_v41 }
 0x96a   :  { %v7987_v29 = vpop.permute.xlu1 %7986  ;;  %v8234_v16 = vld [vmem:[#allocation3 + $0x20] sm:$0xff] }
 0x96b   :  { %7995 = vst.msk [vmem:[#allocation3 + $0x50] sm:$0xff] %vm7506_vm3, %v7987_v29  ;;  %vm9272_vm3 = vcmask 517504  }
 0x96e   :  { %v8110_v8 = vpop.permute.xlu1 %8109  ;;  %v8231_v45 = vld [vmem:[#allocation3 + $0x8] sm:$0xff] }
 0x96f   :  { %8119 = vst.msk [vmem:[#allocation3 + $0x38] sm:$0xff] %vm7632_vm8, %v8110_v8  ;;  %8361 = vmatprep.mubr.f32.mxu1 %v8231_v45  ;;  %v12704_v8 = vpack.c.bf16 %v8611_v24, %v8610_v53  ;;  %v12734_v45 = vpack.c.bf16 %v8659_v49, %v8658_v18  ;;  %v12714_v53 = vpack.c.bf16 %v8633_v54, %v8632_v26  ;;  %v8617_v24 = vld [vmem:[%s17738_s9 + $0x48] sm:$0xff] }
 0x970   :  { %8362 = vmatmul.mubr.f32.vlgmr.msra.gmra.mrb[160].mxu1 %v8230_v14  ;;  %v12716_v18 = vpack.c.bf16 %v8617_v24, %v8616_v2 }
 0x971   :  { %8366 = vmatprep.mubr.f32.mxu1 %v8234_v16  ;;  %12733 = vmatpush3.bf16.msra.mxu1 %v12732_v3 }
 0x972   :  { %v8112_v30 = vpop.permute.xlu1 %8111  ;;  %12705 = vmatpush3.bf16.msra.mxu0 %v12704_v8  ;;  %12735 = vmatprep.subr.bf16.mxu1 %v12734_v45  ;;  %v8635_v45 = vld [vmem:[%s17738_s9 + $0xd8] sm:$0xff] }
 0x973   :  { %8120 = vst.msk [vmem:[#allocation3 + $0x50] sm:$0xff] %vm7632_vm8, %v8112_v30 }
 0x974   :  { %8367 = vmatmul.mubr.f32.gmra.mrb[162].mxu1 %v8233_v38  ;;  %v8642_v38 = vld [vmem:[%s17738_s9 + $0x110] sm:$0xff] }
 0x976   :  { %v8237_v1 = vld [vmem:[#allocation3 + $0x38] sm:$0xff] }
 0x977   :  { %8371 = vmatprep.mubr.f32.mxu1 %v8237_v1  ;;  %v8643_v1 = vld [vmem:[%s17738_s9 + $0x118] sm:$0xff] }
 0x978   :  { %8372 = vmatmul.mubr.f32.gmra.mrb[164].mxu1 %v8236_v40  ;;  %v8628_v40 = vld [vmem:[%s17738_s9 + $0xa0] sm:$0xff] }
 0x97a   :  { %v8240_v21 = vld [vmem:[#allocation3 + $0x50] sm:$0xff] }
 0x97b   :  { %8376 = vmatprep.mubr.f32.mxu1 %v8240_v21 }
 0x97c   :  { %8377 = vmatmul.mubr.f32.gmra.mrb[166].mxu1 %v8239_v4 }
 0x9bb   :  { %v11410_v62 = vpop.f32.mrb[56].mxu0 }
 0x9bc   :  { %v8448_v57 = vpop.f32.mrb[57].mxu0 }
 0x9bf   :  { %v17312_v6 = vpop.f32.mrb[58].mxu0 }
 0x9c0   :  { %v8458_v46 = vpop.f32.mrb[59].mxu0 }
 0xa43   :  { %v11058_v55 = vpop.f32.mrb[160].mxu1 }
 0xa44   :  { %v11059_v27 = vpop.f32.mrb[161].mxu1 }
 0xa45   :  { %v11060_v56 = vadd.f32 %v11059_v27, %v11058_v55  ;;  %v12736_v55 = vpack.c.bf16 %v8643_v1, %v8642_v38  ;;  %v8660_v27 = vld [vmem:[%s17738_s9 + $0x1a0] sm:$0xff]  ;;  %v8619_v38 = vld [vmem:[%s17738_s9 + $0x58] sm:$0xff]  ;;  %v8666_v1 = vld [vmem:[%s17738_s9 + $0x1d0] sm:$0xff] }
 0xa47   :  { %v8364_v11 = vadd.f32 %v11060_v56, %v17317_v42  ;;  %v11061_v22 = vpop.f32.mrb[162].mxu1  ;;  %v8661_v56 = vld [vmem:[%s17738_s9 + $0x1a8] sm:$0xff]  ;;  %12737 = vmatpush3.bf16.msra.mxu1 %v12736_v55 }
 0xa48   :  { %v11062_v39 = vpop.f32.mrb[163].mxu1 }
 0xa49   :  { %v8449_v10 = vadd.f32 %v8448_v57, %v8364_v11  ;;  %v11063_v51 = vadd.f32 %v11062_v39, %v11061_v22  ;;  %v8612_v57 = vld [vmem:[%s17738_s9 + $0x20] sm:$0xff] }
 0xa4b   :  { %vm8467_vm0 = vcmp.gt.f32.partialorder %v8449_v10, 0.0  ;;  %v8471_v0 = vmul.f32 0.01, %v8449_v10  ;;  %v8369_v37 = vadd.f32 %v11063_v51, %v17317_v42  ;;  %v11064_v33 = vpop.f32.mrb[164].mxu1  ;;  %v8645_v51 = vld [vmem:[%s17738_s9 + $0x128] sm:$0xff] }
 0xa4c   :  { %v11065_v63 = vpop.f32.mrb[165].mxu1 }
 0xa4d   :  { %v8475_v61 = vsel %vm8467_vm0, %v8449_v10, %v8471_v0  ;;  %v8454_v19 = vadd.f32 %v11410_v62, %v8369_v37  ;;  %v11066_v31 = vadd.f32 %v11065_v63, %v11064_v33  ;;  %v8629_v62 = vld [vmem:[%s17738_s9 + $0xa8] sm:$0xff]  ;;  %v8644_v10 = vld [vmem:[%s17738_s9 + $0x120] sm:$0xff]  ;;  %v12710_v33 = vpack.c.bf16 %v8631_v50, %v8630_v28  ;;  %v8639_v50 = vld [vmem:[%s17738_s9 + $0xf8] sm:$0xff] }
 0xa4e   :  { %v8488_v9 = vrot.slane %v8475_v61, %v17321_v5  ;;  %8480 = vst.msk [vmem:[#allocation4] sm:$0x3] %vm8479_vm1, %v8475_v61  ;;  %v8495_v29 = vcombine.high %v8475_v61, %v8475_v61  ;;  %v12706_v23 = vpack.c.bf16 %v8629_v62, %v8628_v40  ;;  %v12740_v37 = vpack.c.bf16 %v8645_v51, %v8644_v10  ;;  %v8667_v40 = vld [vmem:[%s17738_s9 + $0x1d8] sm:$0xff]  ;;  %v8638_v10 = vld [vmem:[%s17738_s9 + $0xf0] sm:$0xff] }
 0xa4f   :  { %vm8468_vm11 = vcmp.gt.f32.partialorder %v8454_v19, 0.0  ;;  %v8472_v60 = vmul.f32 0.01, %v8454_v19  ;;  %v8374_v52 = vadd.f32 %v11066_v31, %v17317_v42  ;;  %v11067_v44 = vpop.f32.mrb[166].mxu1  ;;  %v12742_v61 = vpack.c.bf16 %v8663_v20, %v8662_v7  ;;  %v8646_v31 = vld [vmem:[%s17738_s9 + $0x130] sm:$0xff]  ;;  %v8671_v7 = vld [vmem:[%s17738_s9 + $0x1f8] sm:$0xff] }
 0xa50   :  { %v11068_v25 = vpop.f32.mrb[167].mxu1  ;;  %v8489_v41 = vcombine.high %v8488_v9, %v8488_v9  ;;  %v8502_v48 = vrot.slane %v8495_v29, %v17321_v5  ;;  %12707 = vmatprep.subr.bf16.mxu0 %v12706_v23  ;;  %v12744_v36 = vpack.c.bf16 %v8647_v47, %v8646_v31  ;;  %v8634_v29 = vld [vmem:[%s17738_s9 + $0xd0] sm:$0xff]  ;;  %v8668_v23 = vld [vmem:[%s17738_s9 + $0x1e0] sm:$0xff]  ;;  %v12758_v20 = vpack.c.bf16 %v8671_v7, %v8670_v12 }
 0xa51   :  { %v8476_v14 = vsel %vm8468_vm11, %v8454_v19, %v8472_v60  ;;  %v8459_v16 = vadd.f32 %v8458_v46, %v8374_v52  ;;  %v11069_v30 = vadd.f32 %v11068_v25, %v11067_v44  ;;  %v8613_v46 = vld [vmem:[%s17738_s9 + $0x28] sm:$0xff]  ;;  %v8664_v60 = vld [vmem:[%s17738_s9 + $0x1c0] sm:$0xff] }
 0xa52   :  { %8490 = vrot.lane.b32.xlu1 %v8489_v41, %s12995_s30  ;;  %v8522_v21 = vrot.slane %v8476_v14, %v17321_v5  ;;  %v8528_v4 = vcombine.high %v8476_v14, %v8476_v14  ;;  %8514 = vst.msk [vmem:[#allocation4 + $0x2] sm:$0x3] %vm8479_vm1, %v8476_v14  ;;  %v12708_v11 = vpack.c.bf16 %v8613_v46, %v8612_v57  ;;  %v8665_v52 = vld [vmem:[%s17738_s9 + $0x1c8] sm:$0xff]  ;;  %v8648_v25 = vld [vmem:[%s17738_s9 + $0x140] sm:$0xff]  ;;  %v8618_v14 = vld [vmem:[%s17738_s9 + $0x50] sm:$0xff] }
 0xa53   :  { %vm8469_vm13 = vcmp.gt.f32.partialorder %v8459_v16, 0.0  ;;  %v8473_v43 = vmul.f32 0.01, %v8459_v16  ;;  %v8379_v13 = vadd.f32 %v11069_v30, %v17317_v42  ;;  %v12738_v42 = vpack.c.bf16 %v8661_v56, %v8660_v27  ;;  %v8649_v41 = vld [vmem:[%s17738_s9 + $0x148] sm:$0xff]  ;;  %v8650_v46 = vld [vmem:[%s17738_s9 + $0x150] sm:$0xff]  ;;  %v8620_v56 = vld [vmem:[%s17738_s9 + $0x60] sm:$0xff] }
 0xa54   :  { %v8523_v34 = vcombine.high %v8522_v21, %v8522_v21  ;;  %v8508_v63 = vcombine.high %v8502_v48, %v8502_v48  ;;  %12709 = vmatpush3.bf16.msra.mxu0 %v12708_v11  ;;  %v12746_v49 = vpack.c.bf16 %v8665_v52, %v8664_v60  ;;  %v12748_v8 = vpack.c.bf16 %v8649_v41, %v8648_v25  ;;  %v8637_v27 = vld [vmem:[%s17738_s9 + $0xe8] sm:$0xff]  ;;  %v8934_v41 = vld [vmem:[%s17740_s13] sm:$0xff] }
 0xa55   :  { %v8477_v22 = vsel %vm8469_vm13, %v8459_v16, %v8473_v43  ;;  %v8464_v39 = vadd.f32 %v17312_v6, %v8379_v13  ;;  %v8535_v6 = vrot.slane %v8528_v4, %v17321_v5  ;;  %12739 = vmatprep.subr.bf16.mxu1 %v12738_v42  ;;  %12711 = vmatprep.subr.bf16.mxu0 %v12710_v33  ;;  %v8651_v43 = vld [vmem:[%s17738_s9 + $0x158] sm:$0xff]  ;;  %v8636_v13 = vld [vmem:[%s17738_s9 + $0xe0] sm:$0xff]  ;;  %v8669_v11 = vld [vmem:[%s17738_s9 + $0x1e8] sm:$0xff] }
 0xa56   :  { %8524 = vrot.lane.b32.xlu0 %v8523_v34, %s12995_s30  ;;  %8503 = vrot.lane.b32.xlu1 %v8502_v48, %s12997_s0  ;;  %8545 = vst.msk [vmem:[#allocation4 + $0x4] sm:$0x3] %vm8479_vm1, %v8477_v22  ;;  %v8553_v15 = vrot.slane %v8477_v22, %v17321_v5  ;;  %v8559_v3 = vcombine.high %v8477_v22, %v8477_v22  ;;  %v8621_v34 = vld [vmem:[%s17738_s9 + $0x68] sm:$0xff]  ;;  %v8623_v33 = vld [vmem:[%s17738_s9 + $0x78] sm:$0xff] }
 0xa57   :  { %vm8470_vm14 = vcmp.gt.f32.partialorder %v8464_v39, 0.0  ;;  %v8474_v0 = vmul.f32 0.01, %v8464_v39  ;;  %12741 = vmatpush3.bf16.msra.mxu1 %v12740_v37  ;;  %v8540_v9 = vcombine.high %v8535_v6, %v8535_v6  ;;  %v12718_v30 = vpack.c.bf16 %v8635_v45, %v8634_v29  ;;  %v8653_v42 = vld [vmem:[%s17738_s9 + $0x168] sm:$0xff] }
 0xa58   :  { %12743 = vmatprep.subr.bf16.mxu1 %v12742_v61  ;;  %v8554_v44 = vcombine.high %v8553_v15, %v8553_v15  ;;  %12713 = vmatpush3.bf16.msra.mxu0 %v12712_v58  ;;  %v8566_v16 = vrot.slane %v8559_v3, %v17321_v5  ;;  %v12720_v62 = vpack.c.bf16 %v8619_v38, %v8618_v14  ;;  %v8654_v58 = vld [vmem:[%s17738_s9 + $0x170] sm:$0xff]  ;;  %v8655_v61 = vld [vmem:[%s17738_s9 + $0x178] sm:$0xff]  ;;  %v8935_v29 = vld [vmem:[%s17740_s13 + $0x8] sm:$0xff] }
 0xa59   :  { %v17428_v19 = vsel %vm8470_vm14, %v8464_v39, %v8474_v0  ;;  %12715 = vmatprep.subr.bf16.mxu0 %v12714_v53  ;;  %v12750_v57 = vpack.c.bf16 %v8667_v40, %v8666_v1  ;;  %v12752_v55 = vpack.c.bf16 %v8651_v43, %v8650_v46  ;;  %v12722_v48 = vpack.c.bf16 %v8637_v27, %v8636_v13  ;;  %v8652_v39 = vld [vmem:[%s17738_s9 + $0x160] sm:$0xff]  ;;  %v8846_v38 = vld [vmem:[%s17739_s11 + $0x10] sm:$0xff]  ;;  %v8939_v13 = vld [vmem:[%s17740_s13 + $0x28] sm:$0xff] }
 0xa5a   :  { %8536 = vrot.lane.b32.xlu0 %v8535_v6, %s12997_s0  ;;  %8509 = vrot.lane.b32.xlu1 %v8508_v63, %s12999_s23  ;;  %8576 = vst.msk [vmem:[#allocation4 + $0x6] sm:$0x3] %vm8479_vm1, %v17428_v19  ;;  %v8584_v59 = vrot.slane %v17428_v19, %v17321_v5  ;;  %v8590_v4 = vcombine.high %v17428_v19, %v17428_v19  ;;  %v8936_v1 = vld [vmem:[%s17740_s13 + $0x10] sm:$0xff]  ;;  %v8938_v46 = vld [vmem:[%s17740_s13 + $0x20] sm:$0xff] }
 0xa5b   :  { %12745 = vmatpush3.bf16.msra.mxu1 %v12744_v36  ;;  %v12754_v22 = vpack.c.bf16 %v8669_v11, %v8668_v23  ;;  %v8571_v28 = vcombine.high %v8566_v16, %v8566_v16  ;;  %v12724_v6 = vpack.c.bf16 %v8621_v34, %v8620_v56  ;;  %v12756_v0 = vpack.c.bf16 %v8653_v42, %v8652_v39  ;;  %v8851_v27 = vld [vmem:[%s17739_s11 + $0x38] sm:$0xff]  ;;  %v8940_v34 = vld [vmem:[%s17740_s13 + $0x30] sm:$0xff]  ;;  %v9897_v39 = vld [vmem:[%s17741_s10] ss:$0 sm:$0xff] }
 0xa5c   :  { %12747 = vmatprep.subr.bf16.mxu1 %v12746_v49  ;;  %v8585_v21 = vcombine.high %v8584_v59, %v8584_v59  ;;  %12717 = vmatpush3.bf16.msra.mxu0 %v12716_v18  ;;  %v8597_v51 = vrot.slane %v8590_v4, %v17321_v5  ;;  %v12726_v37 = vpack.c.bf16 %v8639_v50, %v8638_v10  ;;  %v8844_v59 = vld [vmem:[%s17739_s11] sm:$0xff]  ;;  %v8845_v18 = vld [vmem:[%s17739_s11 + $0x8] sm:$0xff] }
 0xa5d   :  { %12719 = vmatprep.subr.bf16.mxu0 %v12718_v30  ;;  %v12728_v15 = vpack.c.bf16 %v8623_v33, %v8622_v32  ;;  %v12760_v19 = vpack.c.bf16 %v8655_v61, %v8654_v58  ;;  %v12763_v14 = vpack.c.bf16 %v8845_v18, %v8844_v59  ;;  %v12775_v30 = vpack.c.bf16 %v8935_v29, %v8934_v41  ;;  %v9020_v32 = vld [vmem:[%s17742_s15] sm:$0xff]  ;;  %v9109_v33 = vld [vmem:[%s17743_s17 + $0x8] sm:$0xff]  ;;  %v9023_v58 = vld [vmem:[%s17742_s15 + $0x18] sm:$0xff] }
 0xa5e   :  { %8541 = vrot.lane.b32.xlu0 %v8540_v9, %s12999_s23  ;;  %8555 = vrot.lane.b32.xlu1 %v8554_v44, %s12995_s30  ;;  %v8602_v63 = vcombine.high %v8597_v51, %v8597_v51  ;;  %v12781_v56 = vpack.c.bf16 %v8939_v13, %v8938_v46  ;;  %v9110_v61 = vld [vmem:[%s17743_s17 + $0x10] sm:$0xff]  ;;  %v9900_v18 = vld [vmem:[%s17745_s14] ss:$0 sm:$0xff] }
 0xa5f   :  { %12749 = vmatpush3.bf16.msra.mxu1 %v12748_v8 }
 0xa60   :  { %12751 = vmatprep.subr.bf16.mxu1 %v12750_v57  ;;  %12721 = vmatpush3.bf16.msra.mxu0 %v12720_v62  ;;  %v8848_v62 = vld [vmem:[%s17739_s11 + $0x20] sm:$0xff]  ;;  %v8849_v57 = vld [vmem:[%s17739_s11 + $0x28] sm:$0xff] }
 0xa61   :  { %12723 = vmatprep.subr.bf16.mxu0 %v12722_v48  ;;  %v12769_v43 = vpack.c.bf16 %v8849_v57, %v8848_v62  ;;  %v8941_v48 = vld [vmem:[%s17740_s13 + $0x38] sm:$0xff] }
 0xa62   :  { %8586 = vrot.lane.b32.xlu0 %v8585_v21, %s12995_s30  ;;  %8567 = vrot.lane.b32.xlu1 %v8566_v16, %s12997_s0  ;;  %v8937_v21 = vld [vmem:[%s17740_s13 + $0x18] sm:$0xff]  ;;  %v12784_v11 = vpack.c.bf16 %v8941_v48, %v8940_v34 }
 0xa63   :  { %12753 = vmatpush3.bf16.msra.mxu1 %v12752_v55  ;;  %v12778_v4 = vpack.c.bf16 %v8937_v21, %v8936_v1  ;;  %v8850_v55 = vld [vmem:[%s17739_s11 + $0x30] sm:$0xff] }
 0xa64   :  { %12755 = vmatprep.subr.bf16.mxu1 %v12754_v22  ;;  %12725 = vmatpush3.bf16.msra.mxu0 %v12724_v6  ;;  %v12772_v23 = vpack.c.bf16 %v8851_v27, %v8850_v55 }
 0xa65   :  { %12727 = vmatprep.subr.bf16.mxu0 %v12726_v37  ;;  %v9108_v37 = vld [vmem:[%s17743_s17] sm:$0xff] }
 0xa66   :  { %8598 = vrot.lane.b32.xlu0 %v8597_v51, %s12997_s0  ;;  %8572 = vrot.lane.b32.xlu1 %v8571_v28, %s12999_s23 }
 0xa67   :  { %12757 = vmatpush3.bf16.msra.mxu1 %v12756_v0  ;;  %v9021_v0 = vld [vmem:[%s17742_s15 + $0x8] sm:$0xff] }
 0xa68   :  { %12759 = vmatprep.subr.bf16.mxu1 %v12758_v20  ;;  %12729 = vmatpush3.bf16.msra.mxu0 %v12728_v15  ;;  %v12787_v20 = vpack.c.bf16 %v9021_v0, %v9020_v32  ;;  %v9022_v15 = vld [vmem:[%s17742_s15 + $0x10] sm:$0xff] }
 0xa69   :  { %12762 = vmatprep.subr.bf16.mxu0 %v17836_v17 }
 0xa6a   :  { %8603 = vrot.lane.b32.xlu0 %v8602_v63, %s12999_s23  ;;  %v12799_v63 = vpack.c.bf16 %v9109_v33, %v9108_v37 }
 0xa6b   :  { %12761 = vmatpush3.bf16.msra.mxu1 %v12760_v19  ;;  %v9111_v19 = vld [vmem:[%s17743_s17 + $0x18] sm:$0xff] }
 0xa6c   :  { %12774 = vmatprep.subr.bf16.mxu1 %v17836_v17 }
 0xac4   :  { %v8491_v31 = vpop.permute.xlu1 %8490 }
 0xac5   :  { %8494 = vst.msk [vmem:[#allocation4] sm:$0x3] %vm8493_vm15, %v8491_v31 }
 0xac8   :  { %v8525_v47 = vpop.permute.xlu0 %8524  ;;  %v8504_v26 = vpop.permute.xlu1 %8503 }
 0xac9   :  { %8527 = vst.msk [vmem:[#allocation4 + $0x2] sm:$0x3] %vm8493_vm15, %v8525_v47  ;;  %v12790_v47 = vpack.c.bf16 %v9023_v58, %v9022_v15 }
 0xaca   :  { %8507 = vst.msk [vmem:[#allocation4] sm:$0x3] %vm8506_vm4, %v8504_v26  ;;  %v12802_v26 = vpack.c.bf16 %v9111_v19, %v9110_v61 }
 0xacc   :  { %v8537_v54 = vpop.permute.xlu0 %8536  ;;  %v8510_v2 = vpop.permute.xlu1 %8509 }
 0xacd   :  { %8539 = vst.msk [vmem:[#allocation4 + $0x2] sm:$0x3] %vm8506_vm4, %v8537_v54  ;;  %v9024_v54 = vld [vmem:[%s17742_s15 + $0x20] sm:$0xff] }
 0xace   :  { %8513 = vst.msk [vmem:[#allocation4] sm:$0x3] %vm8512_vm6, %v8510_v2  ;;  %v9025_v2 = vld [vmem:[%s17742_s15 + $0x28] sm:$0xff] }
 0xad0   :  { %v8542_v9 = vpop.permute.xlu0 %8541  ;;  %v8556_v3 = vpop.permute.xlu1 %8555 }
 0xad1   :  { %8544 = vst.msk [vmem:[#allocation4 + $0x2] sm:$0x3] %vm8512_vm6, %v8542_v9  ;;  %v9112_v9 = vld [vmem:[%s17743_s17 + $0x20] sm:$0xff] }
 0xad2   :  { %8558 = vst.msk [vmem:[#allocation4 + $0x4] sm:$0x3] %vm8493_vm15, %v8556_v3  ;;  %v9113_v3 = vld [vmem:[%s17743_s17 + $0x28] sm:$0xff] }
 0xad4   :  { %v8587_v36 = vpop.permute.xlu0 %8586  ;;  %v8568_v53 = vpop.permute.xlu1 %8567 }
 0xad5   :  { %8589 = vst.msk [vmem:[#allocation4 + $0x6] sm:$0x3] %vm8493_vm15, %v8587_v36  ;;  %v12793_v36 = vpack.c.bf16 %v9025_v2, %v9024_v54 }
 0xad6   :  { %8570 = vst.msk [vmem:[#allocation4 + $0x4] sm:$0x3] %vm8506_vm4, %v8568_v53  ;;  %v12805_v53 = vpack.c.bf16 %v9113_v3, %v9112_v9 }
 0xad8   :  { %v8599_v24 = vpop.permute.xlu0 %8598  ;;  %v8573_v60 = vpop.permute.xlu1 %8572 }
 0xad9   :  { %8601 = vst.msk [vmem:[#allocation4 + $0x6] sm:$0x3] %vm8506_vm4, %v8599_v24  ;;  %v9026_v24 = vld [vmem:[%s17742_s15 + $0x30] sm:$0xff] }
 0xada   :  { %8575 = vst.msk [vmem:[#allocation4 + $0x4] sm:$0x3] %vm8512_vm6, %v8573_v60  ;;  %v9114_v60 = vld [vmem:[%s17743_s17 + $0x30] sm:$0xff] }
 0xadc   :  { %v8604_v52 = vpop.permute.xlu0 %8603 }
 0xadd   :  { %8606 = vst.msk [vmem:[#allocation4 + $0x6] sm:$0x3] %vm8512_vm6, %v8604_v52 }
 0xae4   :  { %v8607_v44 = vld [vmem:[#allocation4] sm:$0xff] }
 0xae5   :  { %v8687_v49 = vrot.slane %v8607_v44, %v17321_v5  ;;  %v8680_v25 = vcombine.high %v8607_v44, %v8607_v44  ;;  %v9115_v44 = vld [vmem:[%s17743_s17 + $0x38] sm:$0xff] }
 0xae6   :  { %v12808_v59 = vpack.c.bf16 %v9115_v44, %v9114_v60 }
 0xae7   :  { %v8695_v8 = vcombine.high %v8687_v49, %v8687_v49  ;;  %v8694_v45 = vrot.slane %v8680_v25, %v17321_v5  ;;  %v8847_v5 = vld [vmem:[%s17739_s11 + $0x18] sm:$0xff] }
 0xae8   :  { %v12766_v40 = vpack.c.bf16 %v8847_v5, %v8846_v38  ;;  %v9904_v38 = vld [vmem:[%s17747_s18] ss:$0 sm:$0xff] }
 0xae9   :  { %8765 = vmatprep.mubr.f32.mxu0 %v8695_v8  ;;  %v8696_v16 = vcombine.high %v8694_v45, %v8694_v45 }
 0xaea   :  { %8766 = vmatmul.mubr.f32.vlgmr.msra.gmra.mrb[60].mxu0 %v8687_v49 }
 0xaeb   :  { %8835 = vmatprep.mubr.f32.mxu1 %v8696_v16  ;;  %12764 = vmatpush3.bf16.msra.mxu0 %v12763_v14 }
 0xaec   :  { %8836 = vmatmul.mubr.f32.vlgmr.msra.gmra.mrb[168].mxu1 %v8694_v45  ;;  %12765 = vmatprep.subr.bf16.mxu0 %v17836_v17 }
 0xaed   :  { %12776 = vmatpush3.bf16.msra.mxu1 %v12775_v30  ;;  %11430 = vmatprep.mubr.msk.f32.mxu0 %vm13002_vm7, %v17843_v35  ;;  %v9902_v30 = vld [vmem:[%s17746_s16] ss:$0 sm:$0xff] }
 0xaee   :  { %12777 = vmatprep.subr.bf16.mxu1 %v17836_v17  ;;  %11449 = vmatprep.mubr.msk.f32.mxu1 %vm13002_vm7, %v17843_v35 }
 0xaef   :  { %12767 = vmatpush3.bf16.msra.mxu0 %v12766_v40 }
 0xaf0   :  { %12768 = vmatprep.subr.bf16.mxu0 %v17836_v17 }
 0xaf1   :  { %12779 = vmatpush3.bf16.msra.mxu1 %v12778_v4 }
 0xaf2   :  { %12780 = vmatprep.subr.bf16.mxu1 %v17836_v17 }
 0xaf3   :  { %12770 = vmatpush3.bf16.msra.mxu0 %v12769_v43 }
 0xaf4   :  { %12771 = vmatprep.subr.bf16.mxu0 %v17836_v17 }
 0xaf5   :  { %12782 = vmatpush3.bf16.msra.mxu1 %v12781_v56 }
 0xaf6   :  { %12783 = vmatprep.subr.bf16.mxu1 %v17836_v17 }
 0xaf7   :  { %12773 = vmatpush3.bf16.msra.mxu0 %v12772_v23 }
 0xaf8   :  { %12786 = vmatprep.subr.bf16.mxu0 %v17836_v17 }
 0xaf9   :  { %12785 = vmatpush3.bf16.msra.mxu1 %v12784_v11 }
 0xafa   :  { %12798 = vmatprep.subr.bf16.mxu1 %v17836_v17 }
 0xbbd   :  { %v11110_v22 = vpop.f32.mrb[60].mxu0 }
 0xbbe   :  { %v11111_v42 = vpop.f32.mrb[61].mxu0 }
 0xbbf   :  { %v11112_v10 = vadd.f32 %v11111_v42, %v11110_v22  ;;  %v11145_v51 = vpop.f32.mrb[168].mxu1 }
 0xbc0   :  { %v11146_v28 = vpop.f32.mrb[169].mxu1 }
 0xbc1   :  { %v8768_v6 = vadd.f32 %v11112_v10, %v9897_v39  ;;  %v11147_v50 = vadd.f32 %v11146_v28, %v11145_v51 }
 0xbc3   :  { %v8838_v12 = vadd.f32 %v11147_v50, %v8768_v6 }
 0xbc5   :  { %vm8841_vm10 = vcmp.gt.f32.partialorder %v8838_v12, 0.0  ;;  %v8842_v7 = vmul.f32 0.01, %v8838_v12 }
 0xbc7   :  { %v8843_v31 = vsel %vm8841_vm10, %v8838_v12, %v8842_v7 }
 0xbc8   :  { %11431 = vmatmul.mubr.msk.f32.vlgmr.msra.gmra.mrb[62].mxu0 %vm8859_vm9, %v8843_v31  ;;  %11450 = vmatmul.mubr.msk.f32.vlgmr.msra.gmra.mrb[170].mxu1 %vm8859_vm9, %v8843_v31 }
 0xbc9   :  { %12788 = vmatpush3.bf16.msra.mxu0 %v12787_v20  ;;  %12800 = vmatpush3.bf16.msra.mxu1 %v12799_v63 }
 0xbca   :  { %12789 = vmatprep.subr.bf16.mxu0 %v17836_v17  ;;  %12801 = vmatprep.subr.bf16.mxu1 %v17836_v17 }
 0xbcb   :  { %11468 = vmatprep.mubr.msk.f32.mxu0 %vm13002_vm7, %v17843_v35  ;;  %11487 = vmatprep.mubr.msk.f32.mxu1 %vm13002_vm7, %v17843_v35  ;;  %v9027_v35 = vld [vmem:[%s17742_s15 + $0x38] sm:$0xff] }
 0xbcc   :  { %v12796_v52 = vpack.c.bf16 %v9027_v35, %v9026_v24 }
 0xbcd   :  { %12791 = vmatpush3.bf16.msra.mxu0 %v12790_v47  ;;  %12803 = vmatpush3.bf16.msra.mxu1 %v12802_v26 }
 0xbce   :  { %12792 = vmatprep.subr.bf16.mxu0 %v17836_v17  ;;  %12804 = vmatprep.subr.bf16.mxu1 %v17836_v17 }
 0xbd1   :  { %12794 = vmatpush3.bf16.msra.mxu0 %v12793_v36  ;;  %12806 = vmatpush3.bf16.msra.mxu1 %v12805_v53 }
 0xbd2   :  { %12795 = vmatprep.subr.bf16.mxu0 %v17836_v17  ;;  %12807 = vmatprep.subr.bf16.mxu1 %v17836_v17  ;;  %v9898_v17 = vld [vmem:[%s17744_s12] ss:$0 sm:$0xff] }
 0xbd5   :  { %12797 = vmatpush3.bf16.msra.mxu0 %v12796_v52  ;;  %12809 = vmatpush3.bf16.msra.mxu1 %v12808_v59 }
 0xc9b   :  { %v8929_v49 = vpop.f32.mrb[62].mxu0  ;;  %v9015_v25 = vpop.f32.mrb[170].mxu1 }
 0xc9c   :  { %v8930_v41 = vadd.f32 %v9898_v17, %v8929_v49  ;;  %v9016_v29 = vadd.f32 %v9900_v18, %v9015_v25  ;;  %v11432_v8 = vpop.f32.mrb[63].mxu0  ;;  %v11451_v45 = vpop.f32.mrb[171].mxu1 }
 0xc9e   :  { %v8933_v14 = vmax.f32 %v8930_v41, 0.0  ;;  %v9019_v16 = vmax.f32 %v9016_v29, 0.0 }
 0xca0   :  { %11469 = vmatmul.mubr.msk.f32.vlgmr.msra.gmra.mrb[64].mxu0 %vm8859_vm9, %v8933_v14  ;;  %11488 = vmatmul.mubr.msk.f32.vlgmr.msra.gmra.mrb[172].mxu1 %vm8859_vm9, %v9019_v16 }
 0xd73   :  { %v9104_v5 = vpop.f32.mrb[64].mxu0  ;;  %v9192_v1 = vpop.f32.mrb[172].mxu1 }
 0xd74   :  { %v9105_v40 = vadd.f32 %v9902_v30, %v9104_v5  ;;  %v9193_v21 = vadd.f32 %v9904_v38, %v9192_v1  ;;  %v11470_v4 = vpop.f32.mrb[65].mxu0  ;;  %v11489_v62 = vpop.f32.mrb[173].mxu1 }
 0xd76   :  { %9232 = vrot.lane.b32.xlu0 %v9193_v21, %s12999_s23  ;;  %9211 = vrot.lane.b32.xlu1 %v9193_v21, %s13000_s24  ;;  %v9196_v57 = vadd.f32 %v9193_v21, %v9105_v40 }
 0xd78   :  { %v9198_v11 = vsel %vm9197_vm12, %v9196_v57, -inf }
 0xd7a   :  { %9253 = vrot.lane.b32.xlu1 %v9193_v21, %s12998_s3 }
 0xde8   :  { %v9233_v46 = vpop.permute.xlu0 %9232  ;;  %v9212_v43 = vpop.permute.xlu1 %9211 }
 0xde9   :  { %v9235_v13 = vadd.f32 %v9233_v46, %v9105_v40  ;;  %v9214_v55 = vadd.f32 %v9212_v43, %v9105_v40 }
 0xdeb   :  { %v9236_v27 = vsel %vm9197_vm12, %v9235_v13, -inf  ;;  %v9215_v56 = vsel %vm9197_vm12, %v9214_v55, -inf }
 0xdec   :  { %v9254_v34 = vpop.permute.xlu1 %9253  ;;  %9237 = vmax.xlane.f32.xlu1 %v9236_v27  ;;  %9216 = vmax.xlane.f32.xlu0 %v9215_v56 }
 0xded   :  { %v9256_v48 = vadd.f32 %v9254_v34, %v9105_v40 }
 0xdef   :  { %v9257_v23 = vsel %vm9197_vm12, %v9256_v48, -inf }
 0xdf0   :  { %9258 = vmax.xlane.f32.xlu0 %v9257_v23 }
 0xdf4   :  { %9199 = vmax.xlane.f32.xlu0 %v9198_v11 }
 0xe79   :  { %v9238_v22 = vpop.xlane.xlu1 %9237  ;;  %v9217_v39 = vpop.xlane.xlu0 %9216 }
 0xe7a   :  { %v9239_v42 = vsub.f32 %v9235_v13, %v9238_v22  ;;  %v9218_v10 = vsub.f32 %v9214_v55, %v9217_v39 }
 0xe7c   :  { %v9240_v51 = vmul.f32 1.442695, %v9239_v42  ;;  %v9219_v28 = vmul.f32 1.442695, %v9218_v10 }
 0xe7d   :  { %v9259_v6 = vpop.xlane.xlu0 %9258 }
 0xe7e   :  { %12973 = vpow2.f32 %v9240_v51  ;;  %v9260_v50 = vsub.f32 %v9256_v48, %v9259_v6 }
 0xe7f   :  { %12975 = vpow2.f32 %v9219_v28 }
 0xe80   :  { %v9261_v32 = vmul.f32 1.442695, %v9260_v50 }
 0xe81   :  { %v9200_v0 = vpop.xlane.xlu0 %9199 }
 0xe82   :  { %12977 = vpow2.f32 %v9261_v32  ;;  %v9201_v37 = vsub.f32 %v9196_v57, %v9200_v0 }
 0xe84   :  { %v9202_v33 = vmul.f32 1.442695, %v9201_v37 }
 0xe86   :  { %12979 = vpow2.f32 %v9202_v33 }
 0xe88   :  { %v12974_v12 = vpop.eup %12973 }
 0xe89   :  { %v12976_v7 = vpop.eup %12975  ;;  %v9242_v20 = vsel %vm9197_vm12, %v12974_v12, 0.0 }
 0xe8a   :  { %v9221_v63 = vsel %vm9197_vm12, %v12976_v7, 0.0  ;;  %9243 = vadd.xlane.f32.xlu0 %v9242_v20 }
 0xe8b   :  { %9222 = vadd.xlane.f32.xlu1 %v9221_v63 }
 0xe8c   :  { %v12978_v15 = vpop.eup %12977 }
 0xe8d   :  { %v9263_v58 = vsel %vm9197_vm12, %v12978_v15, 0.0 }
 0xe8f   :  { %9264 = vadd.xlane.f32.xlu1 %v9263_v58 }
 0xe90   :  { %v12980_v61 = vpop.eup %12979 }
 0xe91   :  { %v9204_v19 = vsel %vm9197_vm12, %v12980_v61, 0.0 }
 0xe92   :  { %9205 = vadd.xlane.f32.xlu0 %v9204_v19 }
 0xf17   :  { %v9244_v31 = vpop.xlane.xlu0 %9243 }
 0xf18   :  { %v9223_v47 = vpop.xlane.xlu1 %9222  ;;  %12981 = vrcp.f32 %v9244_v31 }
 0xf19   :  { %12983 = vrcp.f32 %v9223_v47 }
 0xf1c   :  { %v9265_v26 = vpop.xlane.xlu1 %9264 }
 0xf1d   :  { %12985 = vrcp.f32 %v9265_v26 }
 0xf1f   :  { %v9206_v54 = vpop.xlane.xlu0 %9205 }
 0xf20   :  { %12987 = vrcp.f32 %v9206_v54 }
 0xf22   :  { %v12982_v2 = vpop.eup %12981 }
 0xf23   :  { %v12984_v9 = vpop.eup %12983  ;;  %v9246_v3 = vmul.f32 %v12982_v2, %v12974_v12 }
 0xf24   :  { %v9225_v36 = vmul.f32 %v12984_v9, %v12976_v7 }
 0xf25   :  { %9248 = vrot.lane.b32.xlu0 %v9246_v3, %s12995_s30 }
 0xf26   :  { %9227 = vrot.lane.b32.xlu1 %v9225_v36, %s12994_s1 }
 0xf27   :  { %v12986_v53 = vpop.eup %12985 }
 0xf28   :  { %v9267_v24 = vmul.f32 %v12986_v53, %v12978_v15 }
 0xf2a   :  { %v12988_v35 = vpop.eup %12987  ;;  %9269 = vrot.lane.b32.xlu1 %v9267_v24, %s12996_s21 }
 0xf2b   :  { %v9208_v60 = vmul.f32 %v12988_v35, %v12980_v61 }
 0xf2d   :  { %9209 = vst.msk [vmem:[%s17748_s19] sm:$0x3] %vm9197_vm12, %v9208_v60 }
 0xf97   :  { %v9249_v52 = vpop.permute.xlu0 %9248 }
 0xf98   :  { %v9228_v44 = vpop.permute.xlu1 %9227 }
 0xf99   :  { %9231 = vst.msk [vmem:[%s17748_s19] sm:$0x3] %vm9230_vm5, %v9228_v44 }
 0xf9a   :  { %9252 = vst.msk [vmem:[%s17748_s19] sm:$0x3] %vm9251_vm2, %v9249_v52 }
 0xf9c   :  { %v9270_v59 = vpop.permute.xlu1 %9269 }
 0xf9d   :  { %9273 = vst.msk [vmem:[%s17748_s19] sm:$0x3] %vm9272_vm3, %v9270_v59 }

</bundles_post_ra>
